<compile_context>
chip_gen: v7x
topology: tpu7x:2x2x1
jax: 0.10.0
libtpu: 0.0.40
codegen_flags: <defaults>
</compile_context>

<pallas_src>
import functools

import jax
import jax.numpy as jnp
from jax.experimental import pallas as pl
from jax.experimental.pallas import tpu as pltpu


# Matmul operands hit the MXU in this dtype (bf16 is native on v6e/v7x).
# Weights are pre-cast once at init; `.astype` inside _mm is then a no-op.
MATMUL_DTYPE = jnp.bfloat16


def _mm(a, b):
    """MXU matmul with bf16 operands and f32 accumulation."""
    return jnp.dot(a.astype(MATMUL_DTYPE), b.astype(MATMUL_DTYPE),
                   preferred_element_type=jnp.float32)


@functools.lru_cache(maxsize=None)
def _vmem_limit_bytes():
    """~55% of this generation's physical VMEM (v5e/v6e 128MiB, v7x 64MiB)."""
    cap = 128 * 1024 * 1024
    try:
        info = pltpu.get_tpu_info()
        cap = int(getattr(info, "vmem_capacity_bytes", 0) or cap)
    except Exception:
        pass
    return max(32 * 1024 * 1024, min(int(0.55 * cap), 100 * 1024 * 1024))


def _cparams(*semantics):
    return pltpu.CompilerParams(dimension_semantics=semantics,
                                vmem_limit_bytes=_vmem_limit_bytes())


# ---------------------------------------------------------------------------
# K-tap valid conv1d (+ folded BN + ReLU)  -- front-end conv1
# ---------------------------------------------------------------------------

def _conv1d_taps_kernel(x_ref, w_ref, b_ref, o_ref, *, K, d, T_out):
    # x_ref: (1, Tp, Cin) bf16; w_ref: (K, Cin, Cout) bf16; b_ref: (1, Cout) f32
    x = x_ref[0]
    # K accumulating matmuls (no channel-axis im2col concat / relayout).
    acc = _mm(x[0:T_out, :], w_ref[0])
    for k in range(1, K):
        acc += _mm(x[k * d:k * d + T_out, :], w_ref[k])
    y = acc + b_ref[...]
    o_ref[...] = jnp.maximum(y, 0.0)[None].astype(o_ref.dtype)


def conv1d_taps_pallas(x, w, b, *, K, dilation=1):
    """Valid conv1d + bias + ReLU.  x: (B, Tp, Cin); w: (K, Cin, Cout)."""
    B, Tp, Cin = x.shape
    Cout = w.shape[-1]
    T_out = Tp - dilation * (K - 1)
    kernel = functools.partial(_conv1d_taps_kernel, K=K, d=dilation,
                               T_out=T_out)
    return pl.pallas_call(
        kernel,
        out_shape=jax.ShapeDtypeStruct((B, T_out, Cout), x.dtype),
        grid=(B,),
        in_specs=[pl.BlockSpec((1, Tp, Cin), lambda i: (i, 0, 0)),
                  pl.BlockSpec((K, Cin, Cout), lambda i: (0, 0, 0)),
                  pl.BlockSpec((1, Cout), lambda i: (0, 0))],
        out_specs=pl.BlockSpec((1, T_out, Cout), lambda i: (i, 0, 0)),
        compiler_params=_cparams("parallel"),
    )(x, w, b.reshape(1, Cout))


# ---------------------------------------------------------------------------
# Tiled (M, Cin) @ (Cin, Cout) + bias + activation  -- 1x1 convs / linears
# ---------------------------------------------------------------------------

def _matmul_kernel(x_ref, w_ref, b_ref, o_ref, *, act):
    y = _mm(x_ref[...], w_ref[...]) + b_ref[...]
    if act == "relu":
        y = jnp.maximum(y, 0.0)
    elif act == "sigmoid":
        y = 1.0 / (1.0 + jnp.exp(-y))
    o_ref[...] = y.astype(o_ref.dtype)


def _tile_sizes(M, Cout, tile_m, tile_n):
    tm = M if M <= tile_m else tile_m                       # tile_m % 8 == 0
    tn = Cout if (Cout <= tile_n or Cout % 128 != 0) else tile_n
    return tm, tn


def matmul_bias_act(x, w, b, *, act=None, out_dtype=None,
                    tile_m=512, tile_n=512):
    """x: (M, Cin); w: (Cin, Cout) bf16; b: (Cout,) f32."""
    M, Cin = x.shape
    Cout = w.shape[1]
    out_dtype = x.dtype if out_dtype is None else out_dtype
    tm, tn = _tile_sizes(M, Cout, tile_m, tile_n)
    kernel = functools.partial(_matmul_kernel, act=act)
    return pl.pallas_call(
        kernel,
        out_shape=jax.ShapeDtypeStruct((M, Cout), out_dtype),
        grid=(pl.cdiv(M, tm), pl.cdiv(Cout, tn)),
        in_specs=[pl.BlockSpec((tm, Cin), lambda i, j: (i, 0)),
                  pl.BlockSpec((Cin, tn), lambda i, j: (0, j)),
                  pl.BlockSpec((1, tn), lambda i, j: (0, j))],
        out_specs=pl.BlockSpec((tm, tn), lambda i, j: (i, j)),
        compiler_params=_cparams("parallel", "parallel"),
    )(x, w, b.reshape(1, Cout))


# conv2 applied to the channel-concat of (y1, y2, y3) without materializing
# the concat: the weight is row-sliced in-kernel into three (C, tn) slabs.
def _concat3_matmul_kernel(x1_ref, x2_ref, x3_ref, w_ref, b_ref, o_ref, *, C):
    y = (_mm(x1_ref[...], w_ref[0:C, :])
         + _mm(x2_ref[...], w_ref[C:2 * C, :])
         + _mm(x3_ref[...], w_ref[2 * C:3 * C, :])
         + b_ref[...])
    o_ref[...] = jnp.maximum(y, 0.0).astype(o_ref.dtype)


def concat3_matmul_relu(x1, x2, x3, w, b, *, tile_m=1024, tile_n=512):
    """relu(concat([x1,x2,x3], -1) @ w + b) without the HBM concat."""
    M, C = x1.shape
    Cout = w.shape[1]
    tm, tn = _tile_sizes(M, Cout, tile_m, tile_n)
    kernel = functools.partial(_concat3_matmul_kernel, C=C)
    return pl.pallas_call(
        kernel,
        out_shape=jax.ShapeDtypeStruct((M, Cout), x1.dtype),
        grid=(pl.cdiv(M, tm), pl.cdiv(Cout, tn)),
        in_specs=[pl.BlockSpec((tm, C), lambda i, j: (i, 0)),
                  pl.BlockSpec((tm, C), lambda i, j: (i, 0)),
                  pl.BlockSpec((tm, C), lambda i, j: (i, 0)),
                  pl.BlockSpec((3 * C, tn), lambda i, j: (0, j)),
                  pl.BlockSpec((1, tn), lambda i, j: (0, j))],
        out_specs=pl.BlockSpec((tm, tn), lambda i, j: (i, j)),
        compiler_params=_cparams("parallel", "parallel"),
    )(x1, x2, x3, w, b.reshape(1, Cout))


# ---------------------------------------------------------------------------
# Res2Net grouped dilated convs: split + running-sum + reflect-pad + conv +
# BN(fold) + ReLU + channel placement, all inside one per-batch kernel.
# ---------------------------------------------------------------------------

def _res2_kernel(x_ref, wg_ref, bg_ref, o_ref, *, s, d, T, c):
    # x_ref: (1, T, C) bf16; wg_ref: (s-1, 3, c, c) bf16; bg_ref: (s-1, c) f32
    x = x_ref[0]
    sp = None
    for i in range(1, s):                               # nums = s - 1 groups
        g = x[:, i * c:(i + 1) * c].astype(jnp.float32)
        sp = g if i == 1 else sp + g                    # running sum (post-relu)
        # Reflect-padded conv (K=3, dilation d) expressed as 3 accumulating
        # matmuls on shifted views.  tap_k[t] = padded[t + k*d], pad width d.
        # No (T+2d, c) padded buffer, no (T, 3c) im2col concat; only the
        # <= d (=4) boundary rows are gathered explicitly.
        top = jnp.concatenate([sp[d - j:d - j + 1, :] for j in range(d)],
                              axis=0)                   # sp[d], ..., sp[1]
        bot = jnp.concatenate([sp[T - 2 - j:T - 1 - j, :] for j in range(d)],
                              axis=0)                   # sp[T-2], ..., sp[T-1-d]
        tap0 = jnp.concatenate([top, sp[:T - d, :]], axis=0)   # padded[t]
        tap2 = jnp.concatenate([sp[d:, :], bot], axis=0)       # padded[t+2d]
        y = (_mm(tap0, wg_ref[i - 1, 0])
             + _mm(sp, wg_ref[i - 1, 1])
             + _mm(tap2, wg_ref[i - 1, 2])
             + bg_ref[i - 1:i, :])
        sp = jnp.maximum(y, 0.0)
        o_ref[0, :, (i - 1) * c:i * c] = sp.astype(o_ref.dtype)
    # last channel group of the output is the untouched first split
    o_ref[0, :, (s - 1) * c:s * c] = x[:, 0:c].astype(o_ref.dtype)


def res2_grouped_pallas(x, wg, bg, *, d, s):
    """x: (B, T, C); wg: (s-1, 3, c, c); bg: (s-1, c)."""
    B, T, C = x.shape
    c = C // s
    assert wg.shape[1] == 3, "module fixes kernel_size k=3"
    assert T > d + 1, "ReflectionPad1d requires T > dilation + 1"
    kernel = functools.partial(_res2_kernel, s=s, d=d, T=T, c=c)
    return pl.pallas_call(
        kernel,
        out_shape=jax.ShapeDtypeStruct((B, T, C), x.dtype),
        grid=(B,),
        in_specs=[pl.BlockSpec((1, T, C), lambda i: (i, 0, 0)),
                  pl.BlockSpec((s - 1, 3, c, c), lambda i: (0, 0, 0, 0)),
                  pl.BlockSpec((s - 1, c), lambda i: (0, 0))],
        out_specs=pl.BlockSpec((1, T, C), lambda i: (i, 0, 0)),
        compiler_params=_cparams("parallel"),
    )(x, wg, bg)


# ---------------------------------------------------------------------------
# Fused SE tail: conv3(1x1)+BN+ReLU -> time mean -> fc1+ReLU -> fc2+sigmoid
# -> channel scale -> +residual, one kernel per batch element.
# ---------------------------------------------------------------------------

def _se_tail_kernel(x_ref, r_ref, w3_ref, b3_ref, w1_ref, b1_ref,
                    w2_ref, b2_ref, o_ref, *, T):
    x = x_ref[0]                                                       # (T, C)
    y = jnp.maximum(_mm(x, w3_ref[...]) + b3_ref[...], 0.0)           # conv3
    m = jnp.sum(y, axis=0, keepdims=True) * (1.0 / T)                  # (1, C)
    h = jnp.maximum(_mm(m, w1_ref[...]) + b1_ref[...], 0.0)            # fc1
    sv = 1.0 / (1.0 + jnp.exp(-(_mm(h, w2_ref[...]) + b2_ref[...])))   # fc2
    res = r_ref[0].astype(jnp.float32)
    o_ref[...] = (y * sv + res)[None].astype(o_ref.dtype)


def se_tail_pallas(x, residual, w3, b3, fc1_w, fc1_b, fc2_w, fc2_b):
    B, T, C = x.shape
    Bn = fc1_w.shape[1]
    kernel = functools.partial(_se_tail_kernel, T=T)
    return pl.pallas_call(
        kernel,
        out_shape=jax.ShapeDtypeStruct((B, T, C), x.dtype),
        grid=(B,),
        in_specs=[pl.BlockSpec((1, T, C), lambda i: (i, 0, 0)),
                  pl.BlockSpec((1, T, C), lambda i: (i, 0, 0)),
                  pl.BlockSpec((C, C), lambda i: (0, 0)),
                  pl.BlockSpec((1, C), lambda i: (0, 0)),
                  pl.BlockSpec((C, Bn), lambda i: (0, 0)),
                  pl.BlockSpec((1, Bn), lambda i: (0, 0)),
                  pl.BlockSpec((Bn, C), lambda i: (0, 0)),
                  pl.BlockSpec((1, C), lambda i: (0, 0))],
        out_specs=pl.BlockSpec((1, T, C), lambda i: (i, 0, 0)),
        compiler_params=_cparams("parallel"),
    )(x, residual, w3, b3.reshape(1, C), fc1_w, fc1_b.reshape(1, Bn),
      fc2_w, fc2_b.reshape(1, C))


# ---------------------------------------------------------------------------
# Attentive statistics pooling (matches the reference module exactly:
#   score = tanh((x@Wp+bp) . v), softmax over T,
#   mean = sum_t(x*w)/T,  var = sum_t(x*x*w) - mean^2, no sqrt/clamp).
# ---------------------------------------------------------------------------

def _asp_kernel(x_ref, wp_ref, bp_ref, v_ref, o_ref, *, T):
    xb = x_ref[0].astype(jnp.float32)                              # (T, C) f32
    lin = _mm(x_ref[0], wp_ref[...]) + bp_ref[...]                 # (T, E) f32
    # score via VPU multiply + lane reduction (no skinny N=1 MXU matmul)
    score = jnp.tanh(jnp.sum(lin * v_ref[...], axis=-1, keepdims=True))
    score = score - jnp.max(score, axis=0, keepdims=True)          # stable
    e = jnp.exp(score)
    w = e * pl.reciprocal(jnp.sum(e, axis=0, keepdims=True), approx=True)
    xw = xb * w                                                    # (T, C)
    mean = jnp.sum(xw, axis=0, keepdims=True) * (1.0 / T)          # torch.mean
    var = jnp.sum(xb * xw, axis=0, keepdims=True) - mean * mean
    o_ref[...] = jnp.concatenate([mean, var], axis=0)[None].astype(o_ref.dtype)


def asp_pallas(x, wp, bp, v):
    """x: (B, T, C) -> (B, 2C) = [weighted mean | weighted 'variance']."""
    # TODO(synk): T-tiled online-softmax variant for very long utterances on
    # v7x is left as future work; this kernel keeps the whole (T, C) block.
    B, T, C = x.shape
    E = wp.shape[1]
    kernel = functools.partial(_asp_kernel, T=T)
    out = pl.pallas_call(
        kernel,
        out_shape=jax.ShapeDtypeStruct((B, 2, C), jnp.float32),
        grid=(B,),
        in_specs=[pl.BlockSpec((1, T, C), lambda i: (i, 0, 0)),
                  pl.BlockSpec((C, E), lambda i: (0, 0)),
                  pl.BlockSpec((1, E), lambda i: (0, 0)),
                  pl.BlockSpec((1, E), lambda i: (0, 0))],
        out_specs=pl.BlockSpec((1, 2, C), lambda i: (i, 0, 0)),
        compiler_params=_cparams("parallel"),
    )(x, wp, bp.reshape(1, E), v.reshape(1, E))
    return out.reshape(B, 2 * C)


# ---------------------------------------------------------------------------
# Model orchestration (plain JAX glue is only transposes / free reshapes)
# ---------------------------------------------------------------------------

def ecapa_forward(params, x, *, s=4):
    # x: (B, in_dim, T)  -- PyTorch NCW layout
    xt = jnp.transpose(x, (0, 2, 1)).astype(MATMUL_DTYPE)  # (B, T, in_dim) bf16
    y = conv1d_taps_pallas(xt, params["conv1_w"], params["conv1_b"], K=5)
    B, T, C = y.shape

    def block(xin, p, d):
        h = matmul_bias_act(xin.reshape(B * T, C), p["w1"], p["b1"],
                            act="relu").reshape(B, T, C)      # conv1x1+bn+relu
        r2 = res2_grouped_pallas(h, p["wg"], p["bg"], d=d, s=s)
        return se_tail_pallas(r2, xin, p["w3"], p["b3"],
                              p["fc1_w"], p["fc1_b"], p["fc2_w"], p["fc2_b"])

    y1 = block(y, params["blocks"][0], 2)
    y2 = block(y1, params["blocks"][1], 3)
    y3 = block(y2, params["blocks"][2], 4)

    out = concat3_matmul_relu(
        y1.reshape(B * T, C), y2.reshape(B * T, C), y3.reshape(B * T, C),
        params["conv2_w"], params["conv2_b"], tile_m=1024).reshape(B, T, 3 * C)

    asp = asp_pallas(out, params["asp_wp"], params["asp_bp"], params["asp_v"])
    # bn2 -> fc -> bn3 folded into a single linear (eval-mode BN)
    emb = matmul_bias_act(asp, params["final_w"], params["final_b"],
                          act=None, out_dtype=jnp.float32)
    return emb


def init_params(key, *, in_dim, hidden, s, bottleneck, emb, dils=(2, 3, 4)):
    eps = 1e-5
    keys = iter(jax.random.split(key, 256))

    def nrm(shape, std):
        return std * jax.random.normal(next(keys), shape, dtype=jnp.float32)

    def bn(ch):
        gamma = 1.0 + 0.1 * jax.random.normal(next(keys), (ch,), dtype=jnp.float32)
        beta = 0.05 * jax.random.normal(next(keys), (ch,), dtype=jnp.float32)
        scale = gamma / jnp.sqrt(1.0 + eps)   # eval-mode BN: mean=0, var=1
        return scale, beta

    def fold_conv_bn(w, b, ch):
        # w has Cout on its last axis (channels-last weight layout).
        scale, beta = bn(ch)
        return w * scale, scale * b + beta

    def wcast(w):                 # pre-cast weights once (bf16 MXU operands)
        return w.astype(MATMUL_DTYPE)

    p = {}
    K1 = 5
    w = nrm((K1, in_dim, hidden), 1.0 / (in_dim * K1) ** 0.5)
    b = nrm((hidden,), 0.05)
    wf, bf_ = fold_conv_bn(w, b, hidden)
    p["conv1_w"] = wcast(wf)                            # (K, Cin, Cout)
    p["conv1_b"] = bf_

    c = hidden // s
    K = 3
    blocks = []
    for _d in dils:
        bp = {}
        w = nrm((hidden, hidden), 1.0 / hidden ** 0.5)
        b = nrm((hidden,), 0.05)
        w1, b1 = fold_conv_bn(w, b, hidden)
        bp["w1"], bp["b1"] = wcast(w1), b1
        wg_list, bg_list = [], []
        for _i in range(1, s):
            wg = nrm((K, c, c), 1.0 / (K * c) ** 0.5)
            wgf, bgf = fold_conv_bn(wg, jnp.zeros((c,), jnp.float32), c)
            wg_list.append(wgf)                         # (K, c, c)
            bg_list.append(bgf)
        bp["wg"] = wcast(jnp.stack(wg_list))            # (s-1, K, c, c)
        bp["bg"] = jnp.stack(bg_list)                   # (s-1, c) f32
        w = nrm((hidden, hidden), 1.0 / hidden ** 0.5)
        b = nrm((hidden,), 0.05)
        w3, b3 = fold_conv_bn(w, b, hidden)
        bp["w3"], bp["b3"] = wcast(w3), b3
        bp["fc1_w"] = wcast(nrm((hidden, bottleneck), 1.0 / hidden ** 0.5))
        bp["fc1_b"] = nrm((bottleneck,), 0.05)
        bp["fc2_w"] = wcast(nrm((bottleneck, hidden), 1.0 / bottleneck ** 0.5))
        bp["fc2_b"] = nrm((hidden,), 0.05)
        blocks.append(bp)
    p["blocks"] = blocks

    C3 = hidden * 3
    p["conv2_w"] = wcast(nrm((C3, C3), 1.0 / C3 ** 0.5))   # conv2 has no BN
    p["conv2_b"] = nrm((C3,), 0.05)

    p["asp_wp"] = wcast(nrm((C3, bottleneck), 1.0 / C3 ** 0.5))
    p["asp_bp"] = nrm((bottleneck,), 0.05)
    p["asp_v"] = nrm((bottleneck,), 1.0)                   # used on the VPU

    # fold bn2 -> fc -> bn3 into one affine
    s2, b2 = bn(2 * C3)
    wf = nrm((2 * C3, emb), 1.0 / (2 * C3) ** 0.5)
    bf = nrm((emb,), 0.05)
    s3, b3 = bn(emb)
    p["final_w"] = wcast((s2[:, None] * wf) * s3[None, :])
    p["final_b"] = s3 * (b2 @ wf + bf) + b3
    return p


if __name__ == "__main__":
    # Small shapes consistent with the module: B=2, in_dim=16, T=36,
    # hidden=32, scale=4, bottleneck=16, embedding=8 (conv1 is valid, T->32).
    key = jax.random.PRNGKey(0)
    pkey, xkey = jax.random.split(key)
    params = init_params(pkey, in_dim=16, hidden=32, s=4, bottleneck=16, emb=8)
    x = jax.random.normal(xkey, (2, 16, 36), dtype=jnp.float32)  # (B, C_in, T)

    fwd = jax.jit(functools.partial(ecapa_forward, s=4))
    out = jax.block_until_ready(fwd(params, x))
    assert out.shape == (2, 8), out.shape
    assert bool(jnp.all(jnp.isfinite(out)))
    print("KERNEL_OK")
</pallas_src>

<mosaic_0001>
module attributes {stable_mosaic.version = 11 : i64} {
  func.func @_conv1d_taps_kernel(%arg0: i32, %arg1: memref<1x36x16xbf16, #tpu.memory_space<vmem>>, %arg2: memref<5x16x32xbf16, #tpu.memory_space<vmem>>, %arg3: memref<1x32xf32, #tpu.memory_space<vmem>>, %arg4: memref<1x32x32xbf16, #tpu.memory_space<vmem>>) attributes {dimension_semantics = [#tpu.dimension_semantics<parallel>], iteration_bounds = array<i64: 2>, scalar_prefetch = 0 : i64, scratch_operands = 0 : i64, tpu.core_type = #tpu.core_type<tc>, window_params = [{transform_indices = @transform_0, window_bounds = array<i64: 1, 36, 16>}, {pipeline_mode = #tpu.pipeline_mode<synchronous>, transform_indices = @transform_1, window_bounds = array<i64: 5, 16, 32>}, {pipeline_mode = #tpu.pipeline_mode<synchronous>, transform_indices = @transform_2, window_bounds = array<i64: 1, 32>}, {transform_indices = @transform_3, window_bounds = array<i64: 1, 32, 32>}]} {
    %c0 = arith.constant 0 : index
    %c0_0 = arith.constant 0 : index
    %c0_1 = arith.constant 0 : index
    %0 = vector.load %arg1[%c0, %c0_0, %c0_1] : memref<1x36x16xbf16, #tpu.memory_space<vmem>>, vector<1x36x16xbf16>
    %1 = vector.shape_cast %0 : vector<1x36x16xbf16> to vector<36x16xbf16>
    %2 = vector.extract_strided_slice %1 {offsets = [0, 0], sizes = [32, 16], strides = [1, 1]} : vector<36x16xbf16> to vector<32x16xbf16>
    %c0_2 = arith.constant 0 : index
    %c0_3 = arith.constant 0 : index
    %c0_4 = arith.constant 0 : index
    %3 = vector.load %arg2[%c0_2, %c0_3, %c0_4] : memref<5x16x32xbf16, #tpu.memory_space<vmem>>, vector<1x16x32xbf16>
    %4 = vector.shape_cast %3 : vector<1x16x32xbf16> to vector<16x32xbf16>
    %cst = arith.constant dense<0.000000e+00> : vector<32x32xf32>
    %5 = tpu.matmul %2, %4, %cst {dimension_numbers = #tpu.dot_dimension_numbers<[1], [0], [0], [1], [0, 0, 1, 1], [], []>} : vector<32x16xbf16>, vector<16x32xbf16>, vector<32x32xf32> -> vector<32x32xf32>
    %6 = vector.extract_strided_slice %1 {offsets = [1, 0], sizes = [32, 16], strides = [1, 1]} : vector<36x16xbf16> to vector<32x16xbf16>
    %c1 = arith.constant 1 : index
    %c0_5 = arith.constant 0 : index
    %c0_6 = arith.constant 0 : index
    %7 = vector.load %arg2[%c1, %c0_5, %c0_6] : memref<5x16x32xbf16, #tpu.memory_space<vmem>>, vector<1x16x32xbf16>
    %8 = vector.shape_cast %7 : vector<1x16x32xbf16> to vector<16x32xbf16>
    %cst_7 = arith.constant dense<0.000000e+00> : vector<32x32xf32>
    %9 = tpu.matmul %6, %8, %cst_7 {dimension_numbers = #tpu.dot_dimension_numbers<[1], [0], [0], [1], [0, 0, 1, 1], [], []>} : vector<32x16xbf16>, vector<16x32xbf16>, vector<32x32xf32> -> vector<32x32xf32>
    %10 = arith.addf %5, %9 : vector<32x32xf32>
    %11 = vector.extract_strided_slice %1 {offsets = [2, 0], sizes = [32, 16], strides = [1, 1]} : vector<36x16xbf16> to vector<32x16xbf16>
    %c2 = arith.constant 2 : index
    %c0_8 = arith.constant 0 : index
    %c0_9 = arith.constant 0 : index
    %12 = vector.load %arg2[%c2, %c0_8, %c0_9] : memref<5x16x32xbf16, #tpu.memory_space<vmem>>, vector<1x16x32xbf16>
    %13 = vector.shape_cast %12 : vector<1x16x32xbf16> to vector<16x32xbf16>
    %cst_10 = arith.constant dense<0.000000e+00> : vector<32x32xf32>
    %14 = tpu.matmul %11, %13, %cst_10 {dimension_numbers = #tpu.dot_dimension_numbers<[1], [0], [0], [1], [0, 0, 1, 1], [], []>} : vector<32x16xbf16>, vector<16x32xbf16>, vector<32x32xf32> -> vector<32x32xf32>
    %15 = arith.addf %10, %14 : vector<32x32xf32>
    %16 = vector.extract_strided_slice %1 {offsets = [3, 0], sizes = [32, 16], strides = [1, 1]} : vector<36x16xbf16> to vector<32x16xbf16>
    %c3 = arith.constant 3 : index
    %c0_11 = arith.constant 0 : index
    %c0_12 = arith.constant 0 : index
    %17 = vector.load %arg2[%c3, %c0_11, %c0_12] : memref<5x16x32xbf16, #tpu.memory_space<vmem>>, vector<1x16x32xbf16>
    %18 = vector.shape_cast %17 : vector<1x16x32xbf16> to vector<16x32xbf16>
    %cst_13 = arith.constant dense<0.000000e+00> : vector<32x32xf32>
    %19 = tpu.matmul %16, %18, %cst_13 {dimension_numbers = #tpu.dot_dimension_numbers<[1], [0], [0], [1], [0, 0, 1, 1], [], []>} : vector<32x16xbf16>, vector<16x32xbf16>, vector<32x32xf32> -> vector<32x32xf32>
    %20 = arith.addf %15, %19 : vector<32x32xf32>
    %21 = vector.extract_strided_slice %1 {offsets = [4, 0], sizes = [32, 16], strides = [1, 1]} : vector<36x16xbf16> to vector<32x16xbf16>
    %c4 = arith.constant 4 : index
    %c0_14 = arith.constant 0 : index
    %c0_15 = arith.constant 0 : index
    %22 = vector.load %arg2[%c4, %c0_14, %c0_15] : memref<5x16x32xbf16, #tpu.memory_space<vmem>>, vector<1x16x32xbf16>
    %23 = vector.shape_cast %22 : vector<1x16x32xbf16> to vector<16x32xbf16>
    %cst_16 = arith.constant dense<0.000000e+00> : vector<32x32xf32>
    %24 = tpu.matmul %21, %23, %cst_16 {dimension_numbers = #tpu.dot_dimension_numbers<[1], [0], [0], [1], [0, 0, 1, 1], [], []>} : vector<32x16xbf16>, vector<16x32xbf16>, vector<32x32xf32> -> vector<32x32xf32>
    %25 = arith.addf %20, %24 : vector<32x32xf32>
    %c0_17 = arith.constant 0 : index
    %c0_18 = arith.constant 0 : index
    %26 = vector.load %arg3[%c0_17, %c0_18] : memref<1x32xf32, #tpu.memory_space<vmem>>, vector<1x32xf32>
    %27 = vector.broadcast %26 : vector<1x32xf32> to vector<32x32xf32>
    %28 = arith.addf %25, %27 : vector<32x32xf32>
    %cst_19 = arith.constant 0.000000e+00 : f32
    %29 = vector.broadcast %cst_19 : f32 to vector<32x32xf32>
    %30 = arith.maximumf %28, %29 : vector<32x32xf32>
    %31 = vector.shape_cast %30 : vector<32x32xf32> to vector<1x32x32xf32>
    %32 = arith.truncf %31 : vector<1x32x32xf32> to vector<1x32x32xbf16>
    %c0_20 = arith.constant 0 : index
    %c0_21 = arith.constant 0 : index
    %c0_22 = arith.constant 0 : index
    %33 = vector.load %arg4[%c0_20, %c0_21, %c0_22] : memref<1x32x32xbf16, #tpu.memory_space<vmem>>, vector<1x32x32xbf16>
    tpu.vector_store %arg4[%c0_20, %c0_21, %c0_22], %32 {strides = array<i32>} : memref<1x32x32xbf16, #tpu.memory_space<vmem>>, vector<1x32x32xbf16>,
    return
  }
  func.func @transform_0(%arg0: i32) -> (i32, i32, i32) {
    %c0_i32 = arith.constant 0 : i32
    %c0_i32_0 = arith.constant 0 : i32
    %c0_i32_1 = arith.constant 0 : i32
    return %arg0, %c0_i32, %c0_i32_0 : i32, i32, i32
  }
  func.func @transform_1(%arg0: i32) -> (i32, i32, i32) {
    %c0_i32 = arith.constant 0 : i32
    %c0_i32_0 = arith.constant 0 : i32
    %c0_i32_1 = arith.constant 0 : i32
    %c0_i32_2 = arith.constant 0 : i32
    return %c0_i32, %c0_i32_0, %c0_i32_1 : i32, i32, i32
  }
  func.func @transform_2(%arg0: i32) -> (i32, i32) {
    %c0_i32 = arith.constant 0 : i32
    %c0_i32_0 = arith.constant 0 : i32
    %c0_i32_1 = arith.constant 0 : i32
    return %c0_i32, %c0_i32_0 : i32, i32
  }
  func.func @transform_3(%arg0: i32) -> (i32, i32, i32) {
    %c0_i32 = arith.constant 0 : i32
    %c0_i32_0 = arith.constant 0 : i32
    %c0_i32_1 = arith.constant 0 : i32
    return %arg0, %c0_i32, %c0_i32_0 : i32, i32, i32
  }
}

module attributes {stable_mosaic.version = 11 : i64} {
  func.func @_matmul_kernel(%arg0: i32, %arg1: i32, %arg2: memref<64x32xbf16, #tpu.memory_space<vmem>>, %arg3: memref<32x32xbf16, #tpu.memory_space<vmem>>, %arg4: memref<1x32xf32, #tpu.memory_space<vmem>>, %arg5: memref<64x32xbf16, #tpu.memory_space<vmem>>) attributes {dimension_semantics = [#tpu.dimension_semantics<parallel>, #tpu.dimension_semantics<parallel>], iteration_bounds = array<i64: 1, 1>, scalar_prefetch = 0 : i64, scratch_operands = 0 : i64, tpu.core_type = #tpu.core_type<tc>, window_params = [{transform_indices = @transform_0, window_bounds = array<i64: 64, 32>}, {transform_indices = @transform_1, window_bounds = array<i64: 32, 32>}, {transform_indices = @transform_2, window_bounds = array<i64: 1, 32>}, {transform_indices = @transform_3, window_bounds = array<i64: 64, 32>}]} {
    %c0 = arith.constant 0 : index
    %c0_0 = arith.constant 0 : index
    %0 = vector.load %arg2[%c0, %c0_0] : memref<64x32xbf16, #tpu.memory_space<vmem>>, vector<64x32xbf16>
    %c0_1 = arith.constant 0 : index
    %c0_2 = arith.constant 0 : index
    %1 = vector.load %arg3[%c0_1, %c0_2] : memref<32x32xbf16, #tpu.memory_space<vmem>>, vector<32x32xbf16>
    %cst = arith.constant dense<0.000000e+00> : vector<64x32xf32>
    %2 = tpu.matmul %0, %1, %cst {dimension_numbers = #tpu.dot_dimension_numbers<[1], [0], [0], [1], [0, 0, 1, 1], [], []>} : vector<64x32xbf16>, vector<32x32xbf16>, vector<64x32xf32> -> vector<64x32xf32>
    %c0_3 = arith.constant 0 : index
    %c0_4 = arith.constant 0 : index
    %3 = vector.load %arg4[%c0_3, %c0_4] : memref<1x32xf32, #tpu.memory_space<vmem>>, vector<1x32xf32>
    %4 = vector.broadcast %3 : vector<1x32xf32> to vector<64x32xf32>
    %5 = arith.addf %2, %4 : vector<64x32xf32>
    %cst_5 = arith.constant 0.000000e+00 : f32
    %6 = vector.broadcast %cst_5 : f32 to vector<64x32xf32>
    %7 = arith.maximumf %5, %6 : vector<64x32xf32>
    %8 = arith.truncf %7 : vector<64x32xf32> to vector<64x32xbf16>
    %c0_6 = arith.constant 0 : index
    %c0_7 = arith.constant 0 : index
    %9 = vector.load %arg5[%c0_6, %c0_7] : memref<64x32xbf16, #tpu.memory_space<vmem>>, vector<64x32xbf16>
    tpu.vector_store %arg5[%c0_6, %c0_7], %8 {strides = array<i32>} : memref<64x32xbf16, #tpu.memory_space<vmem>>, vector<64x32xbf16>,
    return
  }
  func.func @transform_0(%arg0: i32, %arg1: i32) -> (i32, i32) {
    %c0_i32 = arith.constant 0 : i32
    %c0_i32_0 = arith.constant 0 : i32
    return %arg0, %c0_i32 : i32, i32
  }
  func.func @transform_1(%arg0: i32, %arg1: i32) -> (i32, i32) {
    %c0_i32 = arith.constant 0 : i32
    %c0_i32_0 = arith.constant 0 : i32
    return %c0_i32, %arg1 : i32, i32
  }
  func.func @transform_2(%arg0: i32, %arg1: i32) -> (i32, i32) {
    %c0_i32 = arith.constant 0 : i32
    %c0_i32_0 = arith.constant 0 : i32
    return %c0_i32, %arg1 : i32, i32
  }
  func.func @transform_3(%arg0: i32, %arg1: i32) -> (i32, i32) {
    %c0_i32 = arith.constant 0 : i32
    return %arg0, %arg1 : i32, i32
  }
}

module attributes {stable_mosaic.version = 11 : i64} {
  func.func @_res2_kernel(%arg0: i32, %arg1: memref<1x32x32xbf16, #tpu.memory_space<vmem>>, %arg2: memref<3x3x8x8xbf16, #tpu.memory_space<vmem>>, %arg3: memref<3x8xf32, #tpu.memory_space<vmem>>, %arg4: memref<1x32x32xbf16, #tpu.memory_space<vmem>>) attributes {dimension_semantics = [#tpu.dimension_semantics<parallel>], iteration_bounds = array<i64: 2>, scalar_prefetch = 0 : i64, scratch_operands = 0 : i64, tpu.core_type = #tpu.core_type<tc>, window_params = [{transform_indices = @transform_0, window_bounds = array<i64: 1, 32, 32>}, {pipeline_mode = #tpu.pipeline_mode<synchronous>, transform_indices = @transform_1, window_bounds = array<i64: 3, 3, 8, 8>}, {pipeline_mode = #tpu.pipeline_mode<synchronous>, transform_indices = @transform_2, window_bounds = array<i64: 3, 8>}, {transform_indices = @transform_3, window_bounds = array<i64: 1, 32, 32>}]} {
    %c0 = arith.constant 0 : index
    %c0_0 = arith.constant 0 : index
    %c0_1 = arith.constant 0 : index
    %0 = vector.load %arg1[%c0, %c0_0, %c0_1] : memref<1x32x32xbf16, #tpu.memory_space<vmem>>, vector<1x32x32xbf16>
    %1 = vector.shape_cast %0 : vector<1x32x32xbf16> to vector<32x32xbf16>
    %2 = vector.extract_strided_slice %1 {offsets = [0, 8], sizes = [32, 8], strides = [1, 1]} : vector<32x32xbf16> to vector<32x8xbf16>
    %3 = arith.extf %2 : vector<32x8xbf16> to vector<32x8xf32>
    %4 = vector.extract_strided_slice %3 {offsets = [2, 0], sizes = [1, 8], strides = [1, 1]} : vector<32x8xf32> to vector<1x8xf32>
    %5 = vector.extract_strided_slice %3 {offsets = [1, 0], sizes = [1, 8], strides = [1, 1]} : vector<32x8xf32> to vector<1x8xf32>
    %6 = tpu.concatenate %4, %5 in 0 : vector<1x8xf32>, vector<1x8xf32> -> vector<2x8xf32>
    %7 = vector.extract_strided_slice %3 {offsets = [30, 0], sizes = [1, 8], strides = [1, 1]} : vector<32x8xf32> to vector<1x8xf32>
    %8 = vector.extract_strided_slice %3 {offsets = [29, 0], sizes = [1, 8], strides = [1, 1]} : vector<32x8xf32> to vector<1x8xf32>
    %9 = tpu.concatenate %7, %8 in 0 : vector<1x8xf32>, vector<1x8xf32> -> vector<2x8xf32>
    %10 = vector.extract_strided_slice %3 {offsets = [0, 0], sizes = [30, 8], strides = [1, 1]} : vector<32x8xf32> to vector<30x8xf32>
    %11 = tpu.concatenate %6, %10 in 0 : vector<2x8xf32>, vector<30x8xf32> -> vector<32x8xf32>
    %12 = vector.extract_strided_slice %3 {offsets = [2, 0], sizes = [30, 8], strides = [1, 1]} : vector<32x8xf32> to vector<30x8xf32>
    %13 = tpu.concatenate %12, %9 in 0 : vector<30x8xf32>, vector<2x8xf32> -> vector<32x8xf32>
    %c0_2 = arith.constant 0 : index
    %c0_3 = arith.constant 0 : index
    %c0_4 = arith.constant 0 : index
    %c0_5 = arith.constant 0 : index
    %14 = vector.load %arg2[%c0_2, %c0_3, %c0_4, %c0_5] : memref<3x3x8x8xbf16, #tpu.memory_space<vmem>>, vector<1x1x8x8xbf16>
    %15 = vector.shape_cast %14 : vector<1x1x8x8xbf16> to vector<8x8xbf16>
    %16 = arith.truncf %11 : vector<32x8xf32> to vector<32x8xbf16>
    %cst = arith.constant dense<0.000000e+00> : vector<32x8xf32>
    %17 = tpu.matmul %16, %15, %cst {dimension_numbers = #tpu.dot_dimension_numbers<[1], [0], [0], [1], [0, 0, 1, 1], [], []>} : vector<32x8xbf16>, vector<8x8xbf16>, vector<32x8xf32> -> vector<32x8xf32>
    %c0_6 = arith.constant 0 : index
    %c1 = arith.constant 1 : index
    %c0_7 = arith.constant 0 : index
    %c0_8 = arith.constant 0 : index
    %18 = vector.load %arg2[%c0_6, %c1, %c0_7, %c0_8] : memref<3x3x8x8xbf16, #tpu.memory_space<vmem>>, vector<1x1x8x8xbf16>
    %19 = vector.shape_cast %18 : vector<1x1x8x8xbf16> to vector<8x8xbf16>
    %20 = arith.truncf %3 : vector<32x8xf32> to vector<32x8xbf16>
    %cst_9 = arith.constant dense<0.000000e+00> : vector<32x8xf32>
    %21 = tpu.matmul %20, %19, %cst_9 {dimension_numbers = #tpu.dot_dimension_numbers<[1], [0], [0], [1], [0, 0, 1, 1], [], []>} : vector<32x8xbf16>, vector<8x8xbf16>, vector<32x8xf32> -> vector<32x8xf32>
    %22 = arith.addf %17, %21 : vector<32x8xf32>
    %c0_10 = arith.constant 0 : index
    %c2 = arith.constant 2 : index
    %c0_11 = arith.constant 0 : index
    %c0_12 = arith.constant 0 : index
    %23 = vector.load %arg2[%c0_10, %c2, %c0_11, %c0_12] : memref<3x3x8x8xbf16, #tpu.memory_space<vmem>>, vector<1x1x8x8xbf16>
    %24 = vector.shape_cast %23 : vector<1x1x8x8xbf16> to vector<8x8xbf16>
    %25 = arith.truncf %13 : vector<32x8xf32> to vector<32x8xbf16>
    %cst_13 = arith.constant dense<0.000000e+00> : vector<32x8xf32>
    %26 = tpu.matmul %25, %24, %cst_13 {dimension_numbers = #tpu.dot_dimension_numbers<[1], [0], [0], [1], [0, 0, 1, 1], [], []>} : vector<32x8xbf16>, vector<8x8xbf16>, vector<32x8xf32> -> vector<32x8xf32>
    %27 = arith.addf %22, %26 : vector<32x8xf32>
    %c0_14 = arith.constant 0 : index
    %c0_15 = arith.constant 0 : index
    %28 = vector.load %arg3[%c0_14, %c0_15] : memref<3x8xf32, #tpu.memory_space<vmem>>, vector<1x8xf32>
    %29 = vector.broadcast %28 : vector<1x8xf32> to vector<32x8xf32>
    %30 = arith.addf %27, %29 : vector<32x8xf32>
    %cst_16 = arith.constant 0.000000e+00 : f32
    %31 = vector.broadcast %cst_16 : f32 to vector<32x8xf32>
    %32 = arith.maximumf %30, %31 : vector<32x8xf32>
    %33 = arith.truncf %32 : vector<32x8xf32> to vector<32x8xbf16>
    %c0_17 = arith.constant 0 : index
    %c0_18 = arith.constant 0 : index
    %c0_19 = arith.constant 0 : index
    %34 = vector.load %arg4[%c0_17, %c0_18, %c0_19] : memref<1x32x32xbf16, #tpu.memory_space<vmem>>, vector<1x32x8xbf16>
    %35 = vector.shape_cast %34 : vector<1x32x8xbf16> to vector<32x8xbf16>
    %36 = vector.shape_cast %33 : vector<32x8xbf16> to vector<1x32x8xbf16>
    tpu.vector_store %arg4[%c0_17, %c0_18, %c0_19], %36 {strides = array<i32>} : memref<1x32x32xbf16, #tpu.memory_space<vmem>>, vector<1x32x8xbf16>,
    %37 = vector.extract_strided_slice %1 {offsets = [0, 16], sizes = [32, 8], strides = [1, 1]} : vector<32x32xbf16> to vector<32x8xbf16>
    %38 = arith.extf %37 : vector<32x8xbf16> to vector<32x8xf32>
    %39 = arith.addf %32, %38 : vector<32x8xf32>
    %40 = vector.extract_strided_slice %39 {offsets = [2, 0], sizes = [1, 8], strides = [1, 1]} : vector<32x8xf32> to vector<1x8xf32>
    %41 = vector.extract_strided_slice %39 {offsets = [1, 0], sizes = [1, 8], strides = [1, 1]} : vector<32x8xf32> to vector<1x8xf32>
    %42 = tpu.concatenate %40, %41 in 0 : vector<1x8xf32>, vector<1x8xf32> -> vector<2x8xf32>
    %43 = vector.extract_strided_slice %39 {offsets = [30, 0], sizes = [1, 8], strides = [1, 1]} : vector<32x8xf32> to vector<1x8xf32>
    %44 = vector.extract_strided_slice %39 {offsets = [29, 0], sizes = [1, 8], strides = [1, 1]} : vector<32x8xf32> to vector<1x8xf32>
    %45 = tpu.concatenate %43, %44 in 0 : vector<1x8xf32>, vector<1x8xf32> -> vector<2x8xf32>
    %46 = vector.extract_strided_slice %39 {offsets = [0, 0], sizes = [30, 8], strides = [1, 1]} : vector<32x8xf32> to vector<30x8xf32>
    %47 = tpu.concatenate %42, %46 in 0 : vector<2x8xf32>, vector<30x8xf32> -> vector<32x8xf32>
    %48 = vector.extract_strided_slice %39 {offsets = [2, 0], sizes = [30, 8], strides = [1, 1]} : vector<32x8xf32> to vector<30x8xf32>
    %49 = tpu.concatenate %48, %45 in 0 : vector<30x8xf32>, vector<2x8xf32> -> vector<32x8xf32>
    %c1_20 = arith.constant 1 : index
    %c0_21 = arith.constant 0 : index
    %c0_22 = arith.constant 0 : index
    %c0_23 = arith.constant 0 : index
    %50 = vector.load %arg2[%c1_20, %c0_21, %c0_22, %c0_23] : memref<3x3x8x8xbf16, #tpu.memory_space<vmem>>, vector<1x1x8x8xbf16>
    %51 = vector.shape_cast %50 : vector<1x1x8x8xbf16> to vector<8x8xbf16>
    %52 = arith.truncf %47 : vector<32x8xf32> to vector<32x8xbf16>
    %cst_24 = arith.constant dense<0.000000e+00> : vector<32x8xf32>
    %53 = tpu.matmul %52, %51, %cst_24 {dimension_numbers = #tpu.dot_dimension_numbers<[1], [0], [0], [1], [0, 0, 1, 1], [], []>} : vector<32x8xbf16>, vector<8x8xbf16>, vector<32x8xf32> -> vector<32x8xf32>
    %c1_25 = arith.constant 1 : index
    %c1_26 = arith.constant 1 : index
    %c0_27 = arith.constant 0 : index
    %c0_28 = arith.constant 0 : index
    %54 = vector.load %arg2[%c1_25, %c1_26, %c0_27, %c0_28] : memref<3x3x8x8xbf16, #tpu.memory_space<vmem>>, vector<1x1x8x8xbf16>
    %55 = vector.shape_cast %54 : vector<1x1x8x8xbf16> to vector<8x8xbf16>
    %56 = arith.truncf %39 : vector<32x8xf32> to vector<32x8xbf16>
    %cst_29 = arith.constant dense<0.000000e+00> : vector<32x8xf32>
    %57 = tpu.matmul %56, %55, %cst_29 {dimension_numbers = #tpu.dot_dimension_numbers<[1], [0], [0], [1], [0, 0, 1, 1], [], []>} : vector<32x8xbf16>, vector<8x8xbf16>, vector<32x8xf32> -> vector<32x8xf32>
    %58 = arith.addf %53, %57 : vector<32x8xf32>
    %c1_30 = arith.constant 1 : index
    %c2_31 = arith.constant 2 : index
    %c0_32 = arith.constant 0 : index
    %c0_33 = arith.constant 0 : index
    %59 = vector.load %arg2[%c1_30, %c2_31, %c0_32, %c0_33] : memref<3x3x8x8xbf16, #tpu.memory_space<vmem>>, vector<1x1x8x8xbf16>
    %60 = vector.shape_cast %59 : vector<1x1x8x8xbf16> to vector<8x8xbf16>
    %61 = arith.truncf %49 : vector<32x8xf32> to vector<32x8xbf16>
    %cst_34 = arith.constant dense<0.000000e+00> : vector<32x8xf32>
    %62 = tpu.matmul %61, %60, %cst_34 {dimension_numbers = #tpu.dot_dimension_numbers<[1], [0], [0], [1], [0, 0, 1, 1], [], []>} : vector<32x8xbf16>, vector<8x8xbf16>, vector<32x8xf32> -> vector<32x8xf32>
    %63 = arith.addf %58, %62 : vector<32x8xf32>
    %c1_35 = arith.constant 1 : index
    %c0_36 = arith.constant 0 : index
    %64 = vector.load %arg3[%c1_35, %c0_36] : memref<3x8xf32, #tpu.memory_space<vmem>>, vector<1x8xf32>
    %65 = vector.broadcast %64 : vector<1x8xf32> to vector<32x8xf32>
    %66 = arith.addf %63, %65 : vector<32x8xf32>
    %cst_37 = arith.constant 0.000000e+00 : f32
    %67 = vector.broadcast %cst_37 : f32 to vector<32x8xf32>
    %68 = arith.maximumf %66, %67 : vector<32x8xf32>
    %69 = arith.truncf %68 : vector<32x8xf32> to vector<32x8xbf16>
    %c0_38 = arith.constant 0 : index
    %c0_39 = arith.constant 0 : index
    %c8 = arith.constant 8 : index
    %70 = vector.load %arg4[%c0_38, %c0_39, %c8] : memref<1x32x32xbf16, #tpu.memory_space<vmem>>, vector<1x32x8xbf16>
    %71 = vector.shape_cast %70 : vector<1x32x8xbf16> to vector<32x8xbf16>
    %72 = vector.shape_cast %69 : vector<32x8xbf16> to vector<1x32x8xbf16>
    tpu.vector_store %arg4[%c0_38, %c0_39, %c8], %72 {strides = array<i32>} : memref<1x32x32xbf16, #tpu.memory_space<vmem>>, vector<1x32x8xbf16>,
    %73 = vector.extract_strided_slice %1 {offsets = [0, 24], sizes = [32, 8], strides = [1, 1]} : vector<32x32xbf16> to vector<32x8xbf16>
    %74 = arith.extf %73 : vector<32x8xbf16> to vector<32x8xf32>
    %75 = arith.addf %68, %74 : vector<32x8xf32>
    %76 = vector.extract_strided_slice %75 {offsets = [2, 0], sizes = [1, 8], strides = [1, 1]} : vector<32x8xf32> to vector<1x8xf32>
    %77 = vector.extract_strided_slice %75 {offsets = [1, 0], sizes = [1, 8], strides = [1, 1]} : vector<32x8xf32> to vector<1x8xf32>
    %78 = tpu.concatenate %76, %77 in 0 : vector<1x8xf32>, vector<1x8xf32> -> vector<2x8xf32>
    %79 = vector.extract_strided_slice %75 {offsets = [30, 0], sizes = [1, 8], strides = [1, 1]} : vector<32x8xf32> to vector<1x8xf32>
    %80 = vector.extract_strided_slice %75 {offsets = [29, 0], sizes = [1, 8], strides = [1, 1]} : vector<32x8xf32> to vector<1x8xf32>
    %81 = tpu.concatenate %79, %80 in 0 : vector<1x8xf32>, vector<1x8xf32> -> vector<2x8xf32>
    %82 = vector.extract_strided_slice %75 {offsets = [0, 0], sizes = [30, 8], strides = [1, 1]} : vector<32x8xf32> to vector<30x8xf32>
    %83 = tpu.concatenate %78, %82 in 0 : vector<2x8xf32>, vector<30x8xf32> -> vector<32x8xf32>
    %84 = vector.extract_strided_slice %75 {offsets = [2, 0], sizes = [30, 8], strides = [1, 1]} : vector<32x8xf32> to vector<30x8xf32>
    %85 = tpu.concatenate %84, %81 in 0 : vector<30x8xf32>, vector<2x8xf32> -> vector<32x8xf32>
    %c2_40 = arith.constant 2 : index
    %c0_41 = arith.constant 0 : index
    %c0_42 = arith.constant 0 : index
    %c0_43 = arith.constant 0 : index
    %86 = vector.load %arg2[%c2_40, %c0_41, %c0_42, %c0_43] : memref<3x3x8x8xbf16, #tpu.memory_space<vmem>>, vector<1x1x8x8xbf16>
    %87 = vector.shape_cast %86 : vector<1x1x8x8xbf16> to vector<8x8xbf16>
    %88 = arith.truncf %83 : vector<32x8xf32> to vector<32x8xbf16>
    %cst_44 = arith.constant dense<0.000000e+00> : vector<32x8xf32>
    %89 = tpu.matmul %88, %87, %cst_44 {dimension_numbers = #tpu.dot_dimension_numbers<[1], [0], [0], [1], [0, 0, 1, 1], [], []>} : vector<32x8xbf16>, vector<8x8xbf16>, vector<32x8xf32> -> vector<32x8xf32>
    %c2_45 = arith.constant 2 : index
    %c1_46 = arith.constant 1 : index
    %c0_47 = arith.constant 0 : index
    %c0_48 = arith.constant 0 : index
    %90 = vector.load %arg2[%c2_45, %c1_46, %c0_47, %c0_48] : memref<3x3x8x8xbf16, #tpu.memory_space<vmem>>, vector<1x1x8x8xbf16>
    %91 = vector.shape_cast %90 : vector<1x1x8x8xbf16> to vector<8x8xbf16>
    %92 = arith.truncf %75 : vector<32x8xf32> to vector<32x8xbf16>
    %cst_49 = arith.constant dense<0.000000e+00> : vector<32x8xf32>
    %93 = tpu.matmul %92, %91, %cst_49 {dimension_numbers = #tpu.dot_dimension_numbers<[1], [0], [0], [1], [0, 0, 1, 1], [], []>} : vector<32x8xbf16>, vector<8x8xbf16>, vector<32x8xf32> -> vector<32x8xf32>
    %94 = arith.addf %89, %93 : vector<32x8xf32>
    %c2_50 = arith.constant 2 : index
    %c2_51 = arith.constant 2 : index
    %c0_52 = arith.constant 0 : index
    %c0_53 = arith.constant 0 : index
    %95 = vector.load %arg2[%c2_50, %c2_51, %c0_52, %c0_53] : memref<3x3x8x8xbf16, #tpu.memory_space<vmem>>, vector<1x1x8x8xbf16>
    %96 = vector.shape_cast %95 : vector<1x1x8x8xbf16> to vector<8x8xbf16>
    %97 = arith.truncf %85 : vector<32x8xf32> to vector<32x8xbf16>
    %cst_54 = arith.constant dense<0.000000e+00> : vector<32x8xf32>
    %98 = tpu.matmul %97, %96, %cst_54 {dimension_numbers = #tpu.dot_dimension_numbers<[1], [0], [0], [1], [0, 0, 1, 1], [], []>} : vector<32x8xbf16>, vector<8x8xbf16>, vector<32x8xf32> -> vector<32x8xf32>
    %99 = arith.addf %94, %98 : vector<32x8xf32>
    %c2_55 = arith.constant 2 : index
    %c0_56 = arith.constant 0 : index
    %100 = vector.load %arg3[%c2_55, %c0_56] : memref<3x8xf32, #tpu.memory_space<vmem>>, vector<1x8xf32>
    %101 = vector.broadcast %100 : vector<1x8xf32> to vector<32x8xf32>
    %102 = arith.addf %99, %101 : vector<32x8xf32>
    %cst_57 = arith.constant 0.000000e+00 : f32
    %103 = vector.broadcast %cst_57 : f32 to vector<32x8xf32>
    %104 = arith.maximumf %102, %103 : vector<32x8xf32>
    %105 = arith.truncf %104 : vector<32x8xf32> to vector<32x8xbf16>
    %c0_58 = arith.constant 0 : index
    %c0_59 = arith.constant 0 : index
    %c16 = arith.constant 16 : index
    %106 = vector.load %arg4[%c0_58, %c0_59, %c16] : memref<1x32x32xbf16, #tpu.memory_space<vmem>>, vector<1x32x8xbf16>
    %107 = vector.shape_cast %106 : vector<1x32x8xbf16> to vector<32x8xbf16>
    %108 = vector.shape_cast %105 : vector<32x8xbf16> to vector<1x32x8xbf16>
    tpu.vector_store %arg4[%c0_58, %c0_59, %c16], %108 {strides = array<i32>} : memref<1x32x32xbf16, #tpu.memory_space<vmem>>, vector<1x32x8xbf16>,
    %109 = vector.extract_strided_slice %1 {offsets = [0, 0], sizes = [32, 8], strides = [1, 1]} : vector<32x32xbf16> to vector<32x8xbf16>
    %c0_60 = arith.constant 0 : index
    %c0_61 = arith.constant 0 : index
    %c24 = arith.constant 24 : index
    %110 = vector.load %arg4[%c0_60, %c0_61, %c24] : memref<1x32x32xbf16, #tpu.memory_space<vmem>>, vector<1x32x8xbf16>
    %111 = vector.shape_cast %110 : vector<1x32x8xbf16> to vector<32x8xbf16>
    %112 = vector.shape_cast %109 : vector<32x8xbf16> to vector<1x32x8xbf16>
    tpu.vector_store %arg4[%c0_60, %c0_61, %c24], %112 {strides = array<i32>} : memref<1x32x32xbf16, #tpu.memory_space<vmem>>, vector<1x32x8xbf16>,
    return
  }
  func.func @transform_0(%arg0: i32) -> (i32, i32, i32) {
    %c0_i32 = arith.constant 0 : i32
    %c0_i32_0 = arith.constant 0 : i32
    %c0_i32_1 = arith.constant 0 : i32
    return %arg0, %c0_i32, %c0_i32_0 : i32, i32, i32
  }
  func.func @transform_1(%arg0: i32) -> (i32, i32, i32, i32) {
    %c0_i32 = arith.constant 0 : i32
    %c0_i32_0 = arith.constant 0 : i32
    %c0_i32_1 = arith.constant 0 : i32
    %c0_i32_2 = arith.constant 0 : i32
    %c0_i32_3 = arith.constant 0 : i32
    return %c0_i32, %c0_i32_0, %c0_i32_1, %c0_i32_2 : i32, i32, i32, i32
  }
  func.func @transform_2(%arg0: i32) -> (i32, i32) {
    %c0_i32 = arith.constant 0 : i32
    %c0_i32_0 = arith.constant 0 : i32
    %c0_i32_1 = arith.constant 0 : i32
    return %c0_i32, %c0_i32_0 : i32, i32
  }
  func.func @transform_3(%arg0: i32) -> (i32, i32, i32) {
    %c0_i32 = arith.constant 0 : i32
    %c0_i32_0 = arith.constant 0 : i32
    %c0_i32_1 = arith.constant 0 : i32
    return %arg0, %c0_i32, %c0_i32_0 : i32, i32, i32
  }
}

module attributes {stable_mosaic.version = 11 : i64} {
  func.func @_se_tail_kernel(%arg0: i32, %arg1: memref<1x32x32xbf16, #tpu.memory_space<vmem>>, %arg2: memref<1x32x32xbf16, #tpu.memory_space<vmem>>, %arg3: memref<32x32xbf16, #tpu.memory_space<vmem>>, %arg4: memref<1x32xf32, #tpu.memory_space<vmem>>, %arg5: memref<32x16xbf16, #tpu.memory_space<vmem>>, %arg6: memref<1x16xf32, #tpu.memory_space<vmem>>, %arg7: memref<16x32xbf16, #tpu.memory_space<vmem>>, %arg8: memref<1x32xf32, #tpu.memory_space<vmem>>, %arg9: memref<1x32x32xbf16, #tpu.memory_space<vmem>>) attributes {dimension_semantics = [#tpu.dimension_semantics<parallel>], iteration_bounds = array<i64: 2>, scalar_prefetch = 0 : i64, scratch_operands = 0 : i64, tpu.core_type = #tpu.core_type<tc>, window_params = [{transform_indices = @transform_0, window_bounds = array<i64: 1, 32, 32>}, {transform_indices = @transform_1, window_bounds = array<i64: 1, 32, 32>}, {pipeline_mode = #tpu.pipeline_mode<synchronous>, transform_indices = @transform_2, window_bounds = array<i64: 32, 32>}, {pipeline_mode = #tpu.pipeline_mode<synchronous>, transform_indices = @transform_3, window_bounds = array<i64: 1, 32>}, {pipeline_mode = #tpu.pipeline_mode<synchronous>, transform_indices = @transform_4, window_bounds = array<i64: 32, 16>}, {pipeline_mode = #tpu.pipeline_mode<synchronous>, transform_indices = @transform_5, window_bounds = array<i64: 1, 16>}, {pipeline_mode = #tpu.pipeline_mode<synchronous>, transform_indices = @transform_6, window_bounds = array<i64: 16, 32>}, {pipeline_mode = #tpu.pipeline_mode<synchronous>, transform_indices = @transform_7, window_bounds = array<i64: 1, 32>}, {transform_indices = @transform_8, window_bounds = array<i64: 1, 32, 32>}]} {
    %c0 = arith.constant 0 : index
    %c0_0 = arith.constant 0 : index
    %c0_1 = arith.constant 0 : index
    %0 = vector.load %arg1[%c0, %c0_0, %c0_1] : memref<1x32x32xbf16, #tpu.memory_space<vmem>>, vector<1x32x32xbf16>
    %1 = vector.shape_cast %0 : vector<1x32x32xbf16> to vector<32x32xbf16>
    %c0_2 = arith.constant 0 : index
    %c0_3 = arith.constant 0 : index
    %2 = vector.load %arg3[%c0_2, %c0_3] : memref<32x32xbf16, #tpu.memory_space<vmem>>, vector<32x32xbf16>
    %cst = arith.constant dense<0.000000e+00> : vector<32x32xf32>
    %3 = tpu.matmul %1, %2, %cst {dimension_numbers = #tpu.dot_dimension_numbers<[1], [0], [0], [1], [0, 0, 1, 1], [], []>} : vector<32x32xbf16>, vector<32x32xbf16>, vector<32x32xf32> -> vector<32x32xf32>
    %c0_4 = arith.constant 0 : index
    %c0_5 = arith.constant 0 : index
    %4 = vector.load %arg4[%c0_4, %c0_5] : memref<1x32xf32, #tpu.memory_space<vmem>>, vector<1x32xf32>
    %5 = vector.broadcast %4 : vector<1x32xf32> to vector<32x32xf32>
    %6 = arith.addf %3, %5 : vector<32x32xf32>
    %cst_6 = arith.constant 0.000000e+00 : f32
    %7 = vector.broadcast %cst_6 : f32 to vector<32x32xf32>
    %8 = arith.maximumf %6, %7 : vector<32x32xf32>
    %cst_7 = arith.constant dense<0.000000e+00> : vector<32xf32>
    %9 = vector.multi_reduction <add>, %8, %cst_7 [0] : vector<32x32xf32> to vector<32xf32>
    %10 = vector.shape_cast %9 : vector<32xf32> to vector<1x32xf32>
    %cst_8 = arith.constant 3.125000e-02 : f32
    %11 = vector.broadcast %cst_8 : f32 to vector<1x32xf32>
    %12 = arith.mulf %10, %11 : vector<1x32xf32>
    %c0_9 = arith.constant 0 : index
    %c0_10 = arith.constant 0 : index
    %13 = vector.load %arg5[%c0_9, %c0_10] : memref<32x16xbf16, #tpu.memory_space<vmem>>, vector<32x16xbf16>
    %14 = arith.truncf %12 : vector<1x32xf32> to vector<1x32xbf16>
    %cst_11 = arith.constant dense<0.000000e+00> : vector<1x16xf32>
    %15 = tpu.matmul %14, %13, %cst_11 {dimension_numbers = #tpu.dot_dimension_numbers<[1], [0], [0], [1], [0, 0, 1, 1], [], []>} : vector<1x32xbf16>, vector<32x16xbf16>, vector<1x16xf32> -> vector<1x16xf32>
    %c0_12 = arith.constant 0 : index
    %c0_13 = arith.constant 0 : index
    %16 = vector.load %arg6[%c0_12, %c0_13] : memref<1x16xf32, #tpu.memory_space<vmem>>, vector<1x16xf32>
    %17 = arith.addf %15, %16 : vector<1x16xf32>
    %cst_14 = arith.constant 0.000000e+00 : f32
    %18 = vector.broadcast %cst_14 : f32 to vector<1x16xf32>
    %19 = arith.maximumf %17, %18 : vector<1x16xf32>
    %c0_15 = arith.constant 0 : index
    %c0_16 = arith.constant 0 : index
    %20 = vector.load %arg7[%c0_15, %c0_16] : memref<16x32xbf16, #tpu.memory_space<vmem>>, vector<16x32xbf16>
    %21 = arith.truncf %19 : vector<1x16xf32> to vector<1x16xbf16>
    %cst_17 = arith.constant dense<0.000000e+00> : vector<1x32xf32>
    %22 = tpu.matmul %21, %20, %cst_17 {dimension_numbers = #tpu.dot_dimension_numbers<[1], [0], [0], [1], [0, 0, 1, 1], [], []>} : vector<1x16xbf16>, vector<16x32xbf16>, vector<1x32xf32> -> vector<1x32xf32>
    %c0_18 = arith.constant 0 : index
    %c0_19 = arith.constant 0 : index
    %23 = vector.load %arg8[%c0_18, %c0_19] : memref<1x32xf32, #tpu.memory_space<vmem>>, vector<1x32xf32>
    %24 = arith.addf %22, %23 : vector<1x32xf32>
    %cst_20 = arith.constant 0.000000e+00 : f32
    %25 = vector.broadcast %cst_20 : f32 to vector<1x32xf32>
    %26 = arith.subf %25, %24 : vector<1x32xf32>
    %27 = math.exp %26 : vector<1x32xf32>
    %cst_21 = arith.constant 1.000000e+00 : f32
    %28 = vector.broadcast %cst_21 : f32 to vector<1x32xf32>
    %29 = arith.addf %28, %27 : vector<1x32xf32>
    %cst_22 = arith.constant 1.000000e+00 : f32
    %30 = vector.broadcast %cst_22 : f32 to vector<1x32xf32>
    %31 = arith.divf %30, %29 : vector<1x32xf32>
    %c0_23 = arith.constant 0 : index
    %c0_24 = arith.constant 0 : index
    %c0_25 = arith.constant 0 : index
    %32 = vector.load %arg2[%c0_23, %c0_24, %c0_25] : memref<1x32x32xbf16, #tpu.memory_space<vmem>>, vector<1x32x32xbf16>
    %33 = vector.shape_cast %32 : vector<1x32x32xbf16> to vector<32x32xbf16>
    %34 = arith.extf %33 : vector<32x32xbf16> to vector<32x32xf32>
    %35 = vector.broadcast %31 : vector<1x32xf32> to vector<32x32xf32>
    %36 = arith.mulf %8, %35 : vector<32x32xf32>
    %37 = arith.addf %36, %34 : vector<32x32xf32>
    %38 = vector.shape_cast %37 : vector<32x32xf32> to vector<1x32x32xf32>
    %39 = arith.truncf %38 : vector<1x32x32xf32> to vector<1x32x32xbf16>
    %c0_26 = arith.constant 0 : index
    %c0_27 = arith.constant 0 : index
    %c0_28 = arith.constant 0 : index
    %40 = vector.load %arg9[%c0_26, %c0_27, %c0_28] : memref<1x32x32xbf16, #tpu.memory_space<vmem>>, vector<1x32x32xbf16>
    tpu.vector_store %arg9[%c0_26, %c0_27, %c0_28], %39 {strides = array<i32>} : memref<1x32x32xbf16, #tpu.memory_space<vmem>>, vector<1x32x32xbf16>,
    return
  }
  func.func @transform_0(%arg0: i32) -> (i32, i32, i32) {
    %c0_i32 = arith.constant 0 : i32
    %c0_i32_0 = arith.constant 0 : i32
    %c0_i32_1 = arith.constant 0 : i32
    return %arg0, %c0_i32, %c0_i32_0 : i32, i32, i32
  }
  func.func @transform_1(%arg0: i32) -> (i32, i32, i32) {
    %c0_i32 = arith.constant 0 : i32
    %c0_i32_0 = arith.constant 0 : i32
    %c0_i32_1 = arith.constant 0 : i32
    return %arg0, %c0_i32, %c0_i32_0 : i32, i32, i32
  }
  func.func @transform_2(%arg0: i32) -> (i32, i32) {
    %c0_i32 = arith.constant 0 : i32
    %c0_i32_0 = arith.constant 0 : i32
    %c0_i32_1 = arith.constant 0 : i32
    return %c0_i32, %c0_i32_0 : i32, i32
  }
  func.func @transform_3(%arg0: i32) -> (i32, i32) {
    %c0_i32 = arith.constant 0 : i32
    %c0_i32_0 = arith.constant 0 : i32
    %c0_i32_1 = arith.constant 0 : i32
    return %c0_i32, %c0_i32_0 : i32, i32
  }
  func.func @transform_4(%arg0: i32) -> (i32, i32) {
    %c0_i32 = arith.constant 0 : i32
    %c0_i32_0 = arith.constant 0 : i32
    %c0_i32_1 = arith.constant 0 : i32
    return %c0_i32, %c0_i32_0 : i32, i32
  }
  func.func @transform_5(%arg0: i32) -> (i32, i32) {
    %c0_i32 = arith.constant 0 : i32
    %c0_i32_0 = arith.constant 0 : i32
    %c0_i32_1 = arith.constant 0 : i32
    return %c0_i32, %c0_i32_0 : i32, i32
  }
  func.func @transform_6(%arg0: i32) -> (i32, i32) {
    %c0_i32 = arith.constant 0 : i32
    %c0_i32_0 = arith.constant 0 : i32
    %c0_i32_1 = arith.constant 0 : i32
    return %c0_i32, %c0_i32_0 : i32, i32
  }
  func.func @transform_7(%arg0: i32) -> (i32, i32) {
    %c0_i32 = arith.constant 0 : i32
    %c0_i32_0 = arith.constant 0 : i32
    %c0_i32_1 = arith.constant 0 : i32
    return %c0_i32, %c0_i32_0 : i32, i32
  }
  func.func @transform_8(%arg0: i32) -> (i32, i32, i32) {
    %c0_i32 = arith.constant 0 : i32
    %c0_i32_0 = arith.constant 0 : i32
    %c0_i32_1 = arith.constant 0 : i32
    return %arg0, %c0_i32, %c0_i32_0 : i32, i32, i32
  }
}

module attributes {stable_mosaic.version = 11 : i64} {
  func.func @_res2_kernel(%arg0: i32, %arg1: memref<1x32x32xbf16, #tpu.memory_space<vmem>>, %arg2: memref<3x3x8x8xbf16, #tpu.memory_space<vmem>>, %arg3: memref<3x8xf32, #tpu.memory_space<vmem>>, %arg4: memref<1x32x32xbf16, #tpu.memory_space<vmem>>) attributes {dimension_semantics = [#tpu.dimension_semantics<parallel>], iteration_bounds = array<i64: 2>, scalar_prefetch = 0 : i64, scratch_operands = 0 : i64, tpu.core_type = #tpu.core_type<tc>, window_params = [{transform_indices = @transform_0, window_bounds = array<i64: 1, 32, 32>}, {pipeline_mode = #tpu.pipeline_mode<synchronous>, transform_indices = @transform_1, window_bounds = array<i64: 3, 3, 8, 8>}, {pipeline_mode = #tpu.pipeline_mode<synchronous>, transform_indices = @transform_2, window_bounds = array<i64: 3, 8>}, {transform_indices = @transform_3, window_bounds = array<i64: 1, 32, 32>}]} {
    %c0 = arith.constant 0 : index
    %c0_0 = arith.constant 0 : index
    %c0_1 = arith.constant 0 : index
    %0 = vector.load %arg1[%c0, %c0_0, %c0_1] : memref<1x32x32xbf16, #tpu.memory_space<vmem>>, vector<1x32x32xbf16>
    %1 = vector.shape_cast %0 : vector<1x32x32xbf16> to vector<32x32xbf16>
    %2 = vector.extract_strided_slice %1 {offsets = [0, 8], sizes = [32, 8], strides = [1, 1]} : vector<32x32xbf16> to vector<32x8xbf16>
    %3 = arith.extf %2 : vector<32x8xbf16> to vector<32x8xf32>
    %4 = vector.extract_strided_slice %3 {offsets = [3, 0], sizes = [1, 8], strides = [1, 1]} : vector<32x8xf32> to vector<1x8xf32>
    %5 = vector.extract_strided_slice %3 {offsets = [2, 0], sizes = [1, 8], strides = [1, 1]} : vector<32x8xf32> to vector<1x8xf32>
    %6 = vector.extract_strided_slice %3 {offsets = [1, 0], sizes = [1, 8], strides = [1, 1]} : vector<32x8xf32> to vector<1x8xf32>
    %7 = tpu.concatenate %4, %5, %6 in 0 : vector<1x8xf32>, vector<1x8xf32>, vector<1x8xf32> -> vector<3x8xf32>
    %8 = vector.extract_strided_slice %3 {offsets = [30, 0], sizes = [1, 8], strides = [1, 1]} : vector<32x8xf32> to vector<1x8xf32>
    %9 = vector.extract_strided_slice %3 {offsets = [29, 0], sizes = [1, 8], strides = [1, 1]} : vector<32x8xf32> to vector<1x8xf32>
    %10 = vector.extract_strided_slice %3 {offsets = [28, 0], sizes = [1, 8], strides = [1, 1]} : vector<32x8xf32> to vector<1x8xf32>
    %11 = tpu.concatenate %8, %9, %10 in 0 : vector<1x8xf32>, vector<1x8xf32>, vector<1x8xf32> -> vector<3x8xf32>
    %12 = vector.extract_strided_slice %3 {offsets = [0, 0], sizes = [29, 8], strides = [1, 1]} : vector<32x8xf32> to vector<29x8xf32>
    %13 = tpu.concatenate %7, %12 in 0 : vector<3x8xf32>, vector<29x8xf32> -> vector<32x8xf32>
    %14 = vector.extract_strided_slice %3 {offsets = [3, 0], sizes = [29, 8], strides = [1, 1]} : vector<32x8xf32> to vector<29x8xf32>
    %15 = tpu.concatenate %14, %11 in 0 : vector<29x8xf32>, vector<3x8xf32> -> vector<32x8xf32>
    %c0_2 = arith.constant 0 : index
    %c0_3 = arith.constant 0 : index
    %c0_4 = arith.constant 0 : index
    %c0_5 = arith.constant 0 : index
    %16 = vector.load %arg2[%c0_2, %c0_3, %c0_4, %c0_5] : memref<3x3x8x8xbf16, #tpu.memory_space<vmem>>, vector<1x1x8x8xbf16>
    %17 = vector.shape_cast %16 : vector<1x1x8x8xbf16> to vector<8x8xbf16>
    %18 = arith.truncf %13 : vector<32x8xf32> to vector<32x8xbf16>
    %cst = arith.constant dense<0.000000e+00> : vector<32x8xf32>
    %19 = tpu.matmul %18, %17, %cst {dimension_numbers = #tpu.dot_dimension_numbers<[1], [0], [0], [1], [0, 0, 1, 1], [], []>} : vector<32x8xbf16>, vector<8x8xbf16>, vector<32x8xf32> -> vector<32x8xf32>
    %c0_6 = arith.constant 0 : index
    %c1 = arith.constant 1 : index
    %c0_7 = arith.constant 0 : index
    %c0_8 = arith.constant 0 : index
    %20 = vector.load %arg2[%c0_6, %c1, %c0_7, %c0_8] : memref<3x3x8x8xbf16, #tpu.memory_space<vmem>>, vector<1x1x8x8xbf16>
    %21 = vector.shape_cast %20 : vector<1x1x8x8xbf16> to vector<8x8xbf16>
    %22 = arith.truncf %3 : vector<32x8xf32> to vector<32x8xbf16>
    %cst_9 = arith.constant dense<0.000000e+00> : vector<32x8xf32>
    %23 = tpu.matmul %22, %21, %cst_9 {dimension_numbers = #tpu.dot_dimension_numbers<[1], [0], [0], [1], [0, 0, 1, 1], [], []>} : vector<32x8xbf16>, vector<8x8xbf16>, vector<32x8xf32> -> vector<32x8xf32>
    %24 = arith.addf %19, %23 : vector<32x8xf32>
    %c0_10 = arith.constant 0 : index
    %c2 = arith.constant 2 : index
    %c0_11 = arith.constant 0 : index
    %c0_12 = arith.constant 0 : index
    %25 = vector.load %arg2[%c0_10, %c2, %c0_11, %c0_12] : memref<3x3x8x8xbf16, #tpu.memory_space<vmem>>, vector<1x1x8x8xbf16>
    %26 = vector.shape_cast %25 : vector<1x1x8x8xbf16> to vector<8x8xbf16>
    %27 = arith.truncf %15 : vector<32x8xf32> to vector<32x8xbf16>
    %cst_13 = arith.constant dense<0.000000e+00> : vector<32x8xf32>
    %28 = tpu.matmul %27, %26, %cst_13 {dimension_numbers = #tpu.dot_dimension_numbers<[1], [0], [0], [1], [0, 0, 1, 1], [], []>} : vector<32x8xbf16>, vector<8x8xbf16>, vector<32x8xf32> -> vector<32x8xf32>
    %29 = arith.addf %24, %28 : vector<32x8xf32>
    %c0_14 = arith.constant 0 : index
    %c0_15 = arith.constant 0 : index
    %30 = vector.load %arg3[%c0_14, %c0_15] : memref<3x8xf32, #tpu.memory_space<vmem>>, vector<1x8xf32>
    %31 = vector.broadcast %30 : vector<1x8xf32> to vector<32x8xf32>
    %32 = arith.addf %29, %31 : vector<32x8xf32>
    %cst_16 = arith.constant 0.000000e+00 : f32
    %33 = vector.broadcast %cst_16 : f32 to vector<32x8xf32>
    %34 = arith.maximumf %32, %33 : vector<32x8xf32>
    %35 = arith.truncf %34 : vector<32x8xf32> to vector<32x8xbf16>
    %c0_17 = arith.constant 0 : index
    %c0_18 = arith.constant 0 : index
    %c0_19 = arith.constant 0 : index
    %36 = vector.load %arg4[%c0_17, %c0_18, %c0_19] : memref<1x32x32xbf16, #tpu.memory_space<vmem>>, vector<1x32x8xbf16>
    %37 = vector.shape_cast %36 : vector<1x32x8xbf16> to vector<32x8xbf16>
    %38 = vector.shape_cast %35 : vector<32x8xbf16> to vector<1x32x8xbf16>
    tpu.vector_store %arg4[%c0_17, %c0_18, %c0_19], %38 {strides = array<i32>} : memref<1x32x32xbf16, #tpu.memory_space<vmem>>, vector<1x32x8xbf16>,
    %39 = vector.extract_strided_slice %1 {offsets = [0, 16], sizes = [32, 8], strides = [1, 1]} : vector<32x32xbf16> to vector<32x8xbf16>
    %40 = arith.extf %39 : vector<32x8xbf16> to vector<32x8xf32>
    %41 = arith.addf %34, %40 : vector<32x8xf32>
    %42 = vector.extract_strided_slice %41 {offsets = [3, 0], sizes = [1, 8], strides = [1, 1]} : vector<32x8xf32> to vector<1x8xf32>
    %43 = vector.extract_strided_slice %41 {offsets = [2, 0], sizes = [1, 8], strides = [1, 1]} : vector<32x8xf32> to vector<1x8xf32>
    %44 = vector.extract_strided_slice %41 {offsets = [1, 0], sizes = [1, 8], strides = [1, 1]} : vector<32x8xf32> to vector<1x8xf32>
    %45 = tpu.concatenate %42, %43, %44 in 0 : vector<1x8xf32>, vector<1x8xf32>, vector<1x8xf32> -> vector<3x8xf32>
    %46 = vector.extract_strided_slice %41 {offsets = [30, 0], sizes = [1, 8], strides = [1, 1]} : vector<32x8xf32> to vector<1x8xf32>
    %47 = vector.extract_strided_slice %41 {offsets = [29, 0], sizes = [1, 8], strides = [1, 1]} : vector<32x8xf32> to vector<1x8xf32>
    %48 = vector.extract_strided_slice %41 {offsets = [28, 0], sizes = [1, 8], strides = [1, 1]} : vector<32x8xf32> to vector<1x8xf32>
    %49 = tpu.concatenate %46, %47, %48 in 0 : vector<1x8xf32>, vector<1x8xf32>, vector<1x8xf32> -> vector<3x8xf32>
    %50 = vector.extract_strided_slice %41 {offsets = [0, 0], sizes = [29, 8], strides = [1, 1]} : vector<32x8xf32> to vector<29x8xf32>
    %51 = tpu.concatenate %45, %50 in 0 : vector<3x8xf32>, vector<29x8xf32> -> vector<32x8xf32>
    %52 = vector.extract_strided_slice %41 {offsets = [3, 0], sizes = [29, 8], strides = [1, 1]} : vector<32x8xf32> to vector<29x8xf32>
    %53 = tpu.concatenate %52, %49 in 0 : vector<29x8xf32>, vector<3x8xf32> -> vector<32x8xf32>
    %c1_20 = arith.constant 1 : index
    %c0_21 = arith.constant 0 : index
    %c0_22 = arith.constant 0 : index
    %c0_23 = arith.constant 0 : index
    %54 = vector.load %arg2[%c1_20, %c0_21, %c0_22, %c0_23] : memref<3x3x8x8xbf16, #tpu.memory_space<vmem>>, vector<1x1x8x8xbf16>
    %55 = vector.shape_cast %54 : vector<1x1x8x8xbf16> to vector<8x8xbf16>
    %56 = arith.truncf %51 : vector<32x8xf32> to vector<32x8xbf16>
    %cst_24 = arith.constant dense<0.000000e+00> : vector<32x8xf32>
    %57 = tpu.matmul %56, %55, %cst_24 {dimension_numbers = #tpu.dot_dimension_numbers<[1], [0], [0], [1], [0, 0, 1, 1], [], []>} : vector<32x8xbf16>, vector<8x8xbf16>, vector<32x8xf32> -> vector<32x8xf32>
    %c1_25 = arith.constant 1 : index
    %c1_26 = arith.constant 1 : index
    %c0_27 = arith.constant 0 : index
    %c0_28 = arith.constant 0 : index
    %58 = vector.load %arg2[%c1_25, %c1_26, %c0_27, %c0_28] : memref<3x3x8x8xbf16, #tpu.memory_space<vmem>>, vector<1x1x8x8xbf16>
    %59 = vector.shape_cast %58 : vector<1x1x8x8xbf16> to vector<8x8xbf16>
    %60 = arith.truncf %41 : vector<32x8xf32> to vector<32x8xbf16>
    %cst_29 = arith.constant dense<0.000000e+00> : vector<32x8xf32>
    %61 = tpu.matmul %60, %59, %cst_29 {dimension_numbers = #tpu.dot_dimension_numbers<[1], [0], [0], [1], [0, 0, 1, 1], [], []>} : vector<32x8xbf16>, vector<8x8xbf16>, vector<32x8xf32> -> vector<32x8xf32>
    %62 = arith.addf %57, %61 : vector<32x8xf32>
    %c1_30 = arith.constant 1 : index
    %c2_31 = arith.constant 2 : index
    %c0_32 = arith.constant 0 : index
    %c0_33 = arith.constant 0 : index
    %63 = vector.load %arg2[%c1_30, %c2_31, %c0_32, %c0_33] : memref<3x3x8x8xbf16, #tpu.memory_space<vmem>>, vector<1x1x8x8xbf16>
    %64 = vector.shape_cast %63 : vector<1x1x8x8xbf16> to vector<8x8xbf16>
    %65 = arith.truncf %53 : vector<32x8xf32> to vector<32x8xbf16>
    %cst_34 = arith.constant dense<0.000000e+00> : vector<32x8xf32>
    %66 = tpu.matmul %65, %64, %cst_34 {dimension_numbers = #tpu.dot_dimension_numbers<[1], [0], [0], [1], [0, 0, 1, 1], [], []>} : vector<32x8xbf16>, vector<8x8xbf16>, vector<32x8xf32> -> vector<32x8xf32>
    %67 = arith.addf %62, %66 : vector<32x8xf32>
    %c1_35 = arith.constant 1 : index
    %c0_36 = arith.constant 0 : index
    %68 = vector.load %arg3[%c1_35, %c0_36] : memref<3x8xf32, #tpu.memory_space<vmem>>, vector<1x8xf32>
    %69 = vector.broadcast %68 : vector<1x8xf32> to vector<32x8xf32>
    %70 = arith.addf %67, %69 : vector<32x8xf32>
    %cst_37 = arith.constant 0.000000e+00 : f32
    %71 = vector.broadcast %cst_37 : f32 to vector<32x8xf32>
    %72 = arith.maximumf %70, %71 : vector<32x8xf32>
    %73 = arith.truncf %72 : vector<32x8xf32> to vector<32x8xbf16>
    %c0_38 = arith.constant 0 : index
    %c0_39 = arith.constant 0 : index
    %c8 = arith.constant 8 : index
    %74 = vector.load %arg4[%c0_38, %c0_39, %c8] : memref<1x32x32xbf16, #tpu.memory_space<vmem>>, vector<1x32x8xbf16>
    %75 = vector.shape_cast %74 : vector<1x32x8xbf16> to vector<32x8xbf16>
    %76 = vector.shape_cast %73 : vector<32x8xbf16> to vector<1x32x8xbf16>
    tpu.vector_store %arg4[%c0_38, %c0_39, %c8], %76 {strides = array<i32>} : memref<1x32x32xbf16, #tpu.memory_space<vmem>>, vector<1x32x8xbf16>,
    %77 = vector.extract_strided_slice %1 {offsets = [0, 24], sizes = [32, 8], strides = [1, 1]} : vector<32x32xbf16> to vector<32x8xbf16>
    %78 = arith.extf %77 : vector<32x8xbf16> to vector<32x8xf32>
    %79 = arith.addf %72, %78 : vector<32x8xf32>
    %80 = vector.extract_strided_slice %79 {offsets = [3, 0], sizes = [1, 8], strides = [1, 1]} : vector<32x8xf32> to vector<1x8xf32>
    %81 = vector.extract_strided_slice %79 {offsets = [2, 0], sizes = [1, 8], strides = [1, 1]} : vector<32x8xf32> to vector<1x8xf32>
    %82 = vector.extract_strided_slice %79 {offsets = [1, 0], sizes = [1, 8], strides = [1, 1]} : vector<32x8xf32> to vector<1x8xf32>
    %83 = tpu.concatenate %80, %81, %82 in 0 : vector<1x8xf32>, vector<1x8xf32>, vector<1x8xf32> -> vector<3x8xf32>
    %84 = vector.extract_strided_slice %79 {offsets = [30, 0], sizes = [1, 8], strides = [1, 1]} : vector<32x8xf32> to vector<1x8xf32>
    %85 = vector.extract_strided_slice %79 {offsets = [29, 0], sizes = [1, 8], strides = [1, 1]} : vector<32x8xf32> to vector<1x8xf32>
    %86 = vector.extract_strided_slice %79 {offsets = [28, 0], sizes = [1, 8], strides = [1, 1]} : vector<32x8xf32> to vector<1x8xf32>
    %87 = tpu.concatenate %84, %85, %86 in 0 : vector<1x8xf32>, vector<1x8xf32>, vector<1x8xf32> -> vector<3x8xf32>
    %88 = vector.extract_strided_slice %79 {offsets = [0, 0], sizes = [29, 8], strides = [1, 1]} : vector<32x8xf32> to vector<29x8xf32>
    %89 = tpu.concatenate %83, %88 in 0 : vector<3x8xf32>, vector<29x8xf32> -> vector<32x8xf32>
    %90 = vector.extract_strided_slice %79 {offsets = [3, 0], sizes = [29, 8], strides = [1, 1]} : vector<32x8xf32> to vector<29x8xf32>
    %91 = tpu.concatenate %90, %87 in 0 : vector<29x8xf32>, vector<3x8xf32> -> vector<32x8xf32>
    %c2_40 = arith.constant 2 : index
    %c0_41 = arith.constant 0 : index
    %c0_42 = arith.constant 0 : index
    %c0_43 = arith.constant 0 : index
    %92 = vector.load %arg2[%c2_40, %c0_41, %c0_42, %c0_43] : memref<3x3x8x8xbf16, #tpu.memory_space<vmem>>, vector<1x1x8x8xbf16>
    %93 = vector.shape_cast %92 : vector<1x1x8x8xbf16> to vector<8x8xbf16>
    %94 = arith.truncf %89 : vector<32x8xf32> to vector<32x8xbf16>
    %cst_44 = arith.constant dense<0.000000e+00> : vector<32x8xf32>
    %95 = tpu.matmul %94, %93, %cst_44 {dimension_numbers = #tpu.dot_dimension_numbers<[1], [0], [0], [1], [0, 0, 1, 1], [], []>} : vector<32x8xbf16>, vector<8x8xbf16>, vector<32x8xf32> -> vector<32x8xf32>
    %c2_45 = arith.constant 2 : index
    %c1_46 = arith.constant 1 : index
    %c0_47 = arith.constant 0 : index
    %c0_48 = arith.constant 0 : index
    %96 = vector.load %arg2[%c2_45, %c1_46, %c0_47, %c0_48] : memref<3x3x8x8xbf16, #tpu.memory_space<vmem>>, vector<1x1x8x8xbf16>
    %97 = vector.shape_cast %96 : vector<1x1x8x8xbf16> to vector<8x8xbf16>
    %98 = arith.truncf %79 : vector<32x8xf32> to vector<32x8xbf16>
    %cst_49 = arith.constant dense<0.000000e+00> : vector<32x8xf32>
    %99 = tpu.matmul %98, %97, %cst_49 {dimension_numbers = #tpu.dot_dimension_numbers<[1], [0], [0], [1], [0, 0, 1, 1], [], []>} : vector<32x8xbf16>, vector<8x8xbf16>, vector<32x8xf32> -> vector<32x8xf32>
    %100 = arith.addf %95, %99 : vector<32x8xf32>
    %c2_50 = arith.constant 2 : index
    %c2_51 = arith.constant 2 : index
    %c0_52 = arith.constant 0 : index
    %c0_53 = arith.constant 0 : index
    %101 = vector.load %arg2[%c2_50, %c2_51, %c0_52, %c0_53] : memref<3x3x8x8xbf16, #tpu.memory_space<vmem>>, vector<1x1x8x8xbf16>
    %102 = vector.shape_cast %101 : vector<1x1x8x8xbf16> to vector<8x8xbf16>
    %103 = arith.truncf %91 : vector<32x8xf32> to vector<32x8xbf16>
    %cst_54 = arith.constant dense<0.000000e+00> : vector<32x8xf32>
    %104 = tpu.matmul %103, %102, %cst_54 {dimension_numbers = #tpu.dot_dimension_numbers<[1], [0], [0], [1], [0, 0, 1, 1], [], []>} : vector<32x8xbf16>, vector<8x8xbf16>, vector<32x8xf32> -> vector<32x8xf32>
    %105 = arith.addf %100, %104 : vector<32x8xf32>
    %c2_55 = arith.constant 2 : index
    %c0_56 = arith.constant 0 : index
    %106 = vector.load %arg3[%c2_55, %c0_56] : memref<3x8xf32, #tpu.memory_space<vmem>>, vector<1x8xf32>
    %107 = vector.broadcast %106 : vector<1x8xf32> to vector<32x8xf32>
    %108 = arith.addf %105, %107 : vector<32x8xf32>
    %cst_57 = arith.constant 0.000000e+00 : f32
    %109 = vector.broadcast %cst_57 : f32 to vector<32x8xf32>
    %110 = arith.maximumf %108, %109 : vector<32x8xf32>
    %111 = arith.truncf %110 : vector<32x8xf32> to vector<32x8xbf16>
    %c0_58 = arith.constant 0 : index
    %c0_59 = arith.constant 0 : index
    %c16 = arith.constant 16 : index
    %112 = vector.load %arg4[%c0_58, %c0_59, %c16] : memref<1x32x32xbf16, #tpu.memory_space<vmem>>, vector<1x32x8xbf16>
    %113 = vector.shape_cast %112 : vector<1x32x8xbf16> to vector<32x8xbf16>
    %114 = vector.shape_cast %111 : vector<32x8xbf16> to vector<1x32x8xbf16>
    tpu.vector_store %arg4[%c0_58, %c0_59, %c16], %114 {strides = array<i32>} : memref<1x32x32xbf16, #tpu.memory_space<vmem>>, vector<1x32x8xbf16>,
    %115 = vector.extract_strided_slice %1 {offsets = [0, 0], sizes = [32, 8], strides = [1, 1]} : vector<32x32xbf16> to vector<32x8xbf16>
    %c0_60 = arith.constant 0 : index
    %c0_61 = arith.constant 0 : index
    %c24 = arith.constant 24 : index
    %116 = vector.load %arg4[%c0_60, %c0_61, %c24] : memref<1x32x32xbf16, #tpu.memory_space<vmem>>, vector<1x32x8xbf16>
    %117 = vector.shape_cast %116 : vector<1x32x8xbf16> to vector<32x8xbf16>
    %118 = vector.shape_cast %115 : vector<32x8xbf16> to vector<1x32x8xbf16>
    tpu.vector_store %arg4[%c0_60, %c0_61, %c24], %118 {strides = array<i32>} : memref<1x32x32xbf16, #tpu.memory_space<vmem>>, vector<1x32x8xbf16>,
    return
  }
  func.func @transform_0(%arg0: i32) -> (i32, i32, i32) {
    %c0_i32 = arith.constant 0 : i32
    %c0_i32_0 = arith.constant 0 : i32
    %c0_i32_1 = arith.constant 0 : i32
    return %arg0, %c0_i32, %c0_i32_0 : i32, i32, i32
  }
  func.func @transform_1(%arg0: i32) -> (i32, i32, i32, i32) {
    %c0_i32 = arith.constant 0 : i32
    %c0_i32_0 = arith.constant 0 : i32
    %c0_i32_1 = arith.constant 0 : i32
    %c0_i32_2 = arith.constant 0 : i32
    %c0_i32_3 = arith.constant 0 : i32
    return %c0_i32, %c0_i32_0, %c0_i32_1, %c0_i32_2 : i32, i32, i32, i32
  }
  func.func @transform_2(%arg0: i32) -> (i32, i32) {
    %c0_i32 = arith.constant 0 : i32
    %c0_i32_0 = arith.constant 0 : i32
    %c0_i32_1 = arith.constant 0 : i32
    return %c0_i32, %c0_i32_0 : i32, i32
  }
  func.func @transform_3(%arg0: i32) -> (i32, i32, i32) {
    %c0_i32 = arith.constant 0 : i32
    %c0_i32_0 = arith.constant 0 : i32
    %c0_i32_1 = arith.constant 0 : i32
    return %arg0, %c0_i32, %c0_i32_0 : i32, i32, i32
  }
}

module attributes {stable_mosaic.version = 11 : i64} {
  func.func @_res2_kernel(%arg0: i32, %arg1: memref<1x32x32xbf16, #tpu.memory_space<vmem>>, %arg2: memref<3x3x8x8xbf16, #tpu.memory_space<vmem>>, %arg3: memref<3x8xf32, #tpu.memory_space<vmem>>, %arg4: memref<1x32x32xbf16, #tpu.memory_space<vmem>>) attributes {dimension_semantics = [#tpu.dimension_semantics<parallel>], iteration_bounds = array<i64: 2>, scalar_prefetch = 0 : i64, scratch_operands = 0 : i64, tpu.core_type = #tpu.core_type<tc>, window_params = [{transform_indices = @transform_0, window_bounds = array<i64: 1, 32, 32>}, {pipeline_mode = #tpu.pipeline_mode<synchronous>, transform_indices = @transform_1, window_bounds = array<i64: 3, 3, 8, 8>}, {pipeline_mode = #tpu.pipeline_mode<synchronous>, transform_indices = @transform_2, window_bounds = array<i64: 3, 8>}, {transform_indices = @transform_3, window_bounds = array<i64: 1, 32, 32>}]} {
    %c0 = arith.constant 0 : index
    %c0_0 = arith.constant 0 : index
    %c0_1 = arith.constant 0 : index
    %0 = vector.load %arg1[%c0, %c0_0, %c0_1] : memref<1x32x32xbf16, #tpu.memory_space<vmem>>, vector<1x32x32xbf16>
    %1 = vector.shape_cast %0 : vector<1x32x32xbf16> to vector<32x32xbf16>
    %2 = vector.extract_strided_slice %1 {offsets = [0, 8], sizes = [32, 8], strides = [1, 1]} : vector<32x32xbf16> to vector<32x8xbf16>
    %3 = arith.extf %2 : vector<32x8xbf16> to vector<32x8xf32>
    %4 = vector.extract_strided_slice %3 {offsets = [4, 0], sizes = [1, 8], strides = [1, 1]} : vector<32x8xf32> to vector<1x8xf32>
    %5 = vector.extract_strided_slice %3 {offsets = [3, 0], sizes = [1, 8], strides = [1, 1]} : vector<32x8xf32> to vector<1x8xf32>
    %6 = vector.extract_strided_slice %3 {offsets = [2, 0], sizes = [1, 8], strides = [1, 1]} : vector<32x8xf32> to vector<1x8xf32>
    %7 = vector.extract_strided_slice %3 {offsets = [1, 0], sizes = [1, 8], strides = [1, 1]} : vector<32x8xf32> to vector<1x8xf32>
    %8 = tpu.concatenate %4, %5, %6, %7 in 0 : vector<1x8xf32>, vector<1x8xf32>, vector<1x8xf32>, vector<1x8xf32> -> vector<4x8xf32>
    %9 = vector.extract_strided_slice %3 {offsets = [30, 0], sizes = [1, 8], strides = [1, 1]} : vector<32x8xf32> to vector<1x8xf32>
    %10 = vector.extract_strided_slice %3 {offsets = [29, 0], sizes = [1, 8], strides = [1, 1]} : vector<32x8xf32> to vector<1x8xf32>
    %11 = vector.extract_strided_slice %3 {offsets = [28, 0], sizes = [1, 8], strides = [1, 1]} : vector<32x8xf32> to vector<1x8xf32>
    %12 = vector.extract_strided_slice %3 {offsets = [27, 0], sizes = [1, 8], strides = [1, 1]} : vector<32x8xf32> to vector<1x8xf32>
    %13 = tpu.concatenate %9, %10, %11, %12 in 0 : vector<1x8xf32>, vector<1x8xf32>, vector<1x8xf32>, vector<1x8xf32> -> vector<4x8xf32>
    %14 = vector.extract_strided_slice %3 {offsets = [0, 0], sizes = [28, 8], strides = [1, 1]} : vector<32x8xf32> to vector<28x8xf32>
    %15 = tpu.concatenate %8, %14 in 0 : vector<4x8xf32>, vector<28x8xf32> -> vector<32x8xf32>
    %16 = vector.extract_strided_slice %3 {offsets = [4, 0], sizes = [28, 8], strides = [1, 1]} : vector<32x8xf32> to vector<28x8xf32>
    %17 = tpu.concatenate %16, %13 in 0 : vector<28x8xf32>, vector<4x8xf32> -> vector<32x8xf32>
    %c0_2 = arith.constant 0 : index
    %c0_3 = arith.constant 0 : index
    %c0_4 = arith.constant 0 : index
    %c0_5 = arith.constant 0 : index
    %18 = vector.load %arg2[%c0_2, %c0_3, %c0_4, %c0_5] : memref<3x3x8x8xbf16, #tpu.memory_space<vmem>>, vector<1x1x8x8xbf16>
    %19 = vector.shape_cast %18 : vector<1x1x8x8xbf16> to vector<8x8xbf16>
    %20 = arith.truncf %15 : vector<32x8xf32> to vector<32x8xbf16>
    %cst = arith.constant dense<0.000000e+00> : vector<32x8xf32>
    %21 = tpu.matmul %20, %19, %cst {dimension_numbers = #tpu.dot_dimension_numbers<[1], [0], [0], [1], [0, 0, 1, 1], [], []>} : vector<32x8xbf16>, vector<8x8xbf16>, vector<32x8xf32> -> vector<32x8xf32>
    %c0_6 = arith.constant 0 : index
    %c1 = arith.constant 1 : index
    %c0_7 = arith.constant 0 : index
    %c0_8 = arith.constant 0 : index
    %22 = vector.load %arg2[%c0_6, %c1, %c0_7, %c0_8] : memref<3x3x8x8xbf16, #tpu.memory_space<vmem>>, vector<1x1x8x8xbf16>
    %23 = vector.shape_cast %22 : vector<1x1x8x8xbf16> to vector<8x8xbf16>
    %24 = arith.truncf %3 : vector<32x8xf32> to vector<32x8xbf16>
    %cst_9 = arith.constant dense<0.000000e+00> : vector<32x8xf32>
    %25 = tpu.matmul %24, %23, %cst_9 {dimension_numbers = #tpu.dot_dimension_numbers<[1], [0], [0], [1], [0, 0, 1, 1], [], []>} : vector<32x8xbf16>, vector<8x8xbf16>, vector<32x8xf32> -> vector<32x8xf32>
    %26 = arith.addf %21, %25 : vector<32x8xf32>
    %c0_10 = arith.constant 0 : index
    %c2 = arith.constant 2 : index
    %c0_11 = arith.constant 0 : index
    %c0_12 = arith.constant 0 : index
    %27 = vector.load %arg2[%c0_10, %c2, %c0_11, %c0_12] : memref<3x3x8x8xbf16, #tpu.memory_space<vmem>>, vector<1x1x8x8xbf16>
    %28 = vector.shape_cast %27 : vector<1x1x8x8xbf16> to vector<8x8xbf16>
    %29 = arith.truncf %17 : vector<32x8xf32> to vector<32x8xbf16>
    %cst_13 = arith.constant dense<0.000000e+00> : vector<32x8xf32>
    %30 = tpu.matmul %29, %28, %cst_13 {dimension_numbers = #tpu.dot_dimension_numbers<[1], [0], [0], [1], [0, 0, 1, 1], [], []>} : vector<32x8xbf16>, vector<8x8xbf16>, vector<32x8xf32> -> vector<32x8xf32>
    %31 = arith.addf %26, %30 : vector<32x8xf32>
    %c0_14 = arith.constant 0 : index
    %c0_15 = arith.constant 0 : index
    %32 = vector.load %arg3[%c0_14, %c0_15] : memref<3x8xf32, #tpu.memory_space<vmem>>, vector<1x8xf32>
    %33 = vector.broadcast %32 : vector<1x8xf32> to vector<32x8xf32>
    %34 = arith.addf %31, %33 : vector<32x8xf32>
    %cst_16 = arith.constant 0.000000e+00 : f32
    %35 = vector.broadcast %cst_16 : f32 to vector<32x8xf32>
    %36 = arith.maximumf %34, %35 : vector<32x8xf32>
    %37 = arith.truncf %36 : vector<32x8xf32> to vector<32x8xbf16>
    %c0_17 = arith.constant 0 : index
    %c0_18 = arith.constant 0 : index
    %c0_19 = arith.constant 0 : index
    %38 = vector.load %arg4[%c0_17, %c0_18, %c0_19] : memref<1x32x32xbf16, #tpu.memory_space<vmem>>, vector<1x32x8xbf16>
    %39 = vector.shape_cast %38 : vector<1x32x8xbf16> to vector<32x8xbf16>
    %40 = vector.shape_cast %37 : vector<32x8xbf16> to vector<1x32x8xbf16>
    tpu.vector_store %arg4[%c0_17, %c0_18, %c0_19], %40 {strides = array<i32>} : memref<1x32x32xbf16, #tpu.memory_space<vmem>>, vector<1x32x8xbf16>,
    %41 = vector.extract_strided_slice %1 {offsets = [0, 16], sizes = [32, 8], strides = [1, 1]} : vector<32x32xbf16> to vector<32x8xbf16>
    %42 = arith.extf %41 : vector<32x8xbf16> to vector<32x8xf32>
    %43 = arith.addf %36, %42 : vector<32x8xf32>
    %44 = vector.extract_strided_slice %43 {offsets = [4, 0], sizes = [1, 8], strides = [1, 1]} : vector<32x8xf32> to vector<1x8xf32>
    %45 = vector.extract_strided_slice %43 {offsets = [3, 0], sizes = [1, 8], strides = [1, 1]} : vector<32x8xf32> to vector<1x8xf32>
    %46 = vector.extract_strided_slice %43 {offsets = [2, 0], sizes = [1, 8], strides = [1, 1]} : vector<32x8xf32> to vector<1x8xf32>
    %47 = vector.extract_strided_slice %43 {offsets = [1, 0], sizes = [1, 8], strides = [1, 1]} : vector<32x8xf32> to vector<1x8xf32>
    %48 = tpu.concatenate %44, %45, %46, %47 in 0 : vector<1x8xf32>, vector<1x8xf32>, vector<1x8xf32>, vector<1x8xf32> -> vector<4x8xf32>
    %49 = vector.extract_strided_slice %43 {offsets = [30, 0], sizes = [1, 8], strides = [1, 1]} : vector<32x8xf32> to vector<1x8xf32>
    %50 = vector.extract_strided_slice %43 {offsets = [29, 0], sizes = [1, 8], strides = [1, 1]} : vector<32x8xf32> to vector<1x8xf32>
    %51 = vector.extract_strided_slice %43 {offsets = [28, 0], sizes = [1, 8], strides = [1, 1]} : vector<32x8xf32> to vector<1x8xf32>
    %52 = vector.extract_strided_slice %43 {offsets = [27, 0], sizes = [1, 8], strides = [1, 1]} : vector<32x8xf32> to vector<1x8xf32>
    %53 = tpu.concatenate %49, %50, %51, %52 in 0 : vector<1x8xf32>, vector<1x8xf32>, vector<1x8xf32>, vector<1x8xf32> -> vector<4x8xf32>
    %54 = vector.extract_strided_slice %43 {offsets = [0, 0], sizes = [28, 8], strides = [1, 1]} : vector<32x8xf32> to vector<28x8xf32>
    %55 = tpu.concatenate %48, %54 in 0 : vector<4x8xf32>, vector<28x8xf32> -> vector<32x8xf32>
    %56 = vector.extract_strided_slice %43 {offsets = [4, 0], sizes = [28, 8], strides = [1, 1]} : vector<32x8xf32> to vector<28x8xf32>
    %57 = tpu.concatenate %56, %53 in 0 : vector<28x8xf32>, vector<4x8xf32> -> vector<32x8xf32>
    %c1_20 = arith.constant 1 : index
    %c0_21 = arith.constant 0 : index
    %c0_22 = arith.constant 0 : index
    %c0_23 = arith.constant 0 : index
    %58 = vector.load %arg2[%c1_20, %c0_21, %c0_22, %c0_23] : memref<3x3x8x8xbf16, #tpu.memory_space<vmem>>, vector<1x1x8x8xbf16>
    %59 = vector.shape_cast %58 : vector<1x1x8x8xbf16> to vector<8x8xbf16>
    %60 = arith.truncf %55 : vector<32x8xf32> to vector<32x8xbf16>
    %cst_24 = arith.constant dense<0.000000e+00> : vector<32x8xf32>
    %61 = tpu.matmul %60, %59, %cst_24 {dimension_numbers = #tpu.dot_dimension_numbers<[1], [0], [0], [1], [0, 0, 1, 1], [], []>} : vector<32x8xbf16>, vector<8x8xbf16>, vector<32x8xf32> -> vector<32x8xf32>
    %c1_25 = arith.constant 1 : index
    %c1_26 = arith.constant 1 : index
    %c0_27 = arith.constant 0 : index
    %c0_28 = arith.constant 0 : index
    %62 = vector.load %arg2[%c1_25, %c1_26, %c0_27, %c0_28] : memref<3x3x8x8xbf16, #tpu.memory_space<vmem>>, vector<1x1x8x8xbf16>
    %63 = vector.shape_cast %62 : vector<1x1x8x8xbf16> to vector<8x8xbf16>
    %64 = arith.truncf %43 : vector<32x8xf32> to vector<32x8xbf16>
    %cst_29 = arith.constant dense<0.000000e+00> : vector<32x8xf32>
    %65 = tpu.matmul %64, %63, %cst_29 {dimension_numbers = #tpu.dot_dimension_numbers<[1], [0], [0], [1], [0, 0, 1, 1], [], []>} : vector<32x8xbf16>, vector<8x8xbf16>, vector<32x8xf32> -> vector<32x8xf32>
    %66 = arith.addf %61, %65 : vector<32x8xf32>
    %c1_30 = arith.constant 1 : index
    %c2_31 = arith.constant 2 : index
    %c0_32 = arith.constant 0 : index
    %c0_33 = arith.constant 0 : index
    %67 = vector.load %arg2[%c1_30, %c2_31, %c0_32, %c0_33] : memref<3x3x8x8xbf16, #tpu.memory_space<vmem>>, vector<1x1x8x8xbf16>
    %68 = vector.shape_cast %67 : vector<1x1x8x8xbf16> to vector<8x8xbf16>
    %69 = arith.truncf %57 : vector<32x8xf32> to vector<32x8xbf16>
    %cst_34 = arith.constant dense<0.000000e+00> : vector<32x8xf32>
    %70 = tpu.matmul %69, %68, %cst_34 {dimension_numbers = #tpu.dot_dimension_numbers<[1], [0], [0], [1], [0, 0, 1, 1], [], []>} : vector<32x8xbf16>, vector<8x8xbf16>, vector<32x8xf32> -> vector<32x8xf32>
    %71 = arith.addf %66, %70 : vector<32x8xf32>
    %c1_35 = arith.constant 1 : index
    %c0_36 = arith.constant 0 : index
    %72 = vector.load %arg3[%c1_35, %c0_36] : memref<3x8xf32, #tpu.memory_space<vmem>>, vector<1x8xf32>
    %73 = vector.broadcast %72 : vector<1x8xf32> to vector<32x8xf32>
    %74 = arith.addf %71, %73 : vector<32x8xf32>
    %cst_37 = arith.constant 0.000000e+00 : f32
    %75 = vector.broadcast %cst_37 : f32 to vector<32x8xf32>
    %76 = arith.maximumf %74, %75 : vector<32x8xf32>
    %77 = arith.truncf %76 : vector<32x8xf32> to vector<32x8xbf16>
    %c0_38 = arith.constant 0 : index
    %c0_39 = arith.constant 0 : index
    %c8 = arith.constant 8 : index
    %78 = vector.load %arg4[%c0_38, %c0_39, %c8] : memref<1x32x32xbf16, #tpu.memory_space<vmem>>, vector<1x32x8xbf16>
    %79 = vector.shape_cast %78 : vector<1x32x8xbf16> to vector<32x8xbf16>
    %80 = vector.shape_cast %77 : vector<32x8xbf16> to vector<1x32x8xbf16>
    tpu.vector_store %arg4[%c0_38, %c0_39, %c8], %80 {strides = array<i32>} : memref<1x32x32xbf16, #tpu.memory_space<vmem>>, vector<1x32x8xbf16>,
    %81 = vector.extract_strided_slice %1 {offsets = [0, 24], sizes = [32, 8], strides = [1, 1]} : vector<32x32xbf16> to vector<32x8xbf16>
    %82 = arith.extf %81 : vector<32x8xbf16> to vector<32x8xf32>
    %83 = arith.addf %76, %82 : vector<32x8xf32>
    %84 = vector.extract_strided_slice %83 {offsets = [4, 0], sizes = [1, 8], strides = [1, 1]} : vector<32x8xf32> to vector<1x8xf32>
    %85 = vector.extract_strided_slice %83 {offsets = [3, 0], sizes = [1, 8], strides = [1, 1]} : vector<32x8xf32> to vector<1x8xf32>
    %86 = vector.extract_strided_slice %83 {offsets = [2, 0], sizes = [1, 8], strides = [1, 1]} : vector<32x8xf32> to vector<1x8xf32>
    %87 = vector.extract_strided_slice %83 {offsets = [1, 0], sizes = [1, 8], strides = [1, 1]} : vector<32x8xf32> to vector<1x8xf32>
    %88 = tpu.concatenate %84, %85, %86, %87 in 0 : vector<1x8xf32>, vector<1x8xf32>, vector<1x8xf32>, vector<1x8xf32> -> vector<4x8xf32>
    %89 = vector.extract_strided_slice %83 {offsets = [30, 0], sizes = [1, 8], strides = [1, 1]} : vector<32x8xf32> to vector<1x8xf32>
    %90 = vector.extract_strided_slice %83 {offsets = [29, 0], sizes = [1, 8], strides = [1, 1]} : vector<32x8xf32> to vector<1x8xf32>
    %91 = vector.extract_strided_slice %83 {offsets = [28, 0], sizes = [1, 8], strides = [1, 1]} : vector<32x8xf32> to vector<1x8xf32>
    %92 = vector.extract_strided_slice %83 {offsets = [27, 0], sizes = [1, 8], strides = [1, 1]} : vector<32x8xf32> to vector<1x8xf32>
    %93 = tpu.concatenate %89, %90, %91, %92 in 0 : vector<1x8xf32>, vector<1x8xf32>, vector<1x8xf32>, vector<1x8xf32> -> vector<4x8xf32>
    %94 = vector.extract_strided_slice %83 {offsets = [0, 0], sizes = [28, 8], strides = [1, 1]} : vector<32x8xf32> to vector<28x8xf32>
    %95 = tpu.concatenate %88, %94 in 0 : vector<4x8xf32>, vector<28x8xf32> -> vector<32x8xf32>
    %96 = vector.extract_strided_slice %83 {offsets = [4, 0], sizes = [28, 8], strides = [1, 1]} : vector<32x8xf32> to vector<28x8xf32>
    %97 = tpu.concatenate %96, %93 in 0 : vector<28x8xf32>, vector<4x8xf32> -> vector<32x8xf32>
    %c2_40 = arith.constant 2 : index
    %c0_41 = arith.constant 0 : index
    %c0_42 = arith.constant 0 : index
    %c0_43 = arith.constant 0 : index
    %98 = vector.load %arg2[%c2_40, %c0_41, %c0_42, %c0_43] : memref<3x3x8x8xbf16, #tpu.memory_space<vmem>>, vector<1x1x8x8xbf16>
    %99 = vector.shape_cast %98 : vector<1x1x8x8xbf16> to vector<8x8xbf16>
    %100 = arith.truncf %95 : vector<32x8xf32> to vector<32x8xbf16>
    %cst_44 = arith.constant dense<0.000000e+00> : vector<32x8xf32>
    %101 = tpu.matmul %100, %99, %cst_44 {dimension_numbers = #tpu.dot_dimension_numbers<[1], [0], [0], [1], [0, 0, 1, 1], [], []>} : vector<32x8xbf16>, vector<8x8xbf16>, vector<32x8xf32> -> vector<32x8xf32>
    %c2_45 = arith.constant 2 : index
    %c1_46 = arith.constant 1 : index
    %c0_47 = arith.constant 0 : index
    %c0_48 = arith.constant 0 : index
    %102 = vector.load %arg2[%c2_45, %c1_46, %c0_47, %c0_48] : memref<3x3x8x8xbf16, #tpu.memory_space<vmem>>, vector<1x1x8x8xbf16>
    %103 = vector.shape_cast %102 : vector<1x1x8x8xbf16> to vector<8x8xbf16>
    %104 = arith.truncf %83 : vector<32x8xf32> to vector<32x8xbf16>
    %cst_49 = arith.constant dense<0.000000e+00> : vector<32x8xf32>
    %105 = tpu.matmul %104, %103, %cst_49 {dimension_numbers = #tpu.dot_dimension_numbers<[1], [0], [0], [1], [0, 0, 1, 1], [], []>} : vector<32x8xbf16>, vector<8x8xbf16>, vector<32x8xf32> -> vector<32x8xf32>
    %106 = arith.addf %101, %105 : vector<32x8xf32>
    %c2_50 = arith.constant 2 : index
    %c2_51 = arith.constant 2 : index
    %c0_52 = arith.constant 0 : index
    %c0_53 = arith.constant 0 : index
    %107 = vector.load %arg2[%c2_50, %c2_51, %c0_52, %c0_53] : memref<3x3x8x8xbf16, #tpu.memory_space<vmem>>, vector<1x1x8x8xbf16>
    %108 = vector.shape_cast %107 : vector<1x1x8x8xbf16> to vector<8x8xbf16>
    %109 = arith.truncf %97 : vector<32x8xf32> to vector<32x8xbf16>
    %cst_54 = arith.constant dense<0.000000e+00> : vector<32x8xf32>
    %110 = tpu.matmul %109, %108, %cst_54 {dimension_numbers = #tpu.dot_dimension_numbers<[1], [0], [0], [1], [0, 0, 1, 1], [], []>} : vector<32x8xbf16>, vector<8x8xbf16>, vector<32x8xf32> -> vector<32x8xf32>
    %111 = arith.addf %106, %110 : vector<32x8xf32>
    %c2_55 = arith.constant 2 : index
    %c0_56 = arith.constant 0 : index
    %112 = vector.load %arg3[%c2_55, %c0_56] : memref<3x8xf32, #tpu.memory_space<vmem>>, vector<1x8xf32>
    %113 = vector.broadcast %112 : vector<1x8xf32> to vector<32x8xf32>
    %114 = arith.addf %111, %113 : vector<32x8xf32>
    %cst_57 = arith.constant 0.000000e+00 : f32
    %115 = vector.broadcast %cst_57 : f32 to vector<32x8xf32>
    %116 = arith.maximumf %114, %115 : vector<32x8xf32>
    %117 = arith.truncf %116 : vector<32x8xf32> to vector<32x8xbf16>
    %c0_58 = arith.constant 0 : index
    %c0_59 = arith.constant 0 : index
    %c16 = arith.constant 16 : index
    %118 = vector.load %arg4[%c0_58, %c0_59, %c16] : memref<1x32x32xbf16, #tpu.memory_space<vmem>>, vector<1x32x8xbf16>
    %119 = vector.shape_cast %118 : vector<1x32x8xbf16> to vector<32x8xbf16>
    %120 = vector.shape_cast %117 : vector<32x8xbf16> to vector<1x32x8xbf16>
    tpu.vector_store %arg4[%c0_58, %c0_59, %c16], %120 {strides = array<i32>} : memref<1x32x32xbf16, #tpu.memory_space<vmem>>, vector<1x32x8xbf16>,
    %121 = vector.extract_strided_slice %1 {offsets = [0, 0], sizes = [32, 8], strides = [1, 1]} : vector<32x32xbf16> to vector<32x8xbf16>
    %c0_60 = arith.constant 0 : index
    %c0_61 = arith.constant 0 : index
    %c24 = arith.constant 24 : index
    %122 = vector.load %arg4[%c0_60, %c0_61, %c24] : memref<1x32x32xbf16, #tpu.memory_space<vmem>>, vector<1x32x8xbf16>
    %123 = vector.shape_cast %122 : vector<1x32x8xbf16> to vector<32x8xbf16>
    %124 = vector.shape_cast %121 : vector<32x8xbf16> to vector<1x32x8xbf16>
    tpu.vector_store %arg4[%c0_60, %c0_61, %c24], %124 {strides = array<i32>} : memref<1x32x32xbf16, #tpu.memory_space<vmem>>, vector<1x32x8xbf16>,
    return
  }
  func.func @transform_0(%arg0: i32) -> (i32, i32, i32) {
    %c0_i32 = arith.constant 0 : i32
    %c0_i32_0 = arith.constant 0 : i32
    %c0_i32_1 = arith.constant 0 : i32
    return %arg0, %c0_i32, %c0_i32_0 : i32, i32, i32
  }
  func.func @transform_1(%arg0: i32) -> (i32, i32, i32, i32) {
    %c0_i32 = arith.constant 0 : i32
    %c0_i32_0 = arith.constant 0 : i32
    %c0_i32_1 = arith.constant 0 : i32
    %c0_i32_2 = arith.constant 0 : i32
    %c0_i32_3 = arith.constant 0 : i32
    return %c0_i32, %c0_i32_0, %c0_i32_1, %c0_i32_2 : i32, i32, i32, i32
  }
  func.func @transform_2(%arg0: i32) -> (i32, i32) {
    %c0_i32 = arith.constant 0 : i32
    %c0_i32_0 = arith.constant 0 : i32
    %c0_i32_1 = arith.constant 0 : i32
    return %c0_i32, %c0_i32_0 : i32, i32
  }
  func.func @transform_3(%arg0: i32) -> (i32, i32, i32) {
    %c0_i32 = arith.constant 0 : i32
    %c0_i32_0 = arith.constant 0 : i32
    %c0_i32_1 = arith.constant 0 : i32
    return %arg0, %c0_i32, %c0_i32_0 : i32, i32, i32
  }
}

module attributes {stable_mosaic.version = 11 : i64} {
  func.func @_concat3_matmul_kernel(%arg0: i32, %arg1: i32, %arg2: memref<64x32xbf16, #tpu.memory_space<vmem>>, %arg3: memref<64x32xbf16, #tpu.memory_space<vmem>>, %arg4: memref<64x32xbf16, #tpu.memory_space<vmem>>, %arg5: memref<96x96xbf16, #tpu.memory_space<vmem>>, %arg6: memref<1x96xf32, #tpu.memory_space<vmem>>, %arg7: memref<64x96xbf16, #tpu.memory_space<vmem>>) attributes {dimension_semantics = [#tpu.dimension_semantics<parallel>, #tpu.dimension_semantics<parallel>], iteration_bounds = array<i64: 1, 1>, scalar_prefetch = 0 : i64, scratch_operands = 0 : i64, tpu.core_type = #tpu.core_type<tc>, window_params = [{transform_indices = @transform_0, window_bounds = array<i64: 64, 32>}, {transform_indices = @transform_1, window_bounds = array<i64: 64, 32>}, {transform_indices = @transform_2, window_bounds = array<i64: 64, 32>}, {transform_indices = @transform_3, window_bounds = array<i64: 96, 96>}, {transform_indices = @transform_4, window_bounds = array<i64: 1, 96>}, {transform_indices = @transform_5, window_bounds = array<i64: 64, 96>}]} {
    %c0 = arith.constant 0 : index
    %c0_0 = arith.constant 0 : index
    %0 = vector.load %arg2[%c0, %c0_0] : memref<64x32xbf16, #tpu.memory_space<vmem>>, vector<64x32xbf16>
    %c0_1 = arith.constant 0 : index
    %c0_2 = arith.constant 0 : index
    %1 = vector.load %arg5[%c0_1, %c0_2] : memref<96x96xbf16, #tpu.memory_space<vmem>>, vector<32x96xbf16>
    %cst = arith.constant dense<0.000000e+00> : vector<64x96xf32>
    %2 = tpu.matmul %0, %1, %cst {dimension_numbers = #tpu.dot_dimension_numbers<[1], [0], [0], [1], [0, 0, 1, 1], [], []>} : vector<64x32xbf16>, vector<32x96xbf16>, vector<64x96xf32> -> vector<64x96xf32>
    %c0_3 = arith.constant 0 : index
    %c0_4 = arith.constant 0 : index
    %3 = vector.load %arg3[%c0_3, %c0_4] : memref<64x32xbf16, #tpu.memory_space<vmem>>, vector<64x32xbf16>
    %c32 = arith.constant 32 : index
    %c0_5 = arith.constant 0 : index
    %4 = vector.load %arg5[%c32, %c0_5] : memref<96x96xbf16, #tpu.memory_space<vmem>>, vector<32x96xbf16>
    %cst_6 = arith.constant dense<0.000000e+00> : vector<64x96xf32>
    %5 = tpu.matmul %3, %4, %cst_6 {dimension_numbers = #tpu.dot_dimension_numbers<[1], [0], [0], [1], [0, 0, 1, 1], [], []>} : vector<64x32xbf16>, vector<32x96xbf16>, vector<64x96xf32> -> vector<64x96xf32>
    %6 = arith.addf %2, %5 : vector<64x96xf32>
    %c0_7 = arith.constant 0 : index
    %c0_8 = arith.constant 0 : index
    %7 = vector.load %arg4[%c0_7, %c0_8] : memref<64x32xbf16, #tpu.memory_space<vmem>>, vector<64x32xbf16>
    %c64 = arith.constant 64 : index
    %c0_9 = arith.constant 0 : index
    %8 = vector.load %arg5[%c64, %c0_9] : memref<96x96xbf16, #tpu.memory_space<vmem>>, vector<32x96xbf16>
    %cst_10 = arith.constant dense<0.000000e+00> : vector<64x96xf32>
    %9 = tpu.matmul %7, %8, %cst_10 {dimension_numbers = #tpu.dot_dimension_numbers<[1], [0], [0], [1], [0, 0, 1, 1], [], []>} : vector<64x32xbf16>, vector<32x96xbf16>, vector<64x96xf32> -> vector<64x96xf32>
    %10 = arith.addf %6, %9 : vector<64x96xf32>
    %c0_11 = arith.constant 0 : index
    %c0_12 = arith.constant 0 : index
    %11 = vector.load %arg6[%c0_11, %c0_12] : memref<1x96xf32, #tpu.memory_space<vmem>>, vector<1x96xf32>
    %12 = vector.broadcast %11 : vector<1x96xf32> to vector<64x96xf32>
    %13 = arith.addf %10, %12 : vector<64x96xf32>
    %cst_13 = arith.constant 0.000000e+00 : f32
    %14 = vector.broadcast %cst_13 : f32 to vector<64x96xf32>
    %15 = arith.maximumf %13, %14 : vector<64x96xf32>
    %16 = arith.truncf %15 : vector<64x96xf32> to vector<64x96xbf16>
    %c0_14 = arith.constant 0 : index
    %c0_15 = arith.constant 0 : index
    %17 = vector.load %arg7[%c0_14, %c0_15] : memref<64x96xbf16, #tpu.memory_space<vmem>>, vector<64x96xbf16>
    tpu.vector_store %arg7[%c0_14, %c0_15], %16 {strides = array<i32>} : memref<64x96xbf16, #tpu.memory_space<vmem>>, vector<64x96xbf16>,
    return
  }
  func.func @transform_0(%arg0: i32, %arg1: i32) -> (i32, i32) {
    %c0_i32 = arith.constant 0 : i32
    %c0_i32_0 = arith.constant 0 : i32
    return %arg0, %c0_i32 : i32, i32
  }
  func.func @transform_1(%arg0: i32, %arg1: i32) -> (i32, i32) {
    %c0_i32 = arith.constant 0 : i32
    %c0_i32_0 = arith.constant 0 : i32
    return %arg0, %c0_i32 : i32, i32
  }
  func.func @transform_2(%arg0: i32, %arg1: i32) -> (i32, i32) {
    %c0_i32 = arith.constant 0 : i32
    %c0_i32_0 = arith.constant 0 : i32
    return %arg0, %c0_i32 : i32, i32
  }
  func.func @transform_3(%arg0: i32, %arg1: i32) -> (i32, i32) {
    %c0_i32 = arith.constant 0 : i32
    %c0_i32_0 = arith.constant 0 : i32
    return %c0_i32, %arg1 : i32, i32
  }
  func.func @transform_4(%arg0: i32, %arg1: i32) -> (i32, i32) {
    %c0_i32 = arith.constant 0 : i32
    %c0_i32_0 = arith.constant 0 : i32
    return %c0_i32, %arg1 : i32, i32
  }
  func.func @transform_5(%arg0: i32, %arg1: i32) -> (i32, i32) {
    %c0_i32 = arith.constant 0 : i32
    return %arg0, %arg1 : i32, i32
  }
}

module attributes {stable_mosaic.version = 11 : i64} {
  func.func @_asp_kernel(%arg0: i32, %arg1: memref<1x32x96xbf16, #tpu.memory_space<vmem>>, %arg2: memref<96x16xbf16, #tpu.memory_space<vmem>>, %arg3: memref<1x16xf32, #tpu.memory_space<vmem>>, %arg4: memref<1x16xf32, #tpu.memory_space<vmem>>, %arg5: memref<1x2x96xf32, #tpu.memory_space<vmem>>) attributes {dimension_semantics = [#tpu.dimension_semantics<parallel>], iteration_bounds = array<i64: 2>, scalar_prefetch = 0 : i64, scratch_operands = 0 : i64, tpu.core_type = #tpu.core_type<tc>, window_params = [{transform_indices = @transform_0, window_bounds = array<i64: 1, 32, 96>}, {pipeline_mode = #tpu.pipeline_mode<synchronous>, transform_indices = @transform_1, window_bounds = array<i64: 96, 16>}, {pipeline_mode = #tpu.pipeline_mode<synchronous>, transform_indices = @transform_2, window_bounds = array<i64: 1, 16>}, {pipeline_mode = #tpu.pipeline_mode<synchronous>, transform_indices = @transform_3, window_bounds = array<i64: 1, 16>}, {transform_indices = @transform_4, window_bounds = array<i64: 1, 2, 96>}]} {
    %c0 = arith.constant 0 : index
    %c0_0 = arith.constant 0 : index
    %c0_1 = arith.constant 0 : index
    %0 = vector.load %arg1[%c0, %c0_0, %c0_1] : memref<1x32x96xbf16, #tpu.memory_space<vmem>>, vector<1x32x96xbf16>
    %1 = vector.shape_cast %0 : vector<1x32x96xbf16> to vector<32x96xbf16>
    %2 = arith.extf %1 : vector<32x96xbf16> to vector<32x96xf32>
    %c0_2 = arith.constant 0 : index
    %c0_3 = arith.constant 0 : index
    %c0_4 = arith.constant 0 : index
    %3 = vector.load %arg1[%c0_2, %c0_3, %c0_4] : memref<1x32x96xbf16, #tpu.memory_space<vmem>>, vector<1x32x96xbf16>
    %4 = vector.shape_cast %3 : vector<1x32x96xbf16> to vector<32x96xbf16>
    %c0_5 = arith.constant 0 : index
    %c0_6 = arith.constant 0 : index
    %5 = vector.load %arg2[%c0_5, %c0_6] : memref<96x16xbf16, #tpu.memory_space<vmem>>, vector<96x16xbf16>
    %cst = arith.constant dense<0.000000e+00> : vector<32x16xf32>
    %6 = tpu.matmul %4, %5, %cst {dimension_numbers = #tpu.dot_dimension_numbers<[1], [0], [0], [1], [0, 0, 1, 1], [], []>} : vector<32x96xbf16>, vector<96x16xbf16>, vector<32x16xf32> -> vector<32x16xf32>
    %c0_7 = arith.constant 0 : index
    %c0_8 = arith.constant 0 : index
    %7 = vector.load %arg3[%c0_7, %c0_8] : memref<1x16xf32, #tpu.memory_space<vmem>>, vector<1x16xf32>
    %8 = vector.broadcast %7 : vector<1x16xf32> to vector<32x16xf32>
    %9 = arith.addf %6, %8 : vector<32x16xf32>
    %c0_9 = arith.constant 0 : index
    %c0_10 = arith.constant 0 : index
    %10 = vector.load %arg4[%c0_9, %c0_10] : memref<1x16xf32, #tpu.memory_space<vmem>>, vector<1x16xf32>
    %11 = vector.broadcast %10 : vector<1x16xf32> to vector<32x16xf32>
    %12 = arith.mulf %9, %11 : vector<32x16xf32>
    %cst_11 = arith.constant dense<0.000000e+00> : vector<32xf32>
    %13 = vector.multi_reduction <add>, %12, %cst_11 [1] : vector<32x16xf32> to vector<32xf32>
    %14 = vector.shape_cast %13 : vector<32xf32> to vector<32x1xf32>
    %15 = math.tanh %14 : vector<32x1xf32>
    %cst_12 = arith.constant dense<0xFF800000> : vector<1xf32>
    %16 = vector.multi_reduction <maximumf>, %15, %cst_12 [0] : vector<32x1xf32> to vector<1xf32>
    %17 = vector.shape_cast %16 : vector<1xf32> to vector<1x1xf32>
    %18 = vector.broadcast %17 : vector<1x1xf32> to vector<32x1xf32>
    %19 = arith.subf %15, %18 : vector<32x1xf32>
    %20 = math.exp %19 : vector<32x1xf32>
    %cst_13 = arith.constant dense<0.000000e+00> : vector<1xf32>
    %21 = vector.multi_reduction <add>, %20, %cst_13 [0] : vector<32x1xf32> to vector<1xf32>
    %22 = vector.shape_cast %21 : vector<1xf32> to vector<1x1xf32>
    %23 = tpu.reciprocal %22 {approx = true} : vector<1x1xf32> -> vector<1x1xf32>
    %24 = vector.broadcast %23 : vector<1x1xf32> to vector<32x1xf32>
    %25 = arith.mulf %20, %24 : vector<32x1xf32>
    %26 = vector.broadcast %25 : vector<32x1xf32> to vector<32x96xf32>
    %27 = arith.mulf %2, %26 : vector<32x96xf32>
    %cst_14 = arith.constant dense<0.000000e+00> : vector<96xf32>
    %28 = vector.multi_reduction <add>, %27, %cst_14 [0] : vector<32x96xf32> to vector<96xf32>
    %29 = vector.shape_cast %28 : vector<96xf32> to vector<1x96xf32>
    %cst_15 = arith.constant 3.125000e-02 : f32
    %30 = vector.broadcast %cst_15 : f32 to vector<1x96xf32>
    %31 = arith.mulf %29, %30 : vector<1x96xf32>
    %32 = arith.mulf %2, %27 : vector<32x96xf32>
    %cst_16 = arith.constant dense<0.000000e+00> : vector<96xf32>
    %33 = vector.multi_reduction <add>, %32, %cst_16 [0] : vector<32x96xf32> to vector<96xf32>
    %34 = vector.shape_cast %33 : vector<96xf32> to vector<1x96xf32>
    %35 = arith.mulf %31, %31 : vector<1x96xf32>
    %36 = arith.subf %34, %35 : vector<1x96xf32>
    %37 = tpu.concatenate %31, %36 in 0 : vector<1x96xf32>, vector<1x96xf32> -> vector<2x96xf32>
    %38 = vector.shape_cast %37 : vector<2x96xf32> to vector<1x2x96xf32>
    %c0_17 = arith.constant 0 : index
    %c0_18 = arith.constant 0 : index
    %c0_19 = arith.constant 0 : index
    %39 = vector.load %arg5[%c0_17, %c0_18, %c0_19] : memref<1x2x96xf32, #tpu.memory_space<vmem>>, vector<1x2x96xf32>
    tpu.vector_store %arg5[%c0_17, %c0_18, %c0_19], %38 {strides = array<i32>} : memref<1x2x96xf32, #tpu.memory_space<vmem>>, vector<1x2x96xf32>,
    return
  }
  func.func @transform_0(%arg0: i32) -> (i32, i32, i32) {
    %c0_i32 = arith.constant 0 : i32
    %c0_i32_0 = arith.constant 0 : i32
    %c0_i32_1 = arith.constant 0 : i32
    return %arg0, %c0_i32, %c0_i32_0 : i32, i32, i32
  }
  func.func @transform_1(%arg0: i32) -> (i32, i32) {
    %c0_i32 = arith.constant 0 : i32
    %c0_i32_0 = arith.constant 0 : i32
    %c0_i32_1 = arith.constant 0 : i32
    return %c0_i32, %c0_i32_0 : i32, i32
  }
  func.func @transform_2(%arg0: i32) -> (i32, i32) {
    %c0_i32 = arith.constant 0 : i32
    %c0_i32_0 = arith.constant 0 : i32
    %c0_i32_1 = arith.constant 0 : i32
    return %c0_i32, %c0_i32_0 : i32, i32
  }
  func.func @transform_3(%arg0: i32) -> (i32, i32) {
    %c0_i32 = arith.constant 0 : i32
    %c0_i32_0 = arith.constant 0 : i32
    %c0_i32_1 = arith.constant 0 : i32
    return %c0_i32, %c0_i32_0 : i32, i32
  }
  func.func @transform_4(%arg0: i32) -> (i32, i32, i32) {
    %c0_i32 = arith.constant 0 : i32
    %c0_i32_0 = arith.constant 0 : i32
    %c0_i32_1 = arith.constant 0 : i32
    return %arg0, %c0_i32, %c0_i32_0 : i32, i32, i32
  }
}

module attributes {stable_mosaic.version = 11 : i64} {
  func.func @_matmul_kernel(%arg0: i32, %arg1: i32, %arg2: memref<2x192xf32, #tpu.memory_space<vmem>>, %arg3: memref<192x8xbf16, #tpu.memory_space<vmem>>, %arg4: memref<1x8xf32, #tpu.memory_space<vmem>>, %arg5: memref<2x8xf32, #tpu.memory_space<vmem>>) attributes {dimension_semantics = [#tpu.dimension_semantics<parallel>, #tpu.dimension_semantics<parallel>], iteration_bounds = array<i64: 1, 1>, scalar_prefetch = 0 : i64, scratch_operands = 0 : i64, tpu.core_type = #tpu.core_type<tc>, window_params = [{transform_indices = @transform_0, window_bounds = array<i64: 2, 192>}, {transform_indices = @transform_1, window_bounds = array<i64: 192, 8>}, {transform_indices = @transform_2, window_bounds = array<i64: 1, 8>}, {transform_indices = @transform_3, window_bounds = array<i64: 2, 8>}]} {
    %c0 = arith.constant 0 : index
    %c0_0 = arith.constant 0 : index
    %0 = vector.load %arg2[%c0, %c0_0] : memref<2x192xf32, #tpu.memory_space<vmem>>, vector<2x192xf32>
    %c0_1 = arith.constant 0 : index
    %c0_2 = arith.constant 0 : index
    %1 = vector.load %arg3[%c0_1, %c0_2] : memref<192x8xbf16, #tpu.memory_space<vmem>>, vector<192x8xbf16>
    %2 = arith.truncf %0 : vector<2x192xf32> to vector<2x192xbf16>
    %cst = arith.constant dense<0.000000e+00> : vector<2x8xf32>
    %3 = tpu.matmul %2, %1, %cst {dimension_numbers = #tpu.dot_dimension_numbers<[1], [0], [0], [1], [0, 0, 1, 1], [], []>} : vector<2x192xbf16>, vector<192x8xbf16>, vector<2x8xf32> -> vector<2x8xf32>
    %c0_3 = arith.constant 0 : index
    %c0_4 = arith.constant 0 : index
    %4 = vector.load %arg4[%c0_3, %c0_4] : memref<1x8xf32, #tpu.memory_space<vmem>>, vector<1x8xf32>
    %5 = vector.broadcast %4 : vector<1x8xf32> to vector<2x8xf32>
    %6 = arith.addf %3, %5 : vector<2x8xf32>
    %c0_5 = arith.constant 0 : index
    %c0_6 = arith.constant 0 : index
    %7 = vector.load %arg5[%c0_5, %c0_6] : memref<2x8xf32, #tpu.memory_space<vmem>>, vector<2x8xf32>
    tpu.vector_store %arg5[%c0_5, %c0_6], %6 {strides = array<i32>} : memref<2x8xf32, #tpu.memory_space<vmem>>, vector<2x8xf32>,
    return
  }
  func.func @transform_0(%arg0: i32, %arg1: i32) -> (i32, i32) {
    %c0_i32 = arith.constant 0 : i32
    %c0_i32_0 = arith.constant 0 : i32
    return %arg0, %c0_i32 : i32, i32
  }
  func.func @transform_1(%arg0: i32, %arg1: i32) -> (i32, i32) {
    %c0_i32 = arith.constant 0 : i32
    %c0_i32_0 = arith.constant 0 : i32
    return %c0_i32, %arg1 : i32, i32
  }
  func.func @transform_2(%arg0: i32, %arg1: i32) -> (i32, i32) {
    %c0_i32 = arith.constant 0 : i32
    %c0_i32_0 = arith.constant 0 : i32
    return %c0_i32, %arg1 : i32, i32
  }
  func.func @transform_3(%arg0: i32, %arg1: i32) -> (i32, i32) {
    %c0_i32 = arith.constant 0 : i32
    return %arg0, %arg1 : i32, i32
  }
}

</mosaic_0001>

<bundles_post_ra>
// kernel: ecapa_forward.13
= control target key start
LH: loop header
LB: loop body
LE: loop exit
PB: predicated region body
PF: predicated region fallthrough
CT: control target
= control target key end

     0   :  { %8 = vsyncpa [#allocation3], 0  ;;  %s1391_s0 = inlined_call_operand.hbm [shape: bf16[2,36,16], index: 0, kind: input, shape index: {}]   ;;  %s1392_s1 = inlined_call_operand.hbm [shape: bf16[5,16,32], index: 1, kind: input, shape index: {}]   ;;  %s1393_s2 = inlined_call_operand.hbm [shape: f32[1,32], index: 2, kind: input, shape index: {}]   ;;  %s1394_s3 = inlined_call_operand.hbm [shape: bf16[2,32,32], index: 3, kind: output, shape index: {}]  }
   0x1   :  { %10 = vsyncpa [#allocation3 + $0x1], 0 }
   0x2   :  { %11 = vsyncpa [#allocation6], 0 }
   0x3   :  { %12 = vsyncpa [#allocation4], 0 }
   0x4   :  { %14 = vsyncpa [#allocation4 + $0x1], 0  ;;  %s1126_s12 = smov 0   ;;  %s1128_s13 = smov 0  }
   0x5   :  { %s1130_s14 = smov 0   ;;  %s1132_s15 = smov 0  }
   0x6 LB: > { %s1147_s16 = sadd.s32 4294967295, %s1096_s15   ;;  %s754_s17 = sadd.s32 4294967294, %s1096_s15   ;;  %s1096_s15 = sphi %s1132_s15, %s1414_s15   ;;  %s1092_s14 = sphi %s1130_s14, %s1413_s14   ;;  %s1088_s13 = sphi %s1128_s13, %s1412_s13   ;;  %s1084_s12 = sphi %s1126_s12, %s1411_s12  }
   0x7   : > { %p40_p0 = scmp.ne.s32.totalorder %s1088_s13, %s1084_s12  ;;  %p1395_p1 = scmp.eq.s32.totalorder %s1147_s16, 0 }
   0x8   : > { %p112_p3 = scmp.eq.s32.totalorder %s754_s17, 1  ;;  %p755_p5 = scmp.ge.s32.totalorder %s1096_s15, 1 }
   0x9   : > { %p1156_p4 = por %p1395_p1, %p40_p0  ;;  %p119_p7 = scmp.lt.s32.totalorder %s1096_s15, 3 }
   0xa   : > { %p1161_p6 = por %p112_p3, %p40_p0  ;;  %s1098_s21 = smov [#allocation5]  }
   0xb   : > { %s1398_s18 = scalar_select %p1156_p4, 1, 0 }
   0xc   : > { %s1399_s19 = scalar_select %p1161_p6, 1, 0 }
   0xd   : > { %p1166_p8 = pnand %p755_p5, %p119_p7  ;;  %s131_s22 = sshll.u32 %s1098_s21, 4  ;;  %s1170_s22 = int_to_ptr.vmem [resolvable:$true] %s131_s22 }
   0xe   : > { %s1099_s24 = smov [#allocation7]   ;;  %s940_s28 = scalar_lea.hbm %s1392_s1, 640 }
   0xf   : > { %p873_p9 = pneg %p1166_p8  ;;  %s145_s25 = sshll.u32 %s1099_s24, 4  ;;  %s1181_s25 = int_to_ptr.vmem [resolvable:$true] %s145_s25 }
  0x10   : > { %p941_p12 = scmp.ne.s32.totalorder %s1392_s1, %s940_s28  ;;  %p947_p5 = scmp.lt.u32.totalorder %s940_s28, %s1392_s1 }
  0x11   : > { %p1177_p11 = pnand %p873_p9, %p1395_p1 }
  0x13   : > { %p942_p13 = pneg %p1177_p11 }
  0x15   : > { %p943_p0 = pnand %p942_p13, %p941_p12 }
  0x17   : > { %p944_p3 = pneg %p943_p0 }
  0x19   : > { %p949_p7 = pnand %p947_p5, %p944_p3 }
  0x1b   : > { %952 = shalt.err (!%p949_p7)
}
  0x1c   : > { %s953_s6 = scalar_lea.vmem %s1170_s22, 640  ;;  %p961_p2 = scmp.lt.s32.totalorder %s1170_s22, %s1170_s22 }
  0x1d   : > { %p954_p9 = scmp.ne.s32.totalorder %s1170_s22, %s953_s6  ;;  %p962_p12 = scmp.lt.s32.totalorder %s953_s6, %s953_s6 }
  0x1f   : > { %p956_p10 = pnand %p954_p9, %p942_p13  ;;  %p963_p0 = por %p962_p12, %p961_p2 }
  0x21   : > { %p957_p1 = pneg %p956_p10 }
  0x23   : > { %p964_p6 = pnand %p963_p0, %p957_p1 }
  0x25   : > { %967 = shalt.err (!%p964_p6)
}
  0x26   : > { %s1100_s7 = smov 64   ;;  %s1101_s8 = smov 4  }
  0x27   : > { %876 = dma.hbm_to_vmem [thread:$0]  (!%p1177_p11), %s1392_s1, 640, %s1170_s22, [#allocation6], %s1100_s7, %s1100_s7, %s1101_s8  }
  0x28   : > { %s968_s21 = scalar_lea.hbm %s1393_s2, 16 }
  0x29   : > { %p969_p1 = scmp.ne.s32.totalorder %s1393_s2, %s968_s21  ;;  %p975_p10 = scmp.lt.u32.totalorder %s968_s21, %s1393_s2 }
  0x2b   : > { %p971_p2 = pnand %p969_p1, %p942_p13 }
  0x2d   : > { %p972_p6 = pneg %p971_p2 }
  0x2f   : > { %p977_p3 = pnand %p975_p10, %p972_p6 }
  0x31   : > { %980 = shalt.err (!%p977_p3)
}
  0x32   : > { %s981_s22 = scalar_lea.vmem %s1181_s25, 16  ;;  %s988_s29 = scalar_lea.vmem %s1181_s25, 32 }
  0x33   : > { %p982_p5 = scmp.ne.s32.totalorder %s1181_s25, %s981_s22  ;;  %p989_p12 = scmp.lt.s32.totalorder %s1181_s25, %s1181_s25 }
  0x34   : > { %p990_p0 = scmp.lt.s32.totalorder %s988_s29, %s981_s22 }
  0x35   : > { %p984_p7 = pnand %p982_p5, %p942_p13 }
  0x36   : > { %p991_p1 = por %p990_p0, %p989_p12 }
  0x37   : > { %p985_p9 = pneg %p984_p7 }
  0x39   : > { %p992_p2 = pnand %p991_p1, %p985_p9 }
  0x3b   : > { %995 = shalt.err (!%p992_p2)
}
  0x3c   : > { %879 = dma.hbm_to_vmem [thread:$0]  (!%p1177_p11), %s1393_s2, 16, %s1181_s25, [#allocation6]  }
  0x3d   : > { %s1240_s5 = sadd.s32 1, %s1096_s15   ;;  %s27_s23 = sadd.s32 1, %s1092_s14 }
  0x3e   : > { %s24_s6 = ssub.s32 %s1096_s15, %s1240_s5  ;;  %p34_p13 = scmp.ne.s32.totalorder %s1092_s14, %s1088_s13 }
  0x3f   : > { %p25_p6 = scmp.eq.s32.totalorder %s24_s6, 0  ;;  %p35_p10 = scmp.eq.s32.totalorder %s1096_s15, 0 }
  0x40   : > { %p1402_p3 = scmp.eq.s32.totalorder %s1147_s16, 1  ;;  %p890_p7 = scmp.lt.s32.totalorder %s1096_s15, 2 }
  0x41   : > { %s1256_s10 = scalar_select %p25_p6, %s1092_s14, %s27_s23  }
  0x42   : > { %p1250_p5 = por %p1402_p3, %p34_p13  ;;  %p36_p9 = por %p35_p10, %p34_p13 }
  0x43   : > { %s156_s11 = sand.u32 1, %s1092_s14   ;;  %s859_s25 = smul.u32 320, %s1096_s15 }
  0x44   : > { %s1403_s9 = scalar_select %p1250_p5, 1, 0 }
  0x45   : > { %s858_s17 = smul.u32 20, %s156_s11  ;;  %p1260_p11 = pnand %p890_p7, %p36_p9 }
  0x46   : > { %s1267_s27 = scalar_lea.hbm %s1391_s0, %s859_s25  ;;  %s1271_s29 = scalar_lea.sflag [#allocation3], %s156_s11 }
  0x47   : > { %s160_s28 = scalar_lea.vmem [#allocation2], %s858_s17  ;;  %s996_s30 = scalar_lea.hbm %s1267_s27, 320 }
  0x48   : > { %s167_s22 = sshll.u32 %s160_s28, 4  ;;  %p997_p12 = scmp.ne.s32.totalorder %s1267_s27, %s996_s30  ;;  %s1269_s22 = int_to_ptr.vmem [resolvable:$true] %s167_s22 }
  0x49   : > { %p998_p0 = pneg %p1260_p11  ;;  %s1001_s6 = scalar_lea.hbm %s1391_s0, 640 }
  0x4a   : > { %p1002_p13 = scmp.lt.u32.totalorder %s1267_s27, %s1391_s0  ;;  %p1003_p6 = scmp.lt.u32.totalorder %s1001_s6, %s996_s30 }
  0x4b   : > { %p999_p1 = pnand %p998_p0, %p997_p12  ;;  %p1005_p3 = scmp.lt.u32.totalorder %s996_s30, %s1267_s27 }
  0x4c   : > { %p1004_p10 = por %p1003_p6, %p1002_p13 }
  0x4d   : > { %p1000_p2 = pneg %p999_p1 }
  0x4e   : > { %p1006_p7 = por %p1005_p3, %p1004_p10 }
  0x50   : > { %p1007_p9 = pnand %p1006_p7, %p1000_p2 }
  0x52   : > { %1010 = shalt.err (!%p1007_p9)
}
  0x53   : > { %s1011_s11 = scalar_lea.vmem %s1269_s22, 320  ;;  %s1102_s17 = smov [#allocation2]  }
  0x54   : > { %p1012_p12 = scmp.ne.s32.totalorder %s1269_s22, %s1011_s11  ;;  %s1016_s26 = sshll.u32 %s1102_s17, 4  ;;  %s1017_s26 = int_to_ptr.vmem [resolvable:$false] %s1016_s26 }
  0x55   : > { %s1018_s28 = scalar_lea.vmem %s1017_s26, 640  ;;  %p1019_p4 = scmp.lt.s32.totalorder %s1269_s22, %s1017_s26 }
  0x56   : > { %p1014_p1 = pnand %p1012_p12, %p998_p0  ;;  %p1020_p13 = scmp.lt.s32.totalorder %s1018_s28, %s1011_s11 }
  0x58   : > { %p1015_p5 = pneg %p1014_p1  ;;  %p1021_p6 = por %p1020_p13, %p1019_p4 }
  0x5a   : > { %p1022_p10 = pnand %p1021_p6, %p1015_p5 }
  0x5c   : > { %1025 = shalt.err (!%p1022_p10)
}
  0x5d   : > { %883 = dma.hbm_to_vmem [thread:$0]  (!%p1260_p11), %s1267_s27, 320, %s1269_s22, %s1271_s29, %s1100_s7, %s1100_s7, %s1101_s8  }
  0x5e   : > { %179 = sbr.rel (%p1166_p8) target bundleno = 373 (0x175), region = 32  ;;  %s1305_s30 = sand.u32 (!%p1166_p8), 1, %s1088_s13  }
  0x5f   : > { %s860_s4 = smul.u32 (!%p1166_p8), 20, %s1305_s30  ;;  %s182_s23 = scalar_lea.sflag (!%p1166_p8), [#allocation3], %s1305_s30 }
  0x60   : > { %p1405_p4 = scmp.ne.s32.totalorder (!%p1166_p8), %s1398_s18, 0 }
  0x61   : > { %s185_s6 = scalar_lea.vmem (!%p1166_p8), [#allocation2], %s860_s4 }
  0x65   : > { %1071 = dma.done.wait (%p1405_p4), %s182_s23, 320  }
  0x66   : > { %1073 = vsyncadd (%p1405_p4), %s182_s23, 4294966976  ;;  %p1406_p5 = scmp.eq.s32.totalorder %s1147_s16, 0 }
  0x68   : > { %1075 = dma.done.wait (%p1406_p5), [#allocation6], 656   ;;  %p1407_p11 = pmov %p1406_p5 }
  0x69   : > { %v932_v0 = vld [vmem:[#allocation5 + $0x10] sm:$0xff]   ;;  %vm267_vm0 = vcmask 130048   ;;  %vm240_vm1 = vsmask.f32 7424  ;;  %vm385_vm2 = vcmask 1046528   ;;  %v935_v3 = vld [vmem:[#allocation5 + $0x8] sm:$0xff]  }
  0x6a   : > { %1077 = vsyncadd (%p1407_p11), [#allocation6], 4294966640  ;;  %824 = vmatprep.subr.bf16.mxu0 %v932_v0  ;;  %v933_v1 = vld [vmem:[%s185_s6] sm:$0xff]   ;;  %v1317_v2 = vld [vmem:[%s185_s6 + $0x8] sm:$0xff]   ;;  %812 = vmatprep.subr.bf16.mxu1 %v935_v3  ;;  %vm459_vm3 = vsmask.f32 6400 }
  0x6b   : > { %825 = vmatpush3.bf16.msra.mxu0 %v932_v0  ;;  %v386_v4 = vrot.slane %v933_v1, 1  ;;  %v387_v5 = vrot.slane %v1317_v2, 1  ;;  %v936_v6 = vld [vmem:[%s185_s6 + $0x10] ss:$0 sps:$4 sm:$0x33]   ;;  %813 = vmatpush3.bf16.msra.mxu1 %v935_v3  ;;  %v242_v9 = vshrl.u32 %v933_v1, 16 }
  0x6c   : > { %v937_v7 = vld [vmem:[#allocation5 + $0x18] sm:$0xff]   ;;  %v244_v10 = vshll.u32 %v933_v1, 16  ;;  %v249_v11 = vshll.u32 %v1317_v2, 16  ;;  %v938_v12 = vld [vmem:[#allocation5] sm:$0xff]   ;;  %v389_v13 = vrot.slane %v936_v6, 1  ;;  %v253_v14 = vshrl.u32 %v1317_v2, 16 }
  0x6d   : > { %v388_v8 = vsel %vm385_vm2, %v386_v4, %v387_v5  ;;  %830 = vmatprep.subr.bf16.mxu0 %v937_v7  ;;  %v257_v15 = vshll.u32 %v936_v6, 16  ;;  %v467_v16 = vshrl.u32 %v936_v6, 16  ;;  %v460_v19 = vrot.slane %v242_v9, 1  ;;  %818 = vmatprep.subr.bf16.mxu1 %v938_v12  ;;  %v939_v24 = vld [vmem:[#allocation5 + $0x20] sm:$0xff]   ;;  %v782_v47 = vld [vmem:[#allocation7] ss:$0 sm:$0xff] }
  0x6e   : > { %826 = vmatprep.mubr.msk.bf16.mxu0 %vm267_vm0, %v388_v8  ;;  %v246_v17 = vrot.slane %v244_v10, 1  ;;  %v251_v18 = vrot.slane %v249_v11, 1  ;;  %v464_v20 = vrot.slane %v249_v11, 2  ;;  %v390_v21 = vsel %vm385_vm2, %v387_v5, %v389_v13  ;;  %s763_s18 = sshll.u32 %s1305_s30, 4  ;;  %s796_s8 = sshll.u32 %s1147_s16, 8 }
  0x6f   : > { %v259_v22 = vrot.slane %v257_v15, 1  ;;  %v461_v23 = vrot.slane %v244_v10, 2  ;;  %827 = vmatmul.mubr.msk.bf16.vlgmr.msra.gmra.mrb[0].mxu0 %vm267_vm0, %v390_v21  ;;  %v463_v27 = vrot.slane %v253_v14, 1  ;;  %v470_v28 = vrot.slane %v257_v15, 2  ;;  %s215_s20 = scalar_lea.vmem [#allocation8], %s763_s18  ;;  %s1347_s22 = scalar_lea.hbm %s1394_s3, %s796_s8 }
  0x70   : > { %v247_v25 = vor.u32 %v246_v17, %v242_v9  ;;  %v255_v26 = vor.u32 %v253_v14, %v251_v18  ;;  %831 = vmatpush3.bf16.msra.mxu0 %v937_v7  ;;  %v469_v30 = vrot.slane %v467_v16, 1  ;;  %v542_v36 = vrot.slane %v933_v1, 2  ;;  %s662_s7 = sshll.u32 %s215_s20, 4  ;;  %s649_s16 = scalar_lea.sflag [#allocation4], %s1305_s30  ;;  %s1342_s7 = int_to_ptr.vmem [resolvable:$true] %s662_s7 }
  0x71   : > { %v462_v29 = vor.u32 %v461_v23, %v460_v19  ;;  %v465_v33 = vor.u32 %v464_v20, %v463_v27  ;;  %836 = vmatprep.subr.bf16.mxu0 %v939_v24  ;;  %v543_v37 = vrot.slane %v1317_v2, 2  ;;  %vm541_vm4 = vcmask 1045504   ;;  %s1026_s29 = scalar_lea.vmem %s1342_s7, 256  ;;  %p1408_p0 = scmp.ne.s32.totalorder %s1403_s9, 0 }
  0x72   : > { %v252_v31 = vsel %vm240_vm1, %v247_v25, %v251_v18  ;;  %v260_v32 = vsel %vm240_vm1, %v255_v26, %v259_v22  ;;  %v471_v35 = vor.u32 %v470_v28, %v469_v30  ;;  %v545_v40 = vrot.slane %v936_v6, 2  ;;  %p1027_p8 = scmp.ne.s32.totalorder %s1342_s7, %s1026_s29  ;;  %s1103_s25 = smov [#allocation8]  }
  0x73   : > { %814 = vmatprep.mubr.msk.bf16.mxu1 %vm267_vm0, %v252_v31  ;;  %v466_v34 = vsel %vm459_vm3, %v462_v29, %v465_v33  ;;  %v544_v39 = vsel %vm541_vm4, %v542_v36, %v543_v37  ;;  %vm643_vm5 = vcmask 257024   ;;  %s1030_s24 = sshll.u32 %s1103_s25, 4  ;;  %s1031_s24 = int_to_ptr.vmem [resolvable:$false] %s1030_s24 }
  0x74   : > { %815 = vmatmul.mubr.msk.bf16.vlgmr.msra.gmra.mrb[0].mxu1 %vm267_vm0, %v260_v32  ;;  %832 = vmatprep.mubr.msk.bf16.mxu0 %vm267_vm0, %v466_v34  ;;  %v472_v38 = vsel %vm459_vm3, %v465_v33, %v471_v35  ;;  %v546_v41 = vsel %vm541_vm4, %v543_v37, %v545_v40  ;;  %p1028_p2 = pnand %p1027_p8, %p1408_p0  ;;  %s1032_s11 = scalar_lea.vmem %s1031_s24, 512 }
  0x75   : > { %819 = vmatpush3.bf16.msra.mxu1 %v938_v12  ;;  %820 = vmatprep.mubr.msk.bf16.mxu1 %vm267_vm0, %v933_v1  ;;  %p1033_p7 = scmp.lt.s32.totalorder %s1342_s7, %s1031_s24  ;;  %p1034_p9 = scmp.lt.s32.totalorder %s1032_s11, %s1026_s29 }
  0x76   : > { %p1029_p3 = pneg %p1028_p2 }
  0x77   : > { %p1035_p12 = por %p1034_p9, %p1033_p7 }
  0x79   : > { %p1036_p1 = pnand %p1035_p12, %p1029_p3 }
  0x7b   : > { %833 = vmatmul.mubr.msk.bf16.vlgmr.msra.gmra.mrb[0].mxu0 %vm267_vm0, %v472_v38 }
  0x7c   : > { %837 = vmatpush3.bf16.msra.mxu0 %v939_v24  ;;  %838 = vmatprep.mubr.msk.bf16.mxu0 %vm267_vm0, %v544_v39 }
  0x80   : > { %821 = vmatmul.mubr.msk.bf16.vlgmr.msra.gmra.mrb[0].mxu1 %vm267_vm0, %v1317_v2 }
  0x87   : > { %839 = vmatmul.mubr.msk.bf16.vlgmr.msra.gmra.mrb[0].mxu0 %vm267_vm0, %v546_v41 }
 0x153   : > { %v822_v42 = vpop.f32.mrb[0].mxu1 }
 0x154   : > { %v367_v43 = vpop.f32.mrb[1].mxu1 }
 0x155   : > { %v823_v44 = vpop.f32.mrb[2].mxu1 }
 0x156   : > { %v370_v45 = vpop.f32.mrb[3].mxu1 }
 0x15a   : > { %v840_v46 = vpop.f32.mrb[0].mxu0 }
 0x15b   : > { %v842_v48 = vadd.f32 %v840_v46, %v822_v42  ;;  %v593_v49 = vpop.f32.mrb[1].mxu0 }
 0x15c   : > { %v843_v50 = vadd.f32 %v593_v49, %v367_v43  ;;  %v841_v51 = vpop.f32.mrb[2].mxu0 }
 0x15d   : > { %v621_v52 = vadd.f32 %v842_v48, %v782_v47  ;;  %v844_v53 = vadd.f32 %v841_v51, %v823_v44  ;;  %v596_v54 = vpop.f32.mrb[3].mxu0 }
 0x15e   : > { %v619_v55 = vadd.f32 %v843_v50, %v782_v47  ;;  %v845_v56 = vadd.f32 %v596_v54, %v370_v45 }
 0x15f   : > { %v625_v57 = vmax.f32 %v621_v52, 0.0  ;;  %v622_v58 = vadd.f32 %v844_v53, %v782_v47 }
 0x160   : > { %v623_v59 = vmax.f32 %v619_v55, 0.0  ;;  %v620_v60 = vadd.f32 %v845_v56, %v782_v47 }
 0x161   : > { %v794_v61 = vpack.c.bf16 %v625_v57, %v625_v57  ;;  %v626_v62 = vmax.f32 %v622_v58, 0.0 }
 0x162   : > { %v792_v63 = vpack.c.bf16 %v623_v59, %v623_v59  ;;  %v624_v0 = vmax.f32 %v620_v60, 0.0 }
 0x163   : > { %646 = vst.msk [vmem:[%s215_s20 + $0x8] sm:$0xf] %vm643_vm5, %v794_v61  ;;  %v795_v1 = vpack.c.bf16 %v626_v62, %v626_v62 }
 0x164   : > { %644 = vst.msk [vmem:[%s215_s20] sm:$0xf] %vm643_vm5, %v792_v63  ;;  %v793_v2 = vpack.c.bf16 %v624_v0, %v624_v0 }
 0x165   : > { %647 = vst.msk [vmem:[%s215_s20 + $0xc] sm:$0xf] %vm643_vm5, %v795_v1 }
 0x166   : > { %645 = vst.msk [vmem:[%s215_s20 + $0x4] sm:$0xf] %vm643_vm5, %v793_v2 }
 0x167   : > { %1039 = shalt.err (!%p1036_p1)
}
 0x168   : > { %s1040_s17 = scalar_lea.hbm %s1347_s22, 256  ;;  %s1044_s4 = scalar_lea.hbm %s1394_s3, 512 }
 0x169   : > { %p1041_p13 = scmp.ne.s32.totalorder %s1347_s22, %s1040_s17  ;;  %p1045_p4 = scmp.lt.u32.totalorder %s1347_s22, %s1394_s3 }
 0x16a   : > { %p1046_p5 = scmp.lt.u32.totalorder %s1044_s4, %s1040_s17  ;;  %p1048_p8 = scmp.lt.u32.totalorder %s1040_s17, %s1347_s22 }
 0x16b   : > { %p1042_p6 = pnand %p1041_p13, %p1408_p0 }
 0x16c   : > { %p1047_p11 = por %p1046_p5, %p1045_p4 }
 0x16d   : > { %p1043_p10 = pneg %p1042_p6 }
 0x16e   : > { %p1049_p2 = por %p1048_p8, %p1047_p11 }
 0x170   : > { %p1050_p3 = pnand %p1049_p2, %p1043_p10 }
 0x172   : > { %1053 = shalt.err (!%p1050_p3)
}
 0x173   : > { %s1104_s18 = smov 64   ;;  %s1105_s20 = smov 4  }
 0x174   : > { %871 = dma.vmem_to_hbm [thread:$0]  (%p1408_p0), %s1342_s7, 256, %s1347_s22, %s649_s16, %s1104_s18, %s1104_s18, %s1105_s20  }
 0x175 PF: > { %s677_s8 = sand.u32 1, %s1084_s12   ;;  %p1409_p7 = scmp.ne.s32.totalorder %s1399_s19, 0 }
 0x176   : > { %p1410_p9 = scmp.ge.s32.totalorder %s1096_s15, 2  ;;  %s678_s21 = scalar_lea.sflag [#allocation4], %s677_s8 }
 0x178   : > { %p885_p12 = pnand %p1410_p9, %p1409_p7 }
 0x17a   : > { %1079 = dma.done.wait (!%p885_p12), %s678_s21, 256  }
 0x17b   : > { %1081 = vsyncadd (!%p885_p12), %s678_s21, 4294967040  ;;  %p17_p1 = scmp.ge.s32.totalorder %s1240_s5, 4   ;;  %s1411_s12 = smov %s1088_s13 }
 0x17c   : > { %s1412_s13 = smov %s1092_s14  ;;  %s1413_s14 = smov %s1256_s10 }
 0x17d   : > { %s1414_s15 = smov %s1240_s5  ;;  %19 = sbr.rel (!%p17_p1) target bundleno = 6 (0x6), region = 89 }
 0x184   :  { %683 = vsyncpa [#allocation3], 1 }
 0x185   :  { %685 = vsyncpa [#allocation3 + $0x1], 1 }
 0x186   :  { %686 = vsyncpa [#allocation6], 1 }
 0x187   :  { %687 = vsyncpa [#allocation4], 1 }
 0x188   :  { %689 = vsyncpa [#allocation4 + $0x1], 1 }

// kernel: ecapa_forward.14
= control target key start
LH: loop header
LB: loop body
LE: loop exit
PB: predicated region body
PF: predicated region fallthrough
CT: control target
= control target key end

     0   :  { %8 = vsyncpa [#allocation3], 0  ;;  %s504_s0 = inlined_call_operand.hbm [shape: bf16[64,32], index: 0, kind: input, shape index: {}]   ;;  %s505_s1 = inlined_call_operand.hbm [shape: bf16[32,32], index: 1, kind: input, shape index: {}]   ;;  %s506_s2 = inlined_call_operand.hbm [shape: f32[1,32], index: 2, kind: input, shape index: {}]   ;;  %s507_s3 = inlined_call_operand.hbm [shape: bf16[64,32], index: 3, kind: output, shape index: {}]  }
   0x1   :  { %9 = vsyncpa [#allocation6], 0 }
   0x2   :  { %10 = vsyncpa [#allocation4], 0  ;;  %s406_s12 = smov [#allocation5]   ;;  %s407_s14 = smov [#allocation2]  }
   0x3   :  { %s28_s13 = sshll.u32 %s406_s12, 4  ;;  %s16_s15 = sshll.u32 %s407_s14, 4  ;;  %s29_s13 = int_to_ptr.vmem [resolvable:$true] %s28_s13  ;;  %s432_s15 = int_to_ptr.vmem [resolvable:$true] %s16_s15 }
   0x4   :  { %s312_s18 = scalar_lea.hbm %s505_s1, 256 }
   0x5   :  { %p313_p0 = scmp.ne.s32.totalorder %s505_s1, %s312_s18  ;;  %p316_p1 = scmp.lt.u32.totalorder %s312_s18, %s505_s1 }
   0x7   :  { %p318_p2 = pnand %p316_p1, %p313_p0 }
   0x9   :  { %321 = shalt.err (!%p318_p2)
}
   0xa   :  { %s322_s23 = scalar_lea.vmem %s29_s13, 256  ;;  %p327_p4 = scmp.lt.s32.totalorder %s29_s13, %s29_s13 }
   0xb   :  { %p323_p3 = scmp.ne.s32.totalorder %s29_s13, %s322_s23  ;;  %p328_p5 = scmp.lt.s32.totalorder %s322_s23, %s322_s23 }
   0xd   :  { %p329_p6 = por %p328_p5, %p327_p4 }
   0xf   :  { %p330_p7 = pnand %p329_p6, %p323_p3 }
  0x11   :  { %333 = shalt.err (!%p330_p7)
}
  0x12   :  { %s408_s24 = smov 64   ;;  %s409_s25 = smov 4  }
  0x13   :  { %34 = dma.hbm_to_vmem [thread:$0]  %s505_s1, 256, %s29_s13, [#allocation6], %s408_s24, %s408_s24, %s409_s25  }
  0x14   :  { %s334_s30 = scalar_lea.hbm %s504_s0, 512 }
  0x15   :  { %p335_p8 = scmp.ne.s32.totalorder %s504_s0, %s334_s30  ;;  %p338_p9 = scmp.lt.u32.totalorder %s334_s30, %s504_s0 }
  0x17   :  { %p340_p10 = pnand %p338_p9, %p335_p8 }
  0x19   :  { %343 = shalt.err (!%p340_p10)
}
  0x1a   :  { %s344_s8 = scalar_lea.vmem %s432_s15, 512  ;;  %p349_p12 = scmp.lt.s32.totalorder %s432_s15, %s432_s15 }
  0x1b   :  { %p345_p11 = scmp.ne.s32.totalorder %s432_s15, %s344_s8  ;;  %p350_p13 = scmp.lt.s32.totalorder %s344_s8, %s344_s8 }
  0x1d   :  { %p351_p0 = por %p350_p13, %p349_p12 }
  0x1f   :  { %p352_p1 = pnand %p351_p0, %p345_p11 }
  0x21   :  { %355 = shalt.err (!%p352_p1)
}
  0x22   :  { %22 = dma.hbm_to_vmem [thread:$0]  %s504_s0, 512, %s432_s15, [#allocation3], %s408_s24, %s408_s24, %s409_s25  }
  0x23   :  { %s410_s10 = smov [#allocation7]   ;;  %s356_s14 = scalar_lea.hbm %s506_s2, 16 }
  0x24   :  { %s41_s11 = sshll.u32 %s410_s10, 4  ;;  %p357_p2 = scmp.ne.s32.totalorder %s506_s2, %s356_s14  ;;  %s42_s11 = int_to_ptr.vmem [resolvable:$true] %s41_s11 }
  0x25   :  { %p360_p3 = scmp.lt.u32.totalorder %s356_s14, %s506_s2 }
  0x27   :  { %p362_p4 = pnand %p360_p3, %p357_p2 }
  0x29   :  { %365 = shalt.err (!%p362_p4)
}
  0x2a   :  { %s366_s20 = scalar_lea.vmem %s42_s11, 16  ;;  %s370_s0 = scalar_lea.vmem %s42_s11, 32 }
  0x2b   :  { %p367_p5 = scmp.ne.s32.totalorder %s42_s11, %s366_s20  ;;  %p371_p6 = scmp.lt.s32.totalorder %s42_s11, %s42_s11 }
  0x2c   :  { %p372_p7 = scmp.lt.s32.totalorder %s370_s0, %s366_s20 }
  0x2e   :  { %p373_p8 = por %p372_p7, %p371_p6 }
  0x30   :  { %p374_p9 = pnand %p373_p8, %p367_p5 }
  0x32   :  { %377 = shalt.err (!%p374_p9)
}
  0x33   :  { %44 = dma.hbm_to_vmem [thread:$0]  %s506_s2, 16, %s42_s11, [#allocation6]  }
  0x34   :  { %400 = dma.done.wait [#allocation3], 512  }
  0x35   :  { %401 = vsyncadd [#allocation3], 4294966784 }
  0x36   :  { %402 = dma.done.wait [#allocation6], 272  }
  0x37   :  { %403 = vsyncadd [#allocation6], 4294967024  ;;  %v306_v0 = vld [vmem:[#allocation5] sm:$0xff]   ;;  %v307_v1 = vld [vmem:[#allocation5 + $0x8] sm:$0xff]   ;;  %vm106_vm0 = vcmask 261120   ;;  %vm224_vm1 = vcmask 257024  }
  0x38   :  { %284 = vmatprep.subr.bf16.mxu0 %v306_v0  ;;  %296 = vmatprep.subr.bf16.mxu1 %v306_v0  ;;  %v308_v2 = vld [vmem:[#allocation2] sm:$0xff]   ;;  %v309_v3 = vld [vmem:[#allocation2 + $0x10] sm:$0xff]   ;;  %v310_v4 = vld [vmem:[#allocation2 + $0x8] sm:$0xff]   ;;  %s411_s2 = smov [#allocation8]  }
  0x39   :  { %285 = vmatpush3.bf16.msra.mxu0 %v306_v0  ;;  %298 = vmatpush3.bf16.msra.mxu1 %v306_v0  ;;  %v311_v5 = vld [vmem:[#allocation2 + $0x18] sm:$0xff]   ;;  %v251_v6 = vld [vmem:[#allocation7] ss:$0 sm:$0xff]  ;;  %s238_s22 = sshll.u32 %s411_s2, 4  ;;  %s239_s22 = int_to_ptr.vmem [resolvable:$true] %s238_s22 }
  0x3a   :  { %286 = vmatprep.subr.bf16.mxu0 %v307_v1  ;;  %297 = vmatprep.subr.bf16.mxu1 %v307_v1  ;;  %s378_s23 = scalar_lea.vmem %s239_s22, 512  ;;  %p383_p11 = scmp.lt.s32.totalorder %s239_s22, %s239_s22 }
  0x3b   :  { %288 = vmatprep.mubr.msk.bf16.mxu0 %vm106_vm0, %v308_v2  ;;  %292 = vmatprep.mubr.msk.bf16.mxu1 %vm106_vm0, %v309_v3  ;;  %p379_p10 = scmp.ne.s32.totalorder %s239_s22, %s378_s23  ;;  %p384_p12 = scmp.lt.s32.totalorder %s378_s23, %s378_s23 }
  0x3d   :  { %287 = vmatpush3.bf16.msra.mxu0 %v307_v1  ;;  %299 = vmatpush3.bf16.msra.mxu1 %v307_v1  ;;  %p385_p13 = por %p384_p12, %p383_p11 }
  0x3f   :  { %p386_p0 = pnand %p385_p13, %p379_p10 }
  0x40   :  { %289 = vmatmul.mubr.msk.bf16.vlgmr.msra.gmra.mrb[0].mxu0 %vm106_vm0, %v310_v4  ;;  %293 = vmatmul.mubr.msk.bf16.vlgmr.msra.gmra.mrb[0].mxu1 %vm106_vm0, %v311_v5 }
 0x113   :  { %v290_v7 = vpop.f32.mrb[0].mxu0  ;;  %v294_v8 = vpop.f32.mrb[0].mxu1 }
 0x114   :  { %v162_v9 = vadd.f32 %v290_v7, %v251_v6  ;;  %v178_v10 = vadd.f32 %v294_v8, %v251_v6  ;;  %v153_v11 = vpop.f32.mrb[1].mxu0  ;;  %v169_v12 = vpop.f32.mrb[1].mxu1 }
 0x115   :  { %v154_v13 = vadd.f32 %v251_v6, %v153_v11  ;;  %v170_v14 = vadd.f32 %v251_v6, %v169_v12  ;;  %v291_v15 = vpop.f32.mrb[2].mxu0  ;;  %v295_v16 = vpop.f32.mrb[2].mxu1 }
 0x116   :  { %v186_v17 = vmax.f32 %v162_v9, 0.0  ;;  %v190_v18 = vmax.f32 %v178_v10, 0.0  ;;  %v165_v19 = vadd.f32 %v291_v15, %v251_v6  ;;  %v181_v20 = vadd.f32 %v295_v16, %v251_v6  ;;  %v156_v21 = vpop.f32.mrb[3].mxu0  ;;  %v172_v22 = vpop.f32.mrb[3].mxu1 }
 0x117   :  { %v184_v23 = vmax.f32 %v154_v13, 0.0  ;;  %v188_v24 = vmax.f32 %v170_v14, 0.0  ;;  %v157_v25 = vadd.f32 %v251_v6, %v156_v21  ;;  %v173_v26 = vadd.f32 %v251_v6, %v172_v22 }
 0x118   :  { %v272_v27 = vpack.c.bf16 %v186_v17, %v186_v17  ;;  %v276_v28 = vpack.c.bf16 %v190_v18, %v190_v18  ;;  %v187_v29 = vmax.f32 %v165_v19, 0.0  ;;  %v191_v30 = vmax.f32 %v181_v20, 0.0 }
 0x119   :  { %v270_v31 = vpack.c.bf16 %v184_v23, %v184_v23  ;;  %v274_v32 = vpack.c.bf16 %v188_v24, %v188_v24  ;;  %v185_v33 = vmax.f32 %v157_v25, 0.0  ;;  %v189_v34 = vmax.f32 %v173_v26, 0.0 }
 0x11a   :  { %227 = vst.msk [vmem:[#allocation8 + $0x8] sm:$0xf] %vm224_vm1, %v272_v27  ;;  %231 = vst.msk [vmem:[#allocation8 + $0x18] sm:$0xf] %vm224_vm1, %v276_v28  ;;  %v273_v35 = vpack.c.bf16 %v187_v29, %v187_v29  ;;  %v277_v36 = vpack.c.bf16 %v191_v30, %v191_v30 }
 0x11b   :  { %225 = vst.msk [vmem:[#allocation8] sm:$0xf] %vm224_vm1, %v270_v31  ;;  %229 = vst.msk [vmem:[#allocation8 + $0x10] sm:$0xf] %vm224_vm1, %v274_v32  ;;  %v271_v37 = vpack.c.bf16 %v185_v33, %v185_v33  ;;  %v275_v38 = vpack.c.bf16 %v189_v34, %v189_v34 }
 0x11c   :  { %228 = vst.msk [vmem:[#allocation8 + $0xc] sm:$0xf] %vm224_vm1, %v273_v35  ;;  %232 = vst.msk [vmem:[#allocation8 + $0x1c] sm:$0xf] %vm224_vm1, %v277_v36 }
 0x11d   :  { %226 = vst.msk [vmem:[#allocation8 + $0x4] sm:$0xf] %vm224_vm1, %v271_v37  ;;  %230 = vst.msk [vmem:[#allocation8 + $0x14] sm:$0xf] %vm224_vm1, %v275_v38 }
 0x11e   :  { %389 = shalt.err (!%p386_p0)
}
 0x11f   :  { %s390_s28 = scalar_lea.hbm %s507_s3, 512 }
 0x120   :  { %p391_p1 = scmp.ne.s32.totalorder %s507_s3, %s390_s28  ;;  %p394_p2 = scmp.lt.u32.totalorder %s390_s28, %s507_s3 }
 0x122   :  { %p396_p3 = pnand %p394_p2, %p391_p1 }
 0x124   :  { %399 = shalt.err (!%p396_p3)
}
 0x125   :  { %244 = dma.vmem_to_hbm [thread:$0]  %s239_s22, 512, %s507_s3, [#allocation4], %s408_s24, %s408_s24, %s409_s25  }
 0x126   :  { %404 = dma.done.wait [#allocation4], 512  }
 0x127   :  { %405 = vsyncadd [#allocation4], 4294966784 }
 0x128   :  { %248 = vsyncpa [#allocation3], 1 }
 0x129   :  { %249 = vsyncpa [#allocation6], 1 }
 0x12a   :  { %250 = vsyncpa [#allocation4], 1 }

// kernel: ecapa_forward.16
= control target key start
LH: loop header
LB: loop body
LE: loop exit
PB: predicated region body
PF: predicated region fallthrough
CT: control target
= control target key end

     0   :  { %s1889_s0 = inlined_call_operand.hbm [shape: bf16[2,32,32], index: 0, kind: input, shape index: {}]   ;;  %s1890_s1 = inlined_call_operand.hbm [shape: bf16[2,32,32], index: 1, kind: input, shape index: {}]   ;;  %s1891_s2 = inlined_call_operand.hbm [shape: bf16[32,32], index: 2, kind: input, shape index: {}]   ;;  %s1892_s3 = inlined_call_operand.hbm [shape: f32[1,32], index: 3, kind: input, shape index: {}]   ;;  %s1893_s4 = inlined_call_operand.hbm [shape: bf16[32,16], index: 4, kind: input, shape index: {}]   ;;  %s1894_s5 = inlined_call_operand.hbm [shape: f32[1,16], index: 5, kind: input, shape index: {}]   ;;  %s1895_s6 = inlined_call_operand.hbm [shape: bf16[16,32], index: 6, kind: input, shape index: {}]   ;;  %s1896_s7 = inlined_call_operand.hbm [shape: f32[1,32], index: 7, kind: input, shape index: {}]   ;;  %s1897_s8 = inlined_call_operand.hbm [shape: bf16[2,32,32], index: 8, kind: output, shape index: {}]  }
   0x1   :  { %1905 = sst [smem:[#allocation24_spill]] %s1891_s2 }
   0x2   :  { %1906 = sst [smem:[#allocation25_spill]] %s1892_s3 }
   0x3   :  { %1907 = sst [smem:[#allocation26_spill]] %s1893_s4 }
   0x4   :  { %1908 = sst [smem:[#allocation27_spill]] %s1894_s5 }
   0x5   :  { %1909 = sst [smem:[#allocation28_spill]] %s1895_s6 }
   0x6   :  { %13 = vsyncpa [#allocation3], 0 }
   0x7   :  { %15 = vsyncpa [#allocation3 + $0x1], 0 }
   0x8   :  { %16 = vsyncpa [#allocation6], 0 }
   0x9   :  { %18 = vsyncpa [#allocation6 + $0x1], 0 }
   0xa   :  { %19 = vsyncpa [#allocation9], 0 }
   0xb   :  { %20 = vsyncpa [#allocation12], 0 }
   0xc   :  { %21 = vsyncpa [#allocation15], 0 }
   0xd   :  { %22 = vsyncpa [#allocation4], 0 }
   0xe   :  { %24 = vsyncpa [#allocation4 + $0x1], 0  ;;  %s1485_s27 = smov 0   ;;  %s1487_s28 = smov 0  }
   0xf   :  { %s1489_s29 = smov 0   ;;  %s1491_s30 = smov 0  }
  0x10 LB: > { %s1425_s9 = smov [#allocation7]   ;;  %s1506_s11 = sadd.s32 4294967295, %s1423_s30   ;;  %s1423_s30 = sphi %s1491_s30, %s1941_s30   ;;  %s1419_s29 = sphi %s1489_s29, %s1940_s29   ;;  %s1415_s28 = sphi %s1487_s28, %s1939_s28   ;;  %s1411_s27 = sphi %s1485_s27, %s1938_s27  }
  0x11   : > { %s251_s10 = sshll.u32 %s1425_s9, 4  ;;  %p888_p0 = scmp.ge.s32.totalorder %s1423_s30, 1  ;;  %s1511_s10 = int_to_ptr.vmem [resolvable:$true] %s251_s10 }
  0x12   : > { %p1900_p1 = scmp.eq.s32.totalorder %s1506_s11, 0  ;;  %p239_p2 = scmp.lt.s32.totalorder %s1423_s30, 3 }
  0x13   : > { %s1426_s13 = smov [#allocation8]   ;;  %s1427_s16 = smov [#allocation11]  }
  0x14   : > { %p1513_p3 = pnand %p888_p0, %p239_p2  ;;  %s265_s14 = sshll.u32 %s1426_s13, 4  ;;  %s1526_s14 = int_to_ptr.vmem [resolvable:$true] %s265_s14 }
  0x15   : > { %s289_s17 = sshll.u32 %s1427_s16, 4  ;;  %s1912_s2 = sld [smem:[#allocation24_spill]]  ;;  %s1528_s17 = int_to_ptr.vmem [resolvable:$true] %s289_s17 }
  0x16   : > { %s1910_s12 = scalar_select %p1513_p3, 1, 0 }
  0x17   : > { %p1010_p5 = pneg %p1513_p3 }
  0x19   : > { %p1522_p6 = pnand %p1010_p5, %p1900_p1 }
  0x1b   : > { %s1109_s20 = scalar_lea.hbm %s1912_s2, 256  ;;  %p1538_p8 = pneg %p1522_p6 }
  0x1c   : > { %p1110_p7 = scmp.ne.s32.totalorder %s1912_s2, %s1109_s20  ;;  %p1116_p11 = scmp.lt.u32.totalorder %s1109_s20, %s1912_s2 }
  0x1e   : > { %p1112_p9 = pnand %p1538_p8, %p1110_p7 }
  0x20   : > { %p1113_p10 = pneg %p1112_p9 }
  0x22   : > { %p1118_p12 = pnand %p1116_p11, %p1113_p10 }
  0x24   : > { %1121 = shalt.err (!%p1118_p12)
}
  0x25   : > { %s1122_s26 = scalar_lea.vmem %s1511_s10, 256  ;;  %p1130_p5 = scmp.lt.s32.totalorder %s1511_s10, %s1511_s10 }
  0x26   : > { %p1123_p13 = scmp.ne.s32.totalorder %s1511_s10, %s1122_s26  ;;  %p1131_p4 = scmp.lt.s32.totalorder %s1122_s26, %s1122_s26 }
  0x28   : > { %p1125_p0 = pnand %p1123_p13, %p1538_p8  ;;  %p1132_p7 = por %p1131_p4, %p1130_p5 }
  0x2a   : > { %p1126_p2 = pneg %p1125_p0 }
  0x2c   : > { %p1133_p9 = pnand %p1132_p7, %p1126_p2 }
  0x2e   : > { %1136 = shalt.err (!%p1133_p9)
}
  0x2f   : > { %s1898_s9 = smov 64   ;;  %s1902_s13 = smov 4  }
  0x30   : > { %1013 = dma.hbm_to_vmem [thread:$0]  (!%p1522_p6), %s1912_s2, 256, %s1511_s10, [#allocation6], %s1898_s9, %s1898_s9, %s1902_s13  }
  0x31   : > { %s1914_s3 = sld [smem:[#allocation25_spill]] }
  0x37   : > { %s1137_s21 = scalar_lea.hbm %s1914_s3, 16 }
  0x38   : > { %p1138_p4 = scmp.ne.s32.totalorder %s1914_s3, %s1137_s21  ;;  %p1144_p12 = scmp.lt.u32.totalorder %s1137_s21, %s1914_s3 }
  0x3a   : > { %p1140_p10 = pnand %p1138_p4, %p1538_p8 }
  0x3c   : > { %p1141_p11 = pneg %p1140_p10 }
  0x3e   : > { %p1146_p13 = pnand %p1144_p12, %p1141_p11 }
  0x40   : > { %1149 = shalt.err (!%p1146_p13)
}
  0x41   : > { %s1150_s10 = scalar_lea.vmem %s1526_s14, 16  ;;  %s1157_s16 = scalar_lea.vmem %s1526_s14, 32 }
  0x42   : > { %p1151_p0 = scmp.ne.s32.totalorder %s1526_s14, %s1150_s10  ;;  %p1158_p7 = scmp.lt.s32.totalorder %s1526_s14, %s1526_s14 }
  0x43   : > { %p1159_p9 = scmp.lt.s32.totalorder %s1157_s16, %s1150_s10 }
  0x44   : > { %p1153_p2 = pnand %p1151_p0, %p1538_p8 }
  0x45   : > { %p1160_p4 = por %p1159_p9, %p1158_p7 }
  0x46   : > { %p1154_p5 = pneg %p1153_p2 }
  0x48   : > { %p1161_p10 = pnand %p1160_p4, %p1154_p5 }
  0x4a   : > { %1164 = shalt.err (!%p1161_p10)
}
  0x4b   : > { %1016 = dma.hbm_to_vmem [thread:$0]  (!%p1522_p6), %s1914_s3, 16, %s1526_s14, [#allocation9]  }
  0x4c   : > { %s1915_s5 = sld [smem:[#allocation27_spill]] }
  0x52   : > { %s1165_s22 = scalar_lea.hbm %s1915_s5, 16 }
  0x53   : > { %p1166_p11 = scmp.ne.s32.totalorder %s1915_s5, %s1165_s22  ;;  %p1172_p0 = scmp.lt.u32.totalorder %s1165_s22, %s1915_s5 }
  0x55   : > { %p1168_p12 = pnand %p1166_p11, %p1538_p8 }
  0x57   : > { %p1169_p13 = pneg %p1168_p12 }
  0x59   : > { %p1174_p2 = pnand %p1172_p0, %p1169_p13 }
  0x5b   : > { %1177 = shalt.err (!%p1174_p2)
}
  0x5c   : > { %s1178_s14 = scalar_lea.vmem %s1528_s17, 16  ;;  %s1185_s16 = scalar_lea.vmem %s1528_s17, 32 }
  0x5d   : > { %p1179_p5 = scmp.ne.s32.totalorder %s1528_s17, %s1178_s14  ;;  %p1186_p4 = scmp.lt.s32.totalorder %s1528_s17, %s1528_s17 }
  0x5e   : > { %p1187_p10 = scmp.lt.s32.totalorder %s1185_s16, %s1178_s14 }
  0x5f   : > { %p1181_p7 = pnand %p1179_p5, %p1538_p8 }
  0x60   : > { %p1188_p11 = por %p1187_p10, %p1186_p4 }
  0x61   : > { %p1182_p9 = pneg %p1181_p7 }
  0x63   : > { %p1189_p12 = pnand %p1188_p11, %p1182_p9 }
  0x65   : > { %1192 = shalt.err (!%p1189_p12)
}
  0x66   : > { %1022 = dma.hbm_to_vmem [thread:$0]  (!%p1522_p6), %s1915_s5, 16, %s1528_s17, [#allocation12]  }
  0x67   : > { %s1430_s20 = smov [#allocation10]   ;;  %s1431_s22 = smov [#allocation13]  }
  0x68   : > { %s275_s21 = sshll.u32 %s1430_s20, 4  ;;  %s299_s24 = sshll.u32 %s1431_s22, 4  ;;  %s276_s21 = int_to_ptr.vmem [resolvable:$true] %s275_s21  ;;  %s300_s24 = int_to_ptr.vmem [resolvable:$true] %s299_s24 }
  0x69   : > { %s1916_s4 = sld [smem:[#allocation26_spill]] }
  0x6f   : > { %s1193_s10 = scalar_lea.hbm %s1916_s4, 256 }
  0x70   : > { %p1194_p13 = scmp.ne.s32.totalorder %s1916_s4, %s1193_s10  ;;  %p1200_p5 = scmp.lt.u32.totalorder %s1193_s10, %s1916_s4 }
  0x72   : > { %p1196_p0 = pnand %p1194_p13, %p1538_p8 }
  0x74   : > { %p1197_p2 = pneg %p1196_p0 }
  0x76   : > { %p1202_p7 = pnand %p1200_p5, %p1197_p2 }
  0x78   : > { %1205 = shalt.err (!%p1202_p7)
}
  0x79   : > { %s1206_s17 = scalar_lea.vmem %s276_s21, 256  ;;  %p1214_p11 = scmp.lt.s32.totalorder %s276_s21, %s276_s21 }
  0x7a   : > { %p1207_p9 = scmp.ne.s32.totalorder %s276_s21, %s1206_s17  ;;  %p1215_p12 = scmp.lt.s32.totalorder %s1206_s17, %s1206_s17 }
  0x7c   : > { %p1209_p4 = pnand %p1207_p9, %p1538_p8  ;;  %p1216_p1 = por %p1215_p12, %p1214_p11 }
  0x7e   : > { %p1210_p10 = pneg %p1209_p4 }
  0x80   : > { %p1217_p3 = pnand %p1216_p1, %p1210_p10 }
  0x82   : > { %1220 = shalt.err (!%p1217_p3)
}
  0x83   : > { %s1917_s19 = smov 64   ;;  %s1918_s6 = sld [smem:[#allocation28_spill]] }
  0x84   : > { %1019 = dma.hbm_to_vmem [thread:$0]  (!%p1522_p6), %s1916_s4, 256, %s276_s21, [#allocation9], %s1917_s19, %s1917_s19, %s1902_s13  }
  0x89   : > { %s1221_s26 = scalar_lea.hbm %s1918_s6, 128 }
  0x8a   : > { %p1222_p1 = scmp.ne.s32.totalorder %s1918_s6, %s1221_s26  ;;  %p1228_p0 = scmp.lt.u32.totalorder %s1221_s26, %s1918_s6 }
  0x8c   : > { %p1224_p3 = pnand %p1222_p1, %p1538_p8 }
  0x8e   : > { %p1225_p13 = pneg %p1224_p3 }
  0x90   : > { %p1230_p2 = pnand %p1228_p0, %p1225_p13 }
  0x92   : > { %1233 = shalt.err (!%p1230_p2)
}
  0x93   : > { %s1234_s17 = scalar_lea.vmem %s300_s24, 128  ;;  %p1242_p4 = scmp.lt.s32.totalorder %s300_s24, %s300_s24 }
  0x94   : > { %p1235_p5 = scmp.ne.s32.totalorder %s300_s24, %s1234_s17  ;;  %p1243_p10 = scmp.lt.s32.totalorder %s1234_s17, %s1234_s17 }
  0x96   : > { %p1237_p7 = pnand %p1235_p5, %p1538_p8  ;;  %p1244_p11 = por %p1243_p10, %p1242_p4 }
  0x98   : > { %p1238_p9 = pneg %p1237_p7 }
  0x9a   : > { %p1245_p12 = pnand %p1244_p11, %p1238_p9 }
  0x9c   : > { %1248 = shalt.err (!%p1245_p12)
}
  0x9d   : > { %1025 = dma.hbm_to_vmem [thread:$0]  (!%p1522_p6), %s1918_s6, 128, %s300_s24, [#allocation12], %s1917_s19, %s1917_s19, %s1902_s13  }
  0x9e   : > { %s1432_s20 = smov [#allocation14]   ;;  %s1249_s10 = scalar_lea.hbm %s1896_s7, 16 }
  0x9f   : > { %s313_s22 = sshll.u32 %s1432_s20, 4  ;;  %p1250_p1 = scmp.ne.s32.totalorder %s1896_s7, %s1249_s10  ;;  %s314_s22 = int_to_ptr.vmem [resolvable:$true] %s313_s22 }
  0xa0   : > { %p1256_p0 = scmp.lt.u32.totalorder %s1249_s10, %s1896_s7 }
  0xa1   : > { %p1252_p3 = pnand %p1250_p1, %p1538_p8 }
  0xa3   : > { %p1253_p13 = pneg %p1252_p3 }
  0xa5   : > { %p1258_p2 = pnand %p1256_p0, %p1253_p13 }
  0xa7   : > { %1261 = shalt.err (!%p1258_p2)
}
  0xa8   : > { %s1262_s24 = scalar_lea.vmem %s314_s22, 16  ;;  %s1269_s21 = scalar_lea.vmem %s314_s22, 32 }
  0xa9   : > { %p1263_p5 = scmp.ne.s32.totalorder %s314_s22, %s1262_s24  ;;  %p1270_p4 = scmp.lt.s32.totalorder %s314_s22, %s314_s22 }
  0xaa   : > { %p1271_p10 = scmp.lt.s32.totalorder %s1269_s21, %s1262_s24 }
  0xab   : > { %p1265_p7 = pnand %p1263_p5, %p1538_p8 }
  0xac   : > { %p1272_p11 = por %p1271_p10, %p1270_p4 }
  0xad   : > { %p1266_p9 = pneg %p1265_p7 }
  0xaf   : > { %p1273_p12 = pnand %p1272_p11, %p1266_p9 }
  0xb1   : > { %1276 = shalt.err (!%p1273_p12)
}
  0xb2   : > { %1028 = dma.hbm_to_vmem [thread:$0]  (!%p1522_p6), %s1896_s7, 16, %s314_s22, [#allocation15]  }
  0xb3   : > { %s887_s23 = sadd.s32 4294967294, %s1423_s30   ;;  %s1672_s15 = sadd.s32 1, %s1423_s30  }
  0xb4   : > { %s34_s25 = ssub.s32 %s1423_s30, %s1672_s15  ;;  %s37_s26 = sadd.s32 1, %s1419_s29 }
  0xb5   : > { %p35_p8 = scmp.eq.s32.totalorder %s34_s25, 0  ;;  %p44_p1 = scmp.ne.s32.totalorder %s1419_s29, %s1415_s28 }
  0xb6   : > { %p45_p3 = scmp.eq.s32.totalorder %s1423_s30, 0  ;;  %p50_p13 = scmp.ne.s32.totalorder %s1415_s28, %s1411_s27 }
  0xb7   : > { %s1683_s10 = scalar_select %p35_p8, %s1419_s29, %s37_s26  }
  0xb8   : > { %p1685_p0 = por %p45_p3, %p44_p1  ;;  %p1920_p2 = scmp.eq.s32.totalorder %s1506_s11, 0 }
  0xb9   : > { %p226_p5 = scmp.eq.s32.totalorder %s1506_s11, 1  ;;  %p232_p7 = scmp.eq.s32.totalorder %s887_s23, 1 }
  0xba   : > { %p1691_p6 = por %p1920_p2, %p50_p13  ;;  %p1046_p9 = scmp.lt.s32.totalorder %s1423_s30, 2 }
  0xbb   : > { %s324_s16 = sand.u32 1, %s1419_s29   ;;  %p1698_p4 = por %p226_p5, %p44_p1 }
  0xbc   : > { %p1702_p10 = por %p232_p7, %p50_p13  ;;  %s896_s24 = sshll.u32 %s324_s16, 4 }
  0xbd   : > { %s1922_s18 = scalar_select %p1698_p4, 1, 0 }
  0xbe   : > { %s1923_s17 = scalar_select %p1702_p10, 1, 0 }
  0xbf   : > { %s933_s21 = sshll.u32 %s1423_s30, 8  ;;  %s328_s23 = scalar_lea.vmem [#allocation2], %s896_s24 }
  0xc0   : > { %s1710_s25 = scalar_lea.hbm %s1889_s0, %s933_s21  ;;  %s335_s26 = sshll.u32 %s328_s23, 4  ;;  %s1712_s26 = int_to_ptr.vmem [resolvable:$true] %s335_s26 }
  0xc1   : > { %p1716_p11 = pnand %p1046_p9, %p1685_p0  ;;  %s1723_s9 = scalar_lea.hbm %s1890_s1, %s933_s21 }
  0xc2   : > { %s349_s20 = scalar_lea.vmem [#allocation5], %s896_s24  ;;  %s1727_s5 = scalar_lea.sflag [#allocation3], %s324_s16 }
  0xc3   : > { %s1725_s4 = sshll.u32 %s349_s20, 4  ;;  %s1277_s23 = scalar_lea.hbm %s1710_s25, 256  ;;  %s1759_s4 = int_to_ptr.vmem [resolvable:$true] %s1725_s4 }
  0xc4   : > { %p1278_p12 = scmp.ne.s32.totalorder %s1710_s25, %s1277_s23  ;;  %p1279_p8 = pneg %p1716_p11 }
  0xc5   : > { %s1282_s2 = scalar_lea.hbm %s1889_s0, 512  ;;  %p1283_p13 = scmp.lt.u32.totalorder %s1710_s25, %s1889_s0 }
  0xc6   : > { %p1280_p1 = pnand %p1279_p8, %p1278_p12  ;;  %p1284_p0 = scmp.lt.u32.totalorder %s1282_s2, %s1277_s23 }
  0xc7   : > { %p1286_p5 = scmp.lt.u32.totalorder %s1277_s23, %s1710_s25 }
  0xc8   : > { %p1281_p3 = pneg %p1280_p1  ;;  %p1285_p2 = por %p1284_p0, %p1283_p13 }
  0xca   : > { %p1287_p7 = por %p1286_p5, %p1285_p2 }
  0xcc   : > { %p1288_p9 = pnand %p1287_p7, %p1281_p3 }
  0xce   : > { %1291 = shalt.err (!%p1288_p9)
}
  0xcf   : > { %s1292_s16 = scalar_lea.vmem %s1712_s26, 256  ;;  %s1433_s6 = smov [#allocation2]  }
  0xd0   : > { %p1293_p12 = scmp.ne.s32.totalorder %s1712_s26, %s1292_s16  ;;  %s1297_s24 = sshll.u32 %s1433_s6, 4  ;;  %s1298_s24 = int_to_ptr.vmem [resolvable:$false] %s1297_s24 }
  0xd1   : > { %s1299_s20 = scalar_lea.vmem %s1298_s24, 512  ;;  %p1300_p4 = scmp.lt.s32.totalorder %s1712_s26, %s1298_s24 }
  0xd2   : > { %p1295_p1 = pnand %p1293_p12, %p1279_p8  ;;  %p1301_p13 = scmp.lt.s32.totalorder %s1299_s20, %s1292_s16 }
  0xd4   : > { %p1296_p10 = pneg %p1295_p1  ;;  %p1302_p0 = por %p1301_p13, %p1300_p4 }
  0xd6   : > { %p1303_p2 = pnand %p1302_p0, %p1296_p10 }
  0xd8   : > { %1306 = shalt.err (!%p1303_p2)
}
  0xd9   : > { %s1925_s23 = smov 4   ;;  %s345_s14 = sand.u32 1, %s1423_s30  }
  0xda   : > { %1032 = dma.hbm_to_vmem [thread:$0]  (!%p1716_p11), %s1710_s25, 256, %s1712_s26, %s1727_s5, %s1917_s19, %s1917_s19, %s1925_s23  }
  0xdb   : > { %s1762_s2 = scalar_lea.sflag [#allocation6], %s345_s14  ;;  %s1307_s3 = scalar_lea.hbm %s1723_s9, 256 }
  0xdc   : > { %p1308_p4 = scmp.ne.s32.totalorder %s1723_s9, %s1307_s3  ;;  %s1312_s6 = scalar_lea.hbm %s1890_s1, 512 }
  0xdd   : > { %p1313_p5 = scmp.lt.u32.totalorder %s1723_s9, %s1890_s1  ;;  %p1314_p7 = scmp.lt.u32.totalorder %s1312_s6, %s1307_s3 }
  0xde   : > { %p1310_p10 = pnand %p1308_p4, %p1279_p8  ;;  %p1316_p12 = scmp.lt.u32.totalorder %s1307_s3, %s1723_s9 }
  0xdf   : > { %p1315_p9 = por %p1314_p7, %p1313_p5 }
  0xe0   : > { %p1311_p3 = pneg %p1310_p10 }
  0xe1   : > { %p1317_p1 = por %p1316_p12, %p1315_p9 }
  0xe3   : > { %p1318_p13 = pnand %p1317_p1, %p1311_p3 }
  0xe5   : > { %1321 = shalt.err (!%p1318_p13)
}
  0xe6   : > { %s1322_s5 = scalar_lea.vmem %s1759_s4, 256  ;;  %s1434_s25 = smov [#allocation5]  }
  0xe7   : > { %p1323_p0 = scmp.ne.s32.totalorder %s1759_s4, %s1322_s5  ;;  %s1327_s26 = sshll.u32 %s1434_s25, 4  ;;  %s1328_s26 = int_to_ptr.vmem [resolvable:$false] %s1327_s26 }
  0xe8   : > { %s1329_s14 = scalar_lea.vmem %s1328_s26, 512  ;;  %p1330_p10 = scmp.lt.s32.totalorder %s1759_s4, %s1328_s26 }
  0xe9   : > { %p1325_p2 = pnand %p1323_p0, %p1279_p8  ;;  %p1331_p5 = scmp.lt.s32.totalorder %s1329_s14, %s1322_s5 }
  0xeb   : > { %p1326_p4 = pneg %p1325_p2  ;;  %p1332_p7 = por %p1331_p5, %p1330_p10 }
  0xed   : > { %p1333_p9 = pnand %p1332_p7, %p1326_p4 }
  0xef   : > { %1336 = shalt.err (!%p1333_p9)
}
  0xf0   : > { %1035 = dma.hbm_to_vmem [thread:$0]  (!%p1716_p11), %s1723_s9, 256, %s1759_s4, %s1762_s2, %s1917_s19, %s1917_s19, %s1925_s23  }
  0xf1   : > { %p1926_p8 = scmp.ne.s32.totalorder %s1910_s12, 0 }
  0xf2   : > { %s1794_s3 = sand.u32 (!%p1926_p8), 1, %s1415_s28  }
  0xf3   : > { %368 = sbr.rel (%p1926_p8) target bundleno = 1002 (0x3ea), region = 52  ;;  %s1797_s21 = sshll.u32 (!%p1926_p8), %s1794_s3, 4 }
  0xf4   : > { %s371_s13 = scalar_lea.sflag (!%p1926_p8), [#allocation3], %s1794_s3  ;;  %s374_s16 = scalar_lea.vmem (!%p1926_p8), [#allocation2], %s1797_s21 }
  0xfa   : > { %1382 = dma.done.wait (%p1691_p6), %s371_s13, 256  }
  0xfb   : > { %1384 = vsyncadd (%p1691_p6), %s371_s13, 4294967040  ;;  %s379_s4 = sand.u32 1, %s1506_s11   ;;  %s383_s19 = scalar_lea.vmem [#allocation5], %s1797_s21 }
  0xfc   : > { %s380_s12 = scalar_lea.sflag [#allocation6], %s379_s4 }
  0xfd   : > { %1386 = dma.done.wait (%p1691_p6), %s380_s12, 256  }
  0xfe   : > { %1388 = vsyncadd (%p1691_p6), %s380_s12, 4294967040  ;;  %p1927_p11 = scmp.eq.s32.totalorder %s1506_s11, 0 }
 0x100   : > { %1390 = dma.done.wait (%p1927_p11), [#allocation6], 256   ;;  %p1928_p3 = pmov %p1927_p11 }
 0x102   : > { %1392 = vsyncadd (%p1928_p3), [#allocation6], 4294967040  ;;  %p1929_p12 = pmov %p1928_p3 }
 0x103   : > { %p1930_p1 = pmov %p1928_p3 }
 0x104   : > { %1394 = dma.done.wait (%p1929_p12), [#allocation9], 272  }
 0x105   : > { %1396 = vsyncadd (%p1930_p1), [#allocation9], 4294967024  ;;  %p1931_p13 = pmov %p1930_p1 }
 0x106   : > { %p1932_p0 = pmov %p1930_p1 }
 0x107   : > { %1398 = dma.done.wait (%p1931_p13), [#allocation12], 144  }
 0x108   : > { %1400 = vsyncadd (%p1932_p0), [#allocation12], 4294967152  ;;  %p1933_p6 = pmov %p1932_p0 }
 0x109   : > { %p1934_p2 = pmov %p1932_p0 }
 0x10a   : > { %1402 = dma.done.wait (%p1933_p6), [#allocation15], 16  }
 0x10b   : > { %1404 = vsyncadd (%p1934_p2), [#allocation15], 4294967280  ;;  %v1098_v0 = vld [vmem:[#allocation7] sm:$0xff]   ;;  %v1099_v1 = vld [vmem:[#allocation7 + $0x8] sm:$0xff]   ;;  %vm483_vm0 = vcmask 261120   ;;  %v1435_v5 = vmov 0.0   ;;  %v687_v54 = vlaneseq }
 0x10c   : > { %958 = vmatprep.subr.bf16.mxu0 %v1098_v0  ;;  %v1100_v2 = vld [vmem:[%s374_s16] sm:$0xff]   ;;  %v1101_v3 = vld [vmem:[%s374_s16 + $0x8] sm:$0xff]   ;;  %966 = vmatprep.subr.bf16.mxu1 %v1435_v5  ;;  %vm1436_vm1 = vmmov 0   ;;  %vm629_vm2 = vcmask 130048   ;;  %s939_s22 = sshll.u32 %s1506_s11, 8  ;;  %s444_s9 = scalar_lea.vmem [#allocation16], %s1797_s21 }
 0x10d   : > { %959 = vmatpush3.bf16.msra.mxu0 %v1098_v0  ;;  %962 = vmatprep.mubr.msk.bf16.mxu0 %vm483_vm0, %v1100_v2  ;;  %v1102_v4 = vld [vmem:[#allocation10] sm:$0xff]   ;;  %v1103_v6 = vld [vmem:[#allocation10 + $0x8] sm:$0xff]   ;;  %v1104_v7 = vld [vmem:[#allocation13] sm:$0xff]   ;;  %v688_v55 = vshrl.u32 %v687_v54, 7  ;;  %s734_s23 = sshll.u32 %s444_s9, 4  ;;  %vm715_vm3 = vcmask 257024   ;;  %s1843_s24 = scalar_lea.hbm %s1897_s8, %s939_s22  ;;  %s1845_s23 = int_to_ptr.vmem [resolvable:$true] %s734_s23 }
 0x10e   : > { %960 = vmatprep.subr.bf16.mxu0 %v1099_v1  ;;  %970 = vmatprep.mubr.msk.bf16.mxu1 %vm1436_vm1, %v1435_v5  ;;  %v912_v8 = vld [vmem:[#allocation8] ss:$0 sm:$0xff]  ;;  %v562_v36 = vld [vmem:[#allocation11] sm:$0x1]  ;;  %v622_v44 = vld [vmem:[#allocation14] sm:$0x1] }
 0x10f   : > { %967 = vmatpush3.bf16.msra.mxu1 %v1102_v4  ;;  %v941_v56 = vld [vmem:[%s383_s19] sm:$0xff]   ;;  %v689_v57 = vsub.s32 0, %v688_v55  ;;  %v948_v58 = vld [vmem:[%s383_s19 + $0x8] sm:$0xff]   ;;  %s721_s11 = scalar_lea.sflag [#allocation4], %s1794_s3  ;;  %s1337_s20 = scalar_lea.vmem %s1845_s23, 256 }
 0x110   : > { %968 = vmatprep.subr.bf16.mxu1 %v1435_v5  ;;  %v942_v60 = vunpack.c.l.bf16 %v941_v56  ;;  %v943_v61 = vunpack.c.h.bf16 %v941_v56  ;;  %v946_v62 = vunpack.c.l.bf16 %v948_v58  ;;  %v947_v63 = vunpack.c.h.bf16 %v948_v58  ;;  %p1338_p4 = scmp.ne.s32.totalorder %s1845_s23, %s1337_s20  ;;  %p1935_p10 = scmp.ne.s32.totalorder %s1922_s18, 0 }
 0x111   : > { %961 = vmatpush3.bf16.msra.mxu0 %v1099_v1  ;;  %s1437_s5 = smov [#allocation16]  }
 0x112   : > { %974 = vmatprep.subr.bf16.mxu0 %v1435_v5  ;;  %p1339_p5 = pnand %p1338_p4, %p1935_p10  ;;  %s1341_s25 = sshll.u32 %s1437_s5, 4  ;;  %s1342_s25 = int_to_ptr.vmem [resolvable:$false] %s1341_s25 }
 0x113   : > { %969 = vmatpush3.bf16.msra.mxu1 %v1103_v6  ;;  %s1343_s26 = scalar_lea.vmem %s1342_s25, 512  ;;  %p1344_p9 = scmp.lt.s32.totalorder %s1845_s23, %s1342_s25 }
 0x114   : > { %963 = vmatmul.mubr.msk.bf16.vlgmr.msra.gmra.mrb[0].mxu0 %vm483_vm0, %v1101_v3  ;;  %p1340_p7 = pneg %p1339_p5  ;;  %p1345_p8 = scmp.lt.s32.totalorder %s1343_s26, %s1337_s20 }
 0x115   : > { %976 = vmatprep.mubr.msk.bf16.mxu0 %vm1436_vm1, %v1435_v5  ;;  %975 = vmatpush3.bf16.msra.mxu0 %v1104_v7 }
 0x116   : > { %p1346_p11 = por %p1345_p8, %p1344_p9 }
 0x118   : > { %p1347_p3 = pnand %p1346_p11, %p1340_p7 }
 0x1e7   : > { %v964_v9 = vpop.f32.mrb[0].mxu0 }
 0x1e8   : > { %v524_v10 = vpop.f32.mrb[1].mxu0  ;;  %v533_v11 = vadd.f32 %v964_v9, %v912_v8 }
 0x1e9   : > { %v525_v12 = vadd.f32 %v912_v8, %v524_v10  ;;  %v965_v13 = vpop.f32.mrb[2].mxu0 }
 0x1ea   : > { %v527_v14 = vpop.f32.mrb[3].mxu0  ;;  %v536_v16 = vadd.f32 %v965_v13, %v912_v8  ;;  %v541_v18 = vmax.f32 %v533_v11, 0.0 }
 0x1eb   : > { %v539_v15 = vmax.f32 %v525_v12, 0.0  ;;  %v528_v17 = vadd.f32 %v912_v8, %v527_v14 }
 0x1ec   : > { %v542_v21 = vmax.f32 %v536_v16, 0.0  ;;  %v546_v24 = vsel %vm483_vm0, %v541_v18, 0.0 }
 0x1ed   : > { %v540_v19 = vmax.f32 %v528_v17, 0.0  ;;  %v543_v20 = vsel %vm483_vm0, %v539_v15, 0.0 }
 0x1ee   : > { %v548_v26 = vsel %vm483_vm0, %v542_v21, 0.0 }
 0x1ef   : > { %v544_v22 = vsel %vm483_vm0, %v540_v19, 0.0 }
 0x1f0   : > { %v545_v23 = vadd.f32 %v544_v22, %v543_v20 }
 0x1f2   : > { %v547_v25 = vadd.f32 %v546_v24, %v545_v23 }
 0x1f4   : > { %v549_v27 = vadd.f32 %v548_v26, %v547_v25 }
 0x1f6   : > { %v550_v28 = vrot.slane %v549_v27, 4 }
 0x1f8   : > { %v551_v29 = vadd.f32 %v550_v28, %v549_v27 }
 0x1fa   : > { %v552_v30 = vrot.slane %v551_v29, 2 }
 0x1fc   : > { %v553_v31 = vadd.f32 %v552_v30, %v551_v29 }
 0x1fe   : > { %v554_v32 = vrot.slane %v553_v31, 1 }
 0x200   : > { %v555_v33 = vadd.f32 %v554_v32, %v553_v31 }
 0x202   : > { %v556_v34 = vmul.f32 0.03125, %v555_v33 }
 0x204   : > { %v561_v35 = vpack.c.bf16 %v556_v34, %v556_v34 }
 0x206   : > { %971 = vmatmul.mubr.msk.bf16.vlgmr.msra.gmra.mrb[0].mxu1 %vm483_vm0, %v561_v35 }
 0x2d9   : > { %v612_v37 = vpop.f32.mrb[0].mxu1 }
 0x2da   : > { %v613_v38 = vadd.f32 %v612_v37, %v562_v36  ;;  %v972_v39 = vpop.f32.mrb[1].mxu1 }
 0x2db   : > { %v615_v40 = vpop.f32.mrb[2].mxu1 }
 0x2dc   : > { %v618_v41 = vmax.f32 %v613_v38, 0.0  ;;  %v973_v42 = vpop.f32.mrb[3].mxu1 }
 0x2de   : > { %v621_v43 = vpack.c.bf16 %v618_v41, %v618_v41 }
 0x2e0   : > { %977 = vmatmul.mubr.msk.bf16.vlgmr.msra.gmra.mrb[4].mxu0 %vm629_vm2, %v621_v43 }
 0x3b3   : > { %v667_v45 = vpop.f32.mrb[4].mxu0 }
 0x3b4   : > { %v668_v46 = vadd.f32 %v667_v45, %v622_v44  ;;  %v978_v47 = vpop.f32.mrb[5].mxu0 }
 0x3b5   : > { %v670_v48 = vpop.f32.mrb[6].mxu0 }
 0x3b6   : > { %v673_v49 = vsub.f32 0.0, %v668_v46  ;;  %v979_v50 = vpop.f32.mrb[7].mxu0 }
 0x3b8   : > { %v674_v51 = vmul.f32 1.442695, %v673_v49 }
 0x3ba   : > { %1105 = vpow2.f32 %v674_v51 }
 0x3c4   : > { %v1106_v52 = vpop.eup %1105 }
 0x3c5   : > { %v676_v53 = vadd.f32 1.0, %v1106_v52 }
 0x3c7   : > { %1107 = vrcp.f32 %v676_v53 }
 0x3d1   : > { %v1108_v59 = vpop.eup %1107 }
 0x3d2   : > { %v690_v0 = vrot.slane %v1108_v59, %v689_v57 }
 0x3d4   : > { %v691_v1 = vmul.f32 %v690_v0, %v539_v15  ;;  %v692_v2 = vmul.f32 %v690_v0, %v540_v19  ;;  %v693_v3 = vmul.f32 %v690_v0, %v541_v18  ;;  %v694_v4 = vmul.f32 %v690_v0, %v542_v21 }
 0x3d6   : > { %v695_v5 = vadd.f32 %v942_v60, %v691_v1  ;;  %v696_v6 = vadd.f32 %v943_v61, %v692_v2  ;;  %v697_v7 = vadd.f32 %v946_v62, %v693_v3  ;;  %v698_v8 = vadd.f32 %v947_v63, %v694_v4 }
 0x3d8   : > { %v935_v9 = vpack.c.bf16 %v695_v5, %v695_v5  ;;  %v936_v10 = vpack.c.bf16 %v696_v6, %v696_v6  ;;  %v937_v11 = vpack.c.bf16 %v697_v7, %v697_v7  ;;  %v938_v12 = vpack.c.bf16 %v698_v8, %v698_v8 }
 0x3da   : > { %716 = vst.msk [vmem:[%s444_s9] sm:$0xf] %vm715_vm3, %v935_v9  ;;  %717 = vst.msk [vmem:[%s444_s9 + $0x4] sm:$0xf] %vm715_vm3, %v936_v10 }
 0x3db   : > { %718 = vst.msk [vmem:[%s444_s9 + $0x8] sm:$0xf] %vm715_vm3, %v937_v11  ;;  %719 = vst.msk [vmem:[%s444_s9 + $0xc] sm:$0xf] %vm715_vm3, %v938_v12 }
 0x3dc   : > { %1350 = shalt.err (!%p1347_p3)
}
 0x3dd   : > { %s1351_s14 = scalar_lea.hbm %s1843_s24, 256  ;;  %s1355_s16 = scalar_lea.hbm %s1897_s8, 512 }
 0x3de   : > { %p1352_p12 = scmp.ne.s32.totalorder %s1843_s24, %s1351_s14  ;;  %p1356_p0 = scmp.lt.u32.totalorder %s1843_s24, %s1897_s8 }
 0x3df   : > { %p1357_p6 = scmp.lt.u32.totalorder %s1355_s16, %s1351_s14  ;;  %p1359_p4 = scmp.lt.u32.totalorder %s1351_s14, %s1843_s24 }
 0x3e0   : > { %p1353_p1 = pnand %p1352_p12, %p1935_p10 }
 0x3e1   : > { %p1358_p2 = por %p1357_p6, %p1356_p0 }
 0x3e2   : > { %p1354_p13 = pneg %p1353_p1 }
 0x3e3   : > { %p1360_p5 = por %p1359_p4, %p1358_p2 }
 0x3e5   : > { %p1361_p7 = pnand %p1360_p5, %p1354_p13 }
 0x3e7   : > { %1364 = shalt.err (!%p1361_p7)
}
 0x3e8   : > { %s1438_s19 = smov 64   ;;  %s1439_s22 = smov 4  }
 0x3e9   : > { %1008 = dma.vmem_to_hbm [thread:$0]  (%p1935_p10), %s1845_s23, 256, %s1843_s24, %s721_s11, %s1438_s19, %s1438_s19, %s1439_s22  }
 0x3ea PF: > { %s749_s9 = sand.u32 1, %s1411_s27   ;;  %p1936_p9 = scmp.ne.s32.totalorder %s1923_s17, 0 }
 0x3eb   : > { %p1937_p8 = scmp.ge.s32.totalorder %s1423_s30, 2  ;;  %s750_s2 = scalar_lea.sflag [#allocation4], %s749_s9 }
 0x3ed   : > { %p1037_p11 = pnand %p1937_p8, %p1936_p9 }
 0x3ef   : > { %1406 = dma.done.wait (!%p1037_p11), %s750_s2, 256  }
 0x3f0   : > { %1408 = vsyncadd (!%p1037_p11), %s750_s2, 4294967040  ;;  %p27_p3 = scmp.ge.s32.totalorder %s1672_s15, 4   ;;  %s1938_s27 = smov %s1415_s28 }
 0x3f1   : > { %s1939_s28 = smov %s1419_s29  ;;  %s1940_s29 = smov %s1683_s10 }
 0x3f2   : > { %s1941_s30 = smov %s1672_s15  ;;  %29 = sbr.rel (!%p27_p3) target bundleno = 16 (0x10), region = 134 }
 0x3f9   :  { %755 = vsyncpa [#allocation3], 1 }
 0x3fa   :  { %757 = vsyncpa [#allocation3 + $0x1], 1 }
 0x3fb   :  { %758 = vsyncpa [#allocation6], 1 }
 0x3fc   :  { %760 = vsyncpa [#allocation6 + $0x1], 1 }
 0x3fd   :  { %761 = vsyncpa [#allocation9], 1 }
 0x3fe   :  { %762 = vsyncpa [#allocation12], 1 }
 0x3ff   :  { %763 = vsyncpa [#allocation15], 1 }
 0x400   :  { %764 = vsyncpa [#allocation4], 1 }
 0x401   :  { %766 = vsyncpa [#allocation4 + $0x1], 1 }

// kernel: ecapa_forward.15
= control target key start
LH: loop header
LB: loop body
LE: loop exit
PB: predicated region body
PF: predicated region fallthrough
CT: control target
= control target key end

     0   :  { %8 = vsyncpa [#allocation3], 0  ;;  %s2050_s0 = inlined_call_operand.hbm [shape: bf16[2,32,32], index: 0, kind: input, shape index: {}]   ;;  %s2051_s1 = inlined_call_operand.hbm [shape: bf16[3,3,8,8], index: 1, kind: input, shape index: {}]   ;;  %s2052_s2 = inlined_call_operand.hbm [shape: f32[3,8], index: 2, kind: input, shape index: {}]   ;;  %s2053_s3 = inlined_call_operand.hbm [shape: bf16[2,32,32], index: 3, kind: output, shape index: {}]  }
   0x1   :  { %10 = vsyncpa [#allocation3 + $0x1], 0 }
   0x2   :  { %11 = vsyncpa [#allocation6], 0 }
   0x3   :  { %12 = vsyncpa [#allocation4], 0 }
   0x4   :  { %14 = vsyncpa [#allocation4 + $0x1], 0  ;;  %s1687_s12 = smov 0   ;;  %s1689_s13 = smov 0  }
   0x5   :  { %s1691_s14 = smov 0   ;;  %s1693_s15 = smov 0  }
   0x6 LB: > { %s1708_s16 = sadd.s32 4294967295, %s1651_s15   ;;  %s1207_s17 = sadd.s32 4294967294, %s1651_s15   ;;  %s1651_s15 = sphi %s1693_s15, %s2073_s15   ;;  %s1647_s14 = sphi %s1691_s14, %s2072_s14   ;;  %s1643_s13 = sphi %s1689_s13, %s2071_s13   ;;  %s1639_s12 = sphi %s1687_s12, %s2070_s12  }
   0x7   : > { %p40_p0 = scmp.ne.s32.totalorder %s1643_s13, %s1639_s12  ;;  %p2054_p1 = scmp.eq.s32.totalorder %s1708_s16, 0 }
   0x8   : > { %p112_p3 = scmp.eq.s32.totalorder %s1207_s17, 1  ;;  %p1208_p5 = scmp.ge.s32.totalorder %s1651_s15, 1 }
   0x9   : > { %p1717_p4 = por %p2054_p1, %p40_p0  ;;  %p119_p7 = scmp.lt.s32.totalorder %s1651_s15, 3 }
   0xa   : > { %p1722_p6 = por %p112_p3, %p40_p0  ;;  %s1653_s21 = smov [#allocation5]  }
   0xb   : > { %s2057_s18 = scalar_select %p1717_p4, 1, 0 }
   0xc   : > { %s2058_s19 = scalar_select %p1722_p6, 1, 0 }
   0xd   : > { %p1727_p8 = pnand %p1208_p5, %p119_p7  ;;  %s131_s22 = sshll.u32 %s1653_s21, 4  ;;  %s1731_s22 = int_to_ptr.vmem [resolvable:$true] %s131_s22 }
   0xe   : > { %s1654_s24 = smov [#allocation7]   ;;  %s1495_s28 = scalar_lea.hbm %s2051_s1, 576 }
   0xf   : > { %p1400_p9 = pneg %p1727_p8  ;;  %s145_s25 = sshll.u32 %s1654_s24, 4  ;;  %s1742_s25 = int_to_ptr.vmem [resolvable:$true] %s145_s25 }
  0x10   : > { %p1496_p12 = scmp.ne.s32.totalorder %s2051_s1, %s1495_s28  ;;  %p1502_p5 = scmp.lt.u32.totalorder %s1495_s28, %s2051_s1 }
  0x11   : > { %p1738_p11 = pnand %p1400_p9, %p2054_p1 }
  0x13   : > { %p1497_p13 = pneg %p1738_p11 }
  0x15   : > { %p1498_p0 = pnand %p1497_p13, %p1496_p12 }
  0x17   : > { %p1499_p3 = pneg %p1498_p0 }
  0x19   : > { %p1504_p7 = pnand %p1502_p5, %p1499_p3 }
  0x1b   : > { %1507 = shalt.err (!%p1504_p7)
}
  0x1c   : > { %s1508_s6 = scalar_lea.vmem %s1731_s22, 576  ;;  %p1516_p2 = scmp.lt.s32.totalorder %s1731_s22, %s1731_s22 }
  0x1d   : > { %p1509_p9 = scmp.ne.s32.totalorder %s1731_s22, %s1508_s6  ;;  %p1517_p12 = scmp.lt.s32.totalorder %s1508_s6, %s1508_s6 }
  0x1f   : > { %p1511_p10 = pnand %p1509_p9, %p1497_p13  ;;  %p1518_p0 = por %p1517_p12, %p1516_p2 }
  0x21   : > { %p1512_p1 = pneg %p1511_p10 }
  0x23   : > { %p1519_p6 = pnand %p1518_p0, %p1512_p1 }
  0x25   : > { %1522 = shalt.err (!%p1519_p6)
}
  0x26   : > { %s1655_s7 = smov 64   ;;  %s1656_s8 = smov 4  }
  0x27   : > { %1403 = dma.hbm_to_vmem [thread:$0]  (!%p1738_p11), %s2051_s1, 576, %s1731_s22, [#allocation6], %s1655_s7, %s1655_s7, %s1656_s8  }
  0x28   : > { %s1523_s21 = scalar_lea.hbm %s2052_s2, 64 }
  0x29   : > { %p1524_p1 = scmp.ne.s32.totalorder %s2052_s2, %s1523_s21  ;;  %p1530_p10 = scmp.lt.u32.totalorder %s1523_s21, %s2052_s2 }
  0x2b   : > { %p1526_p2 = pnand %p1524_p1, %p1497_p13 }
  0x2d   : > { %p1527_p6 = pneg %p1526_p2 }
  0x2f   : > { %p1532_p3 = pnand %p1530_p10, %p1527_p6 }
  0x31   : > { %1535 = shalt.err (!%p1532_p3)
}
  0x32   : > { %s1536_s22 = scalar_lea.vmem %s1742_s25, 64  ;;  %p1544_p12 = scmp.lt.s32.totalorder %s1742_s25, %s1742_s25 }
  0x33   : > { %p1537_p5 = scmp.ne.s32.totalorder %s1742_s25, %s1536_s22  ;;  %p1545_p0 = scmp.lt.s32.totalorder %s1536_s22, %s1536_s22 }
  0x35   : > { %p1539_p7 = pnand %p1537_p5, %p1497_p13  ;;  %p1546_p1 = por %p1545_p0, %p1544_p12 }
  0x37   : > { %p1540_p9 = pneg %p1539_p7 }
  0x39   : > { %p1547_p2 = pnand %p1546_p1, %p1540_p9 }
  0x3b   : > { %1550 = shalt.err (!%p1547_p2)
}
  0x3c   : > { %1406 = dma.hbm_to_vmem [thread:$0]  (!%p1738_p11), %s2052_s2, 64, %s1742_s25, [#allocation6]  }
  0x3d   : > { %s1800_s4 = sadd.s32 1, %s1651_s15   ;;  %s27_s23 = sadd.s32 1, %s1647_s14 }
  0x3e   : > { %s24_s5 = ssub.s32 %s1651_s15, %s1800_s4  ;;  %p34_p13 = scmp.ne.s32.totalorder %s1647_s14, %s1643_s13 }
  0x3f   : > { %p25_p6 = scmp.eq.s32.totalorder %s24_s5, 0  ;;  %p35_p10 = scmp.eq.s32.totalorder %s1651_s15, 0 }
  0x40   : > { %p2061_p3 = scmp.eq.s32.totalorder %s1708_s16, 1  ;;  %p1417_p7 = scmp.lt.s32.totalorder %s1651_s15, 2 }
  0x41   : > { %s1816_s9 = scalar_select %p25_p6, %s1647_s14, %s27_s23  }
  0x42   : > { %p1810_p5 = por %p2061_p3, %p34_p13  ;;  %p36_p9 = por %p35_p10, %p34_p13 }
  0x43   : > { %s156_s10 = sand.u32 1, %s1647_s14   ;;  %s1260_s25 = sshll.u32 %s1651_s15, 8 }
  0x44   : > { %s2062_s6 = scalar_select %p1810_p5, 1, 0 }
  0x45   : > { %s1212_s11 = sshll.u32 %s156_s10, 4  ;;  %s1823_s24 = scalar_lea.hbm %s2050_s0, %s1260_s25 }
  0x46   : > { %s160_s26 = scalar_lea.vmem [#allocation2], %s1212_s11  ;;  %p1827_p11 = pnand %p1417_p7, %p36_p9 }
  0x47   : > { %s167_s27 = sshll.u32 %s160_s26, 4  ;;  %s1831_s22 = scalar_lea.sflag [#allocation3], %s156_s10  ;;  %s1825_s27 = int_to_ptr.vmem [resolvable:$true] %s167_s27 }
  0x48   : > { %s1551_s29 = scalar_lea.hbm %s1823_s24, 256  ;;  %p1553_p0 = pneg %p1827_p11 }
  0x49   : > { %p1552_p12 = scmp.ne.s32.totalorder %s1823_s24, %s1551_s29  ;;  %s1556_s5 = scalar_lea.hbm %s2050_s0, 512 }
  0x4a   : > { %p1557_p13 = scmp.lt.u32.totalorder %s1823_s24, %s2050_s0  ;;  %p1558_p6 = scmp.lt.u32.totalorder %s1556_s5, %s1551_s29 }
  0x4b   : > { %p1554_p1 = pnand %p1553_p0, %p1552_p12  ;;  %p1560_p3 = scmp.lt.u32.totalorder %s1551_s29, %s1823_s24 }
  0x4c   : > { %p1559_p10 = por %p1558_p6, %p1557_p13 }
  0x4d   : > { %p1555_p2 = pneg %p1554_p1 }
  0x4e   : > { %p1561_p7 = por %p1560_p3, %p1559_p10 }
  0x50   : > { %p1562_p9 = pnand %p1561_p7, %p1555_p2 }
  0x52   : > { %1565 = shalt.err (!%p1562_p9)
}
  0x53   : > { %s1566_s10 = scalar_lea.vmem %s1825_s27, 256  ;;  %s1657_s17 = smov [#allocation2]  }
  0x54   : > { %p1567_p12 = scmp.ne.s32.totalorder %s1825_s27, %s1566_s10  ;;  %s1571_s21 = sshll.u32 %s1657_s17, 4  ;;  %s1572_s21 = int_to_ptr.vmem [resolvable:$false] %s1571_s21 }
  0x55   : > { %s1573_s26 = scalar_lea.vmem %s1572_s21, 512  ;;  %p1574_p4 = scmp.lt.s32.totalorder %s1825_s27, %s1572_s21 }
  0x56   : > { %p1569_p1 = pnand %p1567_p12, %p1553_p0  ;;  %p1575_p13 = scmp.lt.s32.totalorder %s1573_s26, %s1566_s10 }
  0x58   : > { %p1570_p5 = pneg %p1569_p1  ;;  %p1576_p6 = por %p1575_p13, %p1574_p4 }
  0x5a   : > { %p1577_p10 = pnand %p1576_p6, %p1570_p5 }
  0x5c   : > { %1580 = shalt.err (!%p1577_p10)
}
  0x5d   : > { %1410 = dma.hbm_to_vmem [thread:$0]  (!%p1827_p11), %s1823_s24, 256, %s1825_s27, %s1831_s22, %s1655_s7, %s1655_s7, %s1656_s8  }
  0x5e   : > { %179 = sbr.rel (%p1727_p8) target bundleno = 1101 (0x44d), region = 32  ;;  %s1865_s29 = sand.u32 (!%p1727_p8), 1, %s1643_s13  }
  0x5f   : > { %s1216_s30 = sshll.u32 (!%p1727_p8), %s1865_s29, 4  ;;  %s182_s23 = scalar_lea.sflag (!%p1727_p8), [#allocation3], %s1865_s29 }
  0x60   : > { %s185_s28 = scalar_lea.vmem (!%p1727_p8), [#allocation2], %s1216_s30  ;;  %p2064_p4 = scmp.ne.s32.totalorder (!%p1727_p8), %s2057_s18, 0 }
  0x65   : > { %1626 = dma.done.wait (%p2064_p4), %s182_s23, 256  }
  0x66   : > { %1628 = vsyncadd (%p2064_p4), %s182_s23, 4294967040  ;;  %p2065_p5 = scmp.eq.s32.totalorder %s1708_s16, 0 }
  0x68   : > { %1630 = dma.done.wait (%p2065_p5), [#allocation6], 640   ;;  %p2066_p8 = pmov %p2065_p5 }
  0x69   : > { %vm228_vm0 = vcmask 1040384   ;;  %vm291_vm1 = vcmask 1043456   ;;  %v1879_v0 = vld [vmem:[%s185_s28] sm:$0xf]  ;;  %v1881_v1 = vld [vmem:[%s185_s28 + $0x4] sm:$0xf] }
  0x6a   : > { %1632 = vsyncadd (%p2066_p8), [#allocation6], 4294966656  ;;  %v1883_v2 = vld [vmem:[%s185_s28 + $0x8] sm:$0xf]  ;;  %v221_v3 = vunpack.c.l.bf16 %v1879_v0  ;;  %v222_v4 = vunpack.c.l.bf16 %v1881_v1  ;;  %v1887_v5 = vld [vmem:[%s185_s28 + $0xc] sm:$0xf]  ;;  %v1220_v7 = vcombine.low %v1879_v0, %v1881_v1 }
  0x6b   : > { %v223_v6 = vunpack.c.l.bf16 %v1883_v2  ;;  %v265_v8 = vld [vmem:[#allocation5] sm:$0xf]  ;;  %v409_v9 = vld [vmem:[#allocation5 + $0x8] sm:$0xf]  ;;  %vm238_vm2 = vcmask 1041408   ;;  %v224_v10 = vunpack.c.l.bf16 %v1887_v5  ;;  %vm250_vm3 = vcmask 1045504  }
  0x6c   : > { %1380 = vmatprep.subr.msk.bf16.mxu0 %vm291_vm1, %v265_v8  ;;  %v357_v11 = vsel %vm291_vm1, %v265_v8, 0  ;;  %v269_v12 = vld [vmem:[#allocation5 + $0x4] sm:$0xf]  ;;  %v226_v13 = vrot.slane %v221_v3, 2  ;;  %v239_v14 = vrot.slane %v221_v3, 6  ;;  %v240_v15 = vrot.slane %v222_v4, 6 }
  0x6d   : > { %v242_v16 = vrot.slane %v223_v6, 6  ;;  %s1658_s18 = smov 120   ;;  %1308 = vmatpush3.bf16.msra.mxu0 %v357_v11  ;;  %v231_v17 = vrot.slane %v224_v10, 6  ;;  %v251_v18 = vrot.slane %v222_v4, 2  ;;  %v253_v19 = vrot.slane %v223_v6, 2  ;;  %1379 = vmatprep.subr.msk.bf16.mxu1 %vm291_vm1, %v269_v12  ;;  %s1659_s20 = smov 112  }
  0x6e   : > { %280 = vrot.lane.b32.xlu1 %v1220_v7, %s1658_s18  ;;  %v233_v20 = vrot.slane %v224_v10, 4  ;;  %1381 = vmatprep.subr.msk.bf16.mxu0 %vm291_vm1, %v409_v9  ;;  %v229_v21 = vsel %vm228_vm0, %v226_v13, %v221_v3  ;;  %v241_v22 = vsel %vm238_vm2, %v239_v14, %v240_v15  ;;  %v255_v24 = vrot.slane %v224_v10, 2  ;;  %v572_v48 = vld [vmem:[#allocation5 + $0x10] sm:$0xf]  ;;  %v568_v50 = vld [vmem:[#allocation5 + $0xc] sm:$0xf] }
  0x6f   : > { %v243_v23 = vsel %vm238_vm2, %v240_v15, %v242_v16  ;;  %v249_v25 = vsel %vm238_vm2, %v229_v21, %v239_v14  ;;  %v244_v26 = vsel %vm238_vm2, %v242_v16, %v231_v17  ;;  %v252_v27 = vsel %vm250_vm3, %v226_v13, %v251_v18  ;;  %s1660_s7 = smov 104   ;;  %v1228_v56 = vld [vmem:[#allocation7] ss:$0 sm:$0xff]  ;;  %s1929_s8 = scalar_lea.vmem [#allocation8], %s1216_s30 }
  0x70   : > { %v254_v28 = vsel %vm250_vm3, %v251_v18, %v253_v19  ;;  %v266_v29 = vpack.c.bf16 %v241_v22, %v249_v25  ;;  %v235_v31 = vsel %vm228_vm0, %v231_v17, %v233_v20  ;;  %v256_v32 = vsel %vm250_vm3, %v253_v19, %v255_v24  ;;  %s1661_s24 = smov 24   ;;  %s1662_s27 = smov 8  }
  0x71   : > { %v410_v30 = vpack.c.bf16 %v254_v28, %v252_v27  ;;  %v262_v33 = vrot.slane %v235_v31, 2  ;;  %v293_v34 = vsel %vm291_vm1, %v269_v12, 0  ;;  %v267_v35 = vpack.c.bf16 %v244_v26, %v243_v23  ;;  %s1663_s22 = smov 16   ;;  %s1273_s5 = sshll.u32 %s1708_s16, 8 }
  0x72   : > { %346 = vrot.lane.b32.xlu0 %v266_v29, %s1658_s18  ;;  %1302 = vmatpush3.bf16.msra.mxu1 %v293_v34  ;;  %v1221_v38 = vcombine.low %v1883_v2, %v1887_v5  ;;  %v1470_v39 = vpack.i.bf16 %v224_v10, %v223_v6  ;;  %v1465_v40 = vpack.i.bf16 %v222_v4, %v221_v3  ;;  %vm284_vm4 = vcmask 64512   ;;  %s1115_s11 = sshll.u32 %s1929_s8, 4  ;;  %s2002_s17 = scalar_lea.hbm %s2053_s3, %s1273_s5  ;;  %s2004_s11 = int_to_ptr.vmem [resolvable:$true] %s1115_s11 }
  0x73   : > { %414 = vrot.lane.b32.xlu1 %v410_v30, %s1658_s18  ;;  %v264_v36 = vsel %vm250_vm3, %v255_v24, %v262_v33  ;;  %v425_v43 = vsel %vm291_vm1, %v409_v9, 0  ;;  %1382 = vmatprep.subr.msk.bf16.mxu1 %vm291_vm1, %v572_v48  ;;  %v582_v49 = vsel %vm291_vm1, %v572_v48, 0  ;;  %vm509_vm5 = vcmask 60416   ;;  %s1102_s16 = scalar_lea.sflag [#allocation4], %s1865_s29  ;;  %s1581_s21 = scalar_lea.vmem %s2004_s11, 256 }
  0x74   : > { %v411_v37 = vpack.c.bf16 %v264_v36, %v256_v32  ;;  %v640_v18 = vsel %vm291_vm1, %v568_v50, 0  ;;  %vm794_vm6 = vcmask 126016   ;;  %vm1079_vm7 = vcmask 191616   ;;  %p1582_p11 = scmp.ne.s32.totalorder %s2004_s11, %s1581_s21  ;;  %p2067_p0 = scmp.ne.s32.totalorder %s2062_s6, 0 }
  0x75   : > { %vm1096_vm8 = vcmask 257216   ;;  %s1664_s26 = smov [#allocation8]  }
  0x76   : > { %348 = vrot.lane.b32.xlu0 %v267_v35, %s1658_s18  ;;  %p1583_p2 = pnand %p1582_p11, %p2067_p0  ;;  %s1585_s30 = sshll.u32 %s1664_s26, 4  ;;  %s1586_s30 = int_to_ptr.vmem [resolvable:$false] %s1585_s30 }
  0x77   : > { %416 = vrot.lane.b32.xlu1 %v411_v37, %s1658_s18  ;;  %s1587_s23 = scalar_lea.vmem %s1586_s30, 512  ;;  %p1588_p7 = scmp.lt.s32.totalorder %s2004_s11, %s1586_s30 }
  0x78   : > { %p1584_p3 = pneg %p1583_p2  ;;  %p1589_p9 = scmp.lt.s32.totalorder %s1587_s23, %s1581_s21 }
  0x7a   : > { %282 = vrot.lane.b32.xlu0 %v1221_v38, %s1658_s18  ;;  %p1590_p12 = por %p1589_p9, %p1588_p7 }
  0x7b   : > { %1471 = vrot.lane.b32.xlu1 %v1470_v39, %s1659_s20 }
  0x7c   : > { %p1591_p1 = pnand %p1590_p12, %p1584_p3 }
  0x7e   : > { %1466 = vrot.lane.b32.xlu0 %v1465_v40, %s1659_s20 }
  0x7f   : > { %1481 = vrot.lane.b32.xlu1 %v1470_v39, %s1660_s7 }
  0x82   : > { %1476 = vrot.lane.b32.xlu0 %v1465_v40, %s1660_s7 }
  0x83   : > { %1086 = vrot.lane.b32.xlu1 %v1881_v1, %s1661_s24 }
  0x86   : > { %1084 = vrot.lane.b32.xlu0 %v1879_v0, %s1661_s24 }
  0xe0   : > { %v281_v41 = vpop.permute.xlu1 %280 }
  0xe1   : > { %1303 = vmatprep.mubr.msk.bf16.mxu1 %vm284_vm4, %v281_v41 }
  0xe4   : > { %v347_v42 = vpop.permute.xlu0 %346 }
  0xe5   : > { %1309 = vmatprep.mubr.msk.bf16.mxu0 %vm284_vm4, %v347_v42  ;;  %v415_v44 = vpop.permute.xlu1 %414  ;;  %v692_v42 = vld [vmem:[#allocation5 + $0x14] sm:$0xf] }
  0xe8   : > { %v349_v45 = vpop.permute.xlu0 %348 }
  0xe9   : > { %1310 = vmatmul.mubr.msk.bf16.vlgmr.msra.gmra.mrb[0].mxu0 %vm284_vm4, %v349_v45  ;;  %v417_v47 = vpop.permute.xlu1 %416 }
  0xea   : > { %1314 = vmatpush3.bf16.msra.mxu0 %v425_v43  ;;  %1315 = vmatprep.mubr.msk.bf16.mxu0 %vm284_vm4, %v415_v44 }
  0xec   : > { %v283_v46 = vpop.permute.xlu0 %282 }
  0xed   : > { %1304 = vmatmul.mubr.msk.bf16.vlgmr.msra.gmra.mrb[0].mxu1 %vm284_vm4, %v283_v46  ;;  %v1472_v57 = vpop.permute.xlu1 %1471 }
  0xee   : > { %1320 = vmatpush3.bf16.msra.mxu1 %v582_v49 }
  0xef   : > { %1383 = vmatprep.subr.msk.bf16.mxu1 %vm291_vm1, %v568_v50  ;;  %v702_v50 = vsel %vm291_vm1, %v692_v42, 0 }
  0xf0   : > { %v1467_v60 = vpop.permute.xlu0 %1466 }
  0xf5   : > { %1316 = vmatmul.mubr.msk.bf16.vlgmr.msra.gmra.mrb[0].mxu0 %vm284_vm4, %v417_v47 }
 0x1c0   : > { %v1305_v51 = vpop.f32.mrb[0].mxu1 }
 0x1c1   : > { %v329_v52 = vpop.f32.mrb[1].mxu1 }
 0x1c2   : > { %v1306_v53 = vpop.f32.mrb[2].mxu1 }
 0x1c3   : > { %v332_v54 = vpop.f32.mrb[3].mxu1 }
 0x1c8   : > { %v1317_v55 = vpop.f32.mrb[0].mxu0 }
 0x1c9   : > { %v1355_v58 = vadd.f32 %v1317_v55, %v1305_v51  ;;  %v461_v59 = vpop.f32.mrb[1].mxu0  ;;  %v857_v51 = vld [vmem:[#allocation5 + $0x1c] sm:$0xf]  ;;  %v1482_v55 = vpop.permute.xlu1 %1481 }
 0x1ca   : > { %v1356_v61 = vadd.f32 %v461_v59, %v329_v52  ;;  %v1318_v62 = vpop.f32.mrb[2].mxu0  ;;  %1385 = vmatprep.subr.msk.bf16.mxu0 %vm291_vm1, %v857_v51  ;;  %v867_v52 = vsel %vm291_vm1, %v857_v51, 0 }
 0x1cb   : > { %v487_v63 = vadd.f32 %v1355_v58, %v1228_v56  ;;  %v1357_v3 = vadd.f32 %v1318_v62, %v1306_v53  ;;  %v464_v4 = vpop.f32.mrb[3].mxu0  ;;  %1338 = vmatpush3.bf16.msra.mxu0 %v867_v52  ;;  %v853_v53 = vld [vmem:[#allocation5 + $0x18] sm:$0xf] }
 0x1cc   : > { %v485_v6 = vadd.f32 %v1356_v61, %v1228_v56  ;;  %v1358_v7 = vadd.f32 %v464_v4, %v332_v54  ;;  %1386 = vmatprep.subr.msk.bf16.mxu0 %vm291_vm1, %v853_v53  ;;  %v1239_v54 = vld [vmem:[#allocation7 + $0x1] ss:$0 sm:$0xff] }
 0x1cd   : > { %v491_v8 = vmax.f32 %v487_v63, 0.0  ;;  %v488_v9 = vadd.f32 %v1357_v3, %v1228_v56 }
 0x1ce   : > { %v489_v10 = vmax.f32 %v485_v6, 0.0  ;;  %v486_v11 = vadd.f32 %v1358_v7, %v1228_v56  ;;  %v1477_v56 = vpop.permute.xlu0 %1476 }
 0x1cf   : > { %v1263_v12 = vpack.c.bf16 %v491_v8, %v491_v8  ;;  %v492_v13 = vmax.f32 %v488_v9, 0.0  ;;  %v1487_v14 = vadd.low.f32.bf16 %v491_v8, %v1472_v57 }
 0x1d0   : > { %v1261_v15 = vpack.c.bf16 %v489_v10, %v489_v10  ;;  %v490_v16 = vmax.f32 %v486_v11, 0.0  ;;  %v1488_v17 = vadd.low.f32.bf16 %v489_v10, %v1467_v60  ;;  %v925_v11 = vsel %vm291_vm1, %v853_v53, 0 }
 0x1d1   : > { %v1264_v19 = vpack.c.bf16 %v492_v13, %v492_v13  ;;  %v1489_v20 = vadd.high.f32.bf16 %v492_v13, %v1472_v57  ;;  %v545_v21 = vrot.slane %v1487_v14, 6  ;;  %v555_v22 = vrot.slane %v1487_v14, 2  ;;  %512 = vst.msk [vmem:[%s1929_s8 + $0x8] sm:$0xf] %vm509_vm5, %v1263_v12 }
 0x1d2   : > { %v1262_v23 = vpack.c.bf16 %v490_v16, %v490_v16  ;;  %v1490_v24 = vadd.high.f32.bf16 %v490_v16, %v1467_v60  ;;  %v531_v25 = vrot.slane %v1488_v17, 2  ;;  %v542_v26 = vrot.slane %v1488_v17, 6  ;;  %510 = vst.msk [vmem:[%s1929_s8] sm:$0xf] %vm509_vm5, %v1261_v15 }
 0x1d3   : > { %v535_v27 = vrot.slane %v1489_v20, 6  ;;  %v537_v28 = vrot.slane %v1489_v20, 4  ;;  %v557_v29 = vrot.slane %v1489_v20, 2  ;;  %v574_v30 = vpack.c.bf16 %v1489_v20, %v1487_v14  ;;  %513 = vst.msk [vmem:[%s1929_s8 + $0xc] sm:$0xf] %vm509_vm5, %v1264_v19 }
 0x1d4   : > { %v543_v31 = vrot.slane %v1490_v24, 6  ;;  %v553_v32 = vrot.slane %v1490_v24, 2  ;;  %v573_v33 = vpack.c.bf16 %v1490_v24, %v1488_v17  ;;  %v533_v34 = vsel %vm228_vm0, %v531_v25, %v1488_v17  ;;  %511 = vst.msk [vmem:[%s1929_s8 + $0x4] sm:$0xf] %vm509_vm5, %v1262_v23 }
 0x1d5   : > { %v539_v35 = vsel %vm228_vm0, %v535_v27, %v537_v28  ;;  %v547_v36 = vsel %vm238_vm2, %v545_v21, %v535_v27  ;;  %v558_v37 = vsel %vm250_vm3, %v555_v22, %v557_v29  ;;  %v552_v38 = vsel %vm238_vm2, %v533_v34, %v542_v26 }
 0x1d6   : > { %v564_v39 = vrot.slane %v539_v35, 2  ;;  %v546_v40 = vsel %vm238_vm2, %v543_v31, %v545_v21  ;;  %1321 = vmatprep.mubr.msk.bf16.mxu1 %vm284_vm4, %v573_v33  ;;  %v544_v41 = vsel %vm238_vm2, %v542_v26, %v543_v31  ;;  %v554_v43 = vsel %vm250_vm3, %v531_v25, %v553_v32  ;;  %v977_v35 = vld [vmem:[#allocation5 + $0x20] sm:$0xf] }
 0x1d7   : > { %1322 = vmatmul.mubr.msk.bf16.vlgmr.msra.gmra.mrb[4].mxu1 %vm284_vm4, %v574_v30  ;;  %v569_v44 = vpack.c.bf16 %v544_v41, %v552_v38  ;;  %v570_v45 = vpack.c.bf16 %v547_v36, %v546_v40  ;;  %v556_v46 = vsel %vm250_vm3, %v553_v32, %v555_v22 }
 0x1d8   : > { %1326 = vmatpush3.bf16.msra.mxu1 %v640_v18  ;;  %v693_v47 = vpack.c.bf16 %v556_v46, %v554_v43  ;;  %v566_v48 = vsel %vm250_vm3, %v557_v29, %v564_v39  ;;  %v987_v43 = vsel %vm291_vm1, %v977_v35, 0 }
 0x1d9   : > { %1327 = vmatprep.mubr.msk.bf16.mxu1 %vm284_vm4, %v569_v44  ;;  %1384 = vmatprep.subr.msk.bf16.mxu1 %vm291_vm1, %v692_v42  ;;  %v694_v49 = vpack.c.bf16 %v566_v48, %v558_v37  ;;  %v1085_v44 = vpop.permute.xlu0 %1084 }
 0x1e3   : > { %1328 = vmatmul.mubr.msk.bf16.vlgmr.msra.gmra.mrb[4].mxu1 %vm284_vm4, %v570_v45  ;;  %v1087_v45 = vpop.permute.xlu1 %1086 }
 0x1e4   : > { %1332 = vmatpush3.bf16.msra.mxu1 %v702_v50  ;;  %1333 = vmatprep.mubr.msk.bf16.mxu1 %vm284_vm4, %v693_v47  ;;  %v1250_v50 = vld [vmem:[#allocation7 + $0x2] ss:$0 sm:$0xff] }
 0x1ef   : > { %1334 = vmatmul.mubr.msk.bf16.vlgmr.msra.gmra.mrb[4].mxu1 %vm284_vm4, %v694_v49 }
 0x2c2   : > { %v1335_v57 = vpop.f32.mrb[4].mxu1 }
 0x2c3   : > { %v764_v58 = vadd.f32 %v1335_v57, %v1239_v54  ;;  %v738_v59 = vpop.f32.mrb[5].mxu1 }
 0x2c4   : > { %v762_v60 = vadd.f32 %v1239_v54, %v738_v59  ;;  %v1336_v0 = vpop.f32.mrb[6].mxu1 }
 0x2c5   : > { %v768_v61 = vmax.f32 %v764_v58, 0.0  ;;  %v765_v62 = vadd.f32 %v1336_v0, %v1239_v54  ;;  %v741_v1 = vpop.f32.mrb[7].mxu1 }
 0x2c6   : > { %v766_v63 = vmax.f32 %v762_v60, 0.0  ;;  %v763_v3 = vadd.f32 %v1239_v54, %v741_v1 }
 0x2c7   : > { %v1267_v4 = vpack.c.bf16 %v768_v61, %v768_v61  ;;  %v1491_v6 = vadd.low.f32.bf16 %v768_v61, %v1482_v55  ;;  %v769_v7 = vmax.f32 %v765_v62, 0.0 }
 0x2c8   : > { %v1265_v8 = vpack.c.bf16 %v766_v63, %v766_v63  ;;  %v1492_v9 = vadd.low.f32.bf16 %v766_v63, %v1477_v56  ;;  %v767_v10 = vmax.f32 %v763_v3, 0.0 }
 0x2c9   : > { %v830_v12 = vrot.slane %v1491_v6, 6  ;;  %v840_v13 = vrot.slane %v1491_v6, 2  ;;  %v1268_v14 = vpack.c.bf16 %v769_v7, %v769_v7  ;;  %v1493_v15 = vadd.high.f32.bf16 %v769_v7, %v1482_v55  ;;  %786 = vrot.lane.b32.xlu0 %v1267_v4, %s1662_s27 }
 0x2ca   : > { %v816_v16 = vrot.slane %v1492_v9, 2  ;;  %v827_v17 = vrot.slane %v1492_v9, 6  ;;  %v1266_v18 = vpack.c.bf16 %v767_v10, %v767_v10  ;;  %v1494_v19 = vadd.high.f32.bf16 %v767_v10, %v1477_v56 }
 0x2cb   : > { %v820_v20 = vrot.slane %v1493_v15, 6  ;;  %v822_v21 = vrot.slane %v1493_v15, 4  ;;  %v842_v22 = vrot.slane %v1493_v15, 2  ;;  %v859_v23 = vpack.c.bf16 %v1493_v15, %v1491_v6  ;;  %788 = vrot.lane.b32.xlu1 %v1268_v14, %s1662_s27 }
 0x2cc   : > { %v828_v24 = vrot.slane %v1494_v19, 6  ;;  %v838_v25 = vrot.slane %v1494_v19, 2  ;;  %v858_v26 = vpack.c.bf16 %v1494_v19, %v1492_v9  ;;  %v818_v27 = vsel %vm228_vm0, %v816_v16, %v1492_v9 }
 0x2cd   : > { %v824_v28 = vsel %vm228_vm0, %v820_v20, %v822_v21  ;;  %782 = vrot.lane.b32.xlu0 %v1265_v8, %s1662_s27  ;;  %v837_v29 = vsel %vm238_vm2, %v818_v27, %v827_v17  ;;  %v832_v30 = vsel %vm238_vm2, %v830_v12, %v820_v20  ;;  %v843_v31 = vsel %vm250_vm3, %v840_v13, %v842_v22 }
 0x2ce   : > { %v849_v32 = vrot.slane %v824_v28, 2  ;;  %v831_v33 = vsel %vm238_vm2, %v828_v24, %v830_v12  ;;  %1339 = vmatprep.mubr.msk.bf16.mxu0 %vm284_vm4, %v858_v26  ;;  %v829_v34 = vsel %vm238_vm2, %v827_v17, %v828_v24  ;;  %v839_v36 = vsel %vm250_vm3, %v816_v16, %v838_v25 }
 0x2cf   : > { %1340 = vmatmul.mubr.msk.bf16.vlgmr.msra.gmra.mrb[4].mxu0 %vm284_vm4, %v859_v23  ;;  %784 = vrot.lane.b32.xlu1 %v1266_v18, %s1662_s27  ;;  %v854_v37 = vpack.c.bf16 %v829_v34, %v837_v29  ;;  %v855_v38 = vpack.c.bf16 %v832_v30, %v831_v33  ;;  %v841_v39 = vsel %vm250_vm3, %v838_v25, %v840_v13 }
 0x2d0   : > { %1344 = vmatpush3.bf16.msra.mxu0 %v925_v11  ;;  %v978_v40 = vpack.c.bf16 %v841_v39, %v839_v36  ;;  %v851_v41 = vsel %vm250_vm3, %v842_v22, %v849_v32 }
 0x2d1   : > { %1345 = vmatprep.mubr.msk.bf16.mxu0 %vm284_vm4, %v854_v37  ;;  %1387 = vmatprep.subr.msk.bf16.mxu0 %vm291_vm1, %v977_v35  ;;  %v979_v42 = vpack.c.bf16 %v851_v41, %v843_v31 }
 0x2db   : > { %1346 = vmatmul.mubr.msk.bf16.vlgmr.msra.gmra.mrb[4].mxu0 %vm284_vm4, %v855_v38 }
 0x2dc   : > { %1350 = vmatpush3.bf16.msra.mxu0 %v987_v43  ;;  %1351 = vmatprep.mubr.msk.bf16.mxu0 %vm284_vm4, %v978_v40 }
 0x2e7   : > { %1352 = vmatmul.mubr.msk.bf16.vlgmr.msra.gmra.mrb[4].mxu0 %vm284_vm4, %v979_v42 }
 0x33b   : > { %v787_v46 = vpop.permute.xlu0 %786 }
 0x33c   : > { %797 = vst.msk [vmem:[%s1929_s8 + $0x8] sm:$0xf] %vm794_vm6, %v787_v46 }
 0x33d   : > { %v789_v47 = vpop.permute.xlu1 %788 }
 0x33e   : > { %798 = vst.msk [vmem:[%s1929_s8 + $0xc] sm:$0xf] %vm794_vm6, %v789_v47 }
 0x33f   : > { %v783_v48 = vpop.permute.xlu0 %782 }
 0x340   : > { %795 = vst.msk [vmem:[%s1929_s8] sm:$0xf] %vm794_vm6, %v783_v48 }
 0x341   : > { %v785_v49 = vpop.permute.xlu1 %784 }
 0x342   : > { %796 = vst.msk [vmem:[%s1929_s8 + $0x4] sm:$0xf] %vm794_vm6, %v785_v49 }
 0x3ba   : > { %v1353_v51 = vpop.f32.mrb[4].mxu0 }
 0x3bb   : > { %v1049_v52 = vadd.f32 %v1353_v51, %v1250_v50  ;;  %v1023_v53 = vpop.f32.mrb[5].mxu0 }
 0x3bc   : > { %v1047_v54 = vadd.f32 %v1250_v50, %v1023_v53  ;;  %v1354_v55 = vpop.f32.mrb[6].mxu0 }
 0x3bd   : > { %v1053_v56 = vmax.f32 %v1049_v52, 0.0  ;;  %v1050_v57 = vadd.f32 %v1354_v55, %v1250_v50  ;;  %v1026_v58 = vpop.f32.mrb[7].mxu0 }
 0x3be   : > { %v1048_v59 = vadd.f32 %v1250_v50, %v1026_v58  ;;  %v1051_v0 = vmax.f32 %v1047_v54, 0.0 }
 0x3bf   : > { %v1271_v60 = vpack.c.bf16 %v1053_v56, %v1053_v56  ;;  %v1054_v61 = vmax.f32 %v1050_v57, 0.0 }
 0x3c0   : > { %v1052_v1 = vmax.f32 %v1048_v59, 0.0  ;;  %v1269_v63 = vpack.c.bf16 %v1051_v0, %v1051_v0 }
 0x3c1   : > { %v1272_v62 = vpack.c.bf16 %v1054_v61, %v1054_v61  ;;  %1071 = vrot.lane.b32.xlu0 %v1271_v60, %s1663_s22 }
 0x3c2   : > { %v1270_v3 = vpack.c.bf16 %v1052_v1, %v1052_v1 }
 0x3c3   : > { %1073 = vrot.lane.b32.xlu1 %v1272_v62, %s1663_s22 }
 0x3c5   : > { %1067 = vrot.lane.b32.xlu0 %v1269_v63, %s1663_s22 }
 0x3c7   : > { %1069 = vrot.lane.b32.xlu1 %v1270_v3, %s1663_s22 }
 0x3c9   : > { %1088 = vrot.lane.b32.xlu0 %v1883_v2, %s1661_s24 }
 0x3cb   : > { %1090 = vrot.lane.b32.xlu1 %v1887_v5, %s1661_s24 }
 0x433   : > { %v1072_v4 = vpop.permute.xlu0 %1071 }
 0x434   : > { %1082 = vst.msk [vmem:[%s1929_s8 + $0x8] sm:$0xf] %vm1079_vm7, %v1072_v4 }
 0x435   : > { %v1074_v6 = vpop.permute.xlu1 %1073 }
 0x436   : > { %1083 = vst.msk [vmem:[%s1929_s8 + $0xc] sm:$0xf] %vm1079_vm7, %v1074_v6 }
 0x437   : > { %v1068_v7 = vpop.permute.xlu0 %1067 }
 0x438   : > { %1080 = vst.msk [vmem:[%s1929_s8] sm:$0xf] %vm1079_vm7, %v1068_v7 }
 0x439   : > { %1097 = vst.msk [vmem:[%s1929_s8] sm:$0xf] %vm1096_vm8, %v1085_v44  ;;  %v1070_v8 = vpop.permute.xlu1 %1069 }
 0x43a   : > { %1081 = vst.msk [vmem:[%s1929_s8 + $0x4] sm:$0xf] %vm1079_vm7, %v1070_v8 }
 0x43b   : > { %1098 = vst.msk [vmem:[%s1929_s8 + $0x4] sm:$0xf] %vm1096_vm8, %v1087_v45  ;;  %v1089_v2 = vpop.permute.xlu0 %1088 }
 0x43c   : > { %1099 = vst.msk [vmem:[%s1929_s8 + $0x8] sm:$0xf] %vm1096_vm8, %v1089_v2 }
 0x43d   : > { %v1091_v5 = vpop.permute.xlu1 %1090 }
 0x43e   : > { %1100 = vst.msk [vmem:[%s1929_s8 + $0xc] sm:$0xf] %vm1096_vm8, %v1091_v5 }
 0x43f   : > { %1594 = shalt.err (!%p1591_p1)
}
 0x440   : > { %s1595_s28 = scalar_lea.hbm %s2002_s17, 256  ;;  %s1599_s7 = scalar_lea.hbm %s2053_s3, 512 }
 0x441   : > { %p1596_p13 = scmp.ne.s32.totalorder %s2002_s17, %s1595_s28  ;;  %p1600_p4 = scmp.lt.u32.totalorder %s2002_s17, %s2053_s3 }
 0x442   : > { %p1601_p5 = scmp.lt.u32.totalorder %s1599_s7, %s1595_s28  ;;  %p1603_p11 = scmp.lt.u32.totalorder %s1595_s28, %s2002_s17 }
 0x443   : > { %p1597_p6 = pnand %p1596_p13, %p2067_p0 }
 0x444   : > { %p1602_p8 = por %p1601_p5, %p1600_p4 }
 0x445   : > { %p1598_p10 = pneg %p1597_p6 }
 0x446   : > { %p1604_p2 = por %p1603_p11, %p1602_p8 }
 0x448   : > { %p1605_p3 = pnand %p1604_p2, %p1598_p10 }
 0x44a   : > { %1608 = shalt.err (!%p1605_p3)
}
 0x44b   : > { %s1665_s27 = smov 64   ;;  %s1666_s22 = smov 4  }
 0x44c   : > { %1398 = dma.vmem_to_hbm [thread:$0]  (%p2067_p0), %s2004_s11, 256, %s2002_s17, %s1102_s16, %s1665_s27, %s1665_s27, %s1666_s22  }
 0x44d PF: > { %s1130_s5 = sand.u32 1, %s1639_s12   ;;  %p2068_p7 = scmp.ne.s32.totalorder %s2058_s19, 0 }
 0x44e   : > { %p2069_p9 = scmp.ge.s32.totalorder %s1651_s15, 2  ;;  %s1131_s25 = scalar_lea.sflag [#allocation4], %s1130_s5 }
 0x450   : > { %p1412_p12 = pnand %p2069_p9, %p2068_p7 }
 0x452   : > { %1634 = dma.done.wait (!%p1412_p12), %s1131_s25, 256  }
 0x453   : > { %1636 = vsyncadd (!%p1412_p12), %s1131_s25, 4294967040  ;;  %p17_p1 = scmp.ge.s32.totalorder %s1800_s4, 4   ;;  %s2070_s12 = smov %s1643_s13 }
 0x454   : > { %s2071_s13 = smov %s1647_s14  ;;  %s2072_s14 = smov %s1816_s9 }
 0x455   : > { %s2073_s15 = smov %s1800_s4  ;;  %19 = sbr.rel (!%p17_p1) target bundleno = 6 (0x6), region = 93 }
 0x45c   :  { %1136 = vsyncpa [#allocation3], 1 }
 0x45d   :  { %1138 = vsyncpa [#allocation3 + $0x1], 1 }
 0x45e   :  { %1139 = vsyncpa [#allocation6], 1 }
 0x45f   :  { %1140 = vsyncpa [#allocation4], 1 }
 0x460   :  { %1142 = vsyncpa [#allocation4 + $0x1], 1 }

// kernel: ecapa_forward.18
= control target key start
LH: loop header
LB: loop body
LE: loop exit
PB: predicated region body
PF: predicated region fallthrough
CT: control target
= control target key end

     0   :  { %8 = vsyncpa [#allocation3], 0  ;;  %s2084_s0 = inlined_call_operand.hbm [shape: bf16[2,32,32], index: 0, kind: input, shape index: {}]   ;;  %s2085_s1 = inlined_call_operand.hbm [shape: bf16[3,3,8,8], index: 1, kind: input, shape index: {}]   ;;  %s2086_s2 = inlined_call_operand.hbm [shape: f32[3,8], index: 2, kind: input, shape index: {}]   ;;  %s2087_s3 = inlined_call_operand.hbm [shape: bf16[2,32,32], index: 3, kind: output, shape index: {}]  }
   0x1   :  { %10 = vsyncpa [#allocation3 + $0x1], 0 }
   0x2   :  { %11 = vsyncpa [#allocation6], 0 }
   0x3   :  { %12 = vsyncpa [#allocation4], 0 }
   0x4   :  { %14 = vsyncpa [#allocation4 + $0x1], 0  ;;  %s1715_s12 = smov 0   ;;  %s1717_s13 = smov 0  }
   0x5   :  { %s1719_s14 = smov 0   ;;  %s1721_s15 = smov 0  }
   0x6 LB: > { %s1736_s16 = sadd.s32 4294967295, %s1679_s15   ;;  %s1235_s17 = sadd.s32 4294967294, %s1679_s15   ;;  %s1679_s15 = sphi %s1721_s15, %s2107_s15   ;;  %s1675_s14 = sphi %s1719_s14, %s2106_s14   ;;  %s1671_s13 = sphi %s1717_s13, %s2105_s13   ;;  %s1667_s12 = sphi %s1715_s12, %s2104_s12  }
   0x7   : > { %p40_p0 = scmp.ne.s32.totalorder %s1671_s13, %s1667_s12  ;;  %p2088_p1 = scmp.eq.s32.totalorder %s1736_s16, 0 }
   0x8   : > { %p112_p3 = scmp.eq.s32.totalorder %s1235_s17, 1  ;;  %p1236_p5 = scmp.ge.s32.totalorder %s1679_s15, 1 }
   0x9   : > { %p1745_p4 = por %p2088_p1, %p40_p0  ;;  %p119_p7 = scmp.lt.s32.totalorder %s1679_s15, 3 }
   0xa   : > { %p1750_p6 = por %p112_p3, %p40_p0  ;;  %s1681_s21 = smov [#allocation5]  }
   0xb   : > { %s2091_s18 = scalar_select %p1745_p4, 1, 0 }
   0xc   : > { %s2092_s19 = scalar_select %p1750_p6, 1, 0 }
   0xd   : > { %p1755_p8 = pnand %p1236_p5, %p119_p7  ;;  %s131_s22 = sshll.u32 %s1681_s21, 4  ;;  %s1759_s22 = int_to_ptr.vmem [resolvable:$true] %s131_s22 }
   0xe   : > { %s1682_s24 = smov [#allocation7]   ;;  %s1523_s28 = scalar_lea.hbm %s2085_s1, 576 }
   0xf   : > { %p1428_p9 = pneg %p1755_p8  ;;  %s145_s25 = sshll.u32 %s1682_s24, 4  ;;  %s1770_s25 = int_to_ptr.vmem [resolvable:$true] %s145_s25 }
  0x10   : > { %p1524_p12 = scmp.ne.s32.totalorder %s2085_s1, %s1523_s28  ;;  %p1530_p5 = scmp.lt.u32.totalorder %s1523_s28, %s2085_s1 }
  0x11   : > { %p1766_p11 = pnand %p1428_p9, %p2088_p1 }
  0x13   : > { %p1525_p13 = pneg %p1766_p11 }
  0x15   : > { %p1526_p0 = pnand %p1525_p13, %p1524_p12 }
  0x17   : > { %p1527_p3 = pneg %p1526_p0 }
  0x19   : > { %p1532_p7 = pnand %p1530_p5, %p1527_p3 }
  0x1b   : > { %1535 = shalt.err (!%p1532_p7)
}
  0x1c   : > { %s1536_s6 = scalar_lea.vmem %s1759_s22, 576  ;;  %p1544_p2 = scmp.lt.s32.totalorder %s1759_s22, %s1759_s22 }
  0x1d   : > { %p1537_p9 = scmp.ne.s32.totalorder %s1759_s22, %s1536_s6  ;;  %p1545_p12 = scmp.lt.s32.totalorder %s1536_s6, %s1536_s6 }
  0x1f   : > { %p1539_p10 = pnand %p1537_p9, %p1525_p13  ;;  %p1546_p0 = por %p1545_p12, %p1544_p2 }
  0x21   : > { %p1540_p1 = pneg %p1539_p10 }
  0x23   : > { %p1547_p6 = pnand %p1546_p0, %p1540_p1 }
  0x25   : > { %1550 = shalt.err (!%p1547_p6)
}
  0x26   : > { %s1683_s7 = smov 64   ;;  %s1684_s8 = smov 4  }
  0x27   : > { %1431 = dma.hbm_to_vmem [thread:$0]  (!%p1766_p11), %s2085_s1, 576, %s1759_s22, [#allocation6], %s1683_s7, %s1683_s7, %s1684_s8  }
  0x28   : > { %s1551_s21 = scalar_lea.hbm %s2086_s2, 64 }
  0x29   : > { %p1552_p1 = scmp.ne.s32.totalorder %s2086_s2, %s1551_s21  ;;  %p1558_p10 = scmp.lt.u32.totalorder %s1551_s21, %s2086_s2 }
  0x2b   : > { %p1554_p2 = pnand %p1552_p1, %p1525_p13 }
  0x2d   : > { %p1555_p6 = pneg %p1554_p2 }
  0x2f   : > { %p1560_p3 = pnand %p1558_p10, %p1555_p6 }
  0x31   : > { %1563 = shalt.err (!%p1560_p3)
}
  0x32   : > { %s1564_s22 = scalar_lea.vmem %s1770_s25, 64  ;;  %p1572_p12 = scmp.lt.s32.totalorder %s1770_s25, %s1770_s25 }
  0x33   : > { %p1565_p5 = scmp.ne.s32.totalorder %s1770_s25, %s1564_s22  ;;  %p1573_p0 = scmp.lt.s32.totalorder %s1564_s22, %s1564_s22 }
  0x35   : > { %p1567_p7 = pnand %p1565_p5, %p1525_p13  ;;  %p1574_p1 = por %p1573_p0, %p1572_p12 }
  0x37   : > { %p1568_p9 = pneg %p1567_p7 }
  0x39   : > { %p1575_p2 = pnand %p1574_p1, %p1568_p9 }
  0x3b   : > { %1578 = shalt.err (!%p1575_p2)
}
  0x3c   : > { %1434 = dma.hbm_to_vmem [thread:$0]  (!%p1766_p11), %s2086_s2, 64, %s1770_s25, [#allocation6]  }
  0x3d   : > { %s1828_s4 = sadd.s32 1, %s1679_s15   ;;  %s27_s23 = sadd.s32 1, %s1675_s14 }
  0x3e   : > { %s24_s5 = ssub.s32 %s1679_s15, %s1828_s4  ;;  %p34_p13 = scmp.ne.s32.totalorder %s1675_s14, %s1671_s13 }
  0x3f   : > { %p25_p6 = scmp.eq.s32.totalorder %s24_s5, 0  ;;  %p35_p10 = scmp.eq.s32.totalorder %s1679_s15, 0 }
  0x40   : > { %p2095_p3 = scmp.eq.s32.totalorder %s1736_s16, 1  ;;  %p1445_p7 = scmp.lt.s32.totalorder %s1679_s15, 2 }
  0x41   : > { %s1844_s9 = scalar_select %p25_p6, %s1675_s14, %s27_s23  }
  0x42   : > { %p1838_p5 = por %p2095_p3, %p34_p13  ;;  %p36_p9 = por %p35_p10, %p34_p13 }
  0x43   : > { %s156_s10 = sand.u32 1, %s1675_s14   ;;  %s1288_s25 = sshll.u32 %s1679_s15, 8 }
  0x44   : > { %s2096_s6 = scalar_select %p1838_p5, 1, 0 }
  0x45   : > { %s1240_s11 = sshll.u32 %s156_s10, 4  ;;  %s1851_s24 = scalar_lea.hbm %s2084_s0, %s1288_s25 }
  0x46   : > { %s160_s26 = scalar_lea.vmem [#allocation2], %s1240_s11  ;;  %p1855_p11 = pnand %p1445_p7, %p36_p9 }
  0x47   : > { %s167_s27 = sshll.u32 %s160_s26, 4  ;;  %s1859_s22 = scalar_lea.sflag [#allocation3], %s156_s10  ;;  %s1853_s27 = int_to_ptr.vmem [resolvable:$true] %s167_s27 }
  0x48   : > { %s1579_s29 = scalar_lea.hbm %s1851_s24, 256  ;;  %p1581_p0 = pneg %p1855_p11 }
  0x49   : > { %p1580_p12 = scmp.ne.s32.totalorder %s1851_s24, %s1579_s29  ;;  %s1584_s5 = scalar_lea.hbm %s2084_s0, 512 }
  0x4a   : > { %p1585_p13 = scmp.lt.u32.totalorder %s1851_s24, %s2084_s0  ;;  %p1586_p6 = scmp.lt.u32.totalorder %s1584_s5, %s1579_s29 }
  0x4b   : > { %p1582_p1 = pnand %p1581_p0, %p1580_p12  ;;  %p1588_p3 = scmp.lt.u32.totalorder %s1579_s29, %s1851_s24 }
  0x4c   : > { %p1587_p10 = por %p1586_p6, %p1585_p13 }
  0x4d   : > { %p1583_p2 = pneg %p1582_p1 }
  0x4e   : > { %p1589_p7 = por %p1588_p3, %p1587_p10 }
  0x50   : > { %p1590_p9 = pnand %p1589_p7, %p1583_p2 }
  0x52   : > { %1593 = shalt.err (!%p1590_p9)
}
  0x53   : > { %s1594_s10 = scalar_lea.vmem %s1853_s27, 256  ;;  %s1685_s17 = smov [#allocation2]  }
  0x54   : > { %p1595_p12 = scmp.ne.s32.totalorder %s1853_s27, %s1594_s10  ;;  %s1599_s21 = sshll.u32 %s1685_s17, 4  ;;  %s1600_s21 = int_to_ptr.vmem [resolvable:$false] %s1599_s21 }
  0x55   : > { %s1601_s26 = scalar_lea.vmem %s1600_s21, 512  ;;  %p1602_p4 = scmp.lt.s32.totalorder %s1853_s27, %s1600_s21 }
  0x56   : > { %p1597_p1 = pnand %p1595_p12, %p1581_p0  ;;  %p1603_p13 = scmp.lt.s32.totalorder %s1601_s26, %s1594_s10 }
  0x58   : > { %p1598_p5 = pneg %p1597_p1  ;;  %p1604_p6 = por %p1603_p13, %p1602_p4 }
  0x5a   : > { %p1605_p10 = pnand %p1604_p6, %p1598_p5 }
  0x5c   : > { %1608 = shalt.err (!%p1605_p10)
}
  0x5d   : > { %1438 = dma.hbm_to_vmem [thread:$0]  (!%p1855_p11), %s1851_s24, 256, %s1853_s27, %s1859_s22, %s1683_s7, %s1683_s7, %s1684_s8  }
  0x5e   : > { %179 = sbr.rel (%p1755_p8) target bundleno = 1104 (0x450), region = 32  ;;  %s1893_s29 = sand.u32 (!%p1755_p8), 1, %s1671_s13  }
  0x5f   : > { %s1244_s30 = sshll.u32 (!%p1755_p8), %s1893_s29, 4  ;;  %s182_s23 = scalar_lea.sflag (!%p1755_p8), [#allocation3], %s1893_s29 }
  0x60   : > { %s185_s28 = scalar_lea.vmem (!%p1755_p8), [#allocation2], %s1244_s30  ;;  %p2098_p4 = scmp.ne.s32.totalorder (!%p1755_p8), %s2091_s18, 0 }
  0x65   : > { %1654 = dma.done.wait (%p2098_p4), %s182_s23, 256  }
  0x66   : > { %1656 = vsyncadd (%p2098_p4), %s182_s23, 4294967040  ;;  %p2099_p5 = scmp.eq.s32.totalorder %s1736_s16, 0 }
  0x68   : > { %1658 = dma.done.wait (%p2099_p5), [#allocation6], 640   ;;  %p2100_p8 = pmov %p2099_p5 }
  0x69   : > { %vm232_vm0 = vcmask 1040384   ;;  %vm234_vm1 = vcmask 1041408   ;;  %vm301_vm2 = vcmask 1043456   ;;  %v1907_v0 = vld [vmem:[%s185_s28] sm:$0xf]  ;;  %vm247_vm3 = vcmask 1042432  }
  0x6a   : > { %1660 = vsyncadd (%p2100_p8), [#allocation6], 4294966656  ;;  %v1909_v1 = vld [vmem:[%s185_s28 + $0x4] sm:$0xf]  ;;  %v1911_v2 = vld [vmem:[%s185_s28 + $0x8] sm:$0xf]  ;;  %v221_v3 = vunpack.c.l.bf16 %v1907_v0 }
  0x6b   : > { %v222_v4 = vunpack.c.l.bf16 %v1909_v1  ;;  %v1915_v5 = vld [vmem:[%s185_s28 + $0xc] sm:$0xf]  ;;  %v223_v6 = vunpack.c.l.bf16 %v1911_v2  ;;  %v1248_v7 = vcombine.low %v1907_v0, %v1909_v1  ;;  %v275_v8 = vld [vmem:[#allocation5] sm:$0xf]  ;;  %v419_v9 = vld [vmem:[#allocation5 + $0x8] sm:$0xf] }
  0x6c   : > { %v224_v10 = vunpack.c.l.bf16 %v1915_v5  ;;  %vm260_vm4 = vcmask 1044480   ;;  %1408 = vmatprep.subr.msk.bf16.mxu0 %vm301_vm2, %v275_v8  ;;  %v367_v11 = vsel %vm301_vm2, %v275_v8, 0  ;;  %v279_v12 = vld [vmem:[#allocation5 + $0x4] sm:$0xf]  ;;  %v226_v13 = vrot.slane %v221_v3, 3  ;;  %s1686_s18 = smov 120  }
  0x6d   : > { %v228_v14 = vrot.slane %v221_v3, 1  ;;  %v230_v15 = vrot.slane %v221_v3, 7  ;;  %v248_v16 = vrot.slane %v221_v3, 5  ;;  %290 = vrot.lane.b32.xlu1 %v1248_v7, %s1686_s18  ;;  %1336 = vmatpush3.bf16.msra.mxu0 %v367_v11  ;;  %v249_v17 = vrot.slane %v222_v4, 5  ;;  %s1687_s20 = smov 112   ;;  %s1688_s7 = smov 104  }
  0x6e   : > { %v251_v18 = vrot.slane %v223_v6, 5  ;;  %v253_v19 = vrot.slane %v224_v10, 5  ;;  %v261_v20 = vrot.slane %v222_v4, 3  ;;  %1409 = vmatprep.subr.msk.bf16.mxu0 %vm301_vm2, %v419_v9  ;;  %1407 = vmatprep.subr.msk.bf16.mxu1 %vm301_vm2, %v279_v12  ;;  %v263_v22 = vrot.slane %v223_v6, 3  ;;  %v591_v54 = vld [vmem:[#allocation5 + $0x10] sm:$0xf] }
  0x6f   : > { %v233_v21 = vsel %vm232_vm0, %v226_v13, %v228_v14  ;;  %v237_v23 = vrot.slane %v224_v10, 6  ;;  %v239_v24 = vrot.slane %v224_v10, 4  ;;  %v250_v26 = vsel %vm247_vm3, %v248_v16, %v249_v17  ;;  %v587_v56 = vld [vmem:[#allocation5 + $0xc] sm:$0xf]  ;;  %v1256_v62 = vld [vmem:[#allocation7] ss:$0 sm:$0xff] }
  0x70   : > { %v235_v25 = vsel %vm234_vm1, %v233_v21, %v230_v15  ;;  %v252_v27 = vsel %vm247_vm3, %v249_v17, %v251_v18  ;;  %v254_v29 = vsel %vm247_vm3, %v251_v18, %v253_v19  ;;  %v262_v30 = vsel %vm260_vm4, %v226_v13, %v261_v20  ;;  %s1959_s8 = scalar_lea.vmem [#allocation8], %s1244_s30  ;;  %s1689_s24 = smov 24  }
  0x71   : > { %v259_v28 = vsel %vm247_vm3, %v235_v25, %v248_v16  ;;  %v264_v31 = vsel %vm260_vm4, %v261_v20, %v263_v22  ;;  %v241_v34 = vrot.slane %v224_v10, 2  ;;  %v243_v35 = vsel %vm232_vm0, %v237_v23, %v239_v24  ;;  %s1690_s27 = smov 8   ;;  %s1691_s22 = smov 16  }
  0x72   : > { %v276_v32 = vpack.c.bf16 %v250_v26, %v259_v28  ;;  %v420_v33 = vpack.c.bf16 %v264_v31, %v262_v30  ;;  %v265_v36 = vrot.slane %v224_v10, 3  ;;  %v303_v37 = vsel %vm301_vm2, %v279_v12, 0  ;;  %s1301_s5 = sshll.u32 %s1736_s16, 8  ;;  %s1143_s11 = sshll.u32 %s1959_s8, 4  ;;  %s2038_s11 = int_to_ptr.vmem [resolvable:$true] %s1143_s11 }
  0x73   : > { %v277_v38 = vpack.c.bf16 %v254_v29, %v252_v27  ;;  %v244_v39 = vsel %vm234_vm1, %v243_v35, %v241_v34  ;;  %1330 = vmatpush3.bf16.msra.mxu1 %v303_v37  ;;  %v1249_v43 = vcombine.low %v1911_v2, %v1915_v5  ;;  %v1498_v45 = vpack.i.bf16 %v224_v10, %v223_v6  ;;  %s2036_s17 = scalar_lea.hbm %s2087_s3, %s1301_s5  ;;  %s1130_s16 = scalar_lea.sflag [#allocation4], %s1893_s29 }
  0x74   : > { %356 = vrot.lane.b32.xlu0 %v276_v32, %s1686_s18  ;;  %424 = vrot.lane.b32.xlu1 %v420_v33, %s1686_s18  ;;  %v266_v40 = vsel %vm260_vm4, %v263_v22, %v265_v36  ;;  %v272_v41 = vrot.slane %v244_v39, 3  ;;  %v1493_v46 = vpack.i.bf16 %v222_v4, %v221_v3  ;;  %vm294_vm5 = vcmask 64512   ;;  %s1609_s21 = scalar_lea.vmem %s2038_s11, 256  ;;  %p2101_p0 = scmp.ne.s32.totalorder %s2096_s6, 0 }
  0x75   : > { %v435_v49 = vsel %vm301_vm2, %v419_v9, 0  ;;  %1410 = vmatprep.subr.msk.bf16.mxu1 %vm301_vm2, %v591_v54  ;;  %v601_v55 = vsel %vm301_vm2, %v591_v54, 0  ;;  %vm519_vm6 = vcmask 60416   ;;  %v659_v24 = vsel %vm301_vm2, %v587_v56, 0  ;;  %p1610_p11 = scmp.ne.s32.totalorder %s2038_s11, %s1609_s21  ;;  %s1692_s26 = smov [#allocation8]  }
  0x76   : > { %v274_v42 = vsel %vm260_vm4, %v265_v36, %v272_v41  ;;  %vm813_vm7 = vcmask 126016   ;;  %vm1107_vm8 = vcmask 191616   ;;  %vm1124_vm9 = vcmask 257216   ;;  %s1613_s30 = sshll.u32 %s1692_s26, 4  ;;  %s1614_s30 = int_to_ptr.vmem [resolvable:$false] %s1613_s30 }
  0x77   : > { %v421_v44 = vpack.c.bf16 %v274_v42, %v266_v40  ;;  %p1611_p2 = pnand %p1610_p11, %p2101_p0  ;;  %s1615_s23 = scalar_lea.vmem %s1614_s30, 512 }
  0x78   : > { %358 = vrot.lane.b32.xlu0 %v277_v38, %s1686_s18  ;;  %p1616_p7 = scmp.lt.s32.totalorder %s2038_s11, %s1614_s30  ;;  %p1617_p9 = scmp.lt.s32.totalorder %s1615_s23, %s1609_s21 }
  0x79   : > { %426 = vrot.lane.b32.xlu1 %v421_v44, %s1686_s18  ;;  %p1612_p3 = pneg %p1611_p2 }
  0x7a   : > { %p1618_p12 = por %p1617_p9, %p1616_p7 }
  0x7c   : > { %292 = vrot.lane.b32.xlu0 %v1249_v43, %s1686_s18  ;;  %p1619_p1 = pnand %p1618_p12, %p1612_p3 }
  0x7d   : > { %1499 = vrot.lane.b32.xlu1 %v1498_v45, %s1687_s20 }
  0x80   : > { %1494 = vrot.lane.b32.xlu0 %v1493_v46, %s1687_s20 }
  0x81   : > { %1509 = vrot.lane.b32.xlu1 %v1498_v45, %s1688_s7 }
  0x84   : > { %1504 = vrot.lane.b32.xlu0 %v1493_v46, %s1688_s7 }
  0x85   : > { %1114 = vrot.lane.b32.xlu1 %v1909_v1, %s1689_s24 }
  0x88   : > { %1112 = vrot.lane.b32.xlu0 %v1907_v0, %s1689_s24 }
  0xdf   : > { %v291_v47 = vpop.permute.xlu1 %290 }
  0xe0   : > { %1331 = vmatprep.mubr.msk.bf16.mxu1 %vm294_vm5, %v291_v47 }
  0xe6   : > { %v357_v48 = vpop.permute.xlu0 %356  ;;  %v425_v50 = vpop.permute.xlu1 %424 }
  0xe7   : > { %1337 = vmatprep.mubr.msk.bf16.mxu0 %vm294_vm5, %v357_v48 }
  0xea   : > { %v359_v51 = vpop.permute.xlu0 %358 }
  0xeb   : > { %1338 = vmatmul.mubr.msk.bf16.vlgmr.msra.gmra.mrb[0].mxu0 %vm294_vm5, %v359_v51  ;;  %v427_v53 = vpop.permute.xlu1 %426 }
  0xec   : > { %1342 = vmatpush3.bf16.msra.mxu0 %v435_v49  ;;  %1343 = vmatprep.mubr.msk.bf16.mxu0 %vm294_vm5, %v425_v50  ;;  %v711_v50 = vld [vmem:[#allocation5 + $0x14] sm:$0xf] }
  0xee   : > { %v293_v52 = vpop.permute.xlu0 %292 }
  0xef   : > { %1332 = vmatmul.mubr.msk.bf16.vlgmr.msra.gmra.mrb[0].mxu1 %vm294_vm5, %v293_v52  ;;  %v1500_v63 = vpop.permute.xlu1 %1499 }
  0xf0   : > { %1348 = vmatpush3.bf16.msra.mxu1 %v601_v55 }
  0xf1   : > { %1411 = vmatprep.subr.msk.bf16.mxu1 %vm301_vm2, %v587_v56 }
  0xf2   : > { %v1495_v6 = vpop.permute.xlu0 %1494 }
  0xf7   : > { %1344 = vmatmul.mubr.msk.bf16.vlgmr.msra.gmra.mrb[0].mxu0 %vm294_vm5, %v427_v53 }
 0x1c2   : > { %v1333_v57 = vpop.f32.mrb[0].mxu1 }
 0x1c3   : > { %v339_v58 = vpop.f32.mrb[1].mxu1 }
 0x1c4   : > { %v1334_v59 = vpop.f32.mrb[2].mxu1 }
 0x1c5   : > { %v342_v60 = vpop.f32.mrb[3].mxu1 }
 0x1ca   : > { %v1345_v61 = vpop.f32.mrb[0].mxu0 }
 0x1cb   : > { %v1383_v3 = vadd.f32 %v1345_v61, %v1333_v57  ;;  %v471_v4 = vpop.f32.mrb[1].mxu0 }
 0x1cc   : > { %v1384_v7 = vadd.f32 %v471_v4, %v339_v58  ;;  %v1346_v8 = vpop.f32.mrb[2].mxu0  ;;  %v881_v4 = vld [vmem:[#allocation5 + $0x18] sm:$0xf] }
 0x1cd   : > { %v497_v9 = vadd.f32 %v1383_v3, %v1256_v62  ;;  %v1385_v10 = vadd.f32 %v1346_v8, %v1334_v59  ;;  %v474_v11 = vpop.f32.mrb[3].mxu0  ;;  %v1505_v8 = vpop.permute.xlu0 %1504 }
 0x1ce   : > { %v495_v12 = vadd.f32 %v1384_v7, %v1256_v62  ;;  %v1386_v13 = vadd.f32 %v474_v11, %v342_v60  ;;  %v1510_v7 = vpop.permute.xlu1 %1509 }
 0x1cf   : > { %v501_v14 = vmax.f32 %v497_v9, 0.0  ;;  %v498_v15 = vadd.f32 %v1385_v10, %v1256_v62 }
 0x1d0   : > { %v499_v16 = vmax.f32 %v495_v12, 0.0  ;;  %v496_v17 = vadd.f32 %v1386_v13, %v1256_v62  ;;  %v721_v62 = vsel %vm301_vm2, %v711_v50, 0 }
 0x1d1   : > { %v1291_v18 = vpack.c.bf16 %v501_v14, %v501_v14  ;;  %v502_v19 = vmax.f32 %v498_v15, 0.0  ;;  %v1515_v20 = vadd.low.f32.bf16 %v501_v14, %v1500_v63 }
 0x1d2   : > { %v1289_v21 = vpack.c.bf16 %v499_v16, %v499_v16  ;;  %v500_v22 = vmax.f32 %v496_v17, 0.0  ;;  %v1516_v23 = vadd.low.f32.bf16 %v499_v16, %v1495_v6 }
 0x1d3   : > { %v1292_v25 = vpack.c.bf16 %v502_v19, %v502_v19  ;;  %v1517_v26 = vadd.high.f32.bf16 %v502_v19, %v1500_v63  ;;  %v563_v27 = vrot.slane %v1515_v20, 5  ;;  %v574_v28 = vrot.slane %v1515_v20, 3  ;;  %522 = vst.msk [vmem:[%s1959_s8 + $0x8] sm:$0xf] %vm519_vm6, %v1291_v18  ;;  %v885_v63 = vld [vmem:[#allocation5 + $0x1c] sm:$0xf] }
 0x1d4   : > { %v1290_v29 = vpack.c.bf16 %v500_v22, %v500_v22  ;;  %v1518_v30 = vadd.high.f32.bf16 %v500_v22, %v1495_v6  ;;  %v541_v31 = vrot.slane %v1516_v23, 3  ;;  %v543_v32 = vrot.slane %v1516_v23, 1  ;;  %520 = vst.msk [vmem:[%s1959_s8] sm:$0xf] %vm519_vm6, %v1289_v21  ;;  %1413 = vmatprep.subr.msk.bf16.mxu0 %vm301_vm2, %v885_v63  ;;  %v1267_v6 = vld [vmem:[#allocation7 + $0x1] ss:$0 sm:$0xff] }
 0x1d5   : > { %v550_v33 = vrot.slane %v1517_v26, 6  ;;  %v552_v34 = vrot.slane %v1517_v26, 4  ;;  %v554_v35 = vrot.slane %v1517_v26, 2  ;;  %v565_v36 = vrot.slane %v1517_v26, 5  ;;  %523 = vst.msk [vmem:[%s1959_s8 + $0xc] sm:$0xf] %vm519_vm6, %v1292_v25 }
 0x1d6   : > { %v576_v37 = vrot.slane %v1517_v26, 3  ;;  %v593_v38 = vpack.c.bf16 %v1517_v26, %v1515_v20  ;;  %v561_v39 = vrot.slane %v1518_v30, 5  ;;  %v572_v40 = vrot.slane %v1518_v30, 3  ;;  %521 = vst.msk [vmem:[%s1959_s8 + $0x4] sm:$0xf] %vm519_vm6, %v1290_v29 }
 0x1d7   : > { %v566_v41 = vsel %vm247_vm3, %v563_v27, %v565_v36  ;;  %v592_v42 = vpack.c.bf16 %v1518_v30, %v1516_v23  ;;  %v545_v43 = vrot.slane %v1516_v23, 7  ;;  %v547_v44 = vsel %vm232_vm0, %v541_v31, %v543_v32 }
 0x1d8   : > { %v577_v45 = vsel %vm260_vm4, %v574_v28, %v576_v37  ;;  %v564_v46 = vsel %vm247_vm3, %v561_v39, %v563_v27  ;;  %v560_v47 = vrot.slane %v1516_v23, 5  ;;  %v573_v48 = vsel %vm260_vm4, %v541_v31, %v572_v40 }
 0x1d9   : > { %1349 = vmatprep.mubr.msk.bf16.mxu1 %vm294_vm5, %v592_v42  ;;  %v548_v49 = vsel %vm234_vm1, %v547_v44, %v545_v43  ;;  %v589_v51 = vpack.c.bf16 %v566_v41, %v564_v46  ;;  %v575_v52 = vsel %vm260_vm4, %v572_v40, %v574_v28  ;;  %v556_v53 = vsel %vm232_vm0, %v550_v33, %v552_v34  ;;  %v1005_v46 = vld [vmem:[#allocation5 + $0x20] sm:$0xf] }
 0x1da   : > { %1350 = vmatmul.mubr.msk.bf16.vlgmr.msra.gmra.mrb[4].mxu1 %vm294_vm5, %v593_v38  ;;  %v562_v54 = vsel %vm247_vm3, %v560_v47, %v561_v39  ;;  %v571_v55 = vsel %vm247_vm3, %v548_v49, %v560_v47  ;;  %v712_v56 = vpack.c.bf16 %v575_v52, %v573_v48  ;;  %v557_v57 = vsel %vm234_vm1, %v556_v53, %v554_v35 }
 0x1db   : > { %1354 = vmatpush3.bf16.msra.mxu1 %v659_v24  ;;  %v588_v58 = vpack.c.bf16 %v562_v54, %v571_v55  ;;  %v583_v59 = vrot.slane %v557_v57, 3  ;;  %v895_v3 = vsel %vm301_vm2, %v885_v63, 0  ;;  %v953_v23 = vsel %vm301_vm2, %v881_v4, 0  ;;  %v1115_v63 = vpop.permute.xlu1 %1114 }
 0x1dc   : > { %1412 = vmatprep.subr.msk.bf16.mxu1 %vm301_vm2, %v711_v50  ;;  %1366 = vmatpush3.bf16.msra.mxu0 %v895_v3 }
 0x1dd   : > { %1355 = vmatprep.mubr.msk.bf16.mxu1 %vm294_vm5, %v588_v58  ;;  %v585_v60 = vsel %vm260_vm4, %v576_v37, %v583_v59  ;;  %1414 = vmatprep.subr.msk.bf16.mxu0 %vm301_vm2, %v881_v4 }
 0x1de   : > { %v713_v61 = vpack.c.bf16 %v585_v60, %v577_v45 }
 0x1e6   : > { %1356 = vmatmul.mubr.msk.bf16.vlgmr.msra.gmra.mrb[4].mxu1 %vm294_vm5, %v589_v51 }
 0x1e7   : > { %1360 = vmatpush3.bf16.msra.mxu1 %v721_v62  ;;  %1361 = vmatprep.mubr.msk.bf16.mxu1 %vm294_vm5, %v712_v56  ;;  %v1113_v62 = vpop.permute.xlu0 %1112 }
 0x1f2   : > { %1362 = vmatmul.mubr.msk.bf16.vlgmr.msra.gmra.mrb[4].mxu1 %vm294_vm5, %v713_v61  ;;  %v1015_v61 = vsel %vm301_vm2, %v1005_v46, 0 }
 0x2c5   : > { %v1363_v9 = vpop.f32.mrb[4].mxu1 }
 0x2c6   : > { %v783_v10 = vadd.f32 %v1363_v9, %v1267_v6  ;;  %v757_v11 = vpop.f32.mrb[5].mxu1 }
 0x2c7   : > { %v781_v12 = vadd.f32 %v1267_v6, %v757_v11  ;;  %v1364_v0 = vpop.f32.mrb[6].mxu1 }
 0x2c8   : > { %v787_v13 = vmax.f32 %v783_v10, 0.0  ;;  %v784_v14 = vadd.f32 %v1364_v0, %v1267_v6  ;;  %v760_v1 = vpop.f32.mrb[7].mxu1 }
 0x2c9   : > { %v785_v15 = vmax.f32 %v781_v12, 0.0  ;;  %v782_v16 = vadd.f32 %v1267_v6, %v760_v1 }
 0x2ca   : > { %v1295_v17 = vpack.c.bf16 %v787_v13, %v787_v13  ;;  %v1519_v18 = vadd.low.f32.bf16 %v787_v13, %v1510_v7  ;;  %v788_v19 = vmax.f32 %v784_v14, 0.0 }
 0x2cb   : > { %v1293_v20 = vpack.c.bf16 %v785_v15, %v785_v15  ;;  %v1520_v21 = vadd.low.f32.bf16 %v785_v15, %v1505_v8  ;;  %v786_v22 = vmax.f32 %v782_v16, 0.0 }
 0x2cc   : > { %v857_v24 = vrot.slane %v1519_v18, 5  ;;  %v868_v25 = vrot.slane %v1519_v18, 3  ;;  %v1296_v26 = vpack.c.bf16 %v788_v19, %v788_v19  ;;  %v1521_v27 = vadd.high.f32.bf16 %v788_v19, %v1510_v7  ;;  %805 = vrot.lane.b32.xlu0 %v1295_v17, %s1690_s27 }
 0x2cd   : > { %v835_v28 = vrot.slane %v1520_v21, 3  ;;  %v837_v29 = vrot.slane %v1520_v21, 1  ;;  %v1294_v30 = vpack.c.bf16 %v786_v22, %v786_v22  ;;  %v1522_v31 = vadd.high.f32.bf16 %v786_v22, %v1505_v8  ;;  %v1278_v8 = vld [vmem:[#allocation7 + $0x2] ss:$0 sm:$0xff] }
 0x2ce   : > { %v844_v32 = vrot.slane %v1521_v27, 6  ;;  %v846_v33 = vrot.slane %v1521_v27, 4  ;;  %v848_v34 = vrot.slane %v1521_v27, 2  ;;  %807 = vrot.lane.b32.xlu1 %v1296_v26, %s1690_s27  ;;  %v887_v35 = vpack.c.bf16 %v1521_v27, %v1519_v18 }
 0x2cf   : > { %v855_v36 = vrot.slane %v1522_v31, 5  ;;  %v866_v37 = vrot.slane %v1522_v31, 3  ;;  %v886_v38 = vpack.c.bf16 %v1522_v31, %v1520_v21  ;;  %v839_v39 = vrot.slane %v1520_v21, 7 }
 0x2d0   : > { %801 = vrot.lane.b32.xlu0 %v1293_v20, %s1690_s27  ;;  %v841_v40 = vsel %vm232_vm0, %v835_v28, %v837_v29  ;;  %v854_v41 = vrot.slane %v1520_v21, 5  ;;  %v859_v42 = vrot.slane %v1521_v27, 5  ;;  %v850_v43 = vsel %vm232_vm0, %v844_v32, %v846_v33 }
 0x2d1   : > { %v858_v44 = vsel %vm247_vm3, %v855_v36, %v857_v24  ;;  %1367 = vmatprep.mubr.msk.bf16.mxu0 %vm294_vm5, %v886_v38  ;;  %v842_v45 = vsel %vm234_vm1, %v841_v40, %v839_v39  ;;  %v867_v47 = vsel %vm260_vm4, %v835_v28, %v866_v37  ;;  %v869_v48 = vsel %vm260_vm4, %v866_v37, %v868_v25 }
 0x2d2   : > { %1368 = vmatmul.mubr.msk.bf16.vlgmr.msra.gmra.mrb[4].mxu0 %vm294_vm5, %v887_v35  ;;  %803 = vrot.lane.b32.xlu1 %v1294_v30, %s1690_s27  ;;  %v856_v49 = vsel %vm247_vm3, %v854_v41, %v855_v36  ;;  %v865_v50 = vsel %vm247_vm3, %v842_v45, %v854_v41  ;;  %v860_v51 = vsel %vm247_vm3, %v857_v24, %v859_v42  ;;  %v870_v52 = vrot.slane %v1521_v27, 3 }
 0x2d3   : > { %1372 = vmatpush3.bf16.msra.mxu0 %v953_v23  ;;  %v882_v53 = vpack.c.bf16 %v856_v49, %v865_v50  ;;  %v883_v54 = vpack.c.bf16 %v860_v51, %v858_v44  ;;  %v1006_v55 = vpack.c.bf16 %v869_v48, %v867_v47  ;;  %v851_v56 = vsel %vm234_vm1, %v850_v43, %v848_v34 }
 0x2d4   : > { %1415 = vmatprep.subr.msk.bf16.mxu0 %vm301_vm2, %v1005_v46  ;;  %v871_v57 = vsel %vm260_vm4, %v868_v25, %v870_v52  ;;  %v877_v58 = vrot.slane %v851_v56, 3 }
 0x2d5   : > { %1373 = vmatprep.mubr.msk.bf16.mxu0 %vm294_vm5, %v882_v53 }
 0x2d6   : > { %v879_v59 = vsel %vm260_vm4, %v870_v52, %v877_v58 }
 0x2d7   : > { %v1007_v60 = vpack.c.bf16 %v879_v59, %v871_v57 }
 0x2de   : > { %1374 = vmatmul.mubr.msk.bf16.vlgmr.msra.gmra.mrb[4].mxu0 %vm294_vm5, %v883_v54 }
 0x2df   : > { %1378 = vmatpush3.bf16.msra.mxu0 %v1015_v61  ;;  %1379 = vmatprep.mubr.msk.bf16.mxu0 %vm294_vm5, %v1006_v55 }
 0x2ea   : > { %1380 = vmatmul.mubr.msk.bf16.vlgmr.msra.gmra.mrb[4].mxu0 %vm294_vm5, %v1007_v60 }
 0x33e   : > { %v806_v3 = vpop.permute.xlu0 %805 }
 0x33f   : > { %816 = vst.msk [vmem:[%s1959_s8 + $0x8] sm:$0xf] %vm813_vm7, %v806_v3 }
 0x340   : > { %v808_v4 = vpop.permute.xlu1 %807 }
 0x341   : > { %817 = vst.msk [vmem:[%s1959_s8 + $0xc] sm:$0xf] %vm813_vm7, %v808_v4 }
 0x342   : > { %v802_v6 = vpop.permute.xlu0 %801 }
 0x343   : > { %814 = vst.msk [vmem:[%s1959_s8] sm:$0xf] %vm813_vm7, %v802_v6 }
 0x344   : > { %v804_v7 = vpop.permute.xlu1 %803 }
 0x345   : > { %815 = vst.msk [vmem:[%s1959_s8 + $0x4] sm:$0xf] %vm813_vm7, %v804_v7 }
 0x3bd   : > { %v1381_v9 = vpop.f32.mrb[4].mxu0 }
 0x3be   : > { %v1077_v10 = vadd.f32 %v1381_v9, %v1278_v8  ;;  %v1051_v11 = vpop.f32.mrb[5].mxu0 }
 0x3bf   : > { %v1075_v12 = vadd.f32 %v1278_v8, %v1051_v11  ;;  %v1382_v0 = vpop.f32.mrb[6].mxu0 }
 0x3c0   : > { %v1081_v13 = vmax.f32 %v1077_v10, 0.0  ;;  %v1078_v14 = vadd.f32 %v1382_v0, %v1278_v8  ;;  %v1054_v1 = vpop.f32.mrb[7].mxu0 }
 0x3c1   : > { %v1076_v15 = vadd.f32 %v1278_v8, %v1054_v1  ;;  %v1079_v17 = vmax.f32 %v1075_v12, 0.0 }
 0x3c2   : > { %v1299_v16 = vpack.c.bf16 %v1081_v13, %v1081_v13  ;;  %v1082_v18 = vmax.f32 %v1078_v14, 0.0 }
 0x3c3   : > { %v1080_v20 = vmax.f32 %v1076_v15, 0.0  ;;  %v1297_v21 = vpack.c.bf16 %v1079_v17, %v1079_v17 }
 0x3c4   : > { %v1300_v19 = vpack.c.bf16 %v1082_v18, %v1082_v18  ;;  %1099 = vrot.lane.b32.xlu0 %v1299_v16, %s1691_s22 }
 0x3c5   : > { %v1298_v22 = vpack.c.bf16 %v1080_v20, %v1080_v20 }
 0x3c6   : > { %1101 = vrot.lane.b32.xlu1 %v1300_v19, %s1691_s22 }
 0x3c8   : > { %1095 = vrot.lane.b32.xlu0 %v1297_v21, %s1691_s22 }
 0x3ca   : > { %1097 = vrot.lane.b32.xlu1 %v1298_v22, %s1691_s22 }
 0x3cc   : > { %1116 = vrot.lane.b32.xlu0 %v1911_v2, %s1689_s24 }
 0x3ce   : > { %1118 = vrot.lane.b32.xlu1 %v1915_v5, %s1689_s24 }
 0x436   : > { %v1100_v23 = vpop.permute.xlu0 %1099 }
 0x437   : > { %1110 = vst.msk [vmem:[%s1959_s8 + $0x8] sm:$0xf] %vm1107_vm8, %v1100_v23 }
 0x438   : > { %v1102_v24 = vpop.permute.xlu1 %1101 }
 0x439   : > { %1111 = vst.msk [vmem:[%s1959_s8 + $0xc] sm:$0xf] %vm1107_vm8, %v1102_v24 }
 0x43a   : > { %v1096_v25 = vpop.permute.xlu0 %1095 }
 0x43b   : > { %1108 = vst.msk [vmem:[%s1959_s8] sm:$0xf] %vm1107_vm8, %v1096_v25 }
 0x43c   : > { %1125 = vst.msk [vmem:[%s1959_s8] sm:$0xf] %vm1124_vm9, %v1113_v62  ;;  %v1098_v26 = vpop.permute.xlu1 %1097 }
 0x43d   : > { %1109 = vst.msk [vmem:[%s1959_s8 + $0x4] sm:$0xf] %vm1107_vm8, %v1098_v26 }
 0x43e   : > { %1126 = vst.msk [vmem:[%s1959_s8 + $0x4] sm:$0xf] %vm1124_vm9, %v1115_v63  ;;  %v1117_v2 = vpop.permute.xlu0 %1116 }
 0x43f   : > { %1127 = vst.msk [vmem:[%s1959_s8 + $0x8] sm:$0xf] %vm1124_vm9, %v1117_v2 }
 0x440   : > { %v1119_v5 = vpop.permute.xlu1 %1118 }
 0x441   : > { %1128 = vst.msk [vmem:[%s1959_s8 + $0xc] sm:$0xf] %vm1124_vm9, %v1119_v5 }
 0x442   : > { %1622 = shalt.err (!%p1619_p1)
}
 0x443   : > { %s1623_s28 = scalar_lea.hbm %s2036_s17, 256  ;;  %s1627_s7 = scalar_lea.hbm %s2087_s3, 512 }
 0x444   : > { %p1624_p13 = scmp.ne.s32.totalorder %s2036_s17, %s1623_s28  ;;  %p1628_p4 = scmp.lt.u32.totalorder %s2036_s17, %s2087_s3 }
 0x445   : > { %p1629_p5 = scmp.lt.u32.totalorder %s1627_s7, %s1623_s28  ;;  %p1631_p11 = scmp.lt.u32.totalorder %s1623_s28, %s2036_s17 }
 0x446   : > { %p1625_p6 = pnand %p1624_p13, %p2101_p0 }
 0x447   : > { %p1630_p8 = por %p1629_p5, %p1628_p4 }
 0x448   : > { %p1626_p10 = pneg %p1625_p6 }
 0x449   : > { %p1632_p2 = por %p1631_p11, %p1630_p8 }
 0x44b   : > { %p1633_p3 = pnand %p1632_p2, %p1626_p10 }
 0x44d   : > { %1636 = shalt.err (!%p1633_p3)
}
 0x44e   : > { %s1693_s27 = smov 64   ;;  %s1694_s22 = smov 4  }
 0x44f   : > { %1426 = dma.vmem_to_hbm [thread:$0]  (%p2101_p0), %s2038_s11, 256, %s2036_s17, %s1130_s16, %s1693_s27, %s1693_s27, %s1694_s22  }
 0x450 PF: > { %s1158_s5 = sand.u32 1, %s1667_s12   ;;  %p2102_p7 = scmp.ne.s32.totalorder %s2092_s19, 0 }
 0x451   : > { %p2103_p9 = scmp.ge.s32.totalorder %s1679_s15, 2  ;;  %s1159_s25 = scalar_lea.sflag [#allocation4], %s1158_s5 }
 0x453   : > { %p1440_p12 = pnand %p2103_p9, %p2102_p7 }
 0x455   : > { %1662 = dma.done.wait (!%p1440_p12), %s1159_s25, 256  }
 0x456   : > { %1664 = vsyncadd (!%p1440_p12), %s1159_s25, 4294967040  ;;  %p17_p1 = scmp.ge.s32.totalorder %s1828_s4, 4   ;;  %s2104_s12 = smov %s1671_s13 }
 0x457   : > { %s2105_s13 = smov %s1675_s14  ;;  %s2106_s14 = smov %s1844_s9 }
 0x458   : > { %s2107_s15 = smov %s1828_s4  ;;  %19 = sbr.rel (!%p17_p1) target bundleno = 6 (0x6), region = 93 }
 0x45f   :  { %1164 = vsyncpa [#allocation3], 1 }
 0x460   :  { %1166 = vsyncpa [#allocation3 + $0x1], 1 }
 0x461   :  { %1167 = vsyncpa [#allocation6], 1 }
 0x462   :  { %1168 = vsyncpa [#allocation4], 1 }
 0x463   :  { %1170 = vsyncpa [#allocation4 + $0x1], 1 }

// kernel: ecapa_forward.23
= control target key start
LH: loop header
LB: loop body
LE: loop exit
PB: predicated region body
PF: predicated region fallthrough
CT: control target
= control target key end

     0   :  { %10 = vsyncpa [#allocation3], 0  ;;  %s989_s0 = inlined_call_operand.hbm [shape: bf16[64,32], index: 0, kind: input, shape index: {}]   ;;  %s990_s1 = inlined_call_operand.hbm [shape: bf16[64,32], index: 1, kind: input, shape index: {}]   ;;  %s991_s2 = inlined_call_operand.hbm [shape: bf16[64,32], index: 2, kind: input, shape index: {}]   ;;  %s992_s3 = inlined_call_operand.hbm [shape: bf16[96,96], index: 3, kind: input, shape index: {}]   ;;  %s993_s4 = inlined_call_operand.hbm [shape: f32[1,96], index: 4, kind: input, shape index: {}]   ;;  %s994_s5 = inlined_call_operand.hbm [shape: bf16[64,96], index: 5, kind: output, shape index: {}]  }
   0x1   :  { %11 = vsyncpa [#allocation6], 0 }
   0x2   :  { %12 = vsyncpa [#allocation9], 0 }
   0x3   :  { %13 = vsyncpa [#allocation4], 0  ;;  %s830_s18 = smov [#allocation5]   ;;  %s831_s20 = smov [#allocation8]  }
   0x4   :  { %s31_s19 = sshll.u32 %s830_s18, 4  ;;  %s55_s21 = sshll.u32 %s831_s20, 4  ;;  %s32_s19 = int_to_ptr.vmem [resolvable:$true] %s31_s19  ;;  %s868_s21 = int_to_ptr.vmem [resolvable:$true] %s55_s21 }
   0x5   :  { %s690_s24 = scalar_lea.hbm %s990_s1, 512 }
   0x6   :  { %p691_p0 = scmp.ne.s32.totalorder %s990_s1, %s690_s24  ;;  %p694_p1 = scmp.lt.u32.totalorder %s690_s24, %s990_s1 }
   0x8   :  { %p696_p2 = pnand %p694_p1, %p691_p0 }
   0xa   :  { %699 = shalt.err (!%p696_p2)
}
   0xb   :  { %s700_s29 = scalar_lea.vmem %s32_s19, 512  ;;  %p705_p4 = scmp.lt.s32.totalorder %s32_s19, %s32_s19 }
   0xc   :  { %p701_p3 = scmp.ne.s32.totalorder %s32_s19, %s700_s29  ;;  %p706_p5 = scmp.lt.s32.totalorder %s700_s29, %s700_s29 }
   0xe   :  { %p707_p6 = por %p706_p5, %p705_p4 }
  0x10   :  { %p708_p7 = pnand %p707_p6, %p701_p3 }
  0x12   :  { %711 = shalt.err (!%p708_p7)
}
  0x13   :  { %s832_s30 = smov 64   ;;  %s833_s6 = smov 4  }
  0x14   :  { %37 = dma.hbm_to_vmem [thread:$0]  %s990_s1, 512, %s32_s19, [#allocation6], %s832_s30, %s832_s30, %s833_s6  }
  0x15   :  { %s712_s11 = scalar_lea.hbm %s992_s3, 768 }
  0x16   :  { %p713_p8 = scmp.ne.s32.totalorder %s992_s3, %s712_s11  ;;  %p716_p9 = scmp.lt.u32.totalorder %s712_s11, %s992_s3 }
  0x18   :  { %p718_p10 = pnand %p716_p9, %p713_p8 }
  0x1a   :  { %721 = shalt.err (!%p718_p10)
}
  0x1b   :  { %s722_s16 = scalar_lea.vmem %s868_s21, 768  ;;  %p727_p12 = scmp.lt.s32.totalorder %s868_s21, %s868_s21 }
  0x1c   :  { %p723_p11 = scmp.ne.s32.totalorder %s868_s21, %s722_s16  ;;  %p728_p13 = scmp.lt.s32.totalorder %s722_s16, %s722_s16 }
  0x1e   :  { %p729_p0 = por %p728_p13, %p727_p12 }
  0x20   :  { %p730_p1 = pnand %p729_p0, %p723_p11 }
  0x22   :  { %733 = shalt.err (!%p730_p1)
}
  0x23   :  { %61 = dma.hbm_to_vmem [thread:$0]  %s992_s3, 768, %s868_s21, [#allocation9], %s832_s30, %s832_s30, %s833_s6  }
  0x24   :  { %s834_s18 = smov [#allocation2]   ;;  %s835_s20 = smov [#allocation7]  }
  0x25   :  { %s19_s19 = sshll.u32 %s834_s18, 4  ;;  %s43_s22 = sshll.u32 %s835_s20, 4  ;;  %s20_s19 = int_to_ptr.vmem [resolvable:$true] %s19_s19  ;;  %s905_s22 = int_to_ptr.vmem [resolvable:$true] %s43_s22 }
  0x26   :  { %s734_s25 = scalar_lea.hbm %s989_s0, 512 }
  0x27   :  { %p735_p2 = scmp.ne.s32.totalorder %s989_s0, %s734_s25  ;;  %p738_p3 = scmp.lt.u32.totalorder %s734_s25, %s989_s0 }
  0x29   :  { %p740_p4 = pnand %p738_p3, %p735_p2 }
  0x2b   :  { %743 = shalt.err (!%p740_p4)
}
  0x2c   :  { %s744_s3 = scalar_lea.vmem %s20_s19, 512  ;;  %p749_p6 = scmp.lt.s32.totalorder %s20_s19, %s20_s19 }
  0x2d   :  { %p745_p5 = scmp.ne.s32.totalorder %s20_s19, %s744_s3  ;;  %p750_p7 = scmp.lt.s32.totalorder %s744_s3, %s744_s3 }
  0x2f   :  { %p751_p8 = por %p750_p7, %p749_p6 }
  0x31   :  { %p752_p9 = pnand %p751_p8, %p745_p5 }
  0x33   :  { %755 = shalt.err (!%p752_p9)
}
  0x34   :  { %25 = dma.hbm_to_vmem [thread:$0]  %s989_s0, 512, %s20_s19, [#allocation3], %s832_s30, %s832_s30, %s833_s6  }
  0x35   :  { %s756_s10 = scalar_lea.hbm %s991_s2, 512 }
  0x36   :  { %p757_p10 = scmp.ne.s32.totalorder %s991_s2, %s756_s10  ;;  %p760_p11 = scmp.lt.u32.totalorder %s756_s10, %s991_s2 }
  0x38   :  { %p762_p12 = pnand %p760_p11, %p757_p10 }
  0x3a   :  { %765 = shalt.err (!%p762_p12)
}
  0x3b   :  { %s766_s15 = scalar_lea.vmem %s905_s22, 512  ;;  %p771_p0 = scmp.lt.s32.totalorder %s905_s22, %s905_s22 }
  0x3c   :  { %p767_p13 = scmp.ne.s32.totalorder %s905_s22, %s766_s15  ;;  %p772_p1 = scmp.lt.s32.totalorder %s766_s15, %s766_s15 }
  0x3e   :  { %p773_p2 = por %p772_p1, %p771_p0 }
  0x40   :  { %p774_p3 = pnand %p773_p2, %p767_p13 }
  0x42   :  { %777 = shalt.err (!%p774_p3)
}
  0x43   :  { %49 = dma.hbm_to_vmem [thread:$0]  %s991_s2, 512, %s905_s22, [#allocation6], %s832_s30, %s832_s30, %s833_s6  }
  0x44   :  { %s836_s1 = smov [#allocation10]   ;;  %s778_s20 = scalar_lea.hbm %s993_s4, 16 }
  0x45   :  { %s68_s17 = sshll.u32 %s836_s1, 4  ;;  %p779_p4 = scmp.ne.s32.totalorder %s993_s4, %s778_s20  ;;  %s69_s17 = int_to_ptr.vmem [resolvable:$true] %s68_s17 }
  0x46   :  { %p782_p5 = scmp.lt.u32.totalorder %s778_s20, %s993_s4 }
  0x48   :  { %p784_p6 = pnand %p782_p5, %p779_p4 }
  0x4a   :  { %787 = shalt.err (!%p784_p6)
}
  0x4b   :  { %s788_s27 = scalar_lea.vmem %s69_s17, 16  ;;  %s792_s2 = scalar_lea.vmem %s69_s17, 32 }
  0x4c   :  { %p789_p7 = scmp.ne.s32.totalorder %s69_s17, %s788_s27  ;;  %p793_p8 = scmp.lt.s32.totalorder %s69_s17, %s69_s17 }
  0x4d   :  { %p794_p9 = scmp.lt.s32.totalorder %s792_s2, %s788_s27 }
  0x4f   :  { %p795_p10 = por %p794_p9, %p793_p8 }
  0x51   :  { %p796_p11 = pnand %p795_p10, %p789_p7 }
  0x53   :  { %799 = shalt.err (!%p796_p11)
}
  0x54   :  { %71 = dma.hbm_to_vmem [thread:$0]  %s993_s4, 16, %s69_s17, [#allocation9]  }
  0x55   :  { %822 = dma.done.wait [#allocation3], 512  }
  0x56   :  { %823 = vsyncadd [#allocation3], 4294966784 }
  0x57   :  { %824 = dma.done.wait [#allocation6], 1024  }
  0x58   :  { %825 = vsyncadd [#allocation6], 4294966272 }
  0x59   :  { %826 = dma.done.wait [#allocation9], 784  }
  0x5a   :  { %827 = vsyncadd [#allocation9], 4294966512  ;;  %v672_v0 = vld [vmem:[#allocation8 + $0x10] sm:$0xff]   ;;  %v673_v1 = vld [vmem:[#allocation8] sm:$0xff]   ;;  %vm144_vm0 = vcmask 261120   ;;  %vm515_vm1 = vcmask 781312  }
  0x5b   :  { %608 = vmatprep.subr.bf16.mxu1 %v672_v0  ;;  %v674_v2 = vld [vmem:[#allocation8 + $0x18] sm:$0xff]   ;;  %620 = vmatprep.subr.bf16.mxu0 %v673_v1  ;;  %v675_v3 = vld [vmem:[#allocation8 + $0x8] sm:$0xff]   ;;  %v676_v4 = vld [vmem:[#allocation5] sm:$0xff]   ;;  %s837_s4 = smov [#allocation11]  }
  0x5c   :  { %609 = vmatpush3.bf16.msra.mxu1 %v672_v0  ;;  %621 = vmatpush3.bf16.msra.mxu0 %v673_v1  ;;  %v677_v5 = vld [vmem:[#allocation2] sm:$0xff]   ;;  %v678_v6 = vld [vmem:[#allocation5 + $0x8] sm:$0xff]   ;;  %v682_v10 = vld [vmem:[#allocation5 + $0x10] sm:$0xff]   ;;  %s529_s29 = sshll.u32 %s837_s4, 4  ;;  %s530_s29 = int_to_ptr.vmem [resolvable:$true] %s529_s29 }
  0x5d   :  { %610 = vmatprep.subr.bf16.mxu1 %v674_v2  ;;  %622 = vmatprep.subr.bf16.mxu0 %v675_v3  ;;  %v679_v7 = vld [vmem:[#allocation2 + $0x8] sm:$0xff]   ;;  %v680_v8 = vld [vmem:[#allocation8 + $0x20] sm:$0xff]   ;;  %v683_v12 = vld [vmem:[#allocation5 + $0x18] sm:$0xff]   ;;  %s800_s3 = scalar_lea.vmem %s530_s29, 512  ;;  %p805_p13 = scmp.lt.s32.totalorder %s530_s29, %s530_s29 }
  0x5e   :  { %612 = vmatprep.mubr.msk.bf16.mxu1 %vm144_vm0, %v676_v4  ;;  %624 = vmatprep.mubr.msk.bf16.mxu0 %vm144_vm0, %v677_v5  ;;  %v681_v9 = vld [vmem:[#allocation8 + $0x28] sm:$0xff]   ;;  %v684_v11 = vld [vmem:[#allocation7] sm:$0xff]   ;;  %v686_v13 = vld [vmem:[#allocation2 + $0x10] sm:$0xff]   ;;  %p801_p12 = scmp.ne.s32.totalorder %s530_s29, %s800_s3  ;;  %p806_p0 = scmp.lt.s32.totalorder %s800_s3, %s800_s3 }
  0x5f   :  { %v685_v14 = vld [vmem:[#allocation7 + $0x8] sm:$0xff]   ;;  %v687_v15 = vld [vmem:[#allocation7 + $0x10] sm:$0xff]   ;;  %v688_v16 = vld [vmem:[#allocation2 + $0x18] sm:$0xff]  }
  0x60   :  { %611 = vmatpush3.bf16.msra.mxu1 %v674_v2  ;;  %623 = vmatpush3.bf16.msra.mxu0 %v675_v3  ;;  %v689_v17 = vld [vmem:[#allocation7 + $0x18] sm:$0xff]   ;;  %v573_v23 = vld [vmem:[#allocation10] ss:$0 sm:$0xff]  ;;  %p807_p1 = por %p806_p0, %p805_p13 }
  0x61   :  { %644 = vmatprep.subr.bf16.mxu1 %v673_v1  ;;  %632 = vmatprep.subr.bf16.mxu0 %v680_v8 }
  0x62   :  { %p808_p2 = pnand %p807_p1, %p801_p12 }
  0x63   :  { %613 = vmatmul.mubr.msk.bf16.vlgmr.msra.gmra.mrb[0].mxu1 %vm144_vm0, %v678_v6  ;;  %625 = vmatmul.mubr.msk.bf16.vlgmr.msra.gmra.mrb[0].mxu0 %vm144_vm0, %v679_v7 }
  0x64   :  { %646 = vmatpush3.bf16.msra.mxu1 %v673_v1  ;;  %633 = vmatpush3.bf16.msra.mxu0 %v680_v8 }
  0x65   :  { %616 = vmatprep.mubr.msk.bf16.mxu1 %vm144_vm0, %v682_v10  ;;  %634 = vmatprep.subr.bf16.mxu0 %v681_v9 }
  0x66   :  { %645 = vmatprep.subr.bf16.mxu1 %v675_v3  ;;  %636 = vmatprep.mubr.msk.bf16.mxu0 %vm144_vm0, %v684_v11 }
  0x68   :  { %647 = vmatpush3.bf16.msra.mxu1 %v675_v3  ;;  %635 = vmatpush3.bf16.msra.mxu0 %v681_v9 }
  0x6b   :  { %617 = vmatmul.mubr.msk.bf16.gmra.mrb[4].mxu1 %vm144_vm0, %v683_v12 }
  0x6c   :  { %628 = vmatprep.mubr.msk.bf16.mxu1 %vm144_vm0, %v686_v13 }
  0x6f   :  { %637 = vmatmul.mubr.msk.bf16.vlgmr.msra.gmra.mrb[0].mxu0 %vm144_vm0, %v685_v14 }
  0x70   :  { %640 = vmatprep.mubr.msk.bf16.mxu0 %vm144_vm0, %v687_v15 }
  0x77   :  { %629 = vmatmul.mubr.msk.bf16.vlgmr.msra.gmra.mrb[4].mxu1 %vm144_vm0, %v688_v16  ;;  %641 = vmatmul.mubr.msk.bf16.gmra.mrb[4].mxu0 %vm144_vm0, %v689_v17 }
 0x136   :  { %v614_v18 = vpop.f32.mrb[0].mxu1 }
 0x137   :  { %v191_v19 = vpop.f32.mrb[1].mxu1 }
 0x138   :  { %v615_v20 = vpop.f32.mrb[2].mxu1 }
 0x139   :  { %v194_v21 = vpop.f32.mrb[3].mxu1 }
 0x142   :  { %v638_v22 = vpop.f32.mrb[0].mxu0 }
 0x143   :  { %v648_v24 = vadd.f32 %v638_v22, %v614_v18  ;;  %v421_v25 = vpop.f32.mrb[1].mxu0 }
 0x144   :  { %v649_v26 = vadd.f32 %v421_v25, %v191_v19  ;;  %v639_v27 = vpop.f32.mrb[2].mxu0 }
 0x145   :  { %v469_v28 = vadd.f32 %v648_v24, %v573_v23  ;;  %v650_v29 = vadd.f32 %v639_v27, %v615_v20  ;;  %v424_v30 = vpop.f32.mrb[3].mxu0 }
 0x146   :  { %v467_v31 = vadd.f32 %v649_v26, %v573_v23  ;;  %v651_v32 = vadd.f32 %v424_v30, %v194_v21 }
 0x147   :  { %v477_v33 = vmax.f32 %v469_v28, 0.0  ;;  %v470_v34 = vadd.f32 %v650_v29, %v573_v23 }
 0x148   :  { %v475_v35 = vmax.f32 %v467_v31, 0.0  ;;  %v468_v36 = vadd.f32 %v651_v32, %v573_v23 }
 0x149   :  { %v584_v37 = vpack.c.bf16 %v477_v33, %v477_v33  ;;  %v478_v38 = vmax.f32 %v470_v34, 0.0 }
 0x14a   :  { %v630_v39 = vpop.f32.mrb[4].mxu1  ;;  %v582_v40 = vpack.c.bf16 %v475_v35, %v475_v35  ;;  %v476_v41 = vmax.f32 %v468_v36, 0.0  ;;  %v642_v42 = vpop.f32.mrb[4].mxu0 }
 0x14b   :  { %v316_v43 = vpop.f32.mrb[5].mxu1  ;;  %518 = vst.msk [vmem:[#allocation11 + $0x8] sm:$0xf] %vm515_vm1, %v584_v37  ;;  %v585_v44 = vpack.c.bf16 %v478_v38, %v478_v38  ;;  %v652_v45 = vadd.f32 %v642_v42, %v630_v39  ;;  %v437_v46 = vpop.f32.mrb[5].mxu0 }
 0x14c   :  { %v631_v47 = vpop.f32.mrb[6].mxu1  ;;  %516 = vst.msk [vmem:[#allocation11] sm:$0xf] %vm515_vm1, %v582_v40  ;;  %v583_v48 = vpack.c.bf16 %v476_v41, %v476_v41  ;;  %v653_v49 = vadd.f32 %v437_v46, %v316_v43  ;;  %v643_v50 = vpop.f32.mrb[6].mxu0 }
 0x14d   :  { %v319_v51 = vpop.f32.mrb[7].mxu1  ;;  %519 = vst.msk [vmem:[#allocation11 + $0xc] sm:$0xf] %vm515_vm1, %v585_v44  ;;  %v473_v52 = vadd.f32 %v652_v45, %v573_v23  ;;  %v654_v53 = vadd.f32 %v643_v50, %v631_v47  ;;  %v440_v54 = vpop.f32.mrb[7].mxu0 }
 0x14e   :  { %517 = vst.msk [vmem:[#allocation11 + $0x4] sm:$0xf] %vm515_vm1, %v583_v48  ;;  %v471_v55 = vadd.f32 %v653_v49, %v573_v23  ;;  %v655_v56 = vadd.f32 %v440_v54, %v319_v51 }
 0x14f   :  { %v481_v57 = vmax.f32 %v473_v52, 0.0  ;;  %v474_v58 = vadd.f32 %v654_v53, %v573_v23 }
 0x150   :  { %v479_v59 = vmax.f32 %v471_v55, 0.0  ;;  %v472_v60 = vadd.f32 %v655_v56, %v573_v23 }
 0x151   :  { %v588_v61 = vpack.c.bf16 %v481_v57, %v481_v57  ;;  %v482_v62 = vmax.f32 %v474_v58, 0.0 }
 0x152   :  { %v586_v63 = vpack.c.bf16 %v479_v59, %v479_v59  ;;  %v480_v0 = vmax.f32 %v472_v60, 0.0 }
 0x153   :  { %522 = vst.msk [vmem:[#allocation11 + $0x18] sm:$0xf] %vm515_vm1, %v588_v61  ;;  %v589_v1 = vpack.c.bf16 %v482_v62, %v482_v62 }
 0x154   :  { %520 = vst.msk [vmem:[#allocation11 + $0x10] sm:$0xf] %vm515_vm1, %v586_v63  ;;  %v587_v2 = vpack.c.bf16 %v480_v0, %v480_v0 }
 0x155   :  { %523 = vst.msk [vmem:[#allocation11 + $0x1c] sm:$0xf] %vm515_vm1, %v589_v1 }
 0x156   :  { %521 = vst.msk [vmem:[#allocation11 + $0x14] sm:$0xf] %vm515_vm1, %v587_v2 }
 0x157   :  { %811 = shalt.err (!%p808_p2)
}
 0x158   :  { %s812_s8 = scalar_lea.hbm %s994_s5, 512 }
 0x159   :  { %p813_p3 = scmp.ne.s32.totalorder %s994_s5, %s812_s8  ;;  %p816_p4 = scmp.lt.u32.totalorder %s812_s8, %s994_s5 }
 0x15b   :  { %p818_p5 = pnand %p816_p4, %p813_p3 }
 0x15d   :  { %821 = shalt.err (!%p818_p5)
}
 0x15e   :  { %535 = dma.vmem_to_hbm [thread:$0]  %s530_s29, 512, %s994_s5, [#allocation4], %s832_s30, %s832_s30, %s833_s6  }
 0x15f   :  { %828 = dma.done.wait [#allocation4], 512  }
 0x160   :  { %829 = vsyncadd [#allocation4], 4294966784 }
 0x161   :  { %539 = vsyncpa [#allocation3], 1 }
 0x162   :  { %540 = vsyncpa [#allocation6], 1 }
 0x163   :  { %541 = vsyncpa [#allocation9], 1 }
 0x164   :  { %542 = vsyncpa [#allocation4], 1 }

// kernel: ecapa_forward.21
= control target key start
LH: loop header
LB: loop body
LE: loop exit
PB: predicated region body
PF: predicated region fallthrough
CT: control target
= control target key end

     0   :  { %8 = vsyncpa [#allocation3], 0  ;;  %s2047_s0 = inlined_call_operand.hbm [shape: bf16[2,32,32], index: 0, kind: input, shape index: {}]   ;;  %s2048_s1 = inlined_call_operand.hbm [shape: bf16[3,3,8,8], index: 1, kind: input, shape index: {}]   ;;  %s2049_s2 = inlined_call_operand.hbm [shape: f32[3,8], index: 2, kind: input, shape index: {}]   ;;  %s2050_s3 = inlined_call_operand.hbm [shape: bf16[2,32,32], index: 3, kind: output, shape index: {}]  }
   0x1   :  { %10 = vsyncpa [#allocation3 + $0x1], 0 }
   0x2   :  { %11 = vsyncpa [#allocation6], 0 }
   0x3   :  { %12 = vsyncpa [#allocation4], 0 }
   0x4   :  { %14 = vsyncpa [#allocation4 + $0x1], 0  ;;  %s1681_s12 = smov 0   ;;  %s1683_s13 = smov 0  }
   0x5   :  { %s1685_s14 = smov 0   ;;  %s1687_s15 = smov 0  }
   0x6 LB: > { %s1702_s16 = sadd.s32 4294967295, %s1645_s15   ;;  %s1201_s17 = sadd.s32 4294967294, %s1645_s15   ;;  %s1645_s15 = sphi %s1687_s15, %s2070_s15   ;;  %s1641_s14 = sphi %s1685_s14, %s2069_s14   ;;  %s1637_s13 = sphi %s1683_s13, %s2068_s13   ;;  %s1633_s12 = sphi %s1681_s12, %s2067_s12  }
   0x7   : > { %p40_p0 = scmp.ne.s32.totalorder %s1637_s13, %s1633_s12  ;;  %p2051_p1 = scmp.eq.s32.totalorder %s1702_s16, 0 }
   0x8   : > { %p112_p3 = scmp.eq.s32.totalorder %s1201_s17, 1  ;;  %p1202_p5 = scmp.ge.s32.totalorder %s1645_s15, 1 }
   0x9   : > { %p1711_p4 = por %p2051_p1, %p40_p0  ;;  %p119_p7 = scmp.lt.s32.totalorder %s1645_s15, 3 }
   0xa   : > { %p1716_p6 = por %p112_p3, %p40_p0  ;;  %s1647_s21 = smov [#allocation5]  }
   0xb   : > { %s2054_s18 = scalar_select %p1711_p4, 1, 0 }
   0xc   : > { %s2055_s19 = scalar_select %p1716_p6, 1, 0 }
   0xd   : > { %p1721_p8 = pnand %p1202_p5, %p119_p7  ;;  %s131_s22 = sshll.u32 %s1647_s21, 4  ;;  %s1725_s22 = int_to_ptr.vmem [resolvable:$true] %s131_s22 }
   0xe   : > { %s1648_s24 = smov [#allocation7]   ;;  %s1489_s28 = scalar_lea.hbm %s2048_s1, 576 }
   0xf   : > { %p1394_p9 = pneg %p1721_p8  ;;  %s145_s25 = sshll.u32 %s1648_s24, 4  ;;  %s1736_s25 = int_to_ptr.vmem [resolvable:$true] %s145_s25 }
  0x10   : > { %p1490_p12 = scmp.ne.s32.totalorder %s2048_s1, %s1489_s28  ;;  %p1496_p5 = scmp.lt.u32.totalorder %s1489_s28, %s2048_s1 }
  0x11   : > { %p1732_p11 = pnand %p1394_p9, %p2051_p1 }
  0x13   : > { %p1491_p13 = pneg %p1732_p11 }
  0x15   : > { %p1492_p0 = pnand %p1491_p13, %p1490_p12 }
  0x17   : > { %p1493_p3 = pneg %p1492_p0 }
  0x19   : > { %p1498_p7 = pnand %p1496_p5, %p1493_p3 }
  0x1b   : > { %1501 = shalt.err (!%p1498_p7)
}
  0x1c   : > { %s1502_s6 = scalar_lea.vmem %s1725_s22, 576  ;;  %p1510_p2 = scmp.lt.s32.totalorder %s1725_s22, %s1725_s22 }
  0x1d   : > { %p1503_p9 = scmp.ne.s32.totalorder %s1725_s22, %s1502_s6  ;;  %p1511_p12 = scmp.lt.s32.totalorder %s1502_s6, %s1502_s6 }
  0x1f   : > { %p1505_p10 = pnand %p1503_p9, %p1491_p13  ;;  %p1512_p0 = por %p1511_p12, %p1510_p2 }
  0x21   : > { %p1506_p1 = pneg %p1505_p10 }
  0x23   : > { %p1513_p6 = pnand %p1512_p0, %p1506_p1 }
  0x25   : > { %1516 = shalt.err (!%p1513_p6)
}
  0x26   : > { %s1649_s7 = smov 64   ;;  %s1650_s8 = smov 4  }
  0x27   : > { %1397 = dma.hbm_to_vmem [thread:$0]  (!%p1732_p11), %s2048_s1, 576, %s1725_s22, [#allocation6], %s1649_s7, %s1649_s7, %s1650_s8  }
  0x28   : > { %s1517_s21 = scalar_lea.hbm %s2049_s2, 64 }
  0x29   : > { %p1518_p1 = scmp.ne.s32.totalorder %s2049_s2, %s1517_s21  ;;  %p1524_p10 = scmp.lt.u32.totalorder %s1517_s21, %s2049_s2 }
  0x2b   : > { %p1520_p2 = pnand %p1518_p1, %p1491_p13 }
  0x2d   : > { %p1521_p6 = pneg %p1520_p2 }
  0x2f   : > { %p1526_p3 = pnand %p1524_p10, %p1521_p6 }
  0x31   : > { %1529 = shalt.err (!%p1526_p3)
}
  0x32   : > { %s1530_s22 = scalar_lea.vmem %s1736_s25, 64  ;;  %p1538_p12 = scmp.lt.s32.totalorder %s1736_s25, %s1736_s25 }
  0x33   : > { %p1531_p5 = scmp.ne.s32.totalorder %s1736_s25, %s1530_s22  ;;  %p1539_p0 = scmp.lt.s32.totalorder %s1530_s22, %s1530_s22 }
  0x35   : > { %p1533_p7 = pnand %p1531_p5, %p1491_p13  ;;  %p1540_p1 = por %p1539_p0, %p1538_p12 }
  0x37   : > { %p1534_p9 = pneg %p1533_p7 }
  0x39   : > { %p1541_p2 = pnand %p1540_p1, %p1534_p9 }
  0x3b   : > { %1544 = shalt.err (!%p1541_p2)
}
  0x3c   : > { %1400 = dma.hbm_to_vmem [thread:$0]  (!%p1732_p11), %s2049_s2, 64, %s1736_s25, [#allocation6]  }
  0x3d   : > { %s1794_s4 = sadd.s32 1, %s1645_s15   ;;  %s27_s23 = sadd.s32 1, %s1641_s14 }
  0x3e   : > { %s24_s5 = ssub.s32 %s1645_s15, %s1794_s4  ;;  %p34_p13 = scmp.ne.s32.totalorder %s1641_s14, %s1637_s13 }
  0x3f   : > { %p25_p6 = scmp.eq.s32.totalorder %s24_s5, 0  ;;  %p35_p10 = scmp.eq.s32.totalorder %s1645_s15, 0 }
  0x40   : > { %p2058_p3 = scmp.eq.s32.totalorder %s1702_s16, 1  ;;  %p1411_p7 = scmp.lt.s32.totalorder %s1645_s15, 2 }
  0x41   : > { %s1810_s9 = scalar_select %p25_p6, %s1641_s14, %s27_s23  }
  0x42   : > { %p1804_p5 = por %p2058_p3, %p34_p13  ;;  %p36_p9 = por %p35_p10, %p34_p13 }
  0x43   : > { %s156_s10 = sand.u32 1, %s1641_s14   ;;  %s1254_s25 = sshll.u32 %s1645_s15, 8 }
  0x44   : > { %s2059_s6 = scalar_select %p1804_p5, 1, 0 }
  0x45   : > { %s1206_s11 = sshll.u32 %s156_s10, 4  ;;  %s1817_s24 = scalar_lea.hbm %s2047_s0, %s1254_s25 }
  0x46   : > { %s160_s26 = scalar_lea.vmem [#allocation2], %s1206_s11  ;;  %p1821_p11 = pnand %p1411_p7, %p36_p9 }
  0x47   : > { %s167_s27 = sshll.u32 %s160_s26, 4  ;;  %s1825_s22 = scalar_lea.sflag [#allocation3], %s156_s10  ;;  %s1819_s27 = int_to_ptr.vmem [resolvable:$true] %s167_s27 }
  0x48   : > { %s1545_s29 = scalar_lea.hbm %s1817_s24, 256  ;;  %p1547_p0 = pneg %p1821_p11 }
  0x49   : > { %p1546_p12 = scmp.ne.s32.totalorder %s1817_s24, %s1545_s29  ;;  %s1550_s5 = scalar_lea.hbm %s2047_s0, 512 }
  0x4a   : > { %p1551_p13 = scmp.lt.u32.totalorder %s1817_s24, %s2047_s0  ;;  %p1552_p6 = scmp.lt.u32.totalorder %s1550_s5, %s1545_s29 }
  0x4b   : > { %p1548_p1 = pnand %p1547_p0, %p1546_p12  ;;  %p1554_p3 = scmp.lt.u32.totalorder %s1545_s29, %s1817_s24 }
  0x4c   : > { %p1553_p10 = por %p1552_p6, %p1551_p13 }
  0x4d   : > { %p1549_p2 = pneg %p1548_p1 }
  0x4e   : > { %p1555_p7 = por %p1554_p3, %p1553_p10 }
  0x50   : > { %p1556_p9 = pnand %p1555_p7, %p1549_p2 }
  0x52   : > { %1559 = shalt.err (!%p1556_p9)
}
  0x53   : > { %s1560_s10 = scalar_lea.vmem %s1819_s27, 256  ;;  %s1651_s17 = smov [#allocation2]  }
  0x54   : > { %p1561_p12 = scmp.ne.s32.totalorder %s1819_s27, %s1560_s10  ;;  %s1565_s21 = sshll.u32 %s1651_s17, 4  ;;  %s1566_s21 = int_to_ptr.vmem [resolvable:$false] %s1565_s21 }
  0x55   : > { %s1567_s26 = scalar_lea.vmem %s1566_s21, 512  ;;  %p1568_p4 = scmp.lt.s32.totalorder %s1819_s27, %s1566_s21 }
  0x56   : > { %p1563_p1 = pnand %p1561_p12, %p1547_p0  ;;  %p1569_p13 = scmp.lt.s32.totalorder %s1567_s26, %s1560_s10 }
  0x58   : > { %p1564_p5 = pneg %p1563_p1  ;;  %p1570_p6 = por %p1569_p13, %p1568_p4 }
  0x5a   : > { %p1571_p10 = pnand %p1570_p6, %p1564_p5 }
  0x5c   : > { %1574 = shalt.err (!%p1571_p10)
}
  0x5d   : > { %1404 = dma.hbm_to_vmem [thread:$0]  (!%p1821_p11), %s1817_s24, 256, %s1819_s27, %s1825_s22, %s1649_s7, %s1649_s7, %s1650_s8  }
  0x5e   : > { %179 = sbr.rel (%p1721_p8) target bundleno = 1103 (0x44f), region = 32  ;;  %s1859_s29 = sand.u32 (!%p1721_p8), 1, %s1637_s13  }
  0x5f   : > { %s1210_s30 = sshll.u32 (!%p1721_p8), %s1859_s29, 4  ;;  %s182_s23 = scalar_lea.sflag (!%p1721_p8), [#allocation3], %s1859_s29 }
  0x60   : > { %s185_s28 = scalar_lea.vmem (!%p1721_p8), [#allocation2], %s1210_s30  ;;  %p2061_p4 = scmp.ne.s32.totalorder (!%p1721_p8), %s2054_s18, 0 }
  0x65   : > { %1620 = dma.done.wait (%p2061_p4), %s182_s23, 256  }
  0x66   : > { %1622 = vsyncadd (%p2061_p4), %s182_s23, 4294967040  ;;  %p2062_p5 = scmp.eq.s32.totalorder %s1702_s16, 0 }
  0x68   : > { %1624 = dma.done.wait (%p2062_p5), [#allocation6], 640   ;;  %p2063_p8 = pmov %p2062_p5 }
  0x69   : > { %vm232_vm0 = vcmask 1040384   ;;  %vm250_vm1 = vcmask 1043456   ;;  %v1873_v0 = vld [vmem:[%s185_s28] sm:$0xf]  ;;  %v1875_v1 = vld [vmem:[%s185_s28 + $0x4] sm:$0xf] }
  0x6a   : > { %1626 = vsyncadd (%p2063_p8), [#allocation6], 4294966656  ;;  %v1877_v2 = vld [vmem:[%s185_s28 + $0x8] sm:$0xf]  ;;  %v221_v3 = vunpack.c.l.bf16 %v1873_v0  ;;  %v222_v4 = vunpack.c.l.bf16 %v1875_v1  ;;  %v1882_v6 = vld [vmem:[%s185_s28 + $0xc] sm:$0xf]  ;;  %v1214_v7 = vcombine.low %v1873_v0, %v1875_v1 }
  0x6b   : > { %v223_v5 = vunpack.c.l.bf16 %v1877_v2  ;;  %v264_v8 = vld [vmem:[#allocation5] sm:$0xf]  ;;  %v407_v9 = vld [vmem:[#allocation5 + $0x8] sm:$0xf]  ;;  %vm234_vm2 = vcmask 1041408   ;;  %vm236_vm3 = vcmask 1042432   ;;  %v224_v10 = vunpack.c.l.bf16 %v1882_v6 }
  0x6c   : > { %1374 = vmatprep.subr.msk.bf16.mxu0 %vm250_vm1, %v264_v8  ;;  %v355_v11 = vsel %vm250_vm1, %v264_v8, 0  ;;  %v226_v12 = vrot.slane %v221_v3, 4  ;;  %v228_v13 = vrot.slane %v221_v3, 2  ;;  %v230_v14 = vrot.slane %v221_v3, 6  ;;  %s1652_s18 = smov 120   ;;  %s1653_s20 = smov 112  }
  0x6d   : > { %v251_v15 = vrot.slane %v222_v4, 4  ;;  %279 = vrot.lane.b32.xlu1 %v1214_v7, %s1652_s18  ;;  %1302 = vmatpush3.bf16.msra.mxu0 %v355_v11  ;;  %v268_v16 = vld [vmem:[#allocation5 + $0x4] sm:$0xf]  ;;  %v253_v17 = vrot.slane %v223_v5, 4  ;;  %v239_v18 = vrot.slane %v224_v10, 6  ;;  %v241_v19 = vrot.slane %v224_v10, 4 }
  0x6e   : > { %v243_v20 = vrot.slane %v224_v10, 2  ;;  %1375 = vmatprep.subr.msk.bf16.mxu0 %vm250_vm1, %v407_v9  ;;  %1373 = vmatprep.subr.msk.bf16.mxu1 %vm250_vm1, %v268_v16  ;;  %v233_v21 = vsel %vm232_vm0, %v226_v12, %v228_v13  ;;  %v291_v22 = vsel %vm250_vm1, %v268_v16, 0  ;;  %v1464_v38 = vpack.i.bf16 %v224_v10, %v223_v5  ;;  %v568_v48 = vld [vmem:[#allocation5 + $0x10] sm:$0xf]  ;;  %v564_v50 = vld [vmem:[#allocation5 + $0xc] sm:$0xf] }
  0x6f   : > { %v235_v23 = vsel %vm234_vm2, %v233_v21, %v221_v3  ;;  %v252_v24 = vsel %vm250_vm1, %v226_v12, %v251_v15  ;;  %v254_v25 = vsel %vm250_vm1, %v251_v15, %v253_v17  ;;  %v245_v26 = vsel %vm232_vm0, %v239_v18, %v241_v19  ;;  %1296 = vmatpush3.bf16.msra.mxu1 %v291_v22  ;;  %s1654_s7 = smov 104   ;;  %v1222_v56 = vld [vmem:[#allocation7] ss:$0 sm:$0xff]  ;;  %s1923_s8 = scalar_lea.vmem [#allocation8], %s1210_s30 }
  0x70   : > { %v237_v27 = vsel %vm236_vm3, %v235_v23, %v230_v14  ;;  %v408_v28 = vpack.c.bf16 %v254_v25, %v252_v24  ;;  %v246_v29 = vsel %vm234_vm2, %v245_v26, %v243_v20  ;;  %v255_v31 = vsel %vm250_vm1, %v253_v17, %v241_v19  ;;  %1376 = vmatprep.subr.msk.bf16.mxu1 %vm250_vm1, %v568_v48  ;;  %s1655_s24 = smov 24   ;;  %s1656_s27 = smov 8  }
  0x71   : > { %v259_v30 = vsel %vm250_vm1, %v237_v27, %v226_v12  ;;  %v247_v32 = vsel %vm236_vm3, %v246_v29, %v224_v10  ;;  %v266_v35 = vpack.c.bf16 %v255_v31, %v254_v25  ;;  %v1215_v39 = vcombine.low %v1877_v2, %v1882_v6  ;;  %s1657_s22 = smov 16   ;;  %s1267_s5 = sshll.u32 %s1702_s16, 8 }
  0x72   : > { %v265_v33 = vpack.c.bf16 %v252_v24, %v259_v30  ;;  %412 = vrot.lane.b32.xlu1 %v408_v28, %s1652_s18  ;;  %v261_v34 = vrot.slane %v247_v32, 4  ;;  %v1459_v40 = vpack.i.bf16 %v222_v4, %v221_v3  ;;  %vm283_vm4 = vcmask 64512   ;;  %s1109_s11 = sshll.u32 %s1923_s8, 4  ;;  %s1999_s17 = scalar_lea.hbm %s2050_s3, %s1267_s5  ;;  %s2001_s11 = int_to_ptr.vmem [resolvable:$true] %s1109_s11 }
  0x73   : > { %v423_v43 = vsel %vm250_vm1, %v407_v9, 0  ;;  %v578_v49 = vsel %vm250_vm1, %v568_v48, 0  ;;  %vm507_vm5 = vcmask 60416   ;;  %vm790_vm6 = vcmask 126016   ;;  %s1096_s16 = scalar_lea.sflag [#allocation4], %s1859_s29  ;;  %s1575_s21 = scalar_lea.vmem %s2001_s11, 256 }
  0x74   : > { %344 = vrot.lane.b32.xlu0 %v265_v33, %s1652_s18  ;;  %v263_v36 = vsel %vm250_vm1, %v241_v19, %v261_v34  ;;  %vm1073_vm7 = vcmask 191616   ;;  %vm1090_vm8 = vcmask 257216   ;;  %p1576_p11 = scmp.ne.s32.totalorder %s2001_s11, %s1575_s21  ;;  %p2064_p0 = scmp.ne.s32.totalorder %s2059_s6, 0 }
  0x75   : > { %v409_v37 = vpack.c.bf16 %v263_v36, %v255_v31  ;;  %s1658_s26 = smov [#allocation8]  }
  0x76   : > { %p1577_p2 = pnand %p1576_p11, %p2064_p0  ;;  %s1579_s30 = sshll.u32 %s1658_s26, 4  ;;  %s1580_s30 = int_to_ptr.vmem [resolvable:$false] %s1579_s30 }
  0x77   : > { %414 = vrot.lane.b32.xlu1 %v409_v37, %s1652_s18  ;;  %s1581_s23 = scalar_lea.vmem %s1580_s30, 512  ;;  %p1582_p7 = scmp.lt.s32.totalorder %s2001_s11, %s1580_s30 }
  0x78   : > { %346 = vrot.lane.b32.xlu0 %v266_v35, %s1652_s18  ;;  %v636_v35 = vsel %vm250_vm1, %v564_v50, 0  ;;  %p1578_p3 = pneg %p1577_p2  ;;  %p1583_p9 = scmp.lt.s32.totalorder %s1581_s23, %s1575_s21 }
  0x7a   : > { %p1584_p12 = por %p1583_p9, %p1582_p7 }
  0x7b   : > { %1465 = vrot.lane.b32.xlu1 %v1464_v38, %s1653_s20 }
  0x7c   : > { %281 = vrot.lane.b32.xlu0 %v1215_v39, %s1652_s18  ;;  %p1585_p1 = pnand %p1584_p12, %p1578_p3 }
  0x7f   : > { %1475 = vrot.lane.b32.xlu1 %v1464_v38, %s1654_s7 }
  0x80   : > { %1460 = vrot.lane.b32.xlu0 %v1459_v40, %s1653_s20 }
  0x83   : > { %1080 = vrot.lane.b32.xlu1 %v1875_v1, %s1655_s24 }
  0x84   : > { %1470 = vrot.lane.b32.xlu0 %v1459_v40, %s1654_s7 }
  0x88   : > { %1078 = vrot.lane.b32.xlu0 %v1873_v0, %s1655_s24 }
  0xdf   : > { %v280_v41 = vpop.permute.xlu1 %279 }
  0xe0   : > { %1297 = vmatprep.mubr.msk.bf16.mxu1 %vm283_vm4, %v280_v41  ;;  %v688_v41 = vld [vmem:[#allocation5 + $0x14] sm:$0xf] }
  0xe4   : > { %v413_v44 = vpop.permute.xlu1 %412 }
  0xe6   : > { %v345_v42 = vpop.permute.xlu0 %344 }
  0xe7   : > { %1303 = vmatprep.mubr.msk.bf16.mxu0 %vm283_vm4, %v345_v42 }
  0xe9   : > { %v415_v47 = vpop.permute.xlu1 %414 }
  0xea   : > { %v347_v45 = vpop.permute.xlu0 %346 }
  0xeb   : > { %1304 = vmatmul.mubr.msk.bf16.vlgmr.msra.gmra.mrb[0].mxu0 %vm283_vm4, %v347_v45 }
  0xec   : > { %1308 = vmatpush3.bf16.msra.mxu0 %v423_v43  ;;  %1309 = vmatprep.mubr.msk.bf16.mxu0 %vm283_vm4, %v413_v44 }
  0xed   : > { %v1466_v57 = vpop.permute.xlu1 %1465 }
  0xee   : > { %v282_v46 = vpop.permute.xlu0 %281 }
  0xef   : > { %1298 = vmatmul.mubr.msk.bf16.vlgmr.msra.gmra.mrb[0].mxu1 %vm283_vm4, %v282_v46 }
  0xf0   : > { %1314 = vmatpush3.bf16.msra.mxu1 %v578_v49 }
  0xf1   : > { %1377 = vmatprep.subr.msk.bf16.mxu1 %vm250_vm1, %v564_v50  ;;  %v698_v50 = vsel %vm250_vm1, %v688_v41, 0 }
  0xf2   : > { %v1461_v60 = vpop.permute.xlu0 %1460 }
  0xf7   : > { %1310 = vmatmul.mubr.msk.bf16.vlgmr.msra.gmra.mrb[0].mxu0 %vm283_vm4, %v415_v47 }
 0x1c2   : > { %v1299_v51 = vpop.f32.mrb[0].mxu1 }
 0x1c3   : > { %v327_v52 = vpop.f32.mrb[1].mxu1 }
 0x1c4   : > { %v1300_v53 = vpop.f32.mrb[2].mxu1 }
 0x1c5   : > { %v330_v54 = vpop.f32.mrb[3].mxu1 }
 0x1ca   : > { %v1311_v55 = vpop.f32.mrb[0].mxu0 }
 0x1cb   : > { %v1349_v58 = vadd.f32 %v1311_v55, %v1299_v51  ;;  %v459_v59 = vpop.f32.mrb[1].mxu0  ;;  %v851_v51 = vld [vmem:[#allocation5 + $0x1c] sm:$0xf]  ;;  %v1476_v55 = vpop.permute.xlu1 %1475 }
 0x1cc   : > { %v1350_v61 = vadd.f32 %v459_v59, %v327_v52  ;;  %v1312_v62 = vpop.f32.mrb[2].mxu0  ;;  %1379 = vmatprep.subr.msk.bf16.mxu0 %vm250_vm1, %v851_v51  ;;  %v861_v52 = vsel %vm250_vm1, %v851_v51, 0 }
 0x1cd   : > { %v485_v63 = vadd.f32 %v1349_v58, %v1222_v56  ;;  %v1351_v3 = vadd.f32 %v1312_v62, %v1300_v53  ;;  %v462_v4 = vpop.f32.mrb[3].mxu0  ;;  %1332 = vmatpush3.bf16.msra.mxu0 %v861_v52  ;;  %v847_v53 = vld [vmem:[#allocation5 + $0x18] sm:$0xf] }
 0x1ce   : > { %v483_v5 = vadd.f32 %v1350_v61, %v1222_v56  ;;  %v1352_v7 = vadd.f32 %v462_v4, %v330_v54  ;;  %1380 = vmatprep.subr.msk.bf16.mxu0 %vm250_vm1, %v847_v53  ;;  %v1233_v54 = vld [vmem:[#allocation7 + $0x1] ss:$0 sm:$0xff] }
 0x1cf   : > { %v489_v8 = vmax.f32 %v485_v63, 0.0  ;;  %v486_v9 = vadd.f32 %v1351_v3, %v1222_v56 }
 0x1d0   : > { %v487_v10 = vmax.f32 %v483_v5, 0.0  ;;  %v484_v11 = vadd.f32 %v1352_v7, %v1222_v56  ;;  %v1471_v56 = vpop.permute.xlu0 %1470 }
 0x1d1   : > { %v1257_v12 = vpack.c.bf16 %v489_v8, %v489_v8  ;;  %v490_v13 = vmax.f32 %v486_v9, 0.0  ;;  %v1481_v14 = vadd.low.f32.bf16 %v489_v8, %v1466_v57 }
 0x1d2   : > { %v1255_v15 = vpack.c.bf16 %v487_v10, %v487_v10  ;;  %v488_v16 = vmax.f32 %v484_v11, 0.0  ;;  %v1482_v17 = vadd.low.f32.bf16 %v487_v10, %v1461_v60 }
 0x1d3   : > { %v1258_v18 = vpack.c.bf16 %v490_v13, %v490_v13  ;;  %v1483_v19 = vadd.high.f32.bf16 %v490_v13, %v1466_v57  ;;  %v552_v20 = vrot.slane %v1481_v14, 4  ;;  %510 = vst.msk [vmem:[%s1923_s8 + $0x8] sm:$0xf] %vm507_vm5, %v1257_v12  ;;  %v919_v13 = vsel %vm250_vm1, %v847_v53, 0 }
 0x1d4   : > { %v1256_v21 = vpack.c.bf16 %v488_v16, %v488_v16  ;;  %v1484_v22 = vadd.high.f32.bf16 %v488_v16, %v1461_v60  ;;  %v531_v23 = vrot.slane %v1482_v17, 2  ;;  %v529_v24 = vrot.slane %v1482_v17, 4  ;;  %508 = vst.msk [vmem:[%s1923_s8] sm:$0xf] %vm507_vm5, %v1255_v15 }
 0x1d5   : > { %v539_v25 = vrot.slane %v1483_v19, 6  ;;  %v541_v26 = vrot.slane %v1483_v19, 4  ;;  %v543_v27 = vrot.slane %v1483_v19, 2  ;;  %v570_v28 = vpack.c.bf16 %v1483_v19, %v1481_v14  ;;  %511 = vst.msk [vmem:[%s1923_s8 + $0xc] sm:$0xf] %vm507_vm5, %v1258_v18 }
 0x1d6   : > { %v550_v29 = vrot.slane %v1484_v22, 4  ;;  %v569_v30 = vpack.c.bf16 %v1484_v22, %v1482_v17  ;;  %v533_v31 = vrot.slane %v1482_v17, 6  ;;  %v535_v32 = vsel %vm232_vm0, %v529_v24, %v531_v23  ;;  %509 = vst.msk [vmem:[%s1923_s8 + $0x4] sm:$0xf] %vm507_vm5, %v1256_v21 }
 0x1d7   : > { %v545_v33 = vsel %vm232_vm0, %v539_v25, %v541_v26  ;;  %v554_v34 = vsel %vm250_vm1, %v552_v20, %v541_v26  ;;  %v536_v36 = vsel %vm234_vm2, %v535_v32, %v1482_v17 }
 0x1d8   : > { %v546_v37 = vsel %vm234_vm2, %v545_v33, %v543_v27  ;;  %v553_v38 = vsel %vm250_vm1, %v550_v29, %v552_v20  ;;  %1315 = vmatprep.mubr.msk.bf16.mxu1 %vm283_vm4, %v569_v30  ;;  %v537_v39 = vsel %vm236_vm3, %v536_v36, %v533_v31  ;;  %v551_v40 = vsel %vm250_vm1, %v529_v24, %v550_v29 }
 0x1d9   : > { %v547_v42 = vsel %vm236_vm3, %v546_v37, %v1483_v19  ;;  %v566_v43 = vpack.c.bf16 %v554_v34, %v553_v38  ;;  %1316 = vmatmul.mubr.msk.bf16.vlgmr.msra.gmra.mrb[4].mxu1 %vm283_vm4, %v570_v28  ;;  %v558_v44 = vsel %vm250_vm1, %v537_v39, %v529_v24  ;;  %v689_v45 = vpack.c.bf16 %v553_v38, %v551_v40 }
 0x1da   : > { %v560_v46 = vrot.slane %v547_v42, 4  ;;  %1320 = vmatpush3.bf16.msra.mxu1 %v636_v35  ;;  %v565_v47 = vpack.c.bf16 %v551_v40, %v558_v44  ;;  %v1079_v44 = vpop.permute.xlu0 %1078 }
 0x1db   : > { %1378 = vmatprep.subr.msk.bf16.mxu1 %vm250_vm1, %v688_v41 }
 0x1dc   : > { %v562_v48 = vsel %vm250_vm1, %v541_v26, %v560_v46  ;;  %1321 = vmatprep.mubr.msk.bf16.mxu1 %vm283_vm4, %v565_v47 }
 0x1dd   : > { %v690_v49 = vpack.c.bf16 %v562_v48, %v554_v34  ;;  %v971_v34 = vld [vmem:[#allocation5 + $0x20] sm:$0xf] }
 0x1e5   : > { %1322 = vmatmul.mubr.msk.bf16.vlgmr.msra.gmra.mrb[4].mxu1 %vm283_vm4, %v566_v43  ;;  %v981_v43 = vsel %vm250_vm1, %v971_v34, 0 }
 0x1e6   : > { %1326 = vmatpush3.bf16.msra.mxu1 %v698_v50  ;;  %1327 = vmatprep.mubr.msk.bf16.mxu1 %vm283_vm4, %v689_v45  ;;  %v1081_v45 = vpop.permute.xlu1 %1080  ;;  %v1244_v50 = vld [vmem:[#allocation7 + $0x2] ss:$0 sm:$0xff] }
 0x1f1   : > { %1328 = vmatmul.mubr.msk.bf16.vlgmr.msra.gmra.mrb[4].mxu1 %vm283_vm4, %v690_v49 }
 0x2c4   : > { %v1329_v57 = vpop.f32.mrb[4].mxu1 }
 0x2c5   : > { %v760_v58 = vadd.f32 %v1329_v57, %v1233_v54  ;;  %v734_v59 = vpop.f32.mrb[5].mxu1 }
 0x2c6   : > { %v758_v60 = vadd.f32 %v1233_v54, %v734_v59  ;;  %v1330_v0 = vpop.f32.mrb[6].mxu1 }
 0x2c7   : > { %v764_v61 = vmax.f32 %v760_v58, 0.0  ;;  %v761_v62 = vadd.f32 %v1330_v0, %v1233_v54  ;;  %v737_v1 = vpop.f32.mrb[7].mxu1 }
 0x2c8   : > { %v762_v63 = vmax.f32 %v758_v60, 0.0  ;;  %v759_v3 = vadd.f32 %v1233_v54, %v737_v1 }
 0x2c9   : > { %v1261_v4 = vpack.c.bf16 %v764_v61, %v764_v61  ;;  %v1485_v5 = vadd.low.f32.bf16 %v764_v61, %v1476_v55  ;;  %v765_v7 = vmax.f32 %v761_v62, 0.0 }
 0x2ca   : > { %v1486_v8 = vadd.low.f32.bf16 %v762_v63, %v1471_v56  ;;  %v763_v9 = vmax.f32 %v759_v3, 0.0  ;;  %v1259_v10 = vpack.c.bf16 %v762_v63, %v762_v63 }
 0x2cb   : > { %v1262_v11 = vpack.c.bf16 %v765_v7, %v765_v7  ;;  %v1487_v12 = vadd.high.f32.bf16 %v765_v7, %v1476_v55  ;;  %782 = vrot.lane.b32.xlu0 %v1261_v4, %s1656_s27  ;;  %v835_v14 = vrot.slane %v1485_v5, 4 }
 0x2cc   : > { %v814_v15 = vrot.slane %v1486_v8, 2  ;;  %v1488_v16 = vadd.high.f32.bf16 %v763_v9, %v1471_v56  ;;  %v812_v17 = vrot.slane %v1486_v8, 4  ;;  %v816_v24 = vrot.slane %v1486_v8, 6 }
 0x2cd   : > { %v822_v18 = vrot.slane %v1487_v12, 6  ;;  %v824_v19 = vrot.slane %v1487_v12, 4  ;;  %v826_v20 = vrot.slane %v1487_v12, 2  ;;  %784 = vrot.lane.b32.xlu1 %v1262_v11, %s1656_s27  ;;  %v853_v21 = vpack.c.bf16 %v1487_v12, %v1485_v5 }
 0x2ce   : > { %v833_v22 = vrot.slane %v1488_v16, 4  ;;  %v852_v23 = vpack.c.bf16 %v1488_v16, %v1486_v8  ;;  %v818_v25 = vsel %vm232_vm0, %v812_v17, %v814_v15  ;;  %v1260_v27 = vpack.c.bf16 %v763_v9, %v763_v9 }
 0x2cf   : > { %v828_v26 = vsel %vm232_vm0, %v822_v18, %v824_v19  ;;  %v837_v28 = vsel %vm250_vm1, %v835_v14, %v824_v19  ;;  %778 = vrot.lane.b32.xlu0 %v1259_v10, %s1656_s27  ;;  %v819_v29 = vsel %vm234_vm2, %v818_v25, %v1486_v8 }
 0x2d0   : > { %v829_v30 = vsel %vm234_vm2, %v828_v26, %v826_v20  ;;  %v836_v31 = vsel %vm250_vm1, %v833_v22, %v835_v14  ;;  %1333 = vmatprep.mubr.msk.bf16.mxu0 %vm283_vm4, %v852_v23  ;;  %v820_v32 = vsel %vm236_vm3, %v819_v29, %v816_v24  ;;  %v834_v33 = vsel %vm250_vm1, %v812_v17, %v833_v22 }
 0x2d1   : > { %v830_v35 = vsel %vm236_vm3, %v829_v30, %v1487_v12  ;;  %v849_v36 = vpack.c.bf16 %v837_v28, %v836_v31  ;;  %1334 = vmatmul.mubr.msk.bf16.vlgmr.msra.gmra.mrb[4].mxu0 %vm283_vm4, %v853_v21  ;;  %780 = vrot.lane.b32.xlu1 %v1260_v27, %s1656_s27  ;;  %v841_v37 = vsel %vm250_vm1, %v820_v32, %v812_v17 }
 0x2d2   : > { %v843_v38 = vrot.slane %v830_v35, 4  ;;  %1338 = vmatpush3.bf16.msra.mxu0 %v919_v13  ;;  %v848_v39 = vpack.c.bf16 %v834_v33, %v841_v37  ;;  %v972_v40 = vpack.c.bf16 %v836_v31, %v834_v33 }
 0x2d3   : > { %1381 = vmatprep.subr.msk.bf16.mxu0 %vm250_vm1, %v971_v34 }
 0x2d4   : > { %1339 = vmatprep.mubr.msk.bf16.mxu0 %vm283_vm4, %v848_v39  ;;  %v845_v41 = vsel %vm250_vm1, %v824_v19, %v843_v38 }
 0x2d5   : > { %v973_v42 = vpack.c.bf16 %v845_v41, %v837_v28 }
 0x2dd   : > { %1340 = vmatmul.mubr.msk.bf16.vlgmr.msra.gmra.mrb[4].mxu0 %vm283_vm4, %v849_v36 }
 0x2de   : > { %1344 = vmatpush3.bf16.msra.mxu0 %v981_v43  ;;  %1345 = vmatprep.mubr.msk.bf16.mxu0 %vm283_vm4, %v972_v40 }
 0x2e9   : > { %1346 = vmatmul.mubr.msk.bf16.vlgmr.msra.gmra.mrb[4].mxu0 %vm283_vm4, %v973_v42 }
 0x33d   : > { %v783_v46 = vpop.permute.xlu0 %782 }
 0x33e   : > { %793 = vst.msk [vmem:[%s1923_s8 + $0x8] sm:$0xf] %vm790_vm6, %v783_v46 }
 0x33f   : > { %v785_v47 = vpop.permute.xlu1 %784 }
 0x340   : > { %794 = vst.msk [vmem:[%s1923_s8 + $0xc] sm:$0xf] %vm790_vm6, %v785_v47 }
 0x341   : > { %v779_v48 = vpop.permute.xlu0 %778 }
 0x342   : > { %791 = vst.msk [vmem:[%s1923_s8] sm:$0xf] %vm790_vm6, %v779_v48 }
 0x343   : > { %v781_v49 = vpop.permute.xlu1 %780 }
 0x344   : > { %792 = vst.msk [vmem:[%s1923_s8 + $0x4] sm:$0xf] %vm790_vm6, %v781_v49 }
 0x3bc   : > { %v1347_v51 = vpop.f32.mrb[4].mxu0 }
 0x3bd   : > { %v1043_v52 = vadd.f32 %v1347_v51, %v1244_v50  ;;  %v1017_v53 = vpop.f32.mrb[5].mxu0 }
 0x3be   : > { %v1041_v54 = vadd.f32 %v1244_v50, %v1017_v53  ;;  %v1348_v55 = vpop.f32.mrb[6].mxu0 }
 0x3bf   : > { %v1047_v56 = vmax.f32 %v1043_v52, 0.0  ;;  %v1044_v57 = vadd.f32 %v1348_v55, %v1244_v50  ;;  %v1020_v58 = vpop.f32.mrb[7].mxu0 }
 0x3c0   : > { %v1042_v59 = vadd.f32 %v1244_v50, %v1020_v58  ;;  %v1045_v0 = vmax.f32 %v1041_v54, 0.0 }
 0x3c1   : > { %v1265_v60 = vpack.c.bf16 %v1047_v56, %v1047_v56  ;;  %v1048_v61 = vmax.f32 %v1044_v57, 0.0 }
 0x3c2   : > { %v1046_v1 = vmax.f32 %v1042_v59, 0.0  ;;  %v1263_v63 = vpack.c.bf16 %v1045_v0, %v1045_v0 }
 0x3c3   : > { %v1266_v62 = vpack.c.bf16 %v1048_v61, %v1048_v61  ;;  %1065 = vrot.lane.b32.xlu0 %v1265_v60, %s1657_s22 }
 0x3c4   : > { %v1264_v3 = vpack.c.bf16 %v1046_v1, %v1046_v1 }
 0x3c5   : > { %1067 = vrot.lane.b32.xlu1 %v1266_v62, %s1657_s22 }
 0x3c7   : > { %1061 = vrot.lane.b32.xlu0 %v1263_v63, %s1657_s22 }
 0x3c9   : > { %1063 = vrot.lane.b32.xlu1 %v1264_v3, %s1657_s22 }
 0x3cb   : > { %1082 = vrot.lane.b32.xlu0 %v1877_v2, %s1655_s24 }
 0x3cd   : > { %1084 = vrot.lane.b32.xlu1 %v1882_v6, %s1655_s24 }
 0x435   : > { %v1066_v4 = vpop.permute.xlu0 %1065 }
 0x436   : > { %1076 = vst.msk [vmem:[%s1923_s8 + $0x8] sm:$0xf] %vm1073_vm7, %v1066_v4 }
 0x437   : > { %v1068_v5 = vpop.permute.xlu1 %1067 }
 0x438   : > { %1077 = vst.msk [vmem:[%s1923_s8 + $0xc] sm:$0xf] %vm1073_vm7, %v1068_v5 }
 0x439   : > { %v1062_v7 = vpop.permute.xlu0 %1061 }
 0x43a   : > { %1074 = vst.msk [vmem:[%s1923_s8] sm:$0xf] %vm1073_vm7, %v1062_v7 }
 0x43b   : > { %1091 = vst.msk [vmem:[%s1923_s8] sm:$0xf] %vm1090_vm8, %v1079_v44  ;;  %v1064_v8 = vpop.permute.xlu1 %1063 }
 0x43c   : > { %1075 = vst.msk [vmem:[%s1923_s8 + $0x4] sm:$0xf] %vm1073_vm7, %v1064_v8 }
 0x43d   : > { %1092 = vst.msk [vmem:[%s1923_s8 + $0x4] sm:$0xf] %vm1090_vm8, %v1081_v45  ;;  %v1083_v2 = vpop.permute.xlu0 %1082 }
 0x43e   : > { %1093 = vst.msk [vmem:[%s1923_s8 + $0x8] sm:$0xf] %vm1090_vm8, %v1083_v2 }
 0x43f   : > { %v1085_v6 = vpop.permute.xlu1 %1084 }
 0x440   : > { %1094 = vst.msk [vmem:[%s1923_s8 + $0xc] sm:$0xf] %vm1090_vm8, %v1085_v6 }
 0x441   : > { %1588 = shalt.err (!%p1585_p1)
}
 0x442   : > { %s1589_s28 = scalar_lea.hbm %s1999_s17, 256  ;;  %s1593_s7 = scalar_lea.hbm %s2050_s3, 512 }
 0x443   : > { %p1590_p13 = scmp.ne.s32.totalorder %s1999_s17, %s1589_s28  ;;  %p1594_p4 = scmp.lt.u32.totalorder %s1999_s17, %s2050_s3 }
 0x444   : > { %p1595_p5 = scmp.lt.u32.totalorder %s1593_s7, %s1589_s28  ;;  %p1597_p11 = scmp.lt.u32.totalorder %s1589_s28, %s1999_s17 }
 0x445   : > { %p1591_p6 = pnand %p1590_p13, %p2064_p0 }
 0x446   : > { %p1596_p8 = por %p1595_p5, %p1594_p4 }
 0x447   : > { %p1592_p10 = pneg %p1591_p6 }
 0x448   : > { %p1598_p2 = por %p1597_p11, %p1596_p8 }
 0x44a   : > { %p1599_p3 = pnand %p1598_p2, %p1592_p10 }
 0x44c   : > { %1602 = shalt.err (!%p1599_p3)
}
 0x44d   : > { %s1659_s27 = smov 64   ;;  %s1660_s22 = smov 4  }
 0x44e   : > { %1392 = dma.vmem_to_hbm [thread:$0]  (%p2064_p0), %s2001_s11, 256, %s1999_s17, %s1096_s16, %s1659_s27, %s1659_s27, %s1660_s22  }
 0x44f PF: > { %s1124_s5 = sand.u32 1, %s1633_s12   ;;  %p2065_p7 = scmp.ne.s32.totalorder %s2055_s19, 0 }
 0x450   : > { %p2066_p9 = scmp.ge.s32.totalorder %s1645_s15, 2  ;;  %s1125_s25 = scalar_lea.sflag [#allocation4], %s1124_s5 }
 0x452   : > { %p1406_p12 = pnand %p2066_p9, %p2065_p7 }
 0x454   : > { %1628 = dma.done.wait (!%p1406_p12), %s1125_s25, 256  }
 0x455   : > { %1630 = vsyncadd (!%p1406_p12), %s1125_s25, 4294967040  ;;  %p17_p1 = scmp.ge.s32.totalorder %s1794_s4, 4   ;;  %s2067_s12 = smov %s1637_s13 }
 0x456   : > { %s2068_s13 = smov %s1641_s14  ;;  %s2069_s14 = smov %s1810_s9 }
 0x457   : > { %s2070_s15 = smov %s1794_s4  ;;  %19 = sbr.rel (!%p17_p1) target bundleno = 6 (0x6), region = 93 }
 0x45e   :  { %1130 = vsyncpa [#allocation3], 1 }
 0x45f   :  { %1132 = vsyncpa [#allocation3 + $0x1], 1 }
 0x460   :  { %1133 = vsyncpa [#allocation6], 1 }
 0x461   :  { %1134 = vsyncpa [#allocation4], 1 }
 0x462   :  { %1136 = vsyncpa [#allocation4 + $0x1], 1 }

// kernel: ecapa_forward.24
= control target key start
LH: loop header
LB: loop body
LE: loop exit
PB: predicated region body
PF: predicated region fallthrough
CT: control target
= control target key end

     0   :  { %9 = vsyncpa [#allocation3], 0  ;;  %s1273_s0 = inlined_call_operand.hbm [shape: bf16[2,32,96], index: 0, kind: input, shape index: {}]   ;;  %s1274_s1 = inlined_call_operand.hbm [shape: bf16[96,16], index: 1, kind: input, shape index: {}]   ;;  %s1275_s2 = inlined_call_operand.hbm [shape: f32[1,16], index: 2, kind: input, shape index: {}]   ;;  %s1276_s3 = inlined_call_operand.hbm [shape: f32[1,16], index: 3, kind: input, shape index: {}]   ;;  %s1277_s4 = inlined_call_operand.hbm [shape: f32[2,2,96], index: 4, kind: output, shape index: {}]  }
   0x1   :  { %11 = vsyncpa [#allocation3 + $0x1], 0 }
   0x2   :  { %12 = vsyncpa [#allocation6], 0 }
   0x3   :  { %13 = vsyncpa [#allocation9], 0 }
   0x4   :  { %14 = vsyncpa [#allocation4], 0 }
   0x5   :  { %16 = vsyncpa [#allocation4 + $0x1], 0  ;;  %s988_s15 = smov 0   ;;  %s990_s16 = smov 0  }
   0x6   :  { %s992_s17 = smov 0   ;;  %s994_s18 = smov 0  }
   0x7 LB: > { %s1009_s19 = sadd.s32 4294967295, %s954_s18   ;;  %s603_s20 = sadd.s32 4294967294, %s954_s18   ;;  %s954_s18 = sphi %s994_s18, %s1300_s18   ;;  %s950_s17 = sphi %s992_s17, %s1299_s17   ;;  %s946_s16 = sphi %s990_s16, %s1298_s16   ;;  %s942_s15 = sphi %s988_s15, %s1297_s15  }
   0x8   : > { %p42_p0 = scmp.ne.s32.totalorder %s946_s16, %s942_s15  ;;  %p1278_p1 = scmp.eq.s32.totalorder %s1009_s19, 0 }
   0x9   : > { %p135_p3 = scmp.eq.s32.totalorder %s603_s20, 1  ;;  %p604_p5 = scmp.ge.s32.totalorder %s954_s18, 1 }
   0xa   : > { %p1018_p4 = por %p1278_p1, %p42_p0  ;;  %p142_p7 = scmp.lt.s32.totalorder %s954_s18, 3 }
   0xb   : > { %p1023_p6 = por %p135_p3, %p42_p0  ;;  %s956_s24 = smov [#allocation5]  }
   0xc   : > { %s1281_s21 = scalar_select %p1018_p4, 1, 0 }
   0xd   : > { %s1282_s22 = scalar_select %p1023_p6, 1, 0 }
   0xe   : > { %p1028_p8 = pnand %p604_p5, %p142_p7  ;;  %s154_s25 = sshll.u32 %s956_s24, 4  ;;  %s1032_s25 = int_to_ptr.vmem [resolvable:$true] %s154_s25 }
   0xf   : > { %s957_s27 = smov [#allocation7]   ;;  %s958_s29 = smov [#allocation8]  }
  0x10   : > { %s1283_s23 = scalar_select %p1028_p8, 1, 0 }
  0x11   : > { %p675_p9 = pneg %p1028_p8  ;;  %s168_s28 = sshll.u32 %s957_s27, 4  ;;  %s1043_s28 = int_to_ptr.vmem [resolvable:$true] %s168_s28 }
  0x12   : > { %s1045_s30 = sshll.u32 %s958_s29, 4  ;;  %s766_s7 = scalar_lea.hbm %s1274_s1, 768  ;;  %s180_s30 = int_to_ptr.vmem [resolvable:$true] %s1045_s30 }
  0x13   : > { %p1039_p11 = pnand %p675_p9, %p1278_p1  ;;  %p767_p12 = scmp.ne.s32.totalorder %s1274_s1, %s766_s7 }
  0x14   : > { %p773_p5 = scmp.lt.u32.totalorder %s766_s7, %s1274_s1 }
  0x15   : > { %p1055_p13 = pneg %p1039_p11 }
  0x17   : > { %p769_p0 = pnand %p1055_p13, %p767_p12 }
  0x19   : > { %p770_p3 = pneg %p769_p0 }
  0x1b   : > { %p775_p7 = pnand %p773_p5, %p770_p3 }
  0x1d   : > { %778 = shalt.err (!%p775_p7)
}
  0x1e   : > { %s779_s13 = scalar_lea.vmem %s1032_s25, 768  ;;  %p787_p2 = scmp.lt.s32.totalorder %s1032_s25, %s1032_s25 }
  0x1f   : > { %p780_p9 = scmp.ne.s32.totalorder %s1032_s25, %s779_s13  ;;  %p788_p6 = scmp.lt.s32.totalorder %s779_s13, %s779_s13 }
  0x21   : > { %p782_p10 = pnand %p780_p9, %p1055_p13  ;;  %p789_p12 = por %p788_p6, %p787_p2 }
  0x23   : > { %p783_p1 = pneg %p782_p10 }
  0x25   : > { %p790_p0 = pnand %p789_p12, %p783_p1 }
  0x27   : > { %793 = shalt.err (!%p790_p0)
}
  0x28   : > { %s959_s14 = smov 64   ;;  %s960_s20 = smov 4  }
  0x29   : > { %678 = dma.hbm_to_vmem [thread:$0]  (!%p1039_p11), %s1274_s1, 768, %s1032_s25, [#allocation6], %s959_s14, %s959_s14, %s960_s20  }
  0x2a   : > { %s794_s6 = scalar_lea.hbm %s1275_s2, 16 }
  0x2b   : > { %p795_p1 = scmp.ne.s32.totalorder %s1275_s2, %s794_s6  ;;  %p801_p10 = scmp.lt.u32.totalorder %s794_s6, %s1275_s2 }
  0x2d   : > { %p797_p2 = pnand %p795_p1, %p1055_p13 }
  0x2f   : > { %p798_p6 = pneg %p797_p2 }
  0x31   : > { %p803_p3 = pnand %p801_p10, %p798_p6 }
  0x33   : > { %806 = shalt.err (!%p803_p3)
}
  0x34   : > { %s807_s25 = scalar_lea.vmem %s1043_s28, 16  ;;  %s814_s12 = scalar_lea.vmem %s1043_s28, 32 }
  0x35   : > { %p808_p5 = scmp.ne.s32.totalorder %s1043_s28, %s807_s25  ;;  %p815_p12 = scmp.lt.s32.totalorder %s1043_s28, %s1043_s28 }
  0x36   : > { %p816_p0 = scmp.lt.s32.totalorder %s814_s12, %s807_s25 }
  0x37   : > { %p810_p7 = pnand %p808_p5, %p1055_p13 }
  0x38   : > { %p817_p1 = por %p816_p0, %p815_p12 }
  0x39   : > { %p811_p9 = pneg %p810_p7 }
  0x3b   : > { %p818_p2 = pnand %p817_p1, %p811_p9 }
  0x3d   : > { %821 = shalt.err (!%p818_p2)
}
  0x3e   : > { %681 = dma.hbm_to_vmem [thread:$0]  (!%p1039_p11), %s1275_s2, 16, %s1043_s28, [#allocation6]  }
  0x3f   : > { %s822_s5 = scalar_lea.hbm %s1276_s3, 16 }
  0x40   : > { %p823_p6 = scmp.ne.s32.totalorder %s1276_s3, %s822_s5  ;;  %p829_p5 = scmp.lt.u32.totalorder %s822_s5, %s1276_s3 }
  0x42   : > { %p825_p10 = pnand %p823_p6, %p1055_p13 }
  0x44   : > { %p826_p3 = pneg %p825_p10 }
  0x46   : > { %p831_p7 = pnand %p829_p5, %p826_p3 }
  0x48   : > { %834 = shalt.err (!%p831_p7)
}
  0x49   : > { %s835_s11 = scalar_lea.vmem %s180_s30, 16  ;;  %s842_s28 = scalar_lea.vmem %s180_s30, 32 }
  0x4a   : > { %p836_p9 = scmp.ne.s32.totalorder %s180_s30, %s835_s11  ;;  %p843_p1 = scmp.lt.s32.totalorder %s180_s30, %s180_s30 }
  0x4b   : > { %p844_p2 = scmp.lt.s32.totalorder %s842_s28, %s835_s11 }
  0x4c   : > { %p838_p12 = pnand %p836_p9, %p1055_p13 }
  0x4d   : > { %p845_p4 = por %p844_p2, %p843_p1 }
  0x4e   : > { %p839_p0 = pneg %p838_p12 }
  0x50   : > { %p846_p8 = pnand %p845_p4, %p839_p0 }
  0x52   : > { %849 = shalt.err (!%p846_p8)
}
  0x53   : > { %684 = dma.hbm_to_vmem [thread:$0]  (!%p1039_p11), %s1276_s3, 16, %s180_s30, [#allocation9]  }
  0x54   : > { %s1123_s10 = sadd.s32 1, %s954_s18   ;;  %s29_s26 = sadd.s32 1, %s950_s17 }
  0x55   : > { %s26_s13 = ssub.s32 %s954_s18, %s1123_s10  ;;  %p36_p8 = scmp.ne.s32.totalorder %s950_s17, %s946_s16 }
  0x56   : > { %p27_p4 = scmp.eq.s32.totalorder %s26_s13, 0  ;;  %p37_p13 = scmp.eq.s32.totalorder %s954_s18, 0 }
  0x57   : > { %p696_p6 = scmp.lt.s32.totalorder %s954_s18, 2  ;;  %p1286_p3 = scmp.eq.s32.totalorder %s1009_s19, 1 }
  0x58   : > { %s1133_s24 = scalar_select %p27_p4, %s950_s17, %s29_s26  }
  0x59   : > { %p38_p10 = por %p37_p13, %p36_p8  ;;  %p1137_p5 = por %p1286_p3, %p36_p8 }
  0x5a   : > { %s190_s29 = sand.u32 1, %s950_s17   ;;  %s634_s5 = sshll.u32 %s954_s18, 8 }
  0x5b   : > { %s609_s30 = sshll.u32 %s190_s29, 4  ;;  %s1146_s8 = scalar_lea.hbm %s1273_s0, %s634_s5 }
  0x5c   : > { %s194_s9 = scalar_lea.vmem [#allocation2], %s609_s30  ;;  %p1148_p11 = pnand %p696_p6, %p38_p10 }
  0x5d   : > { %s201_s11 = sshll.u32 %s194_s9, 4  ;;  %s1154_s25 = scalar_lea.sflag [#allocation3], %s190_s29  ;;  %s1152_s11 = int_to_ptr.vmem [resolvable:$true] %s201_s11 }
  0x5e   : > { %s850_s12 = scalar_lea.hbm %s1146_s8, 256  ;;  %p852_p9 = pneg %p1148_p11 }
  0x5f   : > { %p851_p7 = scmp.ne.s32.totalorder %s1146_s8, %s850_s12  ;;  %s855_s5 = scalar_lea.hbm %s1273_s0, 512 }
  0x60   : > { %p856_p1 = scmp.lt.u32.totalorder %s1146_s8, %s1273_s0  ;;  %p857_p2 = scmp.lt.u32.totalorder %s855_s5, %s850_s12 }
  0x61   : > { %p853_p12 = pnand %p852_p9, %p851_p7  ;;  %p859_p8 = scmp.lt.u32.totalorder %s850_s12, %s1146_s8 }
  0x62   : > { %p858_p4 = por %p857_p2, %p856_p1 }
  0x63   : > { %p854_p0 = pneg %p853_p12 }
  0x64   : > { %p860_p13 = por %p859_p8, %p858_p4 }
  0x66   : > { %p861_p6 = pnand %p860_p13, %p854_p0 }
  0x68   : > { %864 = shalt.err (!%p861_p6)
}
  0x69   : > { %s865_s29 = scalar_lea.vmem %s1152_s11, 256  ;;  %s961_s7 = smov [#allocation2]  }
  0x6a   : > { %p866_p10 = scmp.ne.s32.totalorder %s1152_s11, %s865_s29  ;;  %s870_s9 = sshll.u32 %s961_s7, 4  ;;  %s871_s9 = int_to_ptr.vmem [resolvable:$false] %s870_s9 }
  0x6b   : > { %s872_s13 = scalar_lea.vmem %s871_s9, 512  ;;  %p873_p12 = scmp.lt.s32.totalorder %s1152_s11, %s871_s9 }
  0x6c   : > { %p868_p3 = pnand %p866_p10, %p852_p9  ;;  %p874_p1 = scmp.lt.s32.totalorder %s872_s13, %s865_s29 }
  0x6e   : > { %p869_p7 = pneg %p868_p3  ;;  %p875_p2 = por %p874_p1, %p873_p12 }
  0x70   : > { %p876_p4 = pnand %p875_p2, %p869_p7 }
  0x72   : > { %879 = shalt.err (!%p876_p4)
}
  0x73   : > { %688 = dma.hbm_to_vmem [thread:$0]  (!%p1148_p11), %s1146_s8, 256, %s1152_s11, %s1154_s25, %s959_s14, %s959_s14, %s960_s20  }
  0x74   : > { %p1289_p9 = scmp.ne.s32.totalorder %s1283_s23, 0 }
  0x75   : > { %s1188_s12 = sand.u32 (!%p1289_p9), 1, %s946_s16   ;;  %p1290_p0 = scmp.ne.s32.totalorder (!%p1289_p9), %s1281_s21, 0 }
  0x76   : > { %213 = sbr.rel (%p1289_p9) target bundleno = 637 (0x27d), region = 36  ;;  %s613_s26 = sshll.u32 (!%p1289_p9), %s1188_s12, 4 }
  0x77   : > { %s216_s5 = scalar_lea.sflag (!%p1289_p9), [#allocation3], %s1188_s12  ;;  %s219_s30 = scalar_lea.vmem (!%p1289_p9), [#allocation2], %s613_s26 }
  0x7d   : > { %925 = dma.done.wait (%p1290_p0), %s216_s5, 256  }
  0x7e   : > { %927 = vsyncadd (%p1290_p0), %s216_s5, 4294967040  ;;  %p1291_p8 = scmp.eq.s32.totalorder %s1009_s19, 0 }
  0x80   : > { %929 = dma.done.wait (%p1291_p8), [#allocation6], 784   ;;  %p1292_p11 = pmov %p1291_p8 }
  0x81   : > { %p1293_p13 = pmov %p1291_p8 }
  0x82   : > { %931 = vsyncadd (%p1292_p11), [#allocation6], 4294966512 }
  0x83   : > { %933 = dma.done.wait (%p1293_p13), [#allocation9], 16   ;;  %p1294_p6 = pmov %p1291_p8 }
  0x84   : > { %v738_v0 = vld [vmem:[#allocation5] sm:$0xff]   ;;  %v739_v1 = vld [vmem:[#allocation5 + $0x8] sm:$0xff]   ;;  %v740_v2 = vld [vmem:[#allocation5 + $0x10] sm:$0xff]   ;;  %vm330_vm0 = vcmask 785408   ;;  %vm397_vm1 = vcmask 130048   ;;  %s617_s21 = sshll.u32 %s1188_s12, 1 }
  0x85   : > { %935 = vsyncadd (%p1294_p6), [#allocation9], 4294967280  ;;  %643 = vmatprep.subr.bf16.mxu0 %v738_v0  ;;  %v1204_v3 = vld [vmem:[%s219_s30] sm:$0xff]   ;;  %v741_v4 = vld [vmem:[#allocation5 + $0x18] sm:$0xff]   ;;  %s631_s23 = sshll.u32 %s1009_s19, 5  ;;  %s255_s14 = scalar_lea.vmem [#allocation10], %s617_s21 }
  0x86   : > { %644 = vmatpush3.bf16.msra.mxu0 %v738_v0  ;;  %655 = vmatprep.mubr.msk.bf16.mxu0 %vm330_vm0, %v1204_v3  ;;  %v742_v5 = vld [vmem:[#allocation5 + $0x20] sm:$0xff]   ;;  %v743_v6 = vld [vmem:[#allocation5 + $0x28] sm:$0xff]   ;;  %v618_v8 = vld [vmem:[#allocation7] ss:$0 sm:$0xff]  ;;  %v261_v0 = vunpack.c.l.bf16 %v1204_v3  ;;  %s504_s20 = sshll.u32 %s255_s14, 4  ;;  %vm486_vm2 = vcmask 1040384   ;;  %s1229_s28 = scalar_lea.hbm %s1277_s4, %s631_s23  ;;  %s1231_s20 = int_to_ptr.vmem [resolvable:$true] %s504_s20 }
  0x87   : > { %645 = vmatprep.subr.bf16.mxu0 %v739_v1  ;;  %v1208_v7 = vld [vmem:[%s219_s30 + $0x8] sm:$0xff]   ;;  %v629_v10 = vld [vmem:[#allocation8] ss:$0 sm:$0xff]  ;;  %vm488_vm3 = vcmask 779264   ;;  %s491_s25 = scalar_lea.sflag [#allocation4], %s1188_s12  ;;  %s880_s6 = scalar_lea.vmem %s1231_s20, 32 }
  0x88   : > { %p881_p10 = scmp.ne.s32.totalorder %s1231_s20, %s880_s6  ;;  %s962_s19 = smov [#allocation10]  }
  0x89   : > { %s884_s29 = sshll.u32 %s962_s19, 4  ;;  %s885_s29 = int_to_ptr.vmem [resolvable:$false] %s884_s29 }
  0x8a   : > { %646 = vmatpush3.bf16.msra.mxu0 %v739_v1  ;;  %v262_v1 = vunpack.c.h.bf16 %v1204_v3  ;;  %p882_p3 = pnand %p881_p10, %p1137_p5  ;;  %s886_s7 = scalar_lea.vmem %s885_s29, 64 }
  0x8b   : > { %647 = vmatprep.subr.bf16.mxu0 %v740_v2  ;;  %p887_p12 = scmp.lt.s32.totalorder %s1231_s20, %s885_s29  ;;  %p888_p1 = scmp.lt.s32.totalorder %s886_s7, %s880_s6 }
  0x8c   : > { %p883_p7 = pneg %p882_p3 }
  0x8d   : > { %p889_p2 = por %p888_p1, %p887_p12 }
  0x8e   : > { %648 = vmatpush3.bf16.msra.mxu0 %v740_v2  ;;  %v263_v2 = vunpack.c.l.bf16 %v1208_v7 }
  0x8f   : > { %649 = vmatprep.subr.bf16.mxu0 %v741_v4  ;;  %p890_p4 = pnand %p889_p2, %p883_p7 }
  0x92   : > { %650 = vmatpush3.bf16.msra.mxu0 %v741_v4 }
  0x93   : > { %651 = vmatprep.subr.bf16.mxu0 %v742_v5 }
  0x96   : > { %652 = vmatpush3.bf16.msra.mxu0 %v742_v5  ;;  %v264_v5 = vunpack.c.h.bf16 %v1208_v7 }
  0x97   : > { %653 = vmatprep.subr.bf16.mxu0 %v743_v6 }
  0x9a   : > { %654 = vmatpush3.bf16.msra.mxu0 %v743_v6 }
  0x9d   : > { %656 = vmatmul.mubr.msk.bf16.vlgmr.msra.gmra.mrb[0].mxu0 %vm330_vm0, %v1208_v7 }
 0x170   : > { %v657_v9 = vpop.f32.mrb[0].mxu0 }
 0x171   : > { %v380_v11 = vadd.f32 %v657_v9, %v618_v8  ;;  %v371_v12 = vpop.f32.mrb[1].mxu0 }
 0x172   : > { %v372_v13 = vadd.f32 %v618_v8, %v371_v12  ;;  %v658_v14 = vpop.f32.mrb[2].mxu0 }
 0x173   : > { %v383_v15 = vadd.f32 %v658_v14, %v618_v8  ;;  %v374_v16 = vpop.f32.mrb[3].mxu0  ;;  %v395_v17 = vmul.f32 %v629_v10, %v380_v11 }
 0x174   : > { %v375_v18 = vadd.f32 %v618_v8, %v374_v16  ;;  %v393_v19 = vmul.f32 %v629_v10, %v372_v13 }
 0x175   : > { %v404_v20 = vsel %vm397_vm1, %v395_v17, 0.0  ;;  %v396_v21 = vmul.f32 %v629_v10, %v383_v15 }
 0x176   : > { %405 = vadd.xlane.f32.xlu1 %v404_v20  ;;  %v398_v22 = vsel %vm397_vm1, %v393_v19, 0.0  ;;  %v394_v23 = vmul.f32 %v629_v10, %v375_v18 }
 0x177   : > { %399 = vadd.xlane.f32.xlu0 %v398_v22  ;;  %v407_v24 = vsel %vm397_vm1, %v396_v21, 0.0 }
 0x178   : > { %v401_v25 = vsel %vm397_vm1, %v394_v23, 0.0 }
 0x17a   : > { %408 = vadd.xlane.f32.xlu1 %v407_v24 }
 0x17b   : > { %402 = vadd.xlane.f32.xlu0 %v401_v25 }
 0x203   : > { %v406_v26 = vpop.xlane.xlu1 %405 }
 0x204   : > { %v400_v27 = vpop.xlane.xlu0 %399  ;;  %748 = vtanh.f32 %v406_v26 }
 0x205   : > { %750 = vtanh.f32 %v400_v27 }
 0x207   : > { %v409_v28 = vpop.xlane.xlu1 %408 }
 0x208   : > { %752 = vtanh.f32 %v409_v28  ;;  %v403_v29 = vpop.xlane.xlu0 %402 }
 0x209   : > { %754 = vtanh.f32 %v403_v29 }
 0x20e   : > { %v749_v30 = vpop.eup %748 }
 0x20f   : > { %v751_v31 = vpop.eup %750 }
 0x212   : > { %v753_v32 = vpop.eup %752 }
 0x213   : > { %v755_v33 = vpop.eup %754  ;;  %v415_v34 = vmax.f32 %v749_v30, %v753_v32 }
 0x214   : > { %v414_v35 = vmax.f32 %v751_v31, %v755_v33 }
 0x216   : > { %v416_v36 = vmax.f32 %v414_v35, %v415_v34 }
 0x218   : > { %v417_v37 = vrot.slane %v416_v36, 4 }
 0x21a   : > { %v418_v38 = vmax.f32 %v416_v36, %v417_v37 }
 0x21c   : > { %v419_v39 = vrot.slane %v418_v38, 2 }
 0x21e   : > { %v420_v40 = vmax.f32 %v418_v38, %v419_v39 }
 0x220   : > { %v421_v41 = vrot.slane %v420_v40, 1 }
 0x222   : > { %v422_v42 = vmax.f32 %v420_v40, %v421_v41 }
 0x224   : > { %v423_v43 = vsub.f32 %v751_v31, %v422_v42  ;;  %v424_v44 = vsub.f32 %v755_v33, %v422_v42  ;;  %v425_v45 = vsub.f32 %v749_v30, %v422_v42  ;;  %v426_v46 = vsub.f32 %v753_v32, %v422_v42 }
 0x226   : > { %v427_v47 = vmul.f32 1.442695, %v423_v43  ;;  %v429_v48 = vmul.f32 1.442695, %v424_v44  ;;  %v431_v49 = vmul.f32 1.442695, %v425_v45 }
 0x227   : > { %v433_v50 = vmul.f32 1.442695, %v426_v46 }
 0x228   : > { %756 = vpow2.f32 %v427_v47 }
 0x229   : > { %758 = vpow2.f32 %v429_v48 }
 0x22a   : > { %760 = vpow2.f32 %v431_v49 }
 0x22b   : > { %762 = vpow2.f32 %v433_v50 }
 0x232   : > { %v757_v51 = vpop.eup %756 }
 0x233   : > { %v759_v52 = vpop.eup %758 }
 0x234   : > { %v435_v53 = vadd.f32 %v759_v52, %v757_v51  ;;  %v761_v54 = vpop.eup %760 }
 0x235   : > { %v763_v56 = vpop.eup %762 }
 0x236   : > { %v436_v55 = vadd.f32 %v761_v54, %v435_v53 }
 0x238   : > { %v437_v57 = vadd.f32 %v763_v56, %v436_v55 }
 0x23a   : > { %v438_v58 = vrot.slane %v437_v57, 4 }
 0x23c   : > { %v439_v59 = vadd.f32 %v438_v58, %v437_v57 }
 0x23e   : > { %v440_v60 = vrot.slane %v439_v59, 2 }
 0x240   : > { %v441_v61 = vadd.f32 %v440_v60, %v439_v59 }
 0x242   : > { %v442_v62 = vrot.slane %v441_v61, 1 }
 0x244   : > { %v443_v63 = vadd.f32 %v442_v62, %v441_v61 }
 0x246   : > { %764 = vrcp.f32 %v443_v63 }
 0x250   : > { %v765_v4 = vpop.eup %764 }
 0x251   : > { %v446_v6 = vmul.f32 %v765_v4, %v759_v52  ;;  %v445_v8 = vmul.f32 %v765_v4, %v757_v51  ;;  %v447_v9 = vmul.f32 %v765_v4, %v761_v54  ;;  %v448_v10 = vmul.f32 %v765_v4, %v763_v56 }
 0x253   : > { %v450_v11 = vmul.f32 %v446_v6, %v262_v1  ;;  %v449_v12 = vmul.f32 %v445_v8, %v261_v0  ;;  %v451_v13 = vmul.f32 %v447_v9, %v263_v2  ;;  %v452_v14 = vmul.f32 %v448_v10, %v264_v5 }
 0x255   : > { %v468_v15 = vmul.f32 %v450_v11, %v262_v1  ;;  %v453_v16 = vsel %vm330_vm0, %v449_v12, 0.0  ;;  %v454_v17 = vsel %vm330_vm0, %v450_v11, 0.0  ;;  %v467_v3 = vmul.f32 %v449_v12, %v261_v0 }
 0x256   : > { %v455_v18 = vadd.f32 %v454_v17, %v453_v16  ;;  %v469_v19 = vmul.f32 %v451_v13, %v263_v2  ;;  %v456_v20 = vsel %vm330_vm0, %v451_v13, 0.0  ;;  %v470_v22 = vmul.f32 %v452_v14, %v264_v5 }
 0x257   : > { %v472_v7 = vsel %vm330_vm0, %v468_v15, 0.0  ;;  %v471_v23 = vsel %vm330_vm0, %v467_v3, 0.0  ;;  %v458_v24 = vsel %vm330_vm0, %v452_v14, 0.0 }
 0x258   : > { %v457_v21 = vadd.f32 %v456_v20, %v455_v18  ;;  %v473_v25 = vadd.f32 %v472_v7, %v471_v23  ;;  %v474_v27 = vsel %vm330_vm0, %v469_v19, 0.0  ;;  %v476_v30 = vsel %vm330_vm0, %v470_v22, 0.0 }
 0x25a   : > { %v459_v26 = vadd.f32 %v458_v24, %v457_v21  ;;  %v475_v28 = vadd.f32 %v474_v27, %v473_v25 }
 0x25c   : > { %v460_v29 = vrot.slane %v459_v26, 4  ;;  %v477_v31 = vadd.f32 %v476_v30, %v475_v28 }
 0x25e   : > { %v461_v32 = vadd.f32 %v460_v29, %v459_v26  ;;  %v478_v33 = vrot.slane %v477_v31, 4 }
 0x260   : > { %v462_v34 = vrot.slane %v461_v32, 2  ;;  %v479_v35 = vadd.f32 %v478_v33, %v477_v31 }
 0x262   : > { %v463_v36 = vadd.f32 %v462_v34, %v461_v32  ;;  %v480_v37 = vrot.slane %v479_v35, 2 }
 0x264   : > { %v464_v38 = vrot.slane %v463_v36, 1  ;;  %v481_v39 = vadd.f32 %v480_v37, %v479_v35 }
 0x266   : > { %v465_v40 = vadd.f32 %v464_v38, %v463_v36  ;;  %v482_v41 = vrot.slane %v481_v39, 1 }
 0x268   : > { %v466_v42 = vmul.f32 0.03125, %v465_v40  ;;  %v483_v43 = vadd.f32 %v482_v41, %v481_v39 }
 0x26a   : > { %v484_v44 = vmul.f32 %v466_v42, %v466_v42 }
 0x26c   : > { %v485_v45 = vsub.f32 %v483_v43, %v484_v44 }
 0x26e   : > { %v487_v46 = vsel %vm486_vm2, %v466_v42, %v485_v45 }
 0x26f   : > { %489 = vst.msk [vmem:[%s255_s14] sm:$0x3] %vm488_vm3, %v487_v46 }
 0x270   : > { %893 = shalt.err (!%p890_p4)
}
 0x271   : > { %s894_s9 = scalar_lea.hbm %s1229_s28, 32  ;;  %s898_s26 = scalar_lea.hbm %s1277_s4, 64 }
 0x272   : > { %p895_p9 = scmp.ne.s32.totalorder %s1229_s28, %s894_s9  ;;  %p899_p11 = scmp.lt.u32.totalorder %s1229_s28, %s1277_s4 }
 0x273   : > { %p900_p13 = scmp.lt.u32.totalorder %s898_s26, %s894_s9  ;;  %p902_p10 = scmp.lt.u32.totalorder %s894_s9, %s1229_s28 }
 0x274   : > { %p896_p0 = pnand %p895_p9, %p1137_p5 }
 0x275   : > { %p901_p6 = por %p900_p13, %p899_p11 }
 0x276   : > { %p897_p8 = pneg %p896_p0 }
 0x277   : > { %p903_p3 = por %p902_p10, %p901_p6 }
 0x279   : > { %p904_p7 = pnand %p903_p3, %p897_p8 }
 0x27b   : > { %907 = shalt.err (!%p904_p7)
}
 0x27c   : > { %673 = dma.vmem_to_hbm [thread:$0]  (%p1137_p5), %s1231_s20, 32, %s1229_s28, %s491_s25  }
 0x27d PF: > { %s516_s21 = sand.u32 1, %s942_s15   ;;  %p1295_p12 = scmp.ne.s32.totalorder %s1282_s22, 0 }
 0x27e   : > { %p1296_p1 = scmp.ge.s32.totalorder %s954_s18, 2  ;;  %s517_s23 = scalar_lea.sflag [#allocation4], %s516_s21 }
 0x280   : > { %p690_p2 = pnand %p1296_p1, %p1295_p12 }
 0x282   : > { %937 = dma.done.wait (!%p690_p2), %s517_s23, 32  }
 0x283   : > { %939 = vsyncadd (!%p690_p2), %s517_s23, 4294967264  ;;  %p19_p4 = scmp.ge.s32.totalorder %s1123_s10, 4   ;;  %s1297_s15 = smov %s946_s16 }
 0x284   : > { %s1298_s16 = smov %s950_s17  ;;  %s1299_s17 = smov %s1133_s24 }
 0x285   : > { %s1300_s18 = smov %s1123_s10  ;;  %21 = sbr.rel (!%p19_p4) target bundleno = 7 (0x7), region = 93 }
 0x28c   :  { %522 = vsyncpa [#allocation3], 1 }
 0x28d   :  { %524 = vsyncpa [#allocation3 + $0x1], 1 }
 0x28e   :  { %525 = vsyncpa [#allocation6], 1 }
 0x28f   :  { %526 = vsyncpa [#allocation9], 1 }
 0x290   :  { %527 = vsyncpa [#allocation4], 1 }
 0x291   :  { %529 = vsyncpa [#allocation4 + $0x1], 1 }

// kernel: ecapa_forward.25
= control target key start
LH: loop header
LB: loop body
LE: loop exit
PB: predicated region body
PF: predicated region fallthrough
CT: control target
= control target key end

     0   :  { %8 = vsyncpa [#allocation3], 0  ;;  %s435_s0 = inlined_call_operand.hbm [shape: f32[2,192], index: 0, kind: input, shape index: {}]   ;;  %s436_s1 = inlined_call_operand.hbm [shape: bf16[192,8], index: 1, kind: input, shape index: {}]   ;;  %s437_s2 = inlined_call_operand.hbm [shape: f32[1,8], index: 2, kind: input, shape index: {}]   ;;  %s438_s3 = inlined_call_operand.hbm [shape: f32[2,8], index: 3, kind: output, shape index: {}]  }
   0x1   :  { %9 = vsyncpa [#allocation6], 0 }
   0x2   :  { %10 = vsyncpa [#allocation4], 0  ;;  %s360_s12 = smov [#allocation5]   ;;  %s266_s16 = scalar_lea.hbm %s436_s1, 1536 }
   0x3   :  { %s26_s13 = sshll.u32 %s360_s12, 4  ;;  %p267_p0 = scmp.ne.s32.totalorder %s436_s1, %s266_s16  ;;  %s27_s13 = int_to_ptr.vmem [resolvable:$true] %s26_s13 }
   0x4   :  { %p270_p1 = scmp.lt.u32.totalorder %s266_s16, %s436_s1 }
   0x6   :  { %p272_p2 = pnand %p270_p1, %p267_p0 }
   0x8   :  { %275 = shalt.err (!%p272_p2)
}
   0x9   :  { %s276_s21 = scalar_lea.vmem %s27_s13, 1536  ;;  %p281_p4 = scmp.lt.s32.totalorder %s27_s13, %s27_s13 }
   0xa   :  { %p277_p3 = scmp.ne.s32.totalorder %s27_s13, %s276_s21  ;;  %p282_p5 = scmp.lt.s32.totalorder %s276_s21, %s276_s21 }
   0xc   :  { %p283_p6 = por %p282_p5, %p281_p4 }
   0xe   :  { %p284_p7 = pnand %p283_p6, %p277_p3 }
  0x10   :  { %287 = shalt.err (!%p284_p7)
}
  0x11   :  { %s361_s22 = smov 64   ;;  %s362_s23 = smov 4  }
  0x12   :  { %32 = dma.hbm_to_vmem [thread:$0]  %s436_s1, 1536, %s27_s13, [#allocation6], %s361_s22, %s361_s22, %s362_s23  }
  0x13   :  { %s363_s26 = smov [#allocation2]   ;;  %s364_s28 = smov [#allocation7]  }
  0x14   :  { %s17_s27 = sshll.u32 %s363_s26, 4  ;;  %s39_s29 = sshll.u32 %s364_s28, 4  ;;  %s18_s27 = int_to_ptr.vmem [resolvable:$true] %s17_s27  ;;  %s40_s29 = int_to_ptr.vmem [resolvable:$true] %s39_s29 }
  0x15   :  { %s288_s5 = scalar_lea.hbm %s435_s0, 64 }
  0x16   :  { %p289_p8 = scmp.ne.s32.totalorder %s435_s0, %s288_s5  ;;  %p292_p9 = scmp.lt.u32.totalorder %s288_s5, %s435_s0 }
  0x18   :  { %p294_p10 = pnand %p292_p9, %p289_p8 }
  0x1a   :  { %297 = shalt.err (!%p294_p10)
}
  0x1b   :  { %s298_s1 = scalar_lea.vmem %s18_s27, 64  ;;  %p303_p12 = scmp.lt.s32.totalorder %s18_s27, %s18_s27 }
  0x1c   :  { %p299_p11 = scmp.ne.s32.totalorder %s18_s27, %s298_s1  ;;  %p304_p13 = scmp.lt.s32.totalorder %s298_s1, %s298_s1 }
  0x1e   :  { %p305_p0 = por %p304_p13, %p303_p12 }
  0x20   :  { %p306_p1 = pnand %p305_p0, %p299_p11 }
  0x22   :  { %309 = shalt.err (!%p306_p1)
}
  0x23   :  { %20 = dma.hbm_to_vmem [thread:$0]  %s435_s0, 64, %s18_s27, [#allocation3]  }
  0x24   :  { %s310_s14 = scalar_lea.hbm %s437_s2, 16 }
  0x25   :  { %p311_p2 = scmp.ne.s32.totalorder %s437_s2, %s310_s14  ;;  %p314_p3 = scmp.lt.u32.totalorder %s310_s14, %s437_s2 }
  0x27   :  { %p316_p4 = pnand %p314_p3, %p311_p2 }
  0x29   :  { %319 = shalt.err (!%p316_p4)
}
  0x2a   :  { %s320_s19 = scalar_lea.vmem %s40_s29, 16  ;;  %s324_s20 = scalar_lea.vmem %s40_s29, 32 }
  0x2b   :  { %p321_p5 = scmp.ne.s32.totalorder %s40_s29, %s320_s19  ;;  %p325_p6 = scmp.lt.s32.totalorder %s40_s29, %s40_s29 }
  0x2c   :  { %p326_p7 = scmp.lt.s32.totalorder %s324_s20, %s320_s19 }
  0x2e   :  { %p327_p8 = por %p326_p7, %p325_p6 }
  0x30   :  { %p328_p9 = pnand %p327_p8, %p321_p5 }
  0x32   :  { %331 = shalt.err (!%p328_p9)
}
  0x33   :  { %42 = dma.hbm_to_vmem [thread:$0]  %s437_s2, 16, %s40_s29, [#allocation6]  }
  0x34   :  { %354 = dma.done.wait [#allocation3], 64  }
  0x35   :  { %355 = vsyncadd [#allocation3], 4294967232 }
  0x36   :  { %356 = dma.done.wait [#allocation6], 1552  }
  0x37   :  { %357 = vsyncadd [#allocation6], 4294965744  ;;  %v365_v0 = vmov 0   ;;  %v254_v1 = vld [vmem:[#allocation5] sm:$0xff]   ;;  %v255_v2 = vld [vmem:[#allocation5 + $0x8] sm:$0xff]   ;;  %vm170_vm0 = vcmask 523264  }
  0x38   :  { %174 = vmatprep.subr.bf16.mxu0 %v365_v0  ;;  %v256_v3 = vld [vmem:[#allocation5 + $0x10] sm:$0xff]   ;;  %v257_v4 = vld [vmem:[#allocation5 + $0x18] sm:$0xff]   ;;  %v258_v7 = vld [vmem:[#allocation5 + $0x20] sm:$0xff]   ;;  %s366_s2 = smov [#allocation8]   ;;  %vm214_vm1 = vcmask 58368  }
  0x39   :  { %175 = vmatpush1.bf16.msra.mxu0 %v254_v1  ;;  %v232_v5 = vld.sshfl [vmem:[#allocation2] sm:$0x33 pattern:$0x76325410]  ;;  %v259_v9 = vld [vmem:[#allocation5 + $0x28] sm:$0xff]   ;;  %v260_v10 = vld [vmem:[#allocation5 + $0x30] sm:$0xff]  }
  0x3a   :  { %176 = vmatprep.subr.bf16.mxu0 %v365_v0  ;;  %v86_v6 = vcombine.high %v232_v5, %v232_v5  ;;  %v261_v11 = vld [vmem:[#allocation5 + $0x38] sm:$0xff]   ;;  %v262_v12 = vld [vmem:[#allocation5 + $0x40] sm:$0xff]   ;;  %v263_v13 = vld [vmem:[#allocation5 + $0x48] sm:$0xff]   ;;  %v89_v16 = vpack.c.bf16 %v232_v5, %v232_v5  ;;  %s222_s22 = sshll.u32 %s366_s2, 4  ;;  %s223_s22 = int_to_ptr.vmem [resolvable:$true] %s222_s22 }
  0x3b   :  { %v264_v14 = vld [vmem:[#allocation5 + $0x50] sm:$0xff]   ;;  %v265_v15 = vld [vmem:[#allocation5 + $0x58] sm:$0xff]   ;;  %v233_v17 = vld [vmem:[#allocation7] ss:$0 sm:$0xff]  ;;  %s332_s23 = scalar_lea.vmem %s223_s22, 32  ;;  %p337_p11 = scmp.lt.s32.totalorder %s223_s22, %s223_s22 }
  0x3c   :  { %v90_v8 = vpack.c.bf16 %v86_v6, %v86_v6  ;;  %p333_p10 = scmp.ne.s32.totalorder %s223_s22, %s332_s23  ;;  %p338_p12 = scmp.lt.s32.totalorder %s332_s23, %s332_s23 }
  0x3d   :  { %177 = vmatpush1.bf16.msra.mxu0 %v255_v2 }
  0x3e   :  { %178 = vmatprep.subr.bf16.mxu0 %v365_v0  ;;  %246 = vmatprep.mubr.msk.bf16.mxu0 %vm170_vm0, %v90_v8  ;;  %p339_p13 = por %p338_p12, %p337_p11 }
  0x40   :  { %p340_p0 = pnand %p339_p13, %p333_p10 }
  0x41   :  { %179 = vmatpush1.bf16.msra.mxu0 %v256_v3 }
  0x42   :  { %180 = vmatprep.subr.bf16.mxu0 %v365_v0 }
  0x45   :  { %181 = vmatpush1.bf16.msra.mxu0 %v257_v4 }
  0x46   :  { %182 = vmatprep.subr.bf16.mxu0 %v365_v0 }
  0x49   :  { %183 = vmatpush1.bf16.msra.mxu0 %v258_v7 }
  0x4a   :  { %184 = vmatprep.subr.bf16.mxu0 %v365_v0 }
  0x4d   :  { %185 = vmatpush1.bf16.msra.mxu0 %v259_v9 }
  0x4e   :  { %186 = vmatprep.subr.bf16.mxu0 %v365_v0 }
  0x51   :  { %187 = vmatpush1.bf16.msra.mxu0 %v260_v10 }
  0x52   :  { %188 = vmatprep.subr.bf16.mxu0 %v365_v0 }
  0x55   :  { %189 = vmatpush1.bf16.msra.mxu0 %v261_v11 }
  0x56   :  { %190 = vmatprep.subr.bf16.mxu0 %v365_v0 }
  0x59   :  { %191 = vmatpush1.bf16.msra.mxu0 %v262_v12 }
  0x5a   :  { %192 = vmatprep.subr.bf16.mxu0 %v365_v0 }
  0x5d   :  { %193 = vmatpush1.bf16.msra.mxu0 %v263_v13 }
  0x5e   :  { %194 = vmatprep.subr.bf16.mxu0 %v365_v0 }
  0x61   :  { %195 = vmatpush1.bf16.msra.mxu0 %v264_v14 }
  0x62   :  { %196 = vmatprep.subr.bf16.mxu0 %v365_v0 }
  0x65   :  { %197 = vmatpush1.bf16.msra.mxu0 %v265_v15 }
  0x68   :  { %207 = vmatmul.mubr.bf16.vlgmr.msra.gmra.mrb[0].mxu0 %v89_v16 }
 0x13b   :  { %v208_v18 = vpop.f32.mrb[0].mxu0 }
 0x13c   :  { %v209_v19 = vadd.f32 %v233_v17, %v208_v18  ;;  %v210_v20 = vpop.f32.mrb[1].mxu0 }
 0x13d   :  { %v211_v21 = vpop.f32.mrb[2].mxu0 }
 0x13e   :  { %v212_v22 = vpop.f32.mrb[3].mxu0  ;;  %215 = vst.msk [vmem:[#allocation8] sm:$0x3] %vm214_vm1, %v209_v19 }
 0x13f   :  { %343 = shalt.err (!%p340_p0)
}
 0x140   :  { %s344_s26 = scalar_lea.hbm %s438_s3, 32 }
 0x141   :  { %p345_p1 = scmp.ne.s32.totalorder %s438_s3, %s344_s26  ;;  %p348_p2 = scmp.lt.u32.totalorder %s344_s26, %s438_s3 }
 0x143   :  { %p350_p3 = pnand %p348_p2, %p345_p1 }
 0x145   :  { %353 = shalt.err (!%p350_p3)
}
 0x146   :  { %225 = dma.vmem_to_hbm [thread:$0]  %s223_s22, 32, %s438_s3, [#allocation4]  }
 0x147   :  { %358 = dma.done.wait [#allocation4], 32  }
 0x148   :  { %359 = vsyncadd [#allocation4], 4294967264 }
 0x149   :  { %229 = vsyncpa [#allocation3], 1 }
 0x14a   :  { %230 = vsyncpa [#allocation6], 1 }
 0x14b   :  { %231 = vsyncpa [#allocation4], 1 }

</bundles_post_ra>
